<compile_context>
chip_gen: v6e
topology: v6e:2x2x1
jax: 0.10.0
libtpu: 0.0.40
codegen_flags: <defaults>
</compile_context>

<pallas_src>
import functools

import jax
import jax.numpy as jnp
from jax.experimental import pallas as pl
from jax.experimental.pallas import tpu as pltpu


# ----------------------------------------------------------------------------
# Pallas kernel 1: Conv3d (3x3x3, pad=1) + ReLU + fused spatial max-pool.
# One MXU matmul per grid step; pool groups folded into the M dimension.
# ----------------------------------------------------------------------------
def _conv_pool_kernel(x_ref, w_ref, b_ref, o_ref, *, M, G):
    """Per grid step = one batch element.

    x_ref: (G*M, K) bf16  — im2col rows, grouped by pool-window member g
    w_ref: (K, Cout) bf16
    b_ref: (1, Cout) f32
    o_ref: (M, Cout) bf16 — pooled + ReLU'd output rows
    """
    acc = jnp.dot(x_ref[...], w_ref[...],
                  preferred_element_type=jnp.float32)        # (G*M, Cout) f32
    pooled = acc[0:M, :]
    for g in range(1, G):                                    # fused max-pool
        pooled = jnp.maximum(pooled, acc[g * M:(g + 1) * M, :])
    out = jnp.maximum(pooled + b_ref[...], 0.0)              # bias + ReLU (f32)
    o_ref[...] = out.astype(o_ref.dtype)


def conv3d_relu_pool(x, w, bias, pool_all=False):
    """Conv3d k=3, pad=1, stride=1 + ReLU + max-pool, all fused.

    x: (B, T, H, W, Cin) channels-last; w: (3,3,3,Cin,Cout); bias: (Cout,).
    pool_all=False: MaxPool3d((1,2,2)) -> (B, T, H//2, W//2, Cout) bf16.
    pool_all=True : AdaptiveMaxPool3d((None,1,1)) -> (B, T, Cout) bf16.
    """
    B, T, H, W, Cin = x.shape
    Cout = w.shape[-1]
    K = 27 * Cin

    # --- XLA prep: pad once, full 27-tap im2col (tiny at these shapes) ---
    xp = jnp.pad(x, ((0, 0), (1, 1), (1, 1), (1, 1), (0, 0)))
    cols = jnp.concatenate(
        [xp[:, kt:kt + T, kh:kh + H, kw:kw + W, :]
         for kt in range(3) for kh in range(3) for kw in range(3)],
        axis=-1)                                              # (B, T, H, W, 27*Cin)

    # Group output positions by their pool window so the kernel's pool is a
    # simple max over G consecutive row blocks of the single matmul result.
    if pool_all:
        G, M = H * W, T
        slabs = [cols[:, :, h, w, :] for h in range(H) for w in range(W)]
    else:
        Hh, Wh = H // 2, W // 2
        G, M = 4, T * Hh * Wh
        slabs = [cols[:, :, dh::2, dw::2, :].reshape(B, M, K)
                 for dh in range(2) for dw in range(2)]
    xim = jnp.concatenate([s.reshape(B, M, K) for s in slabs],
                          axis=1).astype(jnp.bfloat16)        # (B, G*M, K)

    wm = w.reshape(K, Cout).astype(jnp.bfloat16)              # (kt,kh,kw,ci) -> rows
    b2 = bias.reshape(1, Cout).astype(jnp.float32)

    out = pl.pallas_call(
        functools.partial(_conv_pool_kernel, M=M, G=G),
        out_shape=jax.ShapeDtypeStruct((B, M, Cout), jnp.bfloat16),
        grid=(B,),
        in_specs=[
            pl.BlockSpec((None, G * M, K), lambda b: (b, 0, 0)),
            pl.BlockSpec((K, Cout), lambda b: (0, 0)),        # weight stays resident
            pl.BlockSpec((1, Cout), lambda b: (0, 0)),
        ],
        out_specs=pl.BlockSpec((None, M, Cout), lambda b: (b, 0, 0)),
        compiler_params=pltpu.CompilerParams(dimension_semantics=("parallel",)),
    )(xim, wm, b2)

    if pool_all:
        return out                                            # (B, T, Cout)
    return out.reshape(B, T, H // 2, W // 2, Cout)


# ----------------------------------------------------------------------------
# Pallas kernel 2: fused head — TCN (1x1 convs + BN fold + residual), the
# hoisted LSTM input projection, the unrolled LSTM recurrence, and the FC.
# ----------------------------------------------------------------------------
def _head_kernel(hseq_ref, w1_ref, b1_ref, w2_ref, b2_ref, wd_ref, bd_ref,
                 wih_ref, bih_ref, whh_ref, fcw_ref, fcb_ref,
                 o_ref, gx_ref, *, T, Bp, H):
    """hseq_ref: (T*Bp, 128) bf16, time-major, batch padded to Bp rows.
    gx_ref: VMEM scratch (T*Bp, 4H) f32 holding the hoisted x@W_ih + b."""
    hm = hseq_ref[...]                                               # bf16

    # --- TCN block 1 (BN scale pre-folded into w1/b1) ---
    t1 = jnp.dot(hm, w1_ref[...], preferred_element_type=jnp.float32) + b1_ref[...]
    t1 = jnp.maximum(t1, 0.0)
    # --- TCN block 2 ---
    t2 = jnp.dot(t1.astype(jnp.bfloat16), w2_ref[...],
                 preferred_element_type=jnp.float32) + b2_ref[...]
    t2 = jnp.maximum(t2, 0.0)
    # --- downsample residual + add ---
    res = jnp.dot(hm, wd_ref[...], preferred_element_type=jnp.float32) + bd_ref[...]
    z = (t2 + res).astype(jnp.bfloat16)                              # (T*Bp, 32)

    # --- hoisted LSTM input projection: one big matmul for all timesteps ---
    gx_ref[...] = (jnp.dot(z, wih_ref[...], preferred_element_type=jnp.float32)
                   + bih_ref[...])                                   # (T*Bp, 4H) f32

    # --- LSTM recurrence (PyTorch gate order i, f, g, o), fully unrolled ---
    h = jnp.zeros((Bp, H), jnp.float32)
    c = jnp.zeros((Bp, H), jnp.float32)
    for t in range(T):
        g = gx_ref[t * Bp:(t + 1) * Bp, :] + jnp.dot(
            h.astype(jnp.bfloat16), whh_ref[...], preferred_element_type=jnp.float32)
        i = jax.nn.sigmoid(g[:, 0:H])
        f = jax.nn.sigmoid(g[:, H:2 * H])
        gg = jnp.tanh(g[:, 2 * H:3 * H])
        o = jax.nn.sigmoid(g[:, 3 * H:4 * H])
        c = f * c + i * gg
        h = o * jnp.tanh(c)

    # --- final FC fused into the epilogue (dropout is identity in eval) ---
    out = jnp.dot(h.astype(jnp.bfloat16), fcw_ref[...],
                  preferred_element_type=jnp.float32) + fcb_ref[...]
    o_ref[...] = out


def tcn_lstm_head(hbt, p):
    """hbt: (B, T, 128) bf16 (C3D features) -> (B, 1) f32."""
    B, T, C = hbt.shape
    H = p["w_hh"].shape[0]
    Bp = max(8, (B + 7) // 8 * 8)      # pad batch rows so per-t slices are aligned

    hseq = jnp.transpose(hbt, (1, 0, 2))                      # time-major (T, B, C)
    hseq = jnp.pad(hseq, ((0, 0), (0, Bp - B), (0, 0)))
    hseq = hseq.reshape(T * Bp, C).astype(jnp.bfloat16)

    # Fold eval-mode BatchNorm1d (default running stats) into the TCN convs.
    bn = (1.0 + 1e-5) ** -0.5
    w1 = (p["t1w"] * bn).astype(jnp.bfloat16)
    b1 = (p["t1b"] * bn).reshape(1, -1).astype(jnp.float32)
    w2 = (p["t2w"] * bn).astype(jnp.bfloat16)
    b2 = (p["t2b"] * bn).reshape(1, -1).astype(jnp.float32)
    wd = p["dw"].astype(jnp.bfloat16)
    bd = p["db"].reshape(1, -1).astype(jnp.float32)
    wih = p["w_ih"].astype(jnp.bfloat16)
    bih = p["lstm_b"].astype(jnp.float32)                     # (1, 4H) = b_ih + b_hh
    whh = p["w_hh"].astype(jnp.bfloat16)
    fcw = p["fcw"].astype(jnp.bfloat16)
    fcb = p["fcb"].reshape(1, -1).astype(jnp.float32)

    vmem = pl.BlockSpec(memory_space=pltpu.MemorySpace.VMEM)
    out = pl.pallas_call(
        functools.partial(_head_kernel, T=T, Bp=Bp, H=H),
        out_shape=jax.ShapeDtypeStruct((Bp, 1), jnp.float32),
        in_specs=[vmem] * 12,
        out_specs=vmem,
        scratch_shapes=[pltpu.VMEM((T * Bp, 4 * H), jnp.float32)],
    )(hseq, w1, b1, w2, b2, wd, bd, wih, bih, whh, fcw, fcb)
    return out[:B]


# ----------------------------------------------------------------------------
# Full forward
# ----------------------------------------------------------------------------
def tcn_lstm_forward(x, p):
    x = x.astype(jnp.bfloat16)
    # --- C3DModule: conv+ReLU+pool fused per layer (pool1-3 = (1,2,2) max,
    #     pool4 = AdaptiveMaxPool3d((None,1,1)) fused into conv4's epilogue) ---
    h = conv3d_relu_pool(x, p["c1w"], p["c1b"])               # (B, T, 8, 8, 16)
    h = conv3d_relu_pool(h, p["c2w"], p["c2b"])               # (B, T, 4, 4, 32)
    h = conv3d_relu_pool(h, p["c3w"], p["c3b"])               # (B, T, 2, 2, 64)
    h = conv3d_relu_pool(h, p["c4w"], p["c4b"], pool_all=True)  # (B, T, 128)
    # --- TCN + LSTM + FC (single fused Pallas kernel) ---
    return tcn_lstm_head(h, p)                                # (B, 1) f32


# ----------------------------------------------------------------------------
# Deterministic parameter init (shapes per the PyTorch module's __init__)
# Conv weights stored as (kT,kH,kW,Cin,Cout) (torch is (Cout,Cin,kT,kH,kW));
# LSTM weights stored transposed (D,4H)/(H,4H) vs torch's (4H,D)/(4H,H) —
# transpose if loading real torch weights.
# ----------------------------------------------------------------------------
def init_params(key):
    def u(k, shape, fan_in):
        bound = 1.0 / jnp.sqrt(float(fan_in))
        return jax.random.uniform(k, shape, jnp.float32, -bound, bound)

    ks = jax.random.split(key, 20)
    H = 128
    p = {}
    p["c1w"] = u(ks[0], (3, 3, 3, 3, 16), 3 * 27);    p["c1b"] = u(ks[1], (16,), 3 * 27)
    p["c2w"] = u(ks[2], (3, 3, 3, 16, 32), 16 * 27);  p["c2b"] = u(ks[3], (32,), 16 * 27)
    p["c3w"] = u(ks[4], (3, 3, 3, 32, 64), 32 * 27);  p["c3b"] = u(ks[5], (64,), 32 * 27)
    p["c4w"] = u(ks[6], (3, 3, 3, 64, 128), 64 * 27); p["c4b"] = u(ks[7], (128,), 64 * 27)
    p["t1w"] = u(ks[8], (128, 16), 128);              p["t1b"] = u(ks[9], (16,), 128)
    p["t2w"] = u(ks[10], (16, 32), 16);               p["t2b"] = u(ks[11], (32,), 16)
    p["dw"] = u(ks[12], (128, 32), 128);              p["db"] = u(ks[13], (32,), 128)
    p["w_ih"] = u(ks[14], (32, 4 * H), H)             # gate order i, f, g, o
    p["w_hh"] = u(ks[15], (H, 4 * H), H)
    b_ih = u(ks[16], (4 * H,), H)
    b_hh = u(ks[17], (4 * H,), H)
    p["lstm_b"] = (b_ih + b_hh).reshape(1, 4 * H)
    p["fcw"] = u(ks[18], (H, 1), H);                  p["fcb"] = u(ks[19], (1,), H)
    return p


if __name__ == "__main__":
    key = jax.random.PRNGKey(0)
    kx, kp = jax.random.split(key)
    # (B, T, H, W, C) — matches the PyTorch forward's expected input before permute.
    x = jax.random.normal(kx, (2, 8, 16, 16, 3), jnp.float32)
    params = init_params(kp)

    out = jax.jit(tcn_lstm_forward)(x, params)
    out = jax.block_until_ready(out)
    assert out.shape == (2, 1) and out.dtype == jnp.float32
    print("KERNEL_OK")
</pallas_src>

<mosaic_0001>
module attributes {stable_mosaic.version = 11 : i64} {
  func.func @_conv_pool_kernel(%arg0: i32, %arg1: memref<1x2048x81xbf16, #tpu.memory_space<vmem>>, %arg2: memref<81x16xbf16, #tpu.memory_space<vmem>>, %arg3: memref<1x16xf32, #tpu.memory_space<vmem>>, %arg4: memref<1x512x16xbf16, #tpu.memory_space<vmem>>) attributes {dimension_semantics = [#tpu.dimension_semantics<parallel>], iteration_bounds = array<i64: 2>, scalar_prefetch = 0 : i64, scratch_operands = 0 : i64, tpu.core_type = #tpu.core_type<tc>, window_params = [{transform_indices = @transform_0, window_bounds = array<i64: 1, 2048, 81>}, {pipeline_mode = #tpu.pipeline_mode<synchronous>, transform_indices = @transform_1, window_bounds = array<i64: 81, 16>}, {pipeline_mode = #tpu.pipeline_mode<synchronous>, transform_indices = @transform_2, window_bounds = array<i64: 1, 16>}, {transform_indices = @transform_3, window_bounds = array<i64: 1, 512, 16>}]} {
    %c0 = arith.constant 0 : index
    %c0_0 = arith.constant 0 : index
    %c0_1 = arith.constant 0 : index
    %0 = vector.load %arg1[%c0, %c0_0, %c0_1] : memref<1x2048x81xbf16, #tpu.memory_space<vmem>>, vector<1x2048x81xbf16>
    %1 = vector.shape_cast %0 : vector<1x2048x81xbf16> to vector<2048x81xbf16>
    %c0_2 = arith.constant 0 : index
    %c0_3 = arith.constant 0 : index
    %2 = vector.load %arg2[%c0_2, %c0_3] : memref<81x16xbf16, #tpu.memory_space<vmem>>, vector<81x16xbf16>
    %cst = arith.constant dense<0.000000e+00> : vector<2048x16xf32>
    %3 = tpu.matmul %1, %2, %cst {dimension_numbers = #tpu.dot_dimension_numbers<[1], [0], [0], [1], [0, 0, 1, 1], [], []>} : vector<2048x81xbf16>, vector<81x16xbf16>, vector<2048x16xf32> -> vector<2048x16xf32>
    %4 = vector.extract_strided_slice %3 {offsets = [0, 0], sizes = [512, 16], strides = [1, 1]} : vector<2048x16xf32> to vector<512x16xf32>
    %5 = vector.extract_strided_slice %3 {offsets = [512, 0], sizes = [512, 16], strides = [1, 1]} : vector<2048x16xf32> to vector<512x16xf32>
    %6 = arith.maximumf %4, %5 : vector<512x16xf32>
    %7 = vector.extract_strided_slice %3 {offsets = [1024, 0], sizes = [512, 16], strides = [1, 1]} : vector<2048x16xf32> to vector<512x16xf32>
    %8 = arith.maximumf %6, %7 : vector<512x16xf32>
    %9 = vector.extract_strided_slice %3 {offsets = [1536, 0], sizes = [512, 16], strides = [1, 1]} : vector<2048x16xf32> to vector<512x16xf32>
    %10 = arith.maximumf %8, %9 : vector<512x16xf32>
    %c0_4 = arith.constant 0 : index
    %c0_5 = arith.constant 0 : index
    %11 = vector.load %arg3[%c0_4, %c0_5] : memref<1x16xf32, #tpu.memory_space<vmem>>, vector<1x16xf32>
    %12 = vector.broadcast %11 : vector<1x16xf32> to vector<512x16xf32>
    %13 = arith.addf %10, %12 : vector<512x16xf32>
    %cst_6 = arith.constant 0.000000e+00 : f32
    %14 = vector.broadcast %cst_6 : f32 to vector<512x16xf32>
    %15 = arith.maximumf %13, %14 : vector<512x16xf32>
    %16 = arith.truncf %15 : vector<512x16xf32> to vector<512x16xbf16>
    %c0_7 = arith.constant 0 : index
    %c0_8 = arith.constant 0 : index
    %c0_9 = arith.constant 0 : index
    %17 = vector.load %arg4[%c0_7, %c0_8, %c0_9] : memref<1x512x16xbf16, #tpu.memory_space<vmem>>, vector<1x512x16xbf16>
    %18 = vector.shape_cast %17 : vector<1x512x16xbf16> to vector<512x16xbf16>
    %19 = vector.shape_cast %16 : vector<512x16xbf16> to vector<1x512x16xbf16>
    tpu.vector_store %arg4[%c0_7, %c0_8, %c0_9], %19 {strides = array<i32>} : memref<1x512x16xbf16, #tpu.memory_space<vmem>>, vector<1x512x16xbf16>,
    return
  }
  func.func @transform_0(%arg0: i32) -> (i32, i32, i32) {
    %c0_i32 = arith.constant 0 : i32
    %c0_i32_0 = arith.constant 0 : i32
    %c0_i32_1 = arith.constant 0 : i32
    return %arg0, %c0_i32, %c0_i32_0 : i32, i32, i32
  }
  func.func @transform_1(%arg0: i32) -> (i32, i32) {
    %c0_i32 = arith.constant 0 : i32
    %c0_i32_0 = arith.constant 0 : i32
    %c0_i32_1 = arith.constant 0 : i32
    return %c0_i32, %c0_i32_0 : i32, i32
  }
  func.func @transform_2(%arg0: i32) -> (i32, i32) {
    %c0_i32 = arith.constant 0 : i32
    %c0_i32_0 = arith.constant 0 : i32
    %c0_i32_1 = arith.constant 0 : i32
    return %c0_i32, %c0_i32_0 : i32, i32
  }
  func.func @transform_3(%arg0: i32) -> (i32, i32, i32) {
    %c0_i32 = arith.constant 0 : i32
    %c0_i32_0 = arith.constant 0 : i32
    %c0_i32_1 = arith.constant 0 : i32
    return %arg0, %c0_i32, %c0_i32_0 : i32, i32, i32
  }
}

module attributes {stable_mosaic.version = 11 : i64} {
  func.func @_conv_pool_kernel(%arg0: i32, %arg1: memref<1x512x432xbf16, #tpu.memory_space<vmem>>, %arg2: memref<432x32xbf16, #tpu.memory_space<vmem>>, %arg3: memref<1x32xf32, #tpu.memory_space<vmem>>, %arg4: memref<1x128x32xbf16, #tpu.memory_space<vmem>>) attributes {dimension_semantics = [#tpu.dimension_semantics<parallel>], iteration_bounds = array<i64: 2>, scalar_prefetch = 0 : i64, scratch_operands = 0 : i64, tpu.core_type = #tpu.core_type<tc>, window_params = [{transform_indices = @transform_0, window_bounds = array<i64: 1, 512, 432>}, {pipeline_mode = #tpu.pipeline_mode<synchronous>, transform_indices = @transform_1, window_bounds = array<i64: 432, 32>}, {pipeline_mode = #tpu.pipeline_mode<synchronous>, transform_indices = @transform_2, window_bounds = array<i64: 1, 32>}, {transform_indices = @transform_3, window_bounds = array<i64: 1, 128, 32>}]} {
    %c0 = arith.constant 0 : index
    %c0_0 = arith.constant 0 : index
    %c0_1 = arith.constant 0 : index
    %0 = vector.load %arg1[%c0, %c0_0, %c0_1] : memref<1x512x432xbf16, #tpu.memory_space<vmem>>, vector<1x512x432xbf16>
    %1 = vector.shape_cast %0 : vector<1x512x432xbf16> to vector<512x432xbf16>
    %c0_2 = arith.constant 0 : index
    %c0_3 = arith.constant 0 : index
    %2 = vector.load %arg2[%c0_2, %c0_3] : memref<432x32xbf16, #tpu.memory_space<vmem>>, vector<432x32xbf16>
    %cst = arith.constant dense<0.000000e+00> : vector<512x32xf32>
    %3 = tpu.matmul %1, %2, %cst {dimension_numbers = #tpu.dot_dimension_numbers<[1], [0], [0], [1], [0, 0, 1, 1], [], []>} : vector<512x432xbf16>, vector<432x32xbf16>, vector<512x32xf32> -> vector<512x32xf32>
    %4 = vector.extract_strided_slice %3 {offsets = [0, 0], sizes = [128, 32], strides = [1, 1]} : vector<512x32xf32> to vector<128x32xf32>
    %5 = vector.extract_strided_slice %3 {offsets = [128, 0], sizes = [128, 32], strides = [1, 1]} : vector<512x32xf32> to vector<128x32xf32>
    %6 = arith.maximumf %4, %5 : vector<128x32xf32>
    %7 = vector.extract_strided_slice %3 {offsets = [256, 0], sizes = [128, 32], strides = [1, 1]} : vector<512x32xf32> to vector<128x32xf32>
    %8 = arith.maximumf %6, %7 : vector<128x32xf32>
    %9 = vector.extract_strided_slice %3 {offsets = [384, 0], sizes = [128, 32], strides = [1, 1]} : vector<512x32xf32> to vector<128x32xf32>
    %10 = arith.maximumf %8, %9 : vector<128x32xf32>
    %c0_4 = arith.constant 0 : index
    %c0_5 = arith.constant 0 : index
    %11 = vector.load %arg3[%c0_4, %c0_5] : memref<1x32xf32, #tpu.memory_space<vmem>>, vector<1x32xf32>
    %12 = vector.broadcast %11 : vector<1x32xf32> to vector<128x32xf32>
    %13 = arith.addf %10, %12 : vector<128x32xf32>
    %cst_6 = arith.constant 0.000000e+00 : f32
    %14 = vector.broadcast %cst_6 : f32 to vector<128x32xf32>
    %15 = arith.maximumf %13, %14 : vector<128x32xf32>
    %16 = arith.truncf %15 : vector<128x32xf32> to vector<128x32xbf16>
    %c0_7 = arith.constant 0 : index
    %c0_8 = arith.constant 0 : index
    %c0_9 = arith.constant 0 : index
    %17 = vector.load %arg4[%c0_7, %c0_8, %c0_9] : memref<1x128x32xbf16, #tpu.memory_space<vmem>>, vector<1x128x32xbf16>
    %18 = vector.shape_cast %17 : vector<1x128x32xbf16> to vector<128x32xbf16>
    %19 = vector.shape_cast %16 : vector<128x32xbf16> to vector<1x128x32xbf16>
    tpu.vector_store %arg4[%c0_7, %c0_8, %c0_9], %19 {strides = array<i32>} : memref<1x128x32xbf16, #tpu.memory_space<vmem>>, vector<1x128x32xbf16>,
    return
  }
  func.func @transform_0(%arg0: i32) -> (i32, i32, i32) {
    %c0_i32 = arith.constant 0 : i32
    %c0_i32_0 = arith.constant 0 : i32
    %c0_i32_1 = arith.constant 0 : i32
    return %arg0, %c0_i32, %c0_i32_0 : i32, i32, i32
  }
  func.func @transform_1(%arg0: i32) -> (i32, i32) {
    %c0_i32 = arith.constant 0 : i32
    %c0_i32_0 = arith.constant 0 : i32
    %c0_i32_1 = arith.constant 0 : i32
    return %c0_i32, %c0_i32_0 : i32, i32
  }
  func.func @transform_2(%arg0: i32) -> (i32, i32) {
    %c0_i32 = arith.constant 0 : i32
    %c0_i32_0 = arith.constant 0 : i32
    %c0_i32_1 = arith.constant 0 : i32
    return %c0_i32, %c0_i32_0 : i32, i32
  }
  func.func @transform_3(%arg0: i32) -> (i32, i32, i32) {
    %c0_i32 = arith.constant 0 : i32
    %c0_i32_0 = arith.constant 0 : i32
    %c0_i32_1 = arith.constant 0 : i32
    return %arg0, %c0_i32, %c0_i32_0 : i32, i32, i32
  }
}

module attributes {stable_mosaic.version = 11 : i64} {
  func.func @_conv_pool_kernel(%arg0: i32, %arg1: memref<1x128x864xbf16, #tpu.memory_space<vmem>>, %arg2: memref<864x64xbf16, #tpu.memory_space<vmem>>, %arg3: memref<1x64xf32, #tpu.memory_space<vmem>>, %arg4: memref<1x32x64xbf16, #tpu.memory_space<vmem>>) attributes {dimension_semantics = [#tpu.dimension_semantics<parallel>], iteration_bounds = array<i64: 2>, scalar_prefetch = 0 : i64, scratch_operands = 0 : i64, tpu.core_type = #tpu.core_type<tc>, window_params = [{transform_indices = @transform_0, window_bounds = array<i64: 1, 128, 864>}, {pipeline_mode = #tpu.pipeline_mode<synchronous>, transform_indices = @transform_1, window_bounds = array<i64: 864, 64>}, {pipeline_mode = #tpu.pipeline_mode<synchronous>, transform_indices = @transform_2, window_bounds = array<i64: 1, 64>}, {transform_indices = @transform_3, window_bounds = array<i64: 1, 32, 64>}]} {
    %c0 = arith.constant 0 : index
    %c0_0 = arith.constant 0 : index
    %c0_1 = arith.constant 0 : index
    %0 = vector.load %arg1[%c0, %c0_0, %c0_1] : memref<1x128x864xbf16, #tpu.memory_space<vmem>>, vector<1x128x864xbf16>
    %1 = vector.shape_cast %0 : vector<1x128x864xbf16> to vector<128x864xbf16>
    %c0_2 = arith.constant 0 : index
    %c0_3 = arith.constant 0 : index
    %2 = vector.load %arg2[%c0_2, %c0_3] : memref<864x64xbf16, #tpu.memory_space<vmem>>, vector<864x64xbf16>
    %cst = arith.constant dense<0.000000e+00> : vector<128x64xf32>
    %3 = tpu.matmul %1, %2, %cst {dimension_numbers = #tpu.dot_dimension_numbers<[1], [0], [0], [1], [0, 0, 1, 1], [], []>} : vector<128x864xbf16>, vector<864x64xbf16>, vector<128x64xf32> -> vector<128x64xf32>
    %4 = vector.extract_strided_slice %3 {offsets = [0, 0], sizes = [32, 64], strides = [1, 1]} : vector<128x64xf32> to vector<32x64xf32>
    %5 = vector.extract_strided_slice %3 {offsets = [32, 0], sizes = [32, 64], strides = [1, 1]} : vector<128x64xf32> to vector<32x64xf32>
    %6 = arith.maximumf %4, %5 : vector<32x64xf32>
    %7 = vector.extract_strided_slice %3 {offsets = [64, 0], sizes = [32, 64], strides = [1, 1]} : vector<128x64xf32> to vector<32x64xf32>
    %8 = arith.maximumf %6, %7 : vector<32x64xf32>
    %9 = vector.extract_strided_slice %3 {offsets = [96, 0], sizes = [32, 64], strides = [1, 1]} : vector<128x64xf32> to vector<32x64xf32>
    %10 = arith.maximumf %8, %9 : vector<32x64xf32>
    %c0_4 = arith.constant 0 : index
    %c0_5 = arith.constant 0 : index
    %11 = vector.load %arg3[%c0_4, %c0_5] : memref<1x64xf32, #tpu.memory_space<vmem>>, vector<1x64xf32>
    %12 = vector.broadcast %11 : vector<1x64xf32> to vector<32x64xf32>
    %13 = arith.addf %10, %12 : vector<32x64xf32>
    %cst_6 = arith.constant 0.000000e+00 : f32
    %14 = vector.broadcast %cst_6 : f32 to vector<32x64xf32>
    %15 = arith.maximumf %13, %14 : vector<32x64xf32>
    %16 = arith.truncf %15 : vector<32x64xf32> to vector<32x64xbf16>
    %c0_7 = arith.constant 0 : index
    %c0_8 = arith.constant 0 : index
    %c0_9 = arith.constant 0 : index
    %17 = vector.load %arg4[%c0_7, %c0_8, %c0_9] : memref<1x32x64xbf16, #tpu.memory_space<vmem>>, vector<1x32x64xbf16>
    %18 = vector.shape_cast %17 : vector<1x32x64xbf16> to vector<32x64xbf16>
    %19 = vector.shape_cast %16 : vector<32x64xbf16> to vector<1x32x64xbf16>
    tpu.vector_store %arg4[%c0_7, %c0_8, %c0_9], %19 {strides = array<i32>} : memref<1x32x64xbf16, #tpu.memory_space<vmem>>, vector<1x32x64xbf16>,
    return
  }
  func.func @transform_0(%arg0: i32) -> (i32, i32, i32) {
    %c0_i32 = arith.constant 0 : i32
    %c0_i32_0 = arith.constant 0 : i32
    %c0_i32_1 = arith.constant 0 : i32
    return %arg0, %c0_i32, %c0_i32_0 : i32, i32, i32
  }
  func.func @transform_1(%arg0: i32) -> (i32, i32) {
    %c0_i32 = arith.constant 0 : i32
    %c0_i32_0 = arith.constant 0 : i32
    %c0_i32_1 = arith.constant 0 : i32
    return %c0_i32, %c0_i32_0 : i32, i32
  }
  func.func @transform_2(%arg0: i32) -> (i32, i32) {
    %c0_i32 = arith.constant 0 : i32
    %c0_i32_0 = arith.constant 0 : i32
    %c0_i32_1 = arith.constant 0 : i32
    return %c0_i32, %c0_i32_0 : i32, i32
  }
  func.func @transform_3(%arg0: i32) -> (i32, i32, i32) {
    %c0_i32 = arith.constant 0 : i32
    %c0_i32_0 = arith.constant 0 : i32
    %c0_i32_1 = arith.constant 0 : i32
    return %arg0, %c0_i32, %c0_i32_0 : i32, i32, i32
  }
}

module attributes {stable_mosaic.version = 11 : i64} {
  func.func @_conv_pool_kernel(%arg0: i32, %arg1: memref<1x32x1728xbf16, #tpu.memory_space<vmem>>, %arg2: memref<1728x128xbf16, #tpu.memory_space<vmem>>, %arg3: memref<1x128xf32, #tpu.memory_space<vmem>>, %arg4: memref<1x8x128xbf16, #tpu.memory_space<vmem>>) attributes {dimension_semantics = [#tpu.dimension_semantics<parallel>], iteration_bounds = array<i64: 2>, scalar_prefetch = 0 : i64, scratch_operands = 0 : i64, tpu.core_type = #tpu.core_type<tc>, window_params = [{transform_indices = @transform_0, window_bounds = array<i64: 1, 32, 1728>}, {pipeline_mode = #tpu.pipeline_mode<synchronous>, transform_indices = @transform_1, window_bounds = array<i64: 1728, 128>}, {pipeline_mode = #tpu.pipeline_mode<synchronous>, transform_indices = @transform_2, window_bounds = array<i64: 1, 128>}, {transform_indices = @transform_3, window_bounds = array<i64: 1, 8, 128>}]} {
    %c0 = arith.constant 0 : index
    %c0_0 = arith.constant 0 : index
    %c0_1 = arith.constant 0 : index
    %0 = vector.load %arg1[%c0, %c0_0, %c0_1] : memref<1x32x1728xbf16, #tpu.memory_space<vmem>>, vector<1x32x1728xbf16>
    %1 = vector.shape_cast %0 : vector<1x32x1728xbf16> to vector<32x1728xbf16>
    %c0_2 = arith.constant 0 : index
    %c0_3 = arith.constant 0 : index
    %2 = vector.load %arg2[%c0_2, %c0_3] : memref<1728x128xbf16, #tpu.memory_space<vmem>>, vector<1728x128xbf16>
    %cst = arith.constant dense<0.000000e+00> : vector<32x128xf32>
    %3 = tpu.matmul %1, %2, %cst {dimension_numbers = #tpu.dot_dimension_numbers<[1], [0], [0], [1], [0, 0, 1, 1], [], []>} : vector<32x1728xbf16>, vector<1728x128xbf16>, vector<32x128xf32> -> vector<32x128xf32>
    %4 = vector.extract_strided_slice %3 {offsets = [0, 0], sizes = [8, 128], strides = [1, 1]} : vector<32x128xf32> to vector<8x128xf32>
    %5 = vector.extract_strided_slice %3 {offsets = [8, 0], sizes = [8, 128], strides = [1, 1]} : vector<32x128xf32> to vector<8x128xf32>
    %6 = arith.maximumf %4, %5 : vector<8x128xf32>
    %7 = vector.extract_strided_slice %3 {offsets = [16, 0], sizes = [8, 128], strides = [1, 1]} : vector<32x128xf32> to vector<8x128xf32>
    %8 = arith.maximumf %6, %7 : vector<8x128xf32>
    %9 = vector.extract_strided_slice %3 {offsets = [24, 0], sizes = [8, 128], strides = [1, 1]} : vector<32x128xf32> to vector<8x128xf32>
    %10 = arith.maximumf %8, %9 : vector<8x128xf32>
    %c0_4 = arith.constant 0 : index
    %c0_5 = arith.constant 0 : index
    %11 = vector.load %arg3[%c0_4, %c0_5] : memref<1x128xf32, #tpu.memory_space<vmem>>, vector<1x128xf32>
    %12 = vector.broadcast %11 : vector<1x128xf32> to vector<8x128xf32>
    %13 = arith.addf %10, %12 : vector<8x128xf32>
    %cst_6 = arith.constant 0.000000e+00 : f32
    %14 = vector.broadcast %cst_6 : f32 to vector<8x128xf32>
    %15 = arith.maximumf %13, %14 : vector<8x128xf32>
    %16 = arith.truncf %15 : vector<8x128xf32> to vector<8x128xbf16>
    %c0_7 = arith.constant 0 : index
    %c0_8 = arith.constant 0 : index
    %c0_9 = arith.constant 0 : index
    %17 = vector.load %arg4[%c0_7, %c0_8, %c0_9] : memref<1x8x128xbf16, #tpu.memory_space<vmem>>, vector<1x8x128xbf16>
    %18 = vector.shape_cast %17 : vector<1x8x128xbf16> to vector<8x128xbf16>
    %19 = vector.shape_cast %16 : vector<8x128xbf16> to vector<1x8x128xbf16>
    tpu.vector_store %arg4[%c0_7, %c0_8, %c0_9], %19 {strides = array<i32>} : memref<1x8x128xbf16, #tpu.memory_space<vmem>>, vector<1x8x128xbf16>,
    return
  }
  func.func @transform_0(%arg0: i32) -> (i32, i32, i32) {
    %c0_i32 = arith.constant 0 : i32
    %c0_i32_0 = arith.constant 0 : i32
    %c0_i32_1 = arith.constant 0 : i32
    return %arg0, %c0_i32, %c0_i32_0 : i32, i32, i32
  }
  func.func @transform_1(%arg0: i32) -> (i32, i32) {
    %c0_i32 = arith.constant 0 : i32
    %c0_i32_0 = arith.constant 0 : i32
    %c0_i32_1 = arith.constant 0 : i32
    return %c0_i32, %c0_i32_0 : i32, i32
  }
  func.func @transform_2(%arg0: i32) -> (i32, i32) {
    %c0_i32 = arith.constant 0 : i32
    %c0_i32_0 = arith.constant 0 : i32
    %c0_i32_1 = arith.constant 0 : i32
    return %c0_i32, %c0_i32_0 : i32, i32
  }
  func.func @transform_3(%arg0: i32) -> (i32, i32, i32) {
    %c0_i32 = arith.constant 0 : i32
    %c0_i32_0 = arith.constant 0 : i32
    %c0_i32_1 = arith.constant 0 : i32
    return %arg0, %c0_i32, %c0_i32_0 : i32, i32, i32
  }
}

module attributes {stable_mosaic.version = 11 : i64} {
  func.func @_head_kernel(%arg0: memref<64x128xbf16, #tpu.memory_space<vmem>>, %arg1: memref<128x16xbf16, #tpu.memory_space<vmem>>, %arg2: memref<1x16xf32, #tpu.memory_space<vmem>>, %arg3: memref<16x32xbf16, #tpu.memory_space<vmem>>, %arg4: memref<1x32xf32, #tpu.memory_space<vmem>>, %arg5: memref<128x32xbf16, #tpu.memory_space<vmem>>, %arg6: memref<1x32xf32, #tpu.memory_space<vmem>>, %arg7: memref<32x512xbf16, #tpu.memory_space<vmem>>, %arg8: memref<1x512xf32, #tpu.memory_space<vmem>>, %arg9: memref<128x512xbf16, #tpu.memory_space<vmem>>, %arg10: memref<128x1xbf16, #tpu.memory_space<vmem>>, %arg11: memref<1x1xf32, #tpu.memory_space<vmem>>, %arg12: memref<8x1xf32, #tpu.memory_space<vmem>>, %arg13: memref<64x512xf32, #tpu.memory_space<vmem>>) attributes {dimension_semantics = [], scalar_prefetch = 0 : i64, scratch_operands = 1 : i64, tpu.core_type = #tpu.core_type<tc>} {
    %c0 = arith.constant 0 : index
    %c0_0 = arith.constant 0 : index
    %0 = vector.load %arg0[%c0, %c0_0] : memref<64x128xbf16, #tpu.memory_space<vmem>>, vector<64x128xbf16>
    %c0_1 = arith.constant 0 : index
    %c0_2 = arith.constant 0 : index
    %1 = vector.load %arg1[%c0_1, %c0_2] : memref<128x16xbf16, #tpu.memory_space<vmem>>, vector<128x16xbf16>
    %cst = arith.constant dense<0.000000e+00> : vector<64x16xf32>
    %2 = tpu.matmul %0, %1, %cst {dimension_numbers = #tpu.dot_dimension_numbers<[1], [0], [0], [1], [0, 0, 1, 1], [], []>} : vector<64x128xbf16>, vector<128x16xbf16>, vector<64x16xf32> -> vector<64x16xf32>
    %c0_3 = arith.constant 0 : index
    %c0_4 = arith.constant 0 : index
    %3 = vector.load %arg2[%c0_3, %c0_4] : memref<1x16xf32, #tpu.memory_space<vmem>>, vector<1x16xf32>
    %4 = vector.broadcast %3 : vector<1x16xf32> to vector<64x16xf32>
    %5 = arith.addf %2, %4 : vector<64x16xf32>
    %cst_5 = arith.constant 0.000000e+00 : f32
    %6 = vector.broadcast %cst_5 : f32 to vector<64x16xf32>
    %7 = arith.maximumf %5, %6 : vector<64x16xf32>
    %8 = arith.truncf %7 : vector<64x16xf32> to vector<64x16xbf16>
    %c0_6 = arith.constant 0 : index
    %c0_7 = arith.constant 0 : index
    %9 = vector.load %arg3[%c0_6, %c0_7] : memref<16x32xbf16, #tpu.memory_space<vmem>>, vector<16x32xbf16>
    %cst_8 = arith.constant dense<0.000000e+00> : vector<64x32xf32>
    %10 = tpu.matmul %8, %9, %cst_8 {dimension_numbers = #tpu.dot_dimension_numbers<[1], [0], [0], [1], [0, 0, 1, 1], [], []>} : vector<64x16xbf16>, vector<16x32xbf16>, vector<64x32xf32> -> vector<64x32xf32>
    %c0_9 = arith.constant 0 : index
    %c0_10 = arith.constant 0 : index
    %11 = vector.load %arg4[%c0_9, %c0_10] : memref<1x32xf32, #tpu.memory_space<vmem>>, vector<1x32xf32>
    %12 = vector.broadcast %11 : vector<1x32xf32> to vector<64x32xf32>
    %13 = arith.addf %10, %12 : vector<64x32xf32>
    %cst_11 = arith.constant 0.000000e+00 : f32
    %14 = vector.broadcast %cst_11 : f32 to vector<64x32xf32>
    %15 = arith.maximumf %13, %14 : vector<64x32xf32>
    %c0_12 = arith.constant 0 : index
    %c0_13 = arith.constant 0 : index
    %16 = vector.load %arg5[%c0_12, %c0_13] : memref<128x32xbf16, #tpu.memory_space<vmem>>, vector<128x32xbf16>
    %cst_14 = arith.constant dense<0.000000e+00> : vector<64x32xf32>
    %17 = tpu.matmul %0, %16, %cst_14 {dimension_numbers = #tpu.dot_dimension_numbers<[1], [0], [0], [1], [0, 0, 1, 1], [], []>} : vector<64x128xbf16>, vector<128x32xbf16>, vector<64x32xf32> -> vector<64x32xf32>
    %c0_15 = arith.constant 0 : index
    %c0_16 = arith.constant 0 : index
    %18 = vector.load %arg6[%c0_15, %c0_16] : memref<1x32xf32, #tpu.memory_space<vmem>>, vector<1x32xf32>
    %19 = vector.broadcast %18 : vector<1x32xf32> to vector<64x32xf32>
    %20 = arith.addf %17, %19 : vector<64x32xf32>
    %21 = arith.addf %15, %20 : vector<64x32xf32>
    %22 = arith.truncf %21 : vector<64x32xf32> to vector<64x32xbf16>
    %c0_17 = arith.constant 0 : index
    %c0_18 = arith.constant 0 : index
    %23 = vector.load %arg7[%c0_17, %c0_18] : memref<32x512xbf16, #tpu.memory_space<vmem>>, vector<32x512xbf16>
    %cst_19 = arith.constant dense<0.000000e+00> : vector<64x512xf32>
    %24 = tpu.matmul %22, %23, %cst_19 {dimension_numbers = #tpu.dot_dimension_numbers<[1], [0], [0], [1], [0, 0, 1, 1], [], []>} : vector<64x32xbf16>, vector<32x512xbf16>, vector<64x512xf32> -> vector<64x512xf32>
    %c0_20 = arith.constant 0 : index
    %c0_21 = arith.constant 0 : index
    %25 = vector.load %arg8[%c0_20, %c0_21] : memref<1x512xf32, #tpu.memory_space<vmem>>, vector<1x512xf32>
    %26 = vector.broadcast %25 : vector<1x512xf32> to vector<64x512xf32>
    %27 = arith.addf %24, %26 : vector<64x512xf32>
    %c0_22 = arith.constant 0 : index
    %c0_23 = arith.constant 0 : index
    %28 = vector.load %arg13[%c0_22, %c0_23] : memref<64x512xf32, #tpu.memory_space<vmem>>, vector<64x512xf32>
    tpu.vector_store %arg13[%c0_22, %c0_23], %27 {strides = array<i32>} : memref<64x512xf32, #tpu.memory_space<vmem>>, vector<64x512xf32>,
    %cst_24 = arith.constant 0.000000e+00 : f32
    %29 = vector.broadcast %cst_24 : f32 to vector<8x128xf32>
    %cst_25 = arith.constant 0.000000e+00 : f32
    %30 = vector.broadcast %cst_25 : f32 to vector<8x128xf32>
    %c0_26 = arith.constant 0 : index
    %c0_27 = arith.constant 0 : index
    %31 = vector.load %arg13[%c0_26, %c0_27] : memref<64x512xf32, #tpu.memory_space<vmem>>, vector<8x512xf32>
    %32 = arith.truncf %29 : vector<8x128xf32> to vector<8x128xbf16>
    %c0_28 = arith.constant 0 : index
    %c0_29 = arith.constant 0 : index
    %33 = vector.load %arg9[%c0_28, %c0_29] : memref<128x512xbf16, #tpu.memory_space<vmem>>, vector<128x512xbf16>
    %cst_30 = arith.constant dense<0.000000e+00> : vector<8x512xf32>
    %34 = tpu.matmul %32, %33, %cst_30 {dimension_numbers = #tpu.dot_dimension_numbers<[1], [0], [0], [1], [0, 0, 1, 1], [], []>} : vector<8x128xbf16>, vector<128x512xbf16>, vector<8x512xf32> -> vector<8x512xf32>
    %35 = arith.addf %31, %34 : vector<8x512xf32>
    %36 = vector.extract_strided_slice %35 {offsets = [0, 0], sizes = [8, 128], strides = [1, 1]} : vector<8x512xf32> to vector<8x128xf32>
    %37 = arith.negf %36 : vector<8x128xf32>
    %38 = math.exp %37 : vector<8x128xf32>
    %cst_31 = arith.constant 1.000000e+00 : f32
    %39 = vector.broadcast %cst_31 : f32 to vector<8x128xf32>
    %40 = arith.addf %39, %38 : vector<8x128xf32>
    %41 = arith.divf %39, %40 : vector<8x128xf32>
    %42 = vector.extract_strided_slice %35 {offsets = [0, 128], sizes = [8, 128], strides = [1, 1]} : vector<8x512xf32> to vector<8x128xf32>
    %43 = arith.negf %42 : vector<8x128xf32>
    %44 = math.exp %43 : vector<8x128xf32>
    %cst_32 = arith.constant 1.000000e+00 : f32
    %45 = vector.broadcast %cst_32 : f32 to vector<8x128xf32>
    %46 = arith.addf %45, %44 : vector<8x128xf32>
    %47 = arith.divf %45, %46 : vector<8x128xf32>
    %48 = vector.extract_strided_slice %35 {offsets = [0, 256], sizes = [8, 128], strides = [1, 1]} : vector<8x512xf32> to vector<8x128xf32>
    %49 = math.tanh %48 : vector<8x128xf32>
    %50 = vector.extract_strided_slice %35 {offsets = [0, 384], sizes = [8, 128], strides = [1, 1]} : vector<8x512xf32> to vector<8x128xf32>
    %51 = arith.negf %50 : vector<8x128xf32>
    %52 = math.exp %51 : vector<8x128xf32>
    %cst_33 = arith.constant 1.000000e+00 : f32
    %53 = vector.broadcast %cst_33 : f32 to vector<8x128xf32>
    %54 = arith.addf %53, %52 : vector<8x128xf32>
    %55 = arith.divf %53, %54 : vector<8x128xf32>
    %56 = arith.mulf %47, %30 : vector<8x128xf32>
    %57 = arith.mulf %41, %49 : vector<8x128xf32>
    %58 = arith.addf %56, %57 : vector<8x128xf32>
    %59 = math.tanh %58 : vector<8x128xf32>
    %60 = arith.mulf %55, %59 : vector<8x128xf32>
    %c8 = arith.constant 8 : index
    %c0_34 = arith.constant 0 : index
    %61 = vector.load %arg13[%c8, %c0_34] : memref<64x512xf32, #tpu.memory_space<vmem>>, vector<8x512xf32>
    %62 = arith.truncf %60 : vector<8x128xf32> to vector<8x128xbf16>
    %c0_35 = arith.constant 0 : index
    %c0_36 = arith.constant 0 : index
    %63 = vector.load %arg9[%c0_35, %c0_36] : memref<128x512xbf16, #tpu.memory_space<vmem>>, vector<128x512xbf16>
    %cst_37 = arith.constant dense<0.000000e+00> : vector<8x512xf32>
    %64 = tpu.matmul %62, %63, %cst_37 {dimension_numbers = #tpu.dot_dimension_numbers<[1], [0], [0], [1], [0, 0, 1, 1], [], []>} : vector<8x128xbf16>, vector<128x512xbf16>, vector<8x512xf32> -> vector<8x512xf32>
    %65 = arith.addf %61, %64 : vector<8x512xf32>
    %66 = vector.extract_strided_slice %65 {offsets = [0, 0], sizes = [8, 128], strides = [1, 1]} : vector<8x512xf32> to vector<8x128xf32>
    %67 = arith.negf %66 : vector<8x128xf32>
    %68 = math.exp %67 : vector<8x128xf32>
    %cst_38 = arith.constant 1.000000e+00 : f32
    %69 = vector.broadcast %cst_38 : f32 to vector<8x128xf32>
    %70 = arith.addf %69, %68 : vector<8x128xf32>
    %71 = arith.divf %69, %70 : vector<8x128xf32>
    %72 = vector.extract_strided_slice %65 {offsets = [0, 128], sizes = [8, 128], strides = [1, 1]} : vector<8x512xf32> to vector<8x128xf32>
    %73 = arith.negf %72 : vector<8x128xf32>
    %74 = math.exp %73 : vector<8x128xf32>
    %cst_39 = arith.constant 1.000000e+00 : f32
    %75 = vector.broadcast %cst_39 : f32 to vector<8x128xf32>
    %76 = arith.addf %75, %74 : vector<8x128xf32>
    %77 = arith.divf %75, %76 : vector<8x128xf32>
    %78 = vector.extract_strided_slice %65 {offsets = [0, 256], sizes = [8, 128], strides = [1, 1]} : vector<8x512xf32> to vector<8x128xf32>
    %79 = math.tanh %78 : vector<8x128xf32>
    %80 = vector.extract_strided_slice %65 {offsets = [0, 384], sizes = [8, 128], strides = [1, 1]} : vector<8x512xf32> to vector<8x128xf32>
    %81 = arith.negf %80 : vector<8x128xf32>
    %82 = math.exp %81 : vector<8x128xf32>
    %cst_40 = arith.constant 1.000000e+00 : f32
    %83 = vector.broadcast %cst_40 : f32 to vector<8x128xf32>
    %84 = arith.addf %83, %82 : vector<8x128xf32>
    %85 = arith.divf %83, %84 : vector<8x128xf32>
    %86 = arith.mulf %77, %58 : vector<8x128xf32>
    %87 = arith.mulf %71, %79 : vector<8x128xf32>
    %88 = arith.addf %86, %87 : vector<8x128xf32>
    %89 = math.tanh %88 : vector<8x128xf32>
    %90 = arith.mulf %85, %89 : vector<8x128xf32>
    %c16 = arith.constant 16 : index
    %c0_41 = arith.constant 0 : index
    %91 = vector.load %arg13[%c16, %c0_41] : memref<64x512xf32, #tpu.memory_space<vmem>>, vector<8x512xf32>
    %92 = arith.truncf %90 : vector<8x128xf32> to vector<8x128xbf16>
    %c0_42 = arith.constant 0 : index
    %c0_43 = arith.constant 0 : index
    %93 = vector.load %arg9[%c0_42, %c0_43] : memref<128x512xbf16, #tpu.memory_space<vmem>>, vector<128x512xbf16>
    %cst_44 = arith.constant dense<0.000000e+00> : vector<8x512xf32>
    %94 = tpu.matmul %92, %93, %cst_44 {dimension_numbers = #tpu.dot_dimension_numbers<[1], [0], [0], [1], [0, 0, 1, 1], [], []>} : vector<8x128xbf16>, vector<128x512xbf16>, vector<8x512xf32> -> vector<8x512xf32>
    %95 = arith.addf %91, %94 : vector<8x512xf32>
    %96 = vector.extract_strided_slice %95 {offsets = [0, 0], sizes = [8, 128], strides = [1, 1]} : vector<8x512xf32> to vector<8x128xf32>
    %97 = arith.negf %96 : vector<8x128xf32>
    %98 = math.exp %97 : vector<8x128xf32>
    %cst_45 = arith.constant 1.000000e+00 : f32
    %99 = vector.broadcast %cst_45 : f32 to vector<8x128xf32>
    %100 = arith.addf %99, %98 : vector<8x128xf32>
    %101 = arith.divf %99, %100 : vector<8x128xf32>
    %102 = vector.extract_strided_slice %95 {offsets = [0, 128], sizes = [8, 128], strides = [1, 1]} : vector<8x512xf32> to vector<8x128xf32>
    %103 = arith.negf %102 : vector<8x128xf32>
    %104 = math.exp %103 : vector<8x128xf32>
    %cst_46 = arith.constant 1.000000e+00 : f32
    %105 = vector.broadcast %cst_46 : f32 to vector<8x128xf32>
    %106 = arith.addf %105, %104 : vector<8x128xf32>
    %107 = arith.divf %105, %106 : vector<8x128xf32>
    %108 = vector.extract_strided_slice %95 {offsets = [0, 256], sizes = [8, 128], strides = [1, 1]} : vector<8x512xf32> to vector<8x128xf32>
    %109 = math.tanh %108 : vector<8x128xf32>
    %110 = vector.extract_strided_slice %95 {offsets = [0, 384], sizes = [8, 128], strides = [1, 1]} : vector<8x512xf32> to vector<8x128xf32>
    %111 = arith.negf %110 : vector<8x128xf32>
    %112 = math.exp %111 : vector<8x128xf32>
    %cst_47 = arith.constant 1.000000e+00 : f32
    %113 = vector.broadcast %cst_47 : f32 to vector<8x128xf32>
    %114 = arith.addf %113, %112 : vector<8x128xf32>
    %115 = arith.divf %113, %114 : vector<8x128xf32>
    %116 = arith.mulf %107, %88 : vector<8x128xf32>
    %117 = arith.mulf %101, %109 : vector<8x128xf32>
    %118 = arith.addf %116, %117 : vector<8x128xf32>
    %119 = math.tanh %118 : vector<8x128xf32>
    %120 = arith.mulf %115, %119 : vector<8x128xf32>
    %c24 = arith.constant 24 : index
    %c0_48 = arith.constant 0 : index
    %121 = vector.load %arg13[%c24, %c0_48] : memref<64x512xf32, #tpu.memory_space<vmem>>, vector<8x512xf32>
    %122 = arith.truncf %120 : vector<8x128xf32> to vector<8x128xbf16>
    %c0_49 = arith.constant 0 : index
    %c0_50 = arith.constant 0 : index
    %123 = vector.load %arg9[%c0_49, %c0_50] : memref<128x512xbf16, #tpu.memory_space<vmem>>, vector<128x512xbf16>
    %cst_51 = arith.constant dense<0.000000e+00> : vector<8x512xf32>
    %124 = tpu.matmul %122, %123, %cst_51 {dimension_numbers = #tpu.dot_dimension_numbers<[1], [0], [0], [1], [0, 0, 1, 1], [], []>} : vector<8x128xbf16>, vector<128x512xbf16>, vector<8x512xf32> -> vector<8x512xf32>
    %125 = arith.addf %121, %124 : vector<8x512xf32>
    %126 = vector.extract_strided_slice %125 {offsets = [0, 0], sizes = [8, 128], strides = [1, 1]} : vector<8x512xf32> to vector<8x128xf32>
    %127 = arith.negf %126 : vector<8x128xf32>
    %128 = math.exp %127 : vector<8x128xf32>
    %cst_52 = arith.constant 1.000000e+00 : f32
    %129 = vector.broadcast %cst_52 : f32 to vector<8x128xf32>
    %130 = arith.addf %129, %128 : vector<8x128xf32>
    %131 = arith.divf %129, %130 : vector<8x128xf32>
    %132 = vector.extract_strided_slice %125 {offsets = [0, 128], sizes = [8, 128], strides = [1, 1]} : vector<8x512xf32> to vector<8x128xf32>
    %133 = arith.negf %132 : vector<8x128xf32>
    %134 = math.exp %133 : vector<8x128xf32>
    %cst_53 = arith.constant 1.000000e+00 : f32
    %135 = vector.broadcast %cst_53 : f32 to vector<8x128xf32>
    %136 = arith.addf %135, %134 : vector<8x128xf32>
    %137 = arith.divf %135, %136 : vector<8x128xf32>
    %138 = vector.extract_strided_slice %125 {offsets = [0, 256], sizes = [8, 128], strides = [1, 1]} : vector<8x512xf32> to vector<8x128xf32>
    %139 = math.tanh %138 : vector<8x128xf32>
    %140 = vector.extract_strided_slice %125 {offsets = [0, 384], sizes = [8, 128], strides = [1, 1]} : vector<8x512xf32> to vector<8x128xf32>
    %141 = arith.negf %140 : vector<8x128xf32>
    %142 = math.exp %141 : vector<8x128xf32>
    %cst_54 = arith.constant 1.000000e+00 : f32
    %143 = vector.broadcast %cst_54 : f32 to vector<8x128xf32>
    %144 = arith.addf %143, %142 : vector<8x128xf32>
    %145 = arith.divf %143, %144 : vector<8x128xf32>
    %146 = arith.mulf %137, %118 : vector<8x128xf32>
    %147 = arith.mulf %131, %139 : vector<8x128xf32>
    %148 = arith.addf %146, %147 : vector<8x128xf32>
    %149 = math.tanh %148 : vector<8x128xf32>
    %150 = arith.mulf %145, %149 : vector<8x128xf32>
    %c32 = arith.constant 32 : index
    %c0_55 = arith.constant 0 : index
    %151 = vector.load %arg13[%c32, %c0_55] : memref<64x512xf32, #tpu.memory_space<vmem>>, vector<8x512xf32>
    %152 = arith.truncf %150 : vector<8x128xf32> to vector<8x128xbf16>
    %c0_56 = arith.constant 0 : index
    %c0_57 = arith.constant 0 : index
    %153 = vector.load %arg9[%c0_56, %c0_57] : memref<128x512xbf16, #tpu.memory_space<vmem>>, vector<128x512xbf16>
    %cst_58 = arith.constant dense<0.000000e+00> : vector<8x512xf32>
    %154 = tpu.matmul %152, %153, %cst_58 {dimension_numbers = #tpu.dot_dimension_numbers<[1], [0], [0], [1], [0, 0, 1, 1], [], []>} : vector<8x128xbf16>, vector<128x512xbf16>, vector<8x512xf32> -> vector<8x512xf32>
    %155 = arith.addf %151, %154 : vector<8x512xf32>
    %156 = vector.extract_strided_slice %155 {offsets = [0, 0], sizes = [8, 128], strides = [1, 1]} : vector<8x512xf32> to vector<8x128xf32>
    %157 = arith.negf %156 : vector<8x128xf32>
    %158 = math.exp %157 : vector<8x128xf32>
    %cst_59 = arith.constant 1.000000e+00 : f32
    %159 = vector.broadcast %cst_59 : f32 to vector<8x128xf32>
    %160 = arith.addf %159, %158 : vector<8x128xf32>
    %161 = arith.divf %159, %160 : vector<8x128xf32>
    %162 = vector.extract_strided_slice %155 {offsets = [0, 128], sizes = [8, 128], strides = [1, 1]} : vector<8x512xf32> to vector<8x128xf32>
    %163 = arith.negf %162 : vector<8x128xf32>
    %164 = math.exp %163 : vector<8x128xf32>
    %cst_60 = arith.constant 1.000000e+00 : f32
    %165 = vector.broadcast %cst_60 : f32 to vector<8x128xf32>
    %166 = arith.addf %165, %164 : vector<8x128xf32>
    %167 = arith.divf %165, %166 : vector<8x128xf32>
    %168 = vector.extract_strided_slice %155 {offsets = [0, 256], sizes = [8, 128], strides = [1, 1]} : vector<8x512xf32> to vector<8x128xf32>
    %169 = math.tanh %168 : vector<8x128xf32>
    %170 = vector.extract_strided_slice %155 {offsets = [0, 384], sizes = [8, 128], strides = [1, 1]} : vector<8x512xf32> to vector<8x128xf32>
    %171 = arith.negf %170 : vector<8x128xf32>
    %172 = math.exp %171 : vector<8x128xf32>
    %cst_61 = arith.constant 1.000000e+00 : f32
    %173 = vector.broadcast %cst_61 : f32 to vector<8x128xf32>
    %174 = arith.addf %173, %172 : vector<8x128xf32>
    %175 = arith.divf %173, %174 : vector<8x128xf32>
    %176 = arith.mulf %167, %148 : vector<8x128xf32>
    %177 = arith.mulf %161, %169 : vector<8x128xf32>
    %178 = arith.addf %176, %177 : vector<8x128xf32>
    %179 = math.tanh %178 : vector<8x128xf32>
    %180 = arith.mulf %175, %179 : vector<8x128xf32>
    %c40 = arith.constant 40 : index
    %c0_62 = arith.constant 0 : index
    %181 = vector.load %arg13[%c40, %c0_62] : memref<64x512xf32, #tpu.memory_space<vmem>>, vector<8x512xf32>
    %182 = arith.truncf %180 : vector<8x128xf32> to vector<8x128xbf16>
    %c0_63 = arith.constant 0 : index
    %c0_64 = arith.constant 0 : index
    %183 = vector.load %arg9[%c0_63, %c0_64] : memref<128x512xbf16, #tpu.memory_space<vmem>>, vector<128x512xbf16>
    %cst_65 = arith.constant dense<0.000000e+00> : vector<8x512xf32>
    %184 = tpu.matmul %182, %183, %cst_65 {dimension_numbers = #tpu.dot_dimension_numbers<[1], [0], [0], [1], [0, 0, 1, 1], [], []>} : vector<8x128xbf16>, vector<128x512xbf16>, vector<8x512xf32> -> vector<8x512xf32>
    %185 = arith.addf %181, %184 : vector<8x512xf32>
    %186 = vector.extract_strided_slice %185 {offsets = [0, 0], sizes = [8, 128], strides = [1, 1]} : vector<8x512xf32> to vector<8x128xf32>
    %187 = arith.negf %186 : vector<8x128xf32>
    %188 = math.exp %187 : vector<8x128xf32>
    %cst_66 = arith.constant 1.000000e+00 : f32
    %189 = vector.broadcast %cst_66 : f32 to vector<8x128xf32>
    %190 = arith.addf %189, %188 : vector<8x128xf32>
    %191 = arith.divf %189, %190 : vector<8x128xf32>
    %192 = vector.extract_strided_slice %185 {offsets = [0, 128], sizes = [8, 128], strides = [1, 1]} : vector<8x512xf32> to vector<8x128xf32>
    %193 = arith.negf %192 : vector<8x128xf32>
    %194 = math.exp %193 : vector<8x128xf32>
    %cst_67 = arith.constant 1.000000e+00 : f32
    %195 = vector.broadcast %cst_67 : f32 to vector<8x128xf32>
    %196 = arith.addf %195, %194 : vector<8x128xf32>
    %197 = arith.divf %195, %196 : vector<8x128xf32>
    %198 = vector.extract_strided_slice %185 {offsets = [0, 256], sizes = [8, 128], strides = [1, 1]} : vector<8x512xf32> to vector<8x128xf32>
    %199 = math.tanh %198 : vector<8x128xf32>
    %200 = vector.extract_strided_slice %185 {offsets = [0, 384], sizes = [8, 128], strides = [1, 1]} : vector<8x512xf32> to vector<8x128xf32>
    %201 = arith.negf %200 : vector<8x128xf32>
    %202 = math.exp %201 : vector<8x128xf32>
    %cst_68 = arith.constant 1.000000e+00 : f32
    %203 = vector.broadcast %cst_68 : f32 to vector<8x128xf32>
    %204 = arith.addf %203, %202 : vector<8x128xf32>
    %205 = arith.divf %203, %204 : vector<8x128xf32>
    %206 = arith.mulf %197, %178 : vector<8x128xf32>
    %207 = arith.mulf %191, %199 : vector<8x128xf32>
    %208 = arith.addf %206, %207 : vector<8x128xf32>
    %209 = math.tanh %208 : vector<8x128xf32>
    %210 = arith.mulf %205, %209 : vector<8x128xf32>
    %c48 = arith.constant 48 : index
    %c0_69 = arith.constant 0 : index
    %211 = vector.load %arg13[%c48, %c0_69] : memref<64x512xf32, #tpu.memory_space<vmem>>, vector<8x512xf32>
    %212 = arith.truncf %210 : vector<8x128xf32> to vector<8x128xbf16>
    %c0_70 = arith.constant 0 : index
    %c0_71 = arith.constant 0 : index
    %213 = vector.load %arg9[%c0_70, %c0_71] : memref<128x512xbf16, #tpu.memory_space<vmem>>, vector<128x512xbf16>
    %cst_72 = arith.constant dense<0.000000e+00> : vector<8x512xf32>
    %214 = tpu.matmul %212, %213, %cst_72 {dimension_numbers = #tpu.dot_dimension_numbers<[1], [0], [0], [1], [0, 0, 1, 1], [], []>} : vector<8x128xbf16>, vector<128x512xbf16>, vector<8x512xf32> -> vector<8x512xf32>
    %215 = arith.addf %211, %214 : vector<8x512xf32>
    %216 = vector.extract_strided_slice %215 {offsets = [0, 0], sizes = [8, 128], strides = [1, 1]} : vector<8x512xf32> to vector<8x128xf32>
    %217 = arith.negf %216 : vector<8x128xf32>
    %218 = math.exp %217 : vector<8x128xf32>
    %cst_73 = arith.constant 1.000000e+00 : f32
    %219 = vector.broadcast %cst_73 : f32 to vector<8x128xf32>
    %220 = arith.addf %219, %218 : vector<8x128xf32>
    %221 = arith.divf %219, %220 : vector<8x128xf32>
    %222 = vector.extract_strided_slice %215 {offsets = [0, 128], sizes = [8, 128], strides = [1, 1]} : vector<8x512xf32> to vector<8x128xf32>
    %223 = arith.negf %222 : vector<8x128xf32>
    %224 = math.exp %223 : vector<8x128xf32>
    %cst_74 = arith.constant 1.000000e+00 : f32
    %225 = vector.broadcast %cst_74 : f32 to vector<8x128xf32>
    %226 = arith.addf %225, %224 : vector<8x128xf32>
    %227 = arith.divf %225, %226 : vector<8x128xf32>
    %228 = vector.extract_strided_slice %215 {offsets = [0, 256], sizes = [8, 128], strides = [1, 1]} : vector<8x512xf32> to vector<8x128xf32>
    %229 = math.tanh %228 : vector<8x128xf32>
    %230 = vector.extract_strided_slice %215 {offsets = [0, 384], sizes = [8, 128], strides = [1, 1]} : vector<8x512xf32> to vector<8x128xf32>
    %231 = arith.negf %230 : vector<8x128xf32>
    %232 = math.exp %231 : vector<8x128xf32>
    %cst_75 = arith.constant 1.000000e+00 : f32
    %233 = vector.broadcast %cst_75 : f32 to vector<8x128xf32>
    %234 = arith.addf %233, %232 : vector<8x128xf32>
    %235 = arith.divf %233, %234 : vector<8x128xf32>
    %236 = arith.mulf %227, %208 : vector<8x128xf32>
    %237 = arith.mulf %221, %229 : vector<8x128xf32>
    %238 = arith.addf %236, %237 : vector<8x128xf32>
    %239 = math.tanh %238 : vector<8x128xf32>
    %240 = arith.mulf %235, %239 : vector<8x128xf32>
    %c56 = arith.constant 56 : index
    %c0_76 = arith.constant 0 : index
    %241 = vector.load %arg13[%c56, %c0_76] : memref<64x512xf32, #tpu.memory_space<vmem>>, vector<8x512xf32>
    %242 = arith.truncf %240 : vector<8x128xf32> to vector<8x128xbf16>
    %c0_77 = arith.constant 0 : index
    %c0_78 = arith.constant 0 : index
    %243 = vector.load %arg9[%c0_77, %c0_78] : memref<128x512xbf16, #tpu.memory_space<vmem>>, vector<128x512xbf16>
    %cst_79 = arith.constant dense<0.000000e+00> : vector<8x512xf32>
    %244 = tpu.matmul %242, %243, %cst_79 {dimension_numbers = #tpu.dot_dimension_numbers<[1], [0], [0], [1], [0, 0, 1, 1], [], []>} : vector<8x128xbf16>, vector<128x512xbf16>, vector<8x512xf32> -> vector<8x512xf32>
    %245 = arith.addf %241, %244 : vector<8x512xf32>
    %246 = vector.extract_strided_slice %245 {offsets = [0, 0], sizes = [8, 128], strides = [1, 1]} : vector<8x512xf32> to vector<8x128xf32>
    %247 = arith.negf %246 : vector<8x128xf32>
    %248 = math.exp %247 : vector<8x128xf32>
    %cst_80 = arith.constant 1.000000e+00 : f32
    %249 = vector.broadcast %cst_80 : f32 to vector<8x128xf32>
    %250 = arith.addf %249, %248 : vector<8x128xf32>
    %251 = arith.divf %249, %250 : vector<8x128xf32>
    %252 = vector.extract_strided_slice %245 {offsets = [0, 128], sizes = [8, 128], strides = [1, 1]} : vector<8x512xf32> to vector<8x128xf32>
    %253 = arith.negf %252 : vector<8x128xf32>
    %254 = math.exp %253 : vector<8x128xf32>
    %cst_81 = arith.constant 1.000000e+00 : f32
    %255 = vector.broadcast %cst_81 : f32 to vector<8x128xf32>
    %256 = arith.addf %255, %254 : vector<8x128xf32>
    %257 = arith.divf %255, %256 : vector<8x128xf32>
    %258 = vector.extract_strided_slice %245 {offsets = [0, 256], sizes = [8, 128], strides = [1, 1]} : vector<8x512xf32> to vector<8x128xf32>
    %259 = math.tanh %258 : vector<8x128xf32>
    %260 = vector.extract_strided_slice %245 {offsets = [0, 384], sizes = [8, 128], strides = [1, 1]} : vector<8x512xf32> to vector<8x128xf32>
    %261 = arith.negf %260 : vector<8x128xf32>
    %262 = math.exp %261 : vector<8x128xf32>
    %cst_82 = arith.constant 1.000000e+00 : f32
    %263 = vector.broadcast %cst_82 : f32 to vector<8x128xf32>
    %264 = arith.addf %263, %262 : vector<8x128xf32>
    %265 = arith.divf %263, %264 : vector<8x128xf32>
    %266 = arith.mulf %257, %238 : vector<8x128xf32>
    %267 = arith.mulf %251, %259 : vector<8x128xf32>
    %268 = arith.addf %266, %267 : vector<8x128xf32>
    %269 = math.tanh %268 : vector<8x128xf32>
    %270 = arith.mulf %265, %269 : vector<8x128xf32>
    %271 = arith.truncf %270 : vector<8x128xf32> to vector<8x128xbf16>
    %c0_83 = arith.constant 0 : index
    %c0_84 = arith.constant 0 : index
    %272 = vector.load %arg10[%c0_83, %c0_84] : memref<128x1xbf16, #tpu.memory_space<vmem>>, vector<128x1xbf16>
    %cst_85 = arith.constant dense<0.000000e+00> : vector<8x1xf32>
    %273 = tpu.matmul %271, %272, %cst_85 {dimension_numbers = #tpu.dot_dimension_numbers<[1], [0], [0], [1], [0, 0, 1, 1], [], []>} : vector<8x128xbf16>, vector<128x1xbf16>, vector<8x1xf32> -> vector<8x1xf32>
    %c0_86 = arith.constant 0 : index
    %c0_87 = arith.constant 0 : index
    %274 = vector.load %arg11[%c0_86, %c0_87] : memref<1x1xf32, #tpu.memory_space<vmem>>, vector<1x1xf32>
    %275 = vector.broadcast %274 : vector<1x1xf32> to vector<8x1xf32>
    %276 = arith.addf %273, %275 : vector<8x1xf32>
    %c0_88 = arith.constant 0 : index
    %c0_89 = arith.constant 0 : index
    %277 = vector.load %arg12[%c0_88, %c0_89] : memref<8x1xf32, #tpu.memory_space<vmem>>, vector<8x1xf32>
    tpu.vector_store %arg12[%c0_88, %c0_89], %276 {strides = array<i32>} : memref<8x1xf32, #tpu.memory_space<vmem>>, vector<8x1xf32>,
    return
  }
}

</mosaic_0001>

<bundles_post_ra>
// kernel: tcn_lstm_forward.5
= control target key start
LH: loop header
LB: loop body
LE: loop exit
PB: predicated region body
PF: predicated region fallthrough
CT: control target
= control target key end

     0   :  { %s4254_s12 = smov 0   ;;  %s5130_s0 = inlined_call_operand.vmem [shape: bf16[2,2048,81], index: 0, kind: input, shape index: {}]   ;;  %s5131_s1 = inlined_call_operand.vmem [shape: bf16[81,16], index: 1, kind: input, shape index: {}]   ;;  %s5132_s2 = inlined_call_operand.vmem [shape: f32[1,16], index: 2, kind: input, shape index: {}]   ;;  %s5133_s3 = inlined_call_operand.vmem [shape: bf16[2,512,16], index: 3, kind: output, shape index: {}]  }
   0x1 LB: > { %s3263_s13 = sadd.s32 4294967295, %s4231_s12   ;;  %p3267_p0 = scmp.ge.s32.totalorder %s4231_s12, 1  ;;  %s4231_s12 = sphi %s4254_s12, %s13_s12  }
   0x2   : > { %p137_p1 = scmp.lt.s32.totalorder %s4231_s12, 3 }
   0x4   : > { %p138_p2 = pnand %p3267_p0, %p137_p1 }
   0x6   : > { %141 = sbr.rel (%p138_p2) target bundleno = 499 (0x1f3), region = 32 }
   0xb   : > { %v4090_v0 = vld [vmem:[%s5131_s1 + $0x28] ss:$0 sps:$4 sm:$0x11]   ;;  %vm1497_vm0 = vcmask 1040384   ;;  %v4233_v1 = vmov 0   ;;  %v4091_v4 = vld [vmem:[%s5131_s1 + $0x20] sm:$0xff]  }
   0xc   : > { %v1499_v2 = vsel %vm1497_vm0, 65535, %v4233_v1  ;;  %p161_p3 = scmp.lt.s32.totalorder %s3263_s13, 1  ;;  %v4092_v5 = vld [vmem:[%s5131_s1 + $0x18] sm:$0xff]   ;;  %vm1112_vm1 = vcmask 662528   ;;  %v4093_v8 = vld [vmem:[%s5131_s1 + $0x10] sm:$0xff]   ;;  %v4094_v9 = vld [vmem:[%s5131_s1 + $0x8] sm:$0xff]  }
   0xd   : > { %v1501_v3 = vand.u32 %v4090_v0, %v1499_v2  ;;  %v4095_v10 = vld [vmem:[%s5131_s1] sm:$0xff]   ;;  %vm3143_vm2 = vcmask 125952  }
   0xe   : > { %s5297_s13 = smov (!%p161_p3, %s3263_s13), 1 }
   0xf   : > { %3801 = vmatprep.subr.bf16.mxu0 %v1501_v3  ;;  %4069 = vmatprep.subr.bf16.mxu1 %v1501_v3  ;;  %s3601_s20 = sshll.u32 %s5297_s13, 10  ;;  %s3602_s5 = sshll.u32 %s5297_s13, 8 }
  0x10   : > { %3802 = vmatpush3.bf16.msra.mxu0 %v1501_v3  ;;  %4075 = vmatpush3.bf16.msra.mxu1 %v1501_v3  ;;  %s4277_s23 = scalar_lea.vmem %s5130_s0, %s3601_s20  ;;  %s4819_s8 = scalar_lea.vmem %s5133_s3, %s3602_s5 }
  0x11   : > { %3803 = vmatprep.subr.bf16.mxu0 %v4091_v4  ;;  %4070 = vmatprep.subr.bf16.mxu1 %v4091_v4  ;;  %v4096_v6 = vld [vmem:[%s4277_s23] sm:$0xff]   ;;  %v4098_v11 = vld [vmem:[%s4277_s23 + $0x8] sm:$0xff]   ;;  %v4100_v13 = vld [vmem:[%s4277_s23 + $0x10] sm:$0xff]  }
  0x12   : > { %v4097_v7 = vld [vmem:[%s4277_s23 + $0x200] sm:$0xff]   ;;  %3813 = vmatprep.mubr.msk.bf16.mxu0 %vm1112_vm1, %v4096_v6  ;;  %v4099_v12 = vld [vmem:[%s4277_s23 + $0x208] sm:$0xff]   ;;  %v4101_v14 = vld [vmem:[%s4277_s23 + $0x210] sm:$0xff]  }
  0x13   : > { %3941 = vmatprep.mubr.msk.bf16.mxu1 %vm1112_vm1, %v4097_v7  ;;  %v4102_v15 = vld [vmem:[%s4277_s23 + $0x18] sm:$0xff]   ;;  %v4104_v17 = vld [vmem:[%s4277_s23 + $0x20] sm:$0xff]   ;;  %v4106_v19 = vld [vmem:[%s4277_s23 + $0x28] sm:$0xff]  }
  0x14   : > { %3804 = vmatpush3.bf16.msra.mxu0 %v4091_v4  ;;  %4076 = vmatpush3.bf16.msra.mxu1 %v4091_v4  ;;  %v4103_v16 = vld [vmem:[%s4277_s23 + $0x218] sm:$0xff]   ;;  %v4105_v18 = vld [vmem:[%s4277_s23 + $0x220] sm:$0xff]   ;;  %v4107_v20 = vld [vmem:[%s4277_s23 + $0x228] sm:$0xff]  }
  0x15   : > { %3805 = vmatprep.subr.bf16.mxu0 %v4092_v5  ;;  %4071 = vmatprep.subr.bf16.mxu1 %v4092_v5  ;;  %v4108_v21 = vld [vmem:[%s4277_s23 + $0x30] sm:$0xff]   ;;  %v4110_v23 = vld [vmem:[%s4277_s23 + $0x38] sm:$0xff]   ;;  %v4112_v25 = vld [vmem:[%s4277_s23 + $0x40] sm:$0xff]  }
  0x16   : > { %v4109_v22 = vld [vmem:[%s4277_s23 + $0x230] sm:$0xff]   ;;  %v4111_v24 = vld [vmem:[%s4277_s23 + $0x238] sm:$0xff]   ;;  %v4113_v26 = vld [vmem:[%s4277_s23 + $0x240] sm:$0xff]  }
  0x17   : > { %v4114_v27 = vld [vmem:[%s4277_s23 + $0x48] sm:$0xff]   ;;  %v4116_v29 = vld [vmem:[%s4277_s23 + $0x50] sm:$0xff]   ;;  %v4118_v31 = vld [vmem:[%s4277_s23 + $0x58] sm:$0xff]  }
  0x18   : > { %3806 = vmatpush3.bf16.msra.mxu0 %v4092_v5  ;;  %4077 = vmatpush3.bf16.msra.mxu1 %v4092_v5  ;;  %v4115_v28 = vld [vmem:[%s4277_s23 + $0x248] sm:$0xff]   ;;  %v4117_v30 = vld [vmem:[%s4277_s23 + $0x250] sm:$0xff]   ;;  %v4119_v32 = vld [vmem:[%s4277_s23 + $0x258] sm:$0xff]  }
  0x19   : > { %3807 = vmatprep.subr.bf16.mxu0 %v4093_v8  ;;  %4072 = vmatprep.subr.bf16.mxu1 %v4093_v8  ;;  %v4120_v33 = vld [vmem:[%s4277_s23 + $0x60] sm:$0xff]   ;;  %v4122_v35 = vld [vmem:[%s4277_s23 + $0x68] sm:$0xff]   ;;  %v4124_v37 = vld [vmem:[%s4277_s23 + $0x70] sm:$0xff]  }
  0x1a   : > { %v4121_v34 = vld [vmem:[%s4277_s23 + $0x260] sm:$0xff]   ;;  %v4123_v36 = vld [vmem:[%s4277_s23 + $0x268] sm:$0xff]   ;;  %v4125_v38 = vld [vmem:[%s4277_s23 + $0x270] sm:$0xff]  }
  0x1b   : > { %v4126_v39 = vld [vmem:[%s4277_s23 + $0x78] sm:$0xff]   ;;  %v4128_v41 = vld [vmem:[%s4277_s23 + $0x80] sm:$0xff]   ;;  %v4130_v43 = vld [vmem:[%s4277_s23 + $0x88] sm:$0xff]  }
  0x1c   : > { %3808 = vmatpush3.bf16.msra.mxu0 %v4093_v8  ;;  %4078 = vmatpush3.bf16.msra.mxu1 %v4093_v8  ;;  %v4127_v40 = vld [vmem:[%s4277_s23 + $0x278] sm:$0xff]   ;;  %v4129_v42 = vld [vmem:[%s4277_s23 + $0x280] sm:$0xff]   ;;  %v4131_v44 = vld [vmem:[%s4277_s23 + $0x288] sm:$0xff]  }
  0x1d   : > { %3809 = vmatprep.subr.bf16.mxu0 %v4094_v9  ;;  %4073 = vmatprep.subr.bf16.mxu1 %v4094_v9  ;;  %v4132_v45 = vld [vmem:[%s4277_s23 + $0x90] sm:$0xff]   ;;  %v4134_v47 = vld [vmem:[%s4277_s23 + $0x98] sm:$0xff]   ;;  %v4136_v49 = vld [vmem:[%s4277_s23 + $0xa0] sm:$0xff]  }
  0x1e   : > { %v4133_v46 = vld [vmem:[%s4277_s23 + $0x290] sm:$0xff]   ;;  %v4135_v48 = vld [vmem:[%s4277_s23 + $0x298] sm:$0xff]   ;;  %v4137_v50 = vld [vmem:[%s4277_s23 + $0x2a0] sm:$0xff]  }
  0x1f   : > { %v4138_v51 = vld [vmem:[%s4277_s23 + $0xa8] sm:$0xff]   ;;  %v4140_v53 = vld [vmem:[%s4277_s23 + $0xb0] sm:$0xff]   ;;  %v4142_v55 = vld [vmem:[%s4277_s23 + $0xb8] sm:$0xff]  }
  0x20   : > { %3810 = vmatpush3.bf16.msra.mxu0 %v4094_v9  ;;  %4079 = vmatpush3.bf16.msra.mxu1 %v4094_v9  ;;  %v4139_v52 = vld [vmem:[%s4277_s23 + $0x2a8] sm:$0xff]   ;;  %v4141_v54 = vld [vmem:[%s4277_s23 + $0x2b0] sm:$0xff]   ;;  %v4143_v56 = vld [vmem:[%s4277_s23 + $0x2b8] sm:$0xff]  }
  0x21   : > { %3811 = vmatprep.subr.bf16.mxu0 %v4095_v10  ;;  %4074 = vmatprep.subr.bf16.mxu1 %v4095_v10  ;;  %v4144_v57 = vld [vmem:[%s4277_s23 + $0xc0] sm:$0xff]   ;;  %v4146_v59 = vld [vmem:[%s4277_s23 + $0xc8] sm:$0xff]   ;;  %v4148_v61 = vld [vmem:[%s4277_s23 + $0xd0] sm:$0xff]  }
  0x22   : > { %v4145_v58 = vld [vmem:[%s4277_s23 + $0x2c0] sm:$0xff]   ;;  %v4147_v60 = vld [vmem:[%s4277_s23 + $0x2c8] sm:$0xff]   ;;  %v4149_v62 = vld [vmem:[%s4277_s23 + $0x2d0] sm:$0xff]  }
  0x23   : > { %v4150_v63 = vld [vmem:[%s4277_s23 + $0xd8] sm:$0xff]   ;;  %v4152_v1 = vld [vmem:[%s4277_s23 + $0xe0] sm:$0xff]   ;;  %v4154_v3 = vld [vmem:[%s4277_s23 + $0xe8] sm:$0xff]  }
  0x24   : > { %3812 = vmatpush3.bf16.msra.mxu0 %v4095_v10  ;;  %4080 = vmatpush3.bf16.msra.mxu1 %v4095_v10  ;;  %v4151_v0 = vld [vmem:[%s4277_s23 + $0x2d8] sm:$0xff]   ;;  %v4153_v2 = vld [vmem:[%s4277_s23 + $0x2e0] sm:$0xff]   ;;  %v4155_v4 = vld [vmem:[%s4277_s23 + $0x2e8] sm:$0xff]  }
  0x25   : > { %v4156_v5 = vld [vmem:[%s4277_s23 + $0xf0] sm:$0xff]   ;;  %v4158_v7 = vld [vmem:[%s4277_s23 + $0xf8] sm:$0xff]   ;;  %v4160_v9 = vld [vmem:[%s4277_s23 + $0x100] sm:$0xff]  }
  0x26   : > { %v4157_v6 = vld [vmem:[%s4277_s23 + $0x2f0] sm:$0xff]   ;;  %v4159_v8 = vld [vmem:[%s4277_s23 + $0x2f8] sm:$0xff]   ;;  %v4161_v10 = vld [vmem:[%s4277_s23 + $0x300] sm:$0xff]  }
  0x27   : > { %3814 = vmatmul.mubr.msk.bf16.vlgmr.msra.gmra.mxu0 %vm1112_vm1, %v4098_v11  ;;  %3942 = vmatmul.mubr.msk.bf16.vlgmr.msra.gmra.mxu1 %vm1112_vm1, %v4099_v12  ;;  %v4162_v11 = vld [vmem:[%s4277_s23 + $0x108] sm:$0xff]  }
  0x28   : > { %3817 = vmatprep.mubr.msk.bf16.mxu0 %vm1112_vm1, %v4100_v13  ;;  %3945 = vmatprep.mubr.msk.bf16.mxu1 %vm1112_vm1, %v4101_v14  ;;  %v4163_v12 = vld [vmem:[%s4277_s23 + $0x308] sm:$0xff]   ;;  %v4164_v13 = vld [vmem:[%s4277_s23 + $0x110] sm:$0xff]  }
  0x29   : > { %v4165_v14 = vld [vmem:[%s4277_s23 + $0x310] sm:$0xff]  }
  0x2f   : > { %3818 = vmatmul.mubr.msk.bf16.gmra.mxu0 %vm1112_vm1, %v4102_v15  ;;  %3946 = vmatmul.mubr.msk.bf16.gmra.mxu1 %vm1112_vm1, %v4103_v16  ;;  %v4166_v15 = vld [vmem:[%s4277_s23 + $0x118] sm:$0xff]  }
  0x30   : > { %3821 = vmatprep.mubr.msk.bf16.mxu0 %vm1112_vm1, %v4104_v17  ;;  %3949 = vmatprep.mubr.msk.bf16.mxu1 %vm1112_vm1, %v4105_v18  ;;  %v4167_v16 = vld [vmem:[%s4277_s23 + $0x318] sm:$0xff]   ;;  %v4168_v17 = vld [vmem:[%s4277_s23 + $0x120] sm:$0xff]  }
  0x31   : > { %v4169_v18 = vld [vmem:[%s4277_s23 + $0x320] sm:$0xff]  }
  0x37   : > { %3822 = vmatmul.mubr.msk.bf16.gmra.mxu0 %vm1112_vm1, %v4106_v19  ;;  %3950 = vmatmul.mubr.msk.bf16.gmra.mxu1 %vm1112_vm1, %v4107_v20  ;;  %v4170_v19 = vld [vmem:[%s4277_s23 + $0x128] sm:$0xff]  }
  0x38   : > { %3825 = vmatprep.mubr.msk.bf16.mxu0 %vm1112_vm1, %v4108_v21  ;;  %3953 = vmatprep.mubr.msk.bf16.mxu1 %vm1112_vm1, %v4109_v22  ;;  %v4171_v20 = vld [vmem:[%s4277_s23 + $0x328] sm:$0xff]   ;;  %v4172_v21 = vld [vmem:[%s4277_s23 + $0x130] sm:$0xff]  }
  0x39   : > { %v4173_v22 = vld [vmem:[%s4277_s23 + $0x330] sm:$0xff]  }
  0x3f   : > { %3826 = vmatmul.mubr.msk.bf16.gmra.mxu0 %vm1112_vm1, %v4110_v23  ;;  %3954 = vmatmul.mubr.msk.bf16.gmra.mxu1 %vm1112_vm1, %v4111_v24  ;;  %v4174_v23 = vld [vmem:[%s4277_s23 + $0x138] sm:$0xff]  }
  0x40   : > { %3829 = vmatprep.mubr.msk.bf16.mxu0 %vm1112_vm1, %v4112_v25  ;;  %3957 = vmatprep.mubr.msk.bf16.mxu1 %vm1112_vm1, %v4113_v26  ;;  %v4175_v24 = vld [vmem:[%s4277_s23 + $0x338] sm:$0xff]   ;;  %v4176_v25 = vld [vmem:[%s4277_s23 + $0x140] sm:$0xff]  }
  0x41   : > { %v4177_v26 = vld [vmem:[%s4277_s23 + $0x340] sm:$0xff]  }
  0x47   : > { %3830 = vmatmul.mubr.msk.bf16.gmra.mxu0 %vm1112_vm1, %v4114_v27  ;;  %3958 = vmatmul.mubr.msk.bf16.gmra.mxu1 %vm1112_vm1, %v4115_v28  ;;  %v4178_v27 = vld [vmem:[%s4277_s23 + $0x148] sm:$0xff]  }
  0x48   : > { %3833 = vmatprep.mubr.msk.bf16.mxu0 %vm1112_vm1, %v4116_v29  ;;  %3961 = vmatprep.mubr.msk.bf16.mxu1 %vm1112_vm1, %v4117_v30  ;;  %v4179_v28 = vld [vmem:[%s4277_s23 + $0x348] sm:$0xff]   ;;  %v4180_v29 = vld [vmem:[%s4277_s23 + $0x150] sm:$0xff]  }
  0x49   : > { %v4181_v30 = vld [vmem:[%s4277_s23 + $0x350] sm:$0xff]  }
  0x4f   : > { %3834 = vmatmul.mubr.msk.bf16.gmra.mxu0 %vm1112_vm1, %v4118_v31  ;;  %3962 = vmatmul.mubr.msk.bf16.gmra.mxu1 %vm1112_vm1, %v4119_v32  ;;  %v4182_v31 = vld [vmem:[%s4277_s23 + $0x158] sm:$0xff]  }
  0x50   : > { %3837 = vmatprep.mubr.msk.bf16.mxu0 %vm1112_vm1, %v4120_v33  ;;  %3965 = vmatprep.mubr.msk.bf16.mxu1 %vm1112_vm1, %v4121_v34  ;;  %v4183_v32 = vld [vmem:[%s4277_s23 + $0x358] sm:$0xff]   ;;  %v4184_v33 = vld [vmem:[%s4277_s23 + $0x160] sm:$0xff]  }
  0x51   : > { %v4185_v34 = vld [vmem:[%s4277_s23 + $0x360] sm:$0xff]  }
  0x57   : > { %3838 = vmatmul.mubr.msk.bf16.gmra.mxu0 %vm1112_vm1, %v4122_v35  ;;  %3966 = vmatmul.mubr.msk.bf16.gmra.mxu1 %vm1112_vm1, %v4123_v36  ;;  %v4186_v35 = vld [vmem:[%s4277_s23 + $0x168] sm:$0xff]  }
  0x58   : > { %3841 = vmatprep.mubr.msk.bf16.mxu0 %vm1112_vm1, %v4124_v37  ;;  %3969 = vmatprep.mubr.msk.bf16.mxu1 %vm1112_vm1, %v4125_v38  ;;  %v4187_v36 = vld [vmem:[%s4277_s23 + $0x368] sm:$0xff]   ;;  %v4188_v37 = vld [vmem:[%s4277_s23 + $0x170] sm:$0xff]  }
  0x59   : > { %v4189_v38 = vld [vmem:[%s4277_s23 + $0x370] sm:$0xff]  }
  0x5f   : > { %3842 = vmatmul.mubr.msk.bf16.gmra.mxu0 %vm1112_vm1, %v4126_v39  ;;  %3970 = vmatmul.mubr.msk.bf16.gmra.mxu1 %vm1112_vm1, %v4127_v40  ;;  %v4190_v39 = vld [vmem:[%s4277_s23 + $0x178] sm:$0xff]  }
  0x60   : > { %3845 = vmatprep.mubr.msk.bf16.mxu0 %vm1112_vm1, %v4128_v41  ;;  %3973 = vmatprep.mubr.msk.bf16.mxu1 %vm1112_vm1, %v4129_v42  ;;  %v4191_v40 = vld [vmem:[%s4277_s23 + $0x378] sm:$0xff]   ;;  %v4192_v41 = vld [vmem:[%s4277_s23 + $0x180] sm:$0xff]  }
  0x61   : > { %v4193_v42 = vld [vmem:[%s4277_s23 + $0x380] sm:$0xff]  }
  0x67   : > { %3846 = vmatmul.mubr.msk.bf16.gmra.mxu0 %vm1112_vm1, %v4130_v43  ;;  %3974 = vmatmul.mubr.msk.bf16.gmra.mxu1 %vm1112_vm1, %v4131_v44  ;;  %v4194_v43 = vld [vmem:[%s4277_s23 + $0x188] sm:$0xff]  }
  0x68   : > { %3849 = vmatprep.mubr.msk.bf16.mxu0 %vm1112_vm1, %v4132_v45  ;;  %3977 = vmatprep.mubr.msk.bf16.mxu1 %vm1112_vm1, %v4133_v46  ;;  %v4195_v44 = vld [vmem:[%s4277_s23 + $0x388] sm:$0xff]   ;;  %v4196_v45 = vld [vmem:[%s4277_s23 + $0x190] sm:$0xff]  }
  0x69   : > { %v4197_v46 = vld [vmem:[%s4277_s23 + $0x390] sm:$0xff]  }
  0x6f   : > { %3850 = vmatmul.mubr.msk.bf16.gmra.mxu0 %vm1112_vm1, %v4134_v47  ;;  %3978 = vmatmul.mubr.msk.bf16.gmra.mxu1 %vm1112_vm1, %v4135_v48 }
  0x70   : > { %3853 = vmatprep.mubr.msk.bf16.mxu0 %vm1112_vm1, %v4136_v49  ;;  %3981 = vmatprep.mubr.msk.bf16.mxu1 %vm1112_vm1, %v4137_v50 }
  0x77   : > { %3854 = vmatmul.mubr.msk.bf16.gmra.mxu0 %vm1112_vm1, %v4138_v51  ;;  %3982 = vmatmul.mubr.msk.bf16.gmra.mxu1 %vm1112_vm1, %v4139_v52 }
  0x78   : > { %3857 = vmatprep.mubr.msk.bf16.mxu0 %vm1112_vm1, %v4140_v53  ;;  %3985 = vmatprep.mubr.msk.bf16.mxu1 %vm1112_vm1, %v4141_v54  ;;  %v4198_v53 = vld [vmem:[%s4277_s23 + $0x198] sm:$0xff]  }
  0x79   : > { %v4199_v54 = vld [vmem:[%s4277_s23 + $0x398] sm:$0xff]  }
  0x7f   : > { %3858 = vmatmul.mubr.msk.bf16.gmra.mxu0 %vm1112_vm1, %v4142_v55  ;;  %3986 = vmatmul.mubr.msk.bf16.gmra.mxu1 %vm1112_vm1, %v4143_v56  ;;  %v4200_v55 = vld [vmem:[%s4277_s23 + $0x1a0] sm:$0xff]  }
  0x80   : > { %3861 = vmatprep.mubr.msk.bf16.mxu0 %vm1112_vm1, %v4144_v57  ;;  %3989 = vmatprep.mubr.msk.bf16.mxu1 %vm1112_vm1, %v4145_v58  ;;  %v4201_v56 = vld [vmem:[%s4277_s23 + $0x3a0] sm:$0xff]  }
  0x87   : > { %3862 = vmatmul.mubr.msk.bf16.gmra.mxu0 %vm1112_vm1, %v4146_v59  ;;  %3990 = vmatmul.mubr.msk.bf16.gmra.mxu1 %vm1112_vm1, %v4147_v60 }
  0x88   : > { %3865 = vmatprep.mubr.msk.bf16.mxu0 %vm1112_vm1, %v4148_v61  ;;  %3993 = vmatprep.mubr.msk.bf16.mxu1 %vm1112_vm1, %v4149_v62 }
  0x8f   : > { %3866 = vmatmul.mubr.msk.bf16.gmra.mxu0 %vm1112_vm1, %v4150_v63  ;;  %3994 = vmatmul.mubr.msk.bf16.gmra.mxu1 %vm1112_vm1, %v4151_v0 }
  0x90   : > { %3869 = vmatprep.mubr.msk.bf16.mxu0 %vm1112_vm1, %v4152_v1  ;;  %3997 = vmatprep.mubr.msk.bf16.mxu1 %vm1112_vm1, %v4153_v2  ;;  %v4202_v1 = vld [vmem:[%s4277_s23 + $0x1a8] sm:$0xff]  }
  0x91   : > { %v4203_v2 = vld [vmem:[%s4277_s23 + $0x3a8] sm:$0xff]  }
  0x97   : > { %3870 = vmatmul.mubr.msk.bf16.gmra.mxu0 %vm1112_vm1, %v4154_v3  ;;  %3998 = vmatmul.mubr.msk.bf16.gmra.mxu1 %vm1112_vm1, %v4155_v4  ;;  %v4204_v3 = vld [vmem:[%s4277_s23 + $0x1b0] sm:$0xff]  }
  0x98   : > { %3873 = vmatprep.mubr.msk.bf16.mxu0 %vm1112_vm1, %v4156_v5  ;;  %4001 = vmatprep.mubr.msk.bf16.mxu1 %vm1112_vm1, %v4157_v6  ;;  %v4205_v4 = vld [vmem:[%s4277_s23 + $0x3b0] sm:$0xff]  }
  0x9f   : > { %3874 = vmatmul.mubr.msk.bf16.gmra.mxu0 %vm1112_vm1, %v4158_v7  ;;  %4002 = vmatmul.mubr.msk.bf16.gmra.mxu1 %vm1112_vm1, %v4159_v8 }
  0xa0   : > { %3877 = vmatprep.mubr.msk.bf16.mxu0 %vm1112_vm1, %v4160_v9  ;;  %4005 = vmatprep.mubr.msk.bf16.mxu1 %vm1112_vm1, %v4161_v10 }
  0xa7   : > { %3878 = vmatmul.mubr.msk.bf16.gmra.mxu0 %vm1112_vm1, %v4162_v11  ;;  %4006 = vmatmul.mubr.msk.bf16.gmra.mxu1 %vm1112_vm1, %v4163_v12 }
  0xa8   : > { %3881 = vmatprep.mubr.msk.bf16.mxu0 %vm1112_vm1, %v4164_v13  ;;  %4009 = vmatprep.mubr.msk.bf16.mxu1 %vm1112_vm1, %v4165_v14  ;;  %v4206_v13 = vld [vmem:[%s4277_s23 + $0x1b8] sm:$0xff]  }
  0xa9   : > { %v4207_v14 = vld [vmem:[%s4277_s23 + $0x3b8] sm:$0xff]  }
  0xaf   : > { %3882 = vmatmul.mubr.msk.bf16.gmra.mxu0 %vm1112_vm1, %v4166_v15  ;;  %4010 = vmatmul.mubr.msk.bf16.gmra.mxu1 %vm1112_vm1, %v4167_v16  ;;  %v4208_v15 = vld [vmem:[%s4277_s23 + $0x1c0] sm:$0xff]  }
  0xb0   : > { %3885 = vmatprep.mubr.msk.bf16.mxu0 %vm1112_vm1, %v4168_v17  ;;  %4013 = vmatprep.mubr.msk.bf16.mxu1 %vm1112_vm1, %v4169_v18  ;;  %v4209_v16 = vld [vmem:[%s4277_s23 + $0x3c0] sm:$0xff]  }
  0xb7   : > { %3886 = vmatmul.mubr.msk.bf16.gmra.mxu0 %vm1112_vm1, %v4170_v19  ;;  %4014 = vmatmul.mubr.msk.bf16.gmra.mxu1 %vm1112_vm1, %v4171_v20 }
  0xb8   : > { %3889 = vmatprep.mubr.msk.bf16.mxu0 %vm1112_vm1, %v4172_v21  ;;  %4017 = vmatprep.mubr.msk.bf16.mxu1 %vm1112_vm1, %v4173_v22 }
  0xbf   : > { %3890 = vmatmul.mubr.msk.bf16.gmra.mxu0 %vm1112_vm1, %v4174_v23  ;;  %4018 = vmatmul.mubr.msk.bf16.gmra.mxu1 %vm1112_vm1, %v4175_v24 }
  0xc0   : > { %3893 = vmatprep.mubr.msk.bf16.mxu0 %vm1112_vm1, %v4176_v25  ;;  %4021 = vmatprep.mubr.msk.bf16.mxu1 %vm1112_vm1, %v4177_v26  ;;  %v4210_v25 = vld [vmem:[%s4277_s23 + $0x1c8] sm:$0xff]  }
  0xc1   : > { %v4211_v26 = vld [vmem:[%s4277_s23 + $0x3c8] sm:$0xff]  }
  0xc7   : > { %3894 = vmatmul.mubr.msk.bf16.gmra.mxu0 %vm1112_vm1, %v4178_v27  ;;  %4022 = vmatmul.mubr.msk.bf16.gmra.mxu1 %vm1112_vm1, %v4179_v28  ;;  %v4212_v27 = vld [vmem:[%s4277_s23 + $0x1d0] sm:$0xff]  }
  0xc8   : > { %3897 = vmatprep.mubr.msk.bf16.mxu0 %vm1112_vm1, %v4180_v29  ;;  %4025 = vmatprep.mubr.msk.bf16.mxu1 %vm1112_vm1, %v4181_v30  ;;  %v4213_v28 = vld [vmem:[%s4277_s23 + $0x3d0] sm:$0xff]  }
  0xcf   : > { %3898 = vmatmul.mubr.msk.bf16.gmra.mxu0 %vm1112_vm1, %v4182_v31  ;;  %4026 = vmatmul.mubr.msk.bf16.gmra.mxu1 %vm1112_vm1, %v4183_v32 }
  0xd0   : > { %3901 = vmatprep.mubr.msk.bf16.mxu0 %vm1112_vm1, %v4184_v33  ;;  %4029 = vmatprep.mubr.msk.bf16.mxu1 %vm1112_vm1, %v4185_v34 }
  0xd7   : > { %3902 = vmatmul.mubr.msk.bf16.gmra.mxu0 %vm1112_vm1, %v4186_v35  ;;  %4030 = vmatmul.mubr.msk.bf16.gmra.mxu1 %vm1112_vm1, %v4187_v36 }
  0xd8   : > { %3905 = vmatprep.mubr.msk.bf16.mxu0 %vm1112_vm1, %v4188_v37  ;;  %4033 = vmatprep.mubr.msk.bf16.mxu1 %vm1112_vm1, %v4189_v38  ;;  %v4214_v37 = vld [vmem:[%s4277_s23 + $0x1d8] sm:$0xff]  }
  0xd9   : > { %v4215_v38 = vld [vmem:[%s4277_s23 + $0x3d8] sm:$0xff]  }
  0xdf   : > { %3906 = vmatmul.mubr.msk.bf16.gmra.mxu0 %vm1112_vm1, %v4190_v39  ;;  %4034 = vmatmul.mubr.msk.bf16.gmra.mxu1 %vm1112_vm1, %v4191_v40  ;;  %v4216_v39 = vld [vmem:[%s4277_s23 + $0x1e0] sm:$0xff]  }
  0xe0   : > { %3909 = vmatprep.mubr.msk.bf16.mxu0 %vm1112_vm1, %v4192_v41  ;;  %4037 = vmatprep.mubr.msk.bf16.mxu1 %vm1112_vm1, %v4193_v42  ;;  %v4217_v40 = vld [vmem:[%s4277_s23 + $0x3e0] sm:$0xff]  }
  0xe7   : > { %v4488_v47 = vpop.f32.mrf.mxu0  ;;  %3910 = vmatmul.mubr.msk.bf16.gmra.mxu0 %vm1112_vm1, %v4194_v43  ;;  %v4491_v48 = vpop.f32.mrf.mxu1  ;;  %4038 = vmatmul.mubr.msk.bf16.gmra.mxu1 %vm1112_vm1, %v4195_v44 }
  0xe8   : > { %3913 = vmatprep.mubr.msk.bf16.mxu0 %vm1112_vm1, %v4196_v45  ;;  %4041 = vmatprep.mubr.msk.bf16.mxu1 %vm1112_vm1, %v4197_v46 }
  0xe9   : > { %v4496_v49 = vpop.f32.mrf.mxu0  ;;  %v4498_v50 = vpop.f32.mrf.mxu1 }
  0xeb   : > { %v4500_v51 = vpop.f32.mrf.mxu0  ;;  %v4502_v52 = vpop.f32.mrf.mxu1 }
  0xed   : > { %v4508_v57 = vpop.f32.mrf.mxu0  ;;  %v4510_v58 = vpop.f32.mrf.mxu1 }
  0xef   : > { %v4512_v59 = vpop.f32.mrf.mxu0  ;;  %3914 = vmatmul.mubr.msk.bf16.gmra.mxu0 %vm1112_vm1, %v4198_v53  ;;  %v4515_v60 = vpop.f32.mrf.mxu1  ;;  %4042 = vmatmul.mubr.msk.bf16.gmra.mxu1 %vm1112_vm1, %v4199_v54 }
  0xf0   : > { %3917 = vmatprep.mubr.msk.bf16.mxu0 %vm1112_vm1, %v4200_v55  ;;  %4045 = vmatprep.mubr.msk.bf16.mxu1 %vm1112_vm1, %v4201_v56  ;;  %v4218_v55 = vld [vmem:[%s4277_s23 + $0x1e8] sm:$0xff]  }
  0xf1   : > { %v4520_v61 = vpop.f32.mrf.mxu0  ;;  %v4522_v62 = vpop.f32.mrf.mxu1  ;;  %v4219_v56 = vld [vmem:[%s4277_s23 + $0x3e8] sm:$0xff]  }
  0xf3   : > { %v4524_v63 = vpop.f32.mrf.mxu0  ;;  %v4526_v0 = vpop.f32.mrf.mxu1 }
  0xf5   : > { %v4532_v5 = vpop.f32.mrf.mxu0  ;;  %v4534_v6 = vpop.f32.mrf.mxu1 }
  0xf7   : > { %v4536_v7 = vpop.f32.mrf.mxu0  ;;  %3918 = vmatmul.mubr.msk.bf16.gmra.mxu0 %vm1112_vm1, %v4202_v1  ;;  %v4539_v8 = vpop.f32.mrf.mxu1  ;;  %4046 = vmatmul.mubr.msk.bf16.gmra.mxu1 %vm1112_vm1, %v4203_v2  ;;  %v4220_v1 = vld [vmem:[%s4277_s23 + $0x1f0] sm:$0xff]  }
  0xf8   : > { %3921 = vmatprep.mubr.msk.bf16.mxu0 %vm1112_vm1, %v4204_v3  ;;  %4049 = vmatprep.mubr.msk.bf16.mxu1 %vm1112_vm1, %v4205_v4  ;;  %v4221_v2 = vld [vmem:[%s4277_s23 + $0x3f0] sm:$0xff]  }
  0xf9   : > { %v4544_v9 = vpop.f32.mrf.mxu0  ;;  %v4546_v10 = vpop.f32.mrf.mxu1 }
  0xfb   : > { %v4548_v11 = vpop.f32.mrf.mxu0  ;;  %v4550_v12 = vpop.f32.mrf.mxu1 }
  0xfd   : > { %v4556_v17 = vpop.f32.mrf.mxu0  ;;  %v4558_v18 = vpop.f32.mrf.mxu1 }
  0xff   : > { %v4560_v19 = vpop.f32.mrf.mxu0  ;;  %3922 = vmatmul.mubr.msk.bf16.gmra.mxu0 %vm1112_vm1, %v4206_v13  ;;  %v4563_v20 = vpop.f32.mrf.mxu1  ;;  %4050 = vmatmul.mubr.msk.bf16.gmra.mxu1 %vm1112_vm1, %v4207_v14 }
 0x100   : > { %3925 = vmatprep.mubr.msk.bf16.mxu0 %vm1112_vm1, %v4208_v15  ;;  %4053 = vmatprep.mubr.msk.bf16.mxu1 %vm1112_vm1, %v4209_v16 }
 0x101   : > { %v4568_v21 = vpop.f32.mrf.mxu0  ;;  %v4570_v22 = vpop.f32.mrf.mxu1 }
 0x103   : > { %v4572_v23 = vpop.f32.mrf.mxu0  ;;  %v4574_v24 = vpop.f32.mrf.mxu1 }
 0x105   : > { %v4580_v29 = vpop.f32.mrf.mxu0  ;;  %v4582_v30 = vpop.f32.mrf.mxu1 }
 0x107   : > { %v4584_v31 = vpop.f32.mrf.mxu0  ;;  %3926 = vmatmul.mubr.msk.bf16.gmra.mxu0 %vm1112_vm1, %v4210_v25  ;;  %v4587_v32 = vpop.f32.mrf.mxu1  ;;  %4054 = vmatmul.mubr.msk.bf16.gmra.mxu1 %vm1112_vm1, %v4211_v26 }
 0x108   : > { %3929 = vmatprep.mubr.msk.bf16.mxu0 %vm1112_vm1, %v4212_v27  ;;  %4057 = vmatprep.mubr.msk.bf16.mxu1 %vm1112_vm1, %v4213_v28  ;;  %v4222_v27 = vld [vmem:[%s4277_s23 + $0x1f8] sm:$0xff]  }
 0x109   : > { %v4592_v33 = vpop.f32.mrf.mxu0  ;;  %v4594_v34 = vpop.f32.mrf.mxu1  ;;  %v4223_v28 = vld [vmem:[%s4277_s23 + $0x3f8] sm:$0xff]  }
 0x10b   : > { %v4596_v35 = vpop.f32.mrf.mxu0  ;;  %v4598_v36 = vpop.f32.mrf.mxu1 }
 0x10d   : > { %v4604_v41 = vpop.f32.mrf.mxu0  ;;  %v4606_v42 = vpop.f32.mrf.mxu1 }
 0x10f   : > { %v4608_v43 = vpop.f32.mrf.mxu0  ;;  %3930 = vmatmul.mubr.msk.bf16.gmra.mxu0 %vm1112_vm1, %v4214_v37  ;;  %v4611_v44 = vpop.f32.mrf.mxu1  ;;  %4058 = vmatmul.mubr.msk.bf16.gmra.mxu1 %vm1112_vm1, %v4215_v38 }
 0x110   : > { %3933 = vmatprep.mubr.msk.bf16.mxu0 %vm1112_vm1, %v4216_v39  ;;  %4061 = vmatprep.mubr.msk.bf16.mxu1 %vm1112_vm1, %v4217_v40 }
 0x111   : > { %v4616_v45 = vpop.f32.mrf.mxu0  ;;  %v4618_v46 = vpop.f32.mrf.mxu1 }
 0x113   : > { %v4620_v53 = vpop.f32.mrf.mxu0  ;;  %v4622_v54 = vpop.f32.mrf.mxu1 }
 0x115   : > { %v4628_v3 = vpop.f32.mrf.mxu0  ;;  %v4630_v4 = vpop.f32.mrf.mxu1 }
 0x116   : > { %5134 = vst [vmem:[#allocation2_spill] sm:$0xff] %v4630_v4 }
 0x117   : > { %v4632_v13 = vpop.f32.mrf.mxu0  ;;  %3934 = vmatmul.mubr.msk.bf16.gmra.mxu0 %vm1112_vm1, %v4218_v55  ;;  %v4635_v14 = vpop.f32.mrf.mxu1  ;;  %4062 = vmatmul.mubr.msk.bf16.gmra.mxu1 %vm1112_vm1, %v4219_v56 }
 0x118   : > { %5135 = vst [vmem:[#allocation3_spill] sm:$0xff] %v4632_v13  ;;  %5136 = vst [vmem:[#allocation4_spill] sm:$0xff] %v4635_v14  ;;  %3937 = vmatprep.mubr.msk.bf16.mxu0 %vm1112_vm1, %v4220_v1  ;;  %4065 = vmatprep.mubr.msk.bf16.mxu1 %vm1112_vm1, %v4221_v2 }
 0x119   : > { %v4640_v15 = vpop.f32.mrf.mxu0  ;;  %v4642_v16 = vpop.f32.mrf.mxu1 }
 0x11a   : > { %5137 = vst [vmem:[#allocation5_spill] sm:$0xff] %v4640_v15  ;;  %5138 = vst [vmem:[#allocation6_spill] sm:$0xff] %v4642_v16 }
 0x11b   : > { %v4644_v25 = vpop.f32.mrf.mxu0  ;;  %v4646_v26 = vpop.f32.mrf.mxu1 }
 0x11c   : > { %5139 = vst [vmem:[#allocation7_spill] sm:$0xff] %v4644_v25  ;;  %5140 = vst [vmem:[#allocation8_spill] sm:$0xff] %v4646_v26 }
 0x11d   : > { %v4650_v37 = vpop.f32.mrf.mxu0  ;;  %v4652_v38 = vpop.f32.mrf.mxu1 }
 0x11e   : > { %5141 = vst [vmem:[#allocation9_spill] sm:$0xff] %v4650_v37  ;;  %5142 = vst [vmem:[#allocation10_spill] sm:$0xff] %v4652_v38 }
 0x11f   : > { %v4654_v39 = vpop.f32.mrf.mxu0  ;;  %3938 = vmatmul.mubr.msk.bf16.gmra.mxu0 %vm1112_vm1, %v4222_v27  ;;  %v4657_v40 = vpop.f32.mrf.mxu1  ;;  %4066 = vmatmul.mubr.msk.bf16.gmra.mxu1 %vm1112_vm1, %v4223_v28 }
 0x120   : > { %5143 = vst [vmem:[#allocation11_spill] sm:$0xff] %v4654_v39  ;;  %5144 = vst [vmem:[#allocation12_spill] sm:$0xff] %v4657_v40 }
 0x121   : > { %v4660_v55 = vpop.f32.mrf.mxu0  ;;  %v4662_v56 = vpop.f32.mrf.mxu1 }
 0x122   : > { %5145 = vst [vmem:[#allocation13_spill] sm:$0xff] %v4660_v55  ;;  %5146 = vst [vmem:[#allocation14_spill] sm:$0xff] %v4662_v56 }
 0x123   : > { %v4664_v1 = vpop.f32.mrf.mxu0  ;;  %v4666_v2 = vpop.f32.mrf.mxu1 }
 0x124   : > { %5147 = vst [vmem:[#allocation15_spill] sm:$0xff] %v4664_v1  ;;  %5148 = vst [vmem:[#allocation16_spill] sm:$0xff] %v4666_v2 }
 0x125   : > { %v4668_v26 = vpop.f32.mrf.mxu0  ;;  %v4670_v37 = vpop.f32.mrf.mxu1 }
 0x126   : > { %5149 = vst [vmem:[#allocation17_spill] sm:$0xff] %v4668_v26  ;;  %5150 = vst [vmem:[#allocation18_spill] sm:$0xff] %v4670_v37 }
 0x127   : > { %v4672_v38 = vpop.f32.mrf.mxu0  ;;  %v4674_v39 = vpop.f32.mrf.mxu1 }
 0x128   : > { %5151 = vst [vmem:[#allocation19_spill] sm:$0xff] %v4672_v38  ;;  %5152 = vst [vmem:[#allocation20_spill] sm:$0xff] %v4674_v39 }
 0x129   : > { %v4676_v27 = vpop.f32.mrf.mxu0  ;;  %v4678_v40 = vpop.f32.mrf.mxu1 }
 0x12a   : > { %5153 = vst [vmem:[#allocation21_spill] sm:$0xff] %v4676_v27  ;;  %5154 = vst [vmem:[#allocation22_spill] sm:$0xff] %v4678_v40 }
 0x12b   : > { %v4680_v28 = vpop.f32.mrf.mxu0  ;;  %v4682_v55 = vpop.f32.mrf.mxu1 }
 0x12c   : > { %5155 = vst [vmem:[#allocation23_spill] sm:$0xff] %v4680_v28  ;;  %5156 = vst [vmem:[#allocation24_spill] sm:$0xff] %v4682_v55 }
 0x12d   : > { %v4684_v56 = vpop.f32.mrf.mxu0  ;;  %v4686_v1 = vpop.f32.mrf.mxu1 }
 0x12e   : > { %5157 = vst [vmem:[#allocation25_spill] sm:$0xff] %v4684_v56  ;;  %5158 = vst [vmem:[#allocation26_spill] sm:$0xff] %v4686_v1 }
 0x12f   : > { %v4688_v2 = vpop.f32.mrf.mxu0  ;;  %v4690_v26 = vpop.f32.mrf.mxu1 }
 0x130   : > { %5159 = vst [vmem:[#allocation27_spill] sm:$0xff] %v4688_v2  ;;  %5160 = vst [vmem:[#allocation28_spill] sm:$0xff] %v4690_v26 }
 0x131   : > { %v4692_v37 = vpop.f32.mrf.mxu0  ;;  %v4694_v38 = vpop.f32.mrf.mxu1 }
 0x132   : > { %5161 = vst [vmem:[#allocation29_spill] sm:$0xff] %v4692_v37  ;;  %5162 = vst [vmem:[#allocation30_spill] sm:$0xff] %v4694_v38 }
 0x133   : > { %v4696_v39 = vpop.f32.mrf.mxu0  ;;  %v4698_v27 = vpop.f32.mrf.mxu1 }
 0x134   : > { %5163 = vst [vmem:[#allocation31_spill] sm:$0xff] %v4696_v39  ;;  %5164 = vst [vmem:[#allocation32_spill] sm:$0xff] %v4698_v27 }
 0x135   : > { %v4700_v40 = vpop.f32.mrf.mxu0  ;;  %v4702_v28 = vpop.f32.mrf.mxu1 }
 0x136   : > { %5165 = vst [vmem:[#allocation33_spill] sm:$0xff] %v4700_v40  ;;  %5166 = vst [vmem:[#allocation34_spill] sm:$0xff] %v4702_v28 }
 0x137   : > { %v4704_v55 = vpop.f32.mrf.mxu0  ;;  %v4706_v56 = vpop.f32.mrf.mxu1 }
 0x138   : > { %5167 = vst [vmem:[#allocation35_spill] sm:$0xff] %v4704_v55  ;;  %5168 = vst [vmem:[#allocation36_spill] sm:$0xff] %v4706_v56 }
 0x139   : > { %v4708_v1 = vpop.f32.mrf.mxu0  ;;  %v4710_v2 = vpop.f32.mrf.mxu1 }
 0x13a   : > { %5169 = vst [vmem:[#allocation37_spill] sm:$0xff] %v4708_v1  ;;  %5170 = vst [vmem:[#allocation38_spill] sm:$0xff] %v4710_v2 }
 0x13b   : > { %v4712_v26 = vpop.f32.mrf.mxu0  ;;  %v4714_v37 = vpop.f32.mrf.mxu1 }
 0x13c   : > { %5171 = vst [vmem:[#allocation39_spill] sm:$0xff] %v4712_v26  ;;  %5172 = vst [vmem:[#allocation40_spill] sm:$0xff] %v4714_v37 }
 0x13d   : > { %v4716_v38 = vpop.f32.mrf.mxu0  ;;  %v4718_v39 = vpop.f32.mrf.mxu1 }
 0x13e   : > { %5173 = vst [vmem:[#allocation41_spill] sm:$0xff] %v4716_v38  ;;  %5174 = vst [vmem:[#allocation42_spill] sm:$0xff] %v4718_v39 }
 0x13f   : > { %v4720_v27 = vpop.f32.mrf.mxu0  ;;  %v4722_v40 = vpop.f32.mrf.mxu1 }
 0x140   : > { %5175 = vst [vmem:[#allocation43_spill] sm:$0xff] %v4720_v27  ;;  %5176 = vst [vmem:[#allocation44_spill] sm:$0xff] %v4722_v40 }
 0x141   : > { %v4724_v28 = vpop.f32.mrf.mxu0  ;;  %v4726_v55 = vpop.f32.mrf.mxu1 }
 0x142   : > { %5177 = vst [vmem:[#allocation45_spill] sm:$0xff] %v4724_v28  ;;  %5178 = vst [vmem:[#allocation46_spill] sm:$0xff] %v4726_v55 }
 0x143   : > { %v4728_v56 = vpop.f32.mrf.mxu0  ;;  %v4730_v1 = vpop.f32.mrf.mxu1 }
 0x144   : > { %5179 = vst [vmem:[#allocation47_spill] sm:$0xff] %v4728_v56  ;;  %5180 = vst [vmem:[#allocation48_spill] sm:$0xff] %v4730_v1 }
 0x145   : > { %v4732_v2 = vpop.f32.mrf.mxu0  ;;  %v4734_v26 = vpop.f32.mrf.mxu1 }
 0x146   : > { %5181 = vst [vmem:[#allocation49_spill] sm:$0xff] %v4732_v2  ;;  %5182 = vst [vmem:[#allocation50_spill] sm:$0xff] %v4734_v26 }
 0x147   : > { %v4736_v37 = vpop.f32.mrf.mxu0  ;;  %v4738_v38 = vpop.f32.mrf.mxu1 }
 0x148   : > { %5183 = vst [vmem:[#allocation51_spill] sm:$0xff] %v4736_v37  ;;  %5184 = vst [vmem:[#allocation52_spill] sm:$0xff] %v4738_v38 }
 0x149   : > { %v4740_v39 = vpop.f32.mrf.mxu0  ;;  %v4742_v27 = vpop.f32.mrf.mxu1 }
 0x14a   : > { %5185 = vst [vmem:[#allocation53_spill] sm:$0xff] %v4740_v39  ;;  %5186 = vst [vmem:[#allocation54_spill] sm:$0xff] %v4742_v27 }
 0x14b   : > { %v4744_v40 = vpop.f32.mrf.mxu0  ;;  %v4746_v28 = vpop.f32.mrf.mxu1 }
 0x14c   : > { %5187 = vst [vmem:[#allocation55_spill] sm:$0xff] %v4744_v40  ;;  %5188 = vst [vmem:[#allocation56_spill] sm:$0xff] %v4746_v28 }
 0x14d   : > { %v4748_v55 = vpop.f32.mrf.mxu0  ;;  %v4750_v56 = vpop.f32.mrf.mxu1 }
 0x14e   : > { %5189 = vst [vmem:[#allocation57_spill] sm:$0xff] %v4748_v55  ;;  %5190 = vst [vmem:[#allocation58_spill] sm:$0xff] %v4750_v56 }
 0x14f   : > { %v4752_v1 = vpop.f32.mrf.mxu0  ;;  %v4754_v2 = vpop.f32.mrf.mxu1 }
 0x150   : > { %5191 = vst [vmem:[#allocation59_spill] sm:$0xff] %v4752_v1  ;;  %5192 = vst [vmem:[#allocation60_spill] sm:$0xff] %v4754_v2 }
 0x151   : > { %v4756_v26 = vpop.f32.mrf.mxu0  ;;  %v4758_v37 = vpop.f32.mrf.mxu1 }
 0x152   : > { %5193 = vst [vmem:[#allocation61_spill] sm:$0xff] %v4756_v26  ;;  %5194 = vst [vmem:[#allocation62_spill] sm:$0xff] %v4758_v37 }
 0x153   : > { %v4760_v38 = vpop.f32.mrf.mxu0  ;;  %v4762_v39 = vpop.f32.mrf.mxu1 }
 0x154   : > { %5195 = vst [vmem:[#allocation63_spill] sm:$0xff] %v4760_v38  ;;  %5196 = vst [vmem:[#allocation64_spill] sm:$0xff] %v4762_v39 }
 0x155   : > { %v4764_v27 = vpop.f32.mrf.mxu0  ;;  %v4766_v40 = vpop.f32.mrf.mxu1 }
 0x156   : > { %5197 = vst [vmem:[#allocation65_spill] sm:$0xff] %v4764_v27  ;;  %5198 = vst [vmem:[#allocation66_spill] sm:$0xff] %v4766_v40 }
 0x157   : > { %v4768_v28 = vpop.f32.mrf.mxu0  ;;  %v4770_v55 = vpop.f32.mrf.mxu1 }
 0x158   : > { %5199 = vst [vmem:[#allocation67_spill] sm:$0xff] %v4768_v28  ;;  %5200 = vst [vmem:[#allocation68_spill] sm:$0xff] %v4770_v55 }
 0x159   : > { %v4772_v56 = vpop.f32.mrf.mxu0  ;;  %v4774_v1 = vpop.f32.mrf.mxu1 }
 0x15a   : > { %5201 = vst [vmem:[#allocation69_spill] sm:$0xff] %v4772_v56  ;;  %5202 = vst [vmem:[#allocation70_spill] sm:$0xff] %v4774_v1 }
 0x15b   : > { %v4776_v2 = vpop.f32.mrf.mxu0  ;;  %v4778_v26 = vpop.f32.mrf.mxu1 }
 0x15c   : > { %5203 = vst [vmem:[#allocation71_spill] sm:$0xff] %v4776_v2  ;;  %5204 = vst [vmem:[#allocation72_spill] sm:$0xff] %v4778_v26 }
 0x15d   : > { %v4780_v37 = vpop.f32.mrf.mxu0  ;;  %v4782_v38 = vpop.f32.mrf.mxu1 }
 0x15e   : > { %5205 = vst [vmem:[#allocation73_spill] sm:$0xff] %v4780_v37  ;;  %5206 = vst [vmem:[#allocation74_spill] sm:$0xff] %v4782_v38 }
 0x15f   : > { %v4784_v39 = vpop.f32.mrf.mxu0  ;;  %v4786_v27 = vpop.f32.mrf.mxu1 }
 0x160   : > { %5207 = vst [vmem:[#allocation75_spill] sm:$0xff] %v4784_v39  ;;  %5208 = vst [vmem:[#allocation76_spill] sm:$0xff] %v4786_v27 }
 0x161   : > { %v4788_v40 = vpop.f32.mrf.mxu0  ;;  %v4790_v28 = vpop.f32.mrf.mxu1 }
 0x162   : > { %5209 = vst [vmem:[#allocation77_spill] sm:$0xff] %v4788_v40  ;;  %5210 = vst [vmem:[#allocation78_spill] sm:$0xff] %v4790_v28 }
 0x163   : > { %v4792_v55 = vpop.f32.mrf.mxu0  ;;  %v4794_v56 = vpop.f32.mrf.mxu1 }
 0x164   : > { %5211 = vst [vmem:[#allocation79_spill] sm:$0xff] %v4792_v55  ;;  %5212 = vst [vmem:[#allocation80_spill] sm:$0xff] %v4794_v56  ;;  %v4806_v55 = vld [vmem:[%s5132_s2] ss:$0 sm:$0xff] }
 0x165   : > { %v4796_v1 = vpop.f32.mrf.mxu0  ;;  %v4798_v2 = vpop.f32.mrf.mxu1 }
 0x166   : > { %5213 = vst [vmem:[#allocation81_spill] sm:$0xff] %v4796_v1  ;;  %5214 = vst [vmem:[#allocation82_spill] sm:$0xff] %v4798_v2 }
 0x167   : > { %v3879_v37 = vpop.f32.mrf.mxu0  ;;  %v4007_v26 = vpop.f32.mrf.mxu1 }
 0x168   : > { %v2562_v38 = vmax.f32 %v4488_v47, %v3879_v37 }
 0x169   : > { %v1793_v39 = vpop.f32.mrf.mxu0  ;;  %v2305_v25 = vpop.f32.mrf.mxu1 }
 0x16a   : > { %v2626_v27 = vmax.f32 %v2562_v38, %v4491_v48  ;;  %v2560_v40 = vmax.f32 %v4496_v49, %v1793_v39 }
 0x16b   : > { %v3880_v56 = vpop.f32.mrf.mxu0  ;;  %v4008_v1 = vpop.f32.mrf.mxu1 }
 0x16c   : > { %v2690_v28 = vmax.f32 %v2626_v27, %v4007_v26  ;;  %v2624_v2 = vmax.f32 %v2560_v40, %v4498_v50  ;;  %v2563_v16 = vmax.f32 %v4500_v51, %v3880_v56 }
 0x16d   : > { %v1796_v15 = vpop.f32.mrf.mxu0  ;;  %v2308_v47 = vpop.f32.mrf.mxu1 }
 0x16e   : > { %v2761_v37 = vadd.f32 %v4806_v55, %v2690_v28  ;;  %v2688_v48 = vmax.f32 %v2624_v2, %v2305_v25  ;;  %v2627_v49 = vmax.f32 %v2563_v16, %v4502_v52  ;;  %v2561_v38 = vmax.f32 %v4508_v57, %v1796_v15 }
 0x16f   : > { %v3883_v39 = vpop.f32.mrf.mxu0  ;;  %v4011_v14 = vpop.f32.mrf.mxu1 }
 0x170   : > { %v2825_v4 = vmax.f32 %v2761_v37, 0.0  ;;  %v2759_v13 = vadd.f32 %v4806_v55, %v2688_v48  ;;  %v2691_v26 = vmax.f32 %v2627_v49, %v4008_v1  ;;  %v2625_v50 = vmax.f32 %v2561_v38, %v4510_v58 }
 0x171   : > { %v2566_v51 = vmax.f32 %v4512_v59, %v3883_v39  ;;  %v1809_v52 = vpop.f32.mrf.mxu0  ;;  %v2321_v16 = vpop.f32.mrf.mxu1 }
 0x172   : > { %v3605_v57 = vpack.c.bf16 %v2825_v4, %v2825_v4  ;;  %v2823_v15 = vmax.f32 %v2759_v13, 0.0  ;;  %v2762_v25 = vadd.f32 %v4806_v55, %v2691_v26  ;;  %v2689_v40 = vmax.f32 %v2625_v50, %v2308_v47 }
 0x173   : > { %v2630_v56 = vmax.f32 %v2566_v51, %v4515_v60  ;;  %v2564_v58 = vmax.f32 %v4520_v61, %v1809_v52  ;;  %v3884_v1 = vpop.f32.mrf.mxu0  ;;  %v4012_v2 = vpop.f32.mrf.mxu1 }
 0x174   : > { %3146 = vst.msk [vmem:[%s4819_s8 + $0x8] sm:$0xf] %vm3143_vm2, %v3605_v57  ;;  %v3603_v27 = vpack.c.bf16 %v2823_v15, %v2823_v15  ;;  %v2826_v28 = vmax.f32 %v2762_v25, 0.0  ;;  %v2760_v59 = vadd.f32 %v4806_v55, %v2689_v40  ;;  %v2567_v4 = vmax.f32 %v4524_v63, %v3884_v1 }
 0x175   : > { %v2694_v13 = vmax.f32 %v2630_v56, %v4011_v14  ;;  %v2628_v37 = vmax.f32 %v2564_v58, %v4522_v62  ;;  %v1812_v48 = vpop.f32.mrf.mxu0  ;;  %v2324_v47 = vpop.f32.mrf.mxu1 }
 0x176   : > { %3144 = vst.msk [vmem:[%s4819_s8] sm:$0xf] %vm3143_vm2, %v3603_v27  ;;  %v3606_v60 = vpack.c.bf16 %v2826_v28, %v2826_v28  ;;  %v2824_v61 = vmax.f32 %v2760_v59, 0.0  ;;  %v2631_v49 = vmax.f32 %v2567_v4, %v4526_v0  ;;  %v2565_v38 = vmax.f32 %v4532_v5, %v1812_v48 }
 0x177   : > { %v2765_v39 = vadd.f32 %v4806_v55, %v2694_v13  ;;  %v2692_v26 = vmax.f32 %v2628_v37, %v2321_v16  ;;  %v3887_v50 = vpop.f32.mrf.mxu0  ;;  %v4015_v51 = vpop.f32.mrf.mxu1 }
 0x178   : > { %3147 = vst.msk [vmem:[%s4819_s8 + $0xc] sm:$0xf] %vm3143_vm2, %v3606_v60  ;;  %v3604_v63 = vpack.c.bf16 %v2824_v61, %v2824_v61  ;;  %v2695_v62 = vmax.f32 %v2631_v49, %v4012_v2  ;;  %v2629_v14 = vmax.f32 %v2565_v38, %v4534_v6  ;;  %v2570_v52 = vmax.f32 %v4536_v7, %v3887_v50 }
 0x179   : > { %v2829_v57 = vmax.f32 %v2765_v39, 0.0  ;;  %v2763_v15 = vadd.f32 %v4806_v55, %v2692_v26  ;;  %v1825_v0 = vpop.f32.mrf.mxu0  ;;  %v2337_v25 = vpop.f32.mrf.mxu1 }
 0x17a   : > { %3145 = vst.msk [vmem:[%s4819_s8 + $0x4] sm:$0xf] %vm3143_vm2, %v3604_v63  ;;  %v2766_v5 = vadd.f32 %v4806_v55, %v2695_v62  ;;  %v2693_v16 = vmax.f32 %v2629_v14, %v2324_v47  ;;  %v2634_v40 = vmax.f32 %v2570_v52, %v4539_v8  ;;  %v2568_v56 = vmax.f32 %v4544_v9, %v1825_v0 }
 0x17b   : > { %v3609_v58 = vpack.c.bf16 %v2829_v57, %v2829_v57  ;;  %v2827_v1 = vmax.f32 %v2763_v15, 0.0  ;;  %v3888_v6 = vpop.f32.mrf.mxu0  ;;  %v4016_v7 = vpop.f32.mrf.mxu1 }
 0x17c   : > { %v2830_v2 = vmax.f32 %v2766_v5, 0.0  ;;  %v2764_v27 = vadd.f32 %v4806_v55, %v2693_v16  ;;  %v2698_v28 = vmax.f32 %v2634_v40, %v4015_v51  ;;  %v2632_v59 = vmax.f32 %v2568_v56, %v4546_v10 }
 0x17d   : > { %3150 = vst.msk [vmem:[%s4819_s8 + $0x18] sm:$0xf] %vm3143_vm2, %v3609_v58  ;;  %v3607_v4 = vpack.c.bf16 %v2827_v1, %v2827_v1  ;;  %v2571_v13 = vmax.f32 %v4548_v11, %v3888_v6  ;;  %v1828_v8 = vpop.f32.mrf.mxu0  ;;  %v2340_v37 = vpop.f32.mrf.mxu1 }
 0x17e   : > { %v3610_v9 = vpack.c.bf16 %v2830_v2, %v2830_v2  ;;  %v2828_v48 = vmax.f32 %v2764_v27, 0.0  ;;  %v2769_v47 = vadd.f32 %v4806_v55, %v2698_v28  ;;  %v2696_v60 = vmax.f32 %v2632_v59, %v2337_v25 }
 0x17f   : > { %3148 = vst.msk [vmem:[%s4819_s8 + $0x10] sm:$0xf] %vm3143_vm2, %v3607_v4  ;;  %v2635_v61 = vmax.f32 %v2571_v13, %v4550_v12  ;;  %v2569_v49 = vmax.f32 %v4556_v17, %v1828_v8  ;;  %v3891_v10 = vpop.f32.mrf.mxu0  ;;  %v4019_v38 = vpop.f32.mrf.mxu1 }
 0x180   : > { %3151 = vst.msk [vmem:[%s4819_s8 + $0x1c] sm:$0xf] %vm3143_vm2, %v3610_v9  ;;  %v3608_v39 = vpack.c.bf16 %v2828_v48, %v2828_v48  ;;  %v2833_v11 = vmax.f32 %v2769_v47, 0.0  ;;  %v2767_v26 = vadd.f32 %v4806_v55, %v2696_v60  ;;  %v2574_v50 = vmax.f32 %v4560_v19, %v3891_v10 }
 0x181   : > { %v2699_v51 = vmax.f32 %v2635_v61, %v4016_v7  ;;  %v2633_v63 = vmax.f32 %v2569_v49, %v4558_v18  ;;  %v1841_v62 = vpop.f32.mrf.mxu0  ;;  %v2353_v14 = vpop.f32.mrf.mxu1 }
 0x182   : > { %3149 = vst.msk [vmem:[%s4819_s8 + $0x14] sm:$0xf] %vm3143_vm2, %v3608_v39  ;;  %v3613_v12 = vpack.c.bf16 %v2833_v11, %v2833_v11  ;;  %v2831_v17 = vmax.f32 %v2767_v26, 0.0  ;;  %v2638_v52 = vmax.f32 %v2574_v50, %v4563_v20  ;;  %v2572_v57 = vmax.f32 %v4568_v21, %v1841_v62 }
 0x183   : > { %v2770_v15 = vadd.f32 %v4806_v55, %v2699_v51  ;;  %v2697_v0 = vmax.f32 %v2633_v63, %v2340_v37  ;;  %v3892_v25 = vpop.f32.mrf.mxu0  ;;  %v4020_v5 = vpop.f32.mrf.mxu1 }
 0x184   : > { %3154 = vst.msk [vmem:[%s4819_s8 + $0x28] sm:$0xf] %vm3143_vm2, %v3613_v12  ;;  %v3611_v19 = vpack.c.bf16 %v2831_v17, %v2831_v17  ;;  %v2702_v18 = vmax.f32 %v2638_v52, %v4019_v38  ;;  %v2636_v16 = vmax.f32 %v2572_v57, %v4570_v22  ;;  %v2575_v40 = vmax.f32 %v4572_v23, %v3892_v25 }
 0x185   : > { %v2834_v56 = vmax.f32 %v2770_v15, 0.0  ;;  %v2768_v58 = vadd.f32 %v4806_v55, %v2697_v0  ;;  %v1844_v20 = vpop.f32.mrf.mxu0  ;;  %v2356_v1 = vpop.f32.mrf.mxu1 }
 0x186   : > { %3152 = vst.msk [vmem:[%s4819_s8 + $0x20] sm:$0xf] %vm3143_vm2, %v3611_v19  ;;  %v2773_v21 = vadd.f32 %v4806_v55, %v2702_v18  ;;  %v2700_v6 = vmax.f32 %v2636_v16, %v2353_v14  ;;  %v2639_v7 = vmax.f32 %v2575_v40, %v4574_v24  ;;  %v2573_v2 = vmax.f32 %v4580_v29, %v1844_v20 }
 0x187   : > { %v3614_v27 = vpack.c.bf16 %v2834_v56, %v2834_v56  ;;  %v2832_v28 = vmax.f32 %v2768_v58, 0.0  ;;  %v3895_v22 = vpop.f32.mrf.mxu0  ;;  %v4023_v23 = vpop.f32.mrf.mxu1 }
 0x188   : > { %v2837_v59 = vmax.f32 %v2773_v21, 0.0  ;;  %v2771_v4 = vadd.f32 %v4806_v55, %v2700_v6  ;;  %v2703_v13 = vmax.f32 %v2639_v7, %v4020_v5  ;;  %v2637_v8 = vmax.f32 %v2573_v2, %v4582_v30 }
 0x189   : > { %3155 = vst.msk [vmem:[%s4819_s8 + $0x2c] sm:$0xf] %vm3143_vm2, %v3614_v27  ;;  %v3612_v37 = vpack.c.bf16 %v2832_v28, %v2832_v28  ;;  %v2578_v9 = vmax.f32 %v4584_v31, %v3895_v22  ;;  %v1857_v24 = vpop.f32.mrf.mxu0  ;;  %v2369_v48 = vpop.f32.mrf.mxu1 }
 0x18a   : > { %v3617_v29 = vpack.c.bf16 %v2837_v59, %v2837_v59  ;;  %v2835_v47 = vmax.f32 %v2771_v4, 0.0  ;;  %v2774_v60 = vadd.f32 %v4806_v55, %v2703_v13  ;;  %v2701_v61 = vmax.f32 %v2637_v8, %v2356_v1 }
 0x18b   : > { %3153 = vst.msk [vmem:[%s4819_s8 + $0x24] sm:$0xf] %vm3143_vm2, %v3612_v37  ;;  %v2642_v49 = vmax.f32 %v2578_v9, %v4587_v32  ;;  %v2576_v10 = vmax.f32 %v4592_v33, %v1857_v24  ;;  %v3896_v30 = vpop.f32.mrf.mxu0  ;;  %v4024_v38 = vpop.f32.mrf.mxu1  ;;  %v5215_v24 = vld [vmem:[#allocation3_spill] sm:$0xff] }
 0x18c   : > { %3158 = vst.msk [vmem:[%s4819_s8 + $0x38] sm:$0xf] %vm3143_vm2, %v3617_v29  ;;  %v3615_v39 = vpack.c.bf16 %v2835_v47, %v2835_v47  ;;  %v2838_v31 = vmax.f32 %v2774_v60, 0.0  ;;  %v2772_v11 = vadd.f32 %v4806_v55, %v2701_v61  ;;  %v2579_v26 = vmax.f32 %v4596_v35, %v3896_v30  ;;  %v5216_v47 = vld [vmem:[#allocation2_spill] sm:$0xff] }
 0x18d   : > { %v2706_v50 = vmax.f32 %v2642_v49, %v4023_v23  ;;  %v2640_v51 = vmax.f32 %v2576_v10, %v4594_v34  ;;  %v1860_v63 = vpop.f32.mrf.mxu0  ;;  %v2372_v62 = vpop.f32.mrf.mxu1  ;;  %v5217_v10 = vld [vmem:[#allocation4_spill] sm:$0xff] }
 0x18e   : > { %3156 = vst.msk [vmem:[%s4819_s8 + $0x30] sm:$0xf] %vm3143_vm2, %v3615_v39  ;;  %v3618_v32 = vpack.c.bf16 %v2838_v31, %v2838_v31  ;;  %v2836_v33 = vmax.f32 %v2772_v11, 0.0  ;;  %v2643_v14 = vmax.f32 %v2579_v26, %v4598_v36  ;;  %v2577_v12 = vmax.f32 %v4604_v41, %v1860_v63 }
 0x18f   : > { %v2777_v17 = vadd.f32 %v4806_v55, %v2706_v50  ;;  %v2704_v52 = vmax.f32 %v2640_v51, %v2369_v48  ;;  %v3899_v57 = vpop.f32.mrf.mxu0  ;;  %v4027_v15 = vpop.f32.mrf.mxu1 }
 0x190   : > { %3159 = vst.msk [vmem:[%s4819_s8 + $0x3c] sm:$0xf] %vm3143_vm2, %v3618_v32  ;;  %v3616_v35 = vpack.c.bf16 %v2836_v33, %v2836_v33  ;;  %v2707_v34 = vmax.f32 %v2643_v14, %v4024_v38  ;;  %v2641_v0 = vmax.f32 %v2577_v12, %v4606_v42  ;;  %v2582_v25 = vmax.f32 %v4608_v43, %v3899_v57  ;;  %v5218_v38 = vld [vmem:[#allocation5_spill] sm:$0xff]  ;;  %v5220_v33 = vld [vmem:[#allocation7_spill] sm:$0xff] }
 0x191   : > { %v2841_v5 = vmax.f32 %v2777_v17, 0.0  ;;  %v2775_v19 = vadd.f32 %v4806_v55, %v2704_v52  ;;  %v1873_v36 = vpop.f32.mrf.mxu0  ;;  %v2385_v18 = vpop.f32.mrf.mxu1 }
 0x192   : > { %3157 = vst.msk [vmem:[%s4819_s8 + $0x34] sm:$0xf] %vm3143_vm2, %v3616_v35  ;;  %v2778_v41 = vadd.f32 %v4806_v55, %v2707_v34  ;;  %v2705_v16 = vmax.f32 %v2641_v0, %v2372_v62  ;;  %v2646_v40 = vmax.f32 %v2582_v25, %v4611_v44  ;;  %v2580_v56 = vmax.f32 %v4616_v45, %v1873_v36  ;;  %v5219_v62 = vld [vmem:[#allocation6_spill] sm:$0xff]  ;;  %v5221_v34 = vld [vmem:[#allocation8_spill] sm:$0xff]  ;;  %v5222_v25 = vld [vmem:[#allocation9_spill] sm:$0xff] }
 0x193   : > { %v3621_v58 = vpack.c.bf16 %v2841_v5, %v2841_v5  ;;  %v2839_v20 = vmax.f32 %v2775_v19, 0.0  ;;  %v3900_v42 = vpop.f32.mrf.mxu0  ;;  %v4028_v43 = vpop.f32.mrf.mxu1 }
 0x194   : > { %v2842_v1 = vmax.f32 %v2778_v41, 0.0  ;;  %v2776_v21 = vadd.f32 %v4806_v55, %v2705_v16  ;;  %v2710_v6 = vmax.f32 %v2646_v40, %v4027_v15  ;;  %v2644_v7 = vmax.f32 %v2580_v56, %v4618_v46 }
 0x195   : > { %3162 = vst.msk [vmem:[%s4819_s8 + $0x48] sm:$0xf] %vm3143_vm2, %v3621_v58  ;;  %v3619_v2 = vpack.c.bf16 %v2839_v20, %v2839_v20  ;;  %v2583_v27 = vmax.f32 %v4620_v53, %v3900_v42  ;;  %v1876_v44 = vpop.f32.mrf.mxu0  ;;  %v2388_v28 = vpop.f32.mrf.mxu1  ;;  %v5223_v58 = vld [vmem:[#allocation10_spill] sm:$0xff] }
 0x196   : > { %v3622_v45 = vpack.c.bf16 %v2842_v1, %v2842_v1  ;;  %v2840_v22 = vmax.f32 %v2776_v21, 0.0  ;;  %v2781_v23 = vadd.f32 %v4806_v55, %v2710_v6  ;;  %v2708_v59 = vmax.f32 %v2644_v7, %v2385_v18 }
 0x197   : > { %3160 = vst.msk [vmem:[%s4819_s8 + $0x40] sm:$0xf] %vm3143_vm2, %v3619_v2  ;;  %v2647_v4 = vmax.f32 %v2583_v27, %v4622_v54  ;;  %v2581_v13 = vmax.f32 %v4628_v3, %v1876_v44  ;;  %v3903_v46 = vpop.f32.mrf.mxu0  ;;  %v4031_v8 = vpop.f32.mrf.mxu1 }
 0x198   : > { %3163 = vst.msk [vmem:[%s4819_s8 + $0x4c] sm:$0xf] %vm3143_vm2, %v3622_v45  ;;  %v3620_v37 = vpack.c.bf16 %v2840_v22, %v2840_v22  ;;  %v2845_v53 = vmax.f32 %v2781_v23, 0.0  ;;  %v2779_v9 = vadd.f32 %v4806_v55, %v2708_v59  ;;  %v2586_v48 = vmax.f32 %v5215_v24, %v3903_v46  ;;  %v5226_v22 = vld [vmem:[#allocation13_spill] sm:$0xff]  ;;  %v5228_v24 = vld [vmem:[#allocation14_spill] sm:$0xff] }
 0x199   : > { %v2711_v29 = vmax.f32 %v2647_v4, %v4028_v43  ;;  %v2645_v60 = vmax.f32 %v2581_v13, %v5216_v47  ;;  %v1889_v61 = vpop.f32.mrf.mxu0  ;;  %v2401_v49 = vpop.f32.mrf.mxu1  ;;  %v5224_v43 = vld [vmem:[#allocation11_spill] sm:$0xff] }
 0x19a   : > { %3161 = vst.msk [vmem:[%s4819_s8 + $0x44] sm:$0xf] %vm3143_vm2, %v3620_v37  ;;  %v3625_v54 = vpack.c.bf16 %v2845_v53, %v2845_v53  ;;  %v2843_v3 = vmax.f32 %v2779_v9, 0.0  ;;  %v2650_v30 = vmax.f32 %v2586_v48, %v5217_v10  ;;  %v2584_v39 = vmax.f32 %v5218_v38, %v1889_v61  ;;  %v5227_v37 = vld [vmem:[#allocation15_spill] sm:$0xff] }
 0x19b   : > { %v2782_v31 = vadd.f32 %v4806_v55, %v2711_v29  ;;  %v2709_v11 = vmax.f32 %v2645_v60, %v2388_v28  ;;  %v3904_v26 = vpop.f32.mrf.mxu0  ;;  %v4032_v50 = vpop.f32.mrf.mxu1  ;;  %v5225_v28 = vld [vmem:[#allocation12_spill] sm:$0xff] }
 0x19c   : > { %3166 = vst.msk [vmem:[%s4819_s8 + $0x58] sm:$0xf] %vm3143_vm2, %v3625_v54  ;;  %v3623_v51 = vpack.c.bf16 %v2843_v3, %v2843_v3  ;;  %v2714_v63 = vmax.f32 %v2650_v30, %v4031_v8  ;;  %v2648_v32 = vmax.f32 %v2584_v39, %v5219_v62  ;;  %v2587_v14 = vmax.f32 %v5220_v33, %v3904_v26  ;;  %v5230_v3 = vld [vmem:[#allocation17_spill] sm:$0xff] }
 0x19d   : > { %v2846_v12 = vmax.f32 %v2782_v31, 0.0  ;;  %v2780_v17 = vadd.f32 %v4806_v55, %v2709_v11  ;;  %v1892_v52 = vpop.f32.mrf.mxu0  ;;  %v2404_v57 = vpop.f32.mrf.mxu1 }
 0x19e   : > { %3164 = vst.msk [vmem:[%s4819_s8 + $0x50] sm:$0xf] %vm3143_vm2, %v3623_v51  ;;  %v2785_v15 = vadd.f32 %v4806_v55, %v2714_v63  ;;  %v2712_v35 = vmax.f32 %v2648_v32, %v2401_v49  ;;  %v2651_v0 = vmax.f32 %v2587_v14, %v5221_v34  ;;  %v2585_v5 = vmax.f32 %v5222_v25, %v1892_v52  ;;  %v5229_v49 = vld [vmem:[#allocation16_spill] sm:$0xff]  ;;  %v5232_v63 = vld [vmem:[#allocation19_spill] sm:$0xff] }
 0x19f   : > { %v3626_v19 = vpack.c.bf16 %v2846_v12, %v2846_v12  ;;  %v2844_v36 = vmax.f32 %v2780_v17, 0.0  ;;  %v3907_v18 = vpop.f32.mrf.mxu0  ;;  %v4035_v41 = vpop.f32.mrf.mxu1 }
 0x1a0   : > { %v2849_v16 = vmax.f32 %v2785_v15, 0.0  ;;  %v2783_v40 = vadd.f32 %v4806_v55, %v2712_v35  ;;  %v2715_v56 = vmax.f32 %v2651_v0, %v4032_v50  ;;  %v2649_v20 = vmax.f32 %v2585_v5, %v5223_v58  ;;  %v5231_v50 = vld [vmem:[#allocation18_spill] sm:$0xff]  ;;  %v5234_v35 = vld [vmem:[#allocation21_spill] sm:$0xff]  ;;  %v5236_v58 = vld [vmem:[#allocation23_spill] sm:$0xff] }
 0x1a1   : > { %3167 = vst.msk [vmem:[%s4819_s8 + $0x5c] sm:$0xf] %vm3143_vm2, %v3626_v19  ;;  %v3624_v42 = vpack.c.bf16 %v2844_v36, %v2844_v36  ;;  %v2590_v1 = vmax.f32 %v5224_v43, %v3907_v18  ;;  %v1905_v21 = vpop.f32.mrf.mxu0  ;;  %v2417_v6 = vpop.f32.mrf.mxu1 }
 0x1a2   : > { %v3629_v7 = vpack.c.bf16 %v2849_v16, %v2849_v16  ;;  %v2847_v2 = vmax.f32 %v2783_v40, 0.0  ;;  %v2786_v27 = vadd.f32 %v4806_v55, %v2715_v56  ;;  %v2713_v44 = vmax.f32 %v2649_v20, %v2404_v57  ;;  %v5233_v57 = vld [vmem:[#allocation20_spill] sm:$0xff]  ;;  %v5235_v16 = vld [vmem:[#allocation22_spill] sm:$0xff] }
 0x1a3   : > { %3165 = vst.msk [vmem:[%s4819_s8 + $0x54] sm:$0xf] %vm3143_vm2, %v3624_v42  ;;  %v2654_v45 = vmax.f32 %v2590_v1, %v5225_v28  ;;  %v2588_v23 = vmax.f32 %v5226_v22, %v1905_v21  ;;  %v3908_v59 = vpop.f32.mrf.mxu0  ;;  %v4036_v4 = vpop.f32.mrf.mxu1 }
 0x1a4   : > { %3170 = vst.msk [vmem:[%s4819_s8 + $0x68] sm:$0xf] %vm3143_vm2, %v3629_v7  ;;  %v3627_v13 = vpack.c.bf16 %v2847_v2, %v2847_v2  ;;  %v2850_v46 = vmax.f32 %v2786_v27, 0.0  ;;  %v2784_v8 = vadd.f32 %v4806_v55, %v2713_v44  ;;  %v2591_v53 = vmax.f32 %v5227_v37, %v3908_v59  ;;  %v5237_v2 = vld [vmem:[#allocation24_spill] sm:$0xff]  ;;  %v5238_v44 = vld [vmem:[#allocation25_spill] sm:$0xff]  ;;  %v5240_v37 = vld [vmem:[#allocation26_spill] sm:$0xff] }
 0x1a5   : > { %v2718_v9 = vmax.f32 %v2654_v45, %v4035_v41  ;;  %v2652_v48 = vmax.f32 %v2588_v23, %v5228_v24  ;;  %v1908_v29 = vpop.f32.mrf.mxu0  ;;  %v2420_v47 = vpop.f32.mrf.mxu1 }
 0x1a6   : > { %3168 = vst.msk [vmem:[%s4819_s8 + $0x60] sm:$0xf] %vm3143_vm2, %v3627_v13  ;;  %v3630_v60 = vpack.c.bf16 %v2850_v46, %v2850_v46  ;;  %v2848_v61 = vmax.f32 %v2784_v8, 0.0  ;;  %v2655_v54 = vmax.f32 %v2591_v53, %v5229_v49  ;;  %v2589_v10 = vmax.f32 %v5230_v3, %v1908_v29  ;;  %v5239_v13 = vld [vmem:[#allocation27_spill] sm:$0xff] }
 0x1a7   : > { %v2789_v30 = vadd.f32 %v4806_v55, %v2718_v9  ;;  %v2716_v38 = vmax.f32 %v2652_v48, %v2417_v6  ;;  %v3911_v39 = vpop.f32.mrf.mxu0  ;;  %v4039_v31 = vpop.f32.mrf.mxu1 }
 0x1a8   : > { %3171 = vst.msk [vmem:[%s4819_s8 + $0x6c] sm:$0xf] %vm3143_vm2, %v3630_v60  ;;  %v3628_v11 = vpack.c.bf16 %v2848_v61, %v2848_v61  ;;  %v2719_v26 = vmax.f32 %v2655_v54, %v4036_v4  ;;  %v2653_v51 = vmax.f32 %v2589_v10, %v5231_v50  ;;  %v2594_v62 = vmax.f32 %v5232_v63, %v3911_v39  ;;  %v5242_v61 = vld [vmem:[#allocation29_spill] sm:$0xff] }
 0x1a9   : > { %v2853_v32 = vmax.f32 %v2789_v30, 0.0  ;;  %v2787_v33 = vadd.f32 %v4806_v55, %v2716_v38  ;;  %v1921_v14 = vpop.f32.mrf.mxu0  ;;  %v2433_v12 = vpop.f32.mrf.mxu1 }
 0x1aa   : > { %3169 = vst.msk [vmem:[%s4819_s8 + $0x64] sm:$0xf] %vm3143_vm2, %v3628_v11  ;;  %v2790_v17 = vadd.f32 %v4806_v55, %v2719_v26  ;;  %v2717_v52 = vmax.f32 %v2653_v51, %v2420_v47  ;;  %v2658_v15 = vmax.f32 %v2594_v62, %v5233_v57  ;;  %v2592_v34 = vmax.f32 %v5234_v35, %v1921_v14  ;;  %v5241_v47 = vld [vmem:[#allocation28_spill] sm:$0xff]  ;;  %v5244_v26 = vld [vmem:[#allocation31_spill] sm:$0xff] }
 0x1ab   : > { %v3633_v0 = vpack.c.bf16 %v2853_v32, %v2853_v32  ;;  %v2851_v25 = vmax.f32 %v2787_v33, 0.0  ;;  %v3912_v5 = vpop.f32.mrf.mxu0  ;;  %v4040_v19 = vpop.f32.mrf.mxu1 }
 0x1ac   : > { %v2854_v36 = vmax.f32 %v2790_v17, 0.0  ;;  %v2788_v18 = vadd.f32 %v4806_v55, %v2717_v52  ;;  %v2722_v41 = vmax.f32 %v2658_v15, %v4039_v31  ;;  %v2656_v40 = vmax.f32 %v2592_v34, %v5235_v16  ;;  %v5243_v31 = vld [vmem:[#allocation30_spill] sm:$0xff]  ;;  %v5246_v52 = vld [vmem:[#allocation33_spill] sm:$0xff]  ;;  %v5248_v16 = vld [vmem:[#allocation35_spill] sm:$0xff] }
 0x1ad   : > { %3174 = vst.msk [vmem:[%s4819_s8 + $0x78] sm:$0xf] %vm3143_vm2, %v3633_v0  ;;  %v3631_v56 = vpack.c.bf16 %v2851_v25, %v2851_v25  ;;  %v2595_v20 = vmax.f32 %v5236_v58, %v3912_v5  ;;  %v1924_v42 = vpop.f32.mrf.mxu0  ;;  %v2436_v43 = vpop.f32.mrf.mxu1 }
 0x1ae   : > { %v3634_v1 = vpack.c.bf16 %v2854_v36, %v2854_v36  ;;  %v2852_v21 = vmax.f32 %v2788_v18, 0.0  ;;  %v2793_v6 = vadd.f32 %v4806_v55, %v2722_v41  ;;  %v2720_v7 = vmax.f32 %v2656_v40, %v2433_v12  ;;  %v5245_v12 = vld [vmem:[#allocation32_spill] sm:$0xff]  ;;  %v5247_v36 = vld [vmem:[#allocation34_spill] sm:$0xff] }
 0x1af   : > { %3172 = vst.msk [vmem:[%s4819_s8 + $0x70] sm:$0xf] %vm3143_vm2, %v3631_v56  ;;  %v2659_v27 = vmax.f32 %v2595_v20, %v5237_v2  ;;  %v2593_v28 = vmax.f32 %v5238_v44, %v1924_v42  ;;  %v3915_v45 = vpop.f32.mrf.mxu0  ;;  %v4043_v22 = vpop.f32.mrf.mxu1 }
 0x1b0   : > { %3175 = vst.msk [vmem:[%s4819_s8 + $0x7c] sm:$0xf] %vm3143_vm2, %v3634_v1  ;;  %v3632_v23 = vpack.c.bf16 %v2852_v21, %v2852_v21  ;;  %v2857_v59 = vmax.f32 %v2793_v6, 0.0  ;;  %v2791_v4 = vadd.f32 %v4806_v55, %v2720_v7  ;;  %v2598_v46 = vmax.f32 %v5239_v13, %v3915_v45  ;;  %v5249_v21 = vld [vmem:[#allocation36_spill] sm:$0xff]  ;;  %v5250_v7 = vld [vmem:[#allocation37_spill] sm:$0xff]  ;;  %v5252_v13 = vld [vmem:[#allocation38_spill] sm:$0xff] }
 0x1b1   : > { %v2723_v8 = vmax.f32 %v2659_v27, %v4040_v19  ;;  %v2657_v53 = vmax.f32 %v2593_v28, %v5240_v37  ;;  %v1937_v9 = vpop.f32.mrf.mxu0  ;;  %v2449_v24 = vpop.f32.mrf.mxu1 }
 0x1b2   : > { %3173 = vst.msk [vmem:[%s4819_s8 + $0x74] sm:$0xf] %vm3143_vm2, %v3632_v23  ;;  %v3637_v48 = vpack.c.bf16 %v2857_v59, %v2857_v59  ;;  %v2855_v29 = vmax.f32 %v2791_v4, 0.0  ;;  %v2662_v60 = vmax.f32 %v2598_v46, %v5241_v47  ;;  %v2596_v49 = vmax.f32 %v5242_v61, %v1937_v9  ;;  %v5251_v23 = vld [vmem:[#allocation39_spill] sm:$0xff] }
 0x1b3   : > { %v2794_v54 = vadd.f32 %v4806_v55, %v2723_v8  ;;  %v2721_v3 = vmax.f32 %v2657_v53, %v2436_v43  ;;  %v3916_v10 = vpop.f32.mrf.mxu0  ;;  %v4044_v30 = vpop.f32.mrf.mxu1 }
 0x1b4   : > { %3178 = vst.msk [vmem:[%s4819_s8 + $0x88] sm:$0xf] %vm3143_vm2, %v3637_v48  ;;  %v3635_v38 = vpack.c.bf16 %v2855_v29, %v2855_v29  ;;  %v2726_v39 = vmax.f32 %v2662_v60, %v4043_v22  ;;  %v2660_v11 = vmax.f32 %v2596_v49, %v5243_v31  ;;  %v2599_v50 = vmax.f32 %v5244_v26, %v3916_v10  ;;  %v5254_v29 = vld [vmem:[#allocation41_spill] sm:$0xff] }
 0x1b5   : > { %v2858_v51 = vmax.f32 %v2794_v54, 0.0  ;;  %v2792_v63 = vadd.f32 %v4806_v55, %v2721_v3  ;;  %v1940_v62 = vpop.f32.mrf.mxu0  ;;  %v2452_v32 = vpop.f32.mrf.mxu1 }
 0x1b6   : > { %3176 = vst.msk [vmem:[%s4819_s8 + $0x80] sm:$0xf] %vm3143_vm2, %v3635_v38  ;;  %v2797_v33 = vadd.f32 %v4806_v55, %v2726_v39  ;;  %v2724_v14 = vmax.f32 %v2660_v11, %v2449_v24  ;;  %v2663_v17 = vmax.f32 %v2599_v50, %v5245_v12  ;;  %v2597_v57 = vmax.f32 %v5246_v52, %v1940_v62  ;;  %v5253_v24 = vld [vmem:[#allocation40_spill] sm:$0xff]  ;;  %v5256_v39 = vld [vmem:[#allocation43_spill] sm:$0xff] }
 0x1b7   : > { %v3638_v15 = vpack.c.bf16 %v2858_v51, %v2858_v51  ;;  %v2856_v35 = vmax.f32 %v2792_v63, 0.0  ;;  %v3919_v34 = vpop.f32.mrf.mxu0  ;;  %v4047_v0 = vpop.f32.mrf.mxu1 }
 0x1b8   : > { %v2861_v25 = vmax.f32 %v2797_v33, 0.0  ;;  %v2795_v5 = vadd.f32 %v4806_v55, %v2724_v14  ;;  %v2727_v19 = vmax.f32 %v2663_v17, %v4044_v30  ;;  %v2661_v18 = vmax.f32 %v2597_v57, %v5247_v36  ;;  %v5255_v30 = vld [vmem:[#allocation42_spill] sm:$0xff]  ;;  %v5258_v14 = vld [vmem:[#allocation45_spill] sm:$0xff]  ;;  %v5260_v36 = vld [vmem:[#allocation47_spill] sm:$0xff] }
 0x1b9   : > { %3179 = vst.msk [vmem:[%s4819_s8 + $0x8c] sm:$0xf] %vm3143_vm2, %v3638_v15  ;;  %v3636_v41 = vpack.c.bf16 %v2856_v35, %v2856_v35  ;;  %v2602_v40 = vmax.f32 %v5248_v16, %v3919_v34  ;;  %v1953_v56 = vpop.f32.mrf.mxu0  ;;  %v2465_v58 = vpop.f32.mrf.mxu1 }
 0x1ba   : > { %v3641_v20 = vpack.c.bf16 %v2861_v25, %v2861_v25  ;;  %v2859_v42 = vmax.f32 %v2795_v5, 0.0  ;;  %v2798_v43 = vadd.f32 %v4806_v55, %v2727_v19  ;;  %v2725_v1 = vmax.f32 %v2661_v18, %v2452_v32  ;;  %v5257_v32 = vld [vmem:[#allocation44_spill] sm:$0xff]  ;;  %v5259_v25 = vld [vmem:[#allocation46_spill] sm:$0xff] }
 0x1bb   : > { %3177 = vst.msk [vmem:[%s4819_s8 + $0x84] sm:$0xf] %vm3143_vm2, %v3636_v41  ;;  %v2666_v6 = vmax.f32 %v2602_v40, %v5249_v21  ;;  %v2600_v2 = vmax.f32 %v5250_v7, %v1953_v56  ;;  %v3920_v27 = vpop.f32.mrf.mxu0  ;;  %v4048_v44 = vpop.f32.mrf.mxu1 }
 0x1bc   : > { %3182 = vst.msk [vmem:[%s4819_s8 + $0x98] sm:$0xf] %vm3143_vm2, %v3641_v20  ;;  %v3639_v28 = vpack.c.bf16 %v2859_v42, %v2859_v42  ;;  %v2862_v45 = vmax.f32 %v2798_v43, 0.0  ;;  %v2796_v22 = vadd.f32 %v4806_v55, %v2725_v1  ;;  %v2603_v59 = vmax.f32 %v5251_v23, %v3920_v27  ;;  %v5261_v42 = vld [vmem:[#allocation48_spill] sm:$0xff]  ;;  %v5262_v1 = vld [vmem:[#allocation49_spill] sm:$0xff]  ;;  %v5264_v23 = vld [vmem:[#allocation50_spill] sm:$0xff] }
 0x1bd   : > { %v2730_v4 = vmax.f32 %v2666_v6, %v4047_v0  ;;  %v2664_v46 = vmax.f32 %v2600_v2, %v5252_v13  ;;  %v1956_v8 = vpop.f32.mrf.mxu0  ;;  %v2468_v37 = vpop.f32.mrf.mxu1 }
 0x1be   : > { %3180 = vst.msk [vmem:[%s4819_s8 + $0x90] sm:$0xf] %vm3143_vm2, %v3639_v28  ;;  %v3642_v53 = vpack.c.bf16 %v2862_v45, %v2862_v45  ;;  %v2860_v9 = vmax.f32 %v2796_v22, 0.0  ;;  %v2667_v48 = vmax.f32 %v2603_v59, %v5253_v24  ;;  %v2601_v47 = vmax.f32 %v5254_v29, %v1956_v8  ;;  %v5263_v28 = vld [vmem:[#allocation51_spill] sm:$0xff] }
 0x1bf   : > { %v2801_v60 = vadd.f32 %v4806_v55, %v2730_v4  ;;  %v2728_v61 = vmax.f32 %v2664_v46, %v2465_v58  ;;  %v3923_v49 = vpop.f32.mrf.mxu0  ;;  %v4051_v54 = vpop.f32.mrf.mxu1 }
 0x1c0   : > { %3183 = vst.msk [vmem:[%s4819_s8 + $0x9c] sm:$0xf] %vm3143_vm2, %v3642_v53  ;;  %v3640_v3 = vpack.c.bf16 %v2860_v9, %v2860_v9  ;;  %v2731_v10 = vmax.f32 %v2667_v48, %v4048_v44  ;;  %v2665_v38 = vmax.f32 %v2601_v47, %v5255_v30  ;;  %v2606_v31 = vmax.f32 %v5256_v39, %v3923_v49  ;;  %v5266_v9 = vld [vmem:[#allocation53_spill] sm:$0xff] }
 0x1c1   : > { %v2865_v11 = vmax.f32 %v2801_v60, 0.0  ;;  %v2799_v26 = vadd.f32 %v4806_v55, %v2728_v61  ;;  %v1969_v50 = vpop.f32.mrf.mxu0  ;;  %v2481_v51 = vpop.f32.mrf.mxu1 }
 0x1c2   : > { %3181 = vst.msk [vmem:[%s4819_s8 + $0x94] sm:$0xf] %vm3143_vm2, %v3640_v3  ;;  %v2802_v63 = vadd.f32 %v4806_v55, %v2731_v10  ;;  %v2729_v62 = vmax.f32 %v2665_v38, %v2468_v37  ;;  %v2670_v33 = vmax.f32 %v2606_v31, %v5257_v32  ;;  %v2604_v12 = vmax.f32 %v5258_v14, %v1969_v50  ;;  %v5265_v37 = vld [vmem:[#allocation52_spill] sm:$0xff]  ;;  %v5268_v10 = vld [vmem:[#allocation55_spill] sm:$0xff] }
 0x1c3   : > { %v3645_v17 = vpack.c.bf16 %v2865_v11, %v2865_v11  ;;  %v2863_v52 = vmax.f32 %v2799_v26, 0.0  ;;  %v3924_v57 = vpop.f32.mrf.mxu0  ;;  %v4052_v15 = vpop.f32.mrf.mxu1 }
 0x1c4   : > { %v2866_v35 = vmax.f32 %v2802_v63, 0.0  ;;  %v2800_v34 = vadd.f32 %v4806_v55, %v2729_v62  ;;  %v2734_v0 = vmax.f32 %v2670_v33, %v4051_v54  ;;  %v2668_v5 = vmax.f32 %v2604_v12, %v5259_v25  ;;  %v5267_v54 = vld [vmem:[#allocation54_spill] sm:$0xff]  ;;  %v5270_v62 = vld [vmem:[#allocation57_spill] sm:$0xff]  ;;  %v5272_v25 = vld [vmem:[#allocation59_spill] sm:$0xff] }
 0x1c5   : > { %3186 = vst.msk [vmem:[%s4819_s8 + $0xa8] sm:$0xf] %vm3143_vm2, %v3645_v17  ;;  %v3643_v19 = vpack.c.bf16 %v2863_v52, %v2863_v52  ;;  %v2607_v18 = vmax.f32 %v5260_v36, %v3924_v57  ;;  %v1972_v41 = vpop.f32.mrf.mxu0  ;;  %v2484_v16 = vpop.f32.mrf.mxu1 }
 0x1c6   : > { %v3646_v40 = vpack.c.bf16 %v2866_v35, %v2866_v35  ;;  %v2864_v56 = vmax.f32 %v2800_v34, 0.0  ;;  %v2805_v58 = vadd.f32 %v4806_v55, %v2734_v0  ;;  %v2732_v20 = vmax.f32 %v2668_v5, %v2481_v51  ;;  %v5269_v51 = vld [vmem:[#allocation56_spill] sm:$0xff]  ;;  %v5271_v35 = vld [vmem:[#allocation58_spill] sm:$0xff] }
 0x1c7   : > { %3184 = vst.msk [vmem:[%s4819_s8 + $0xa0] sm:$0xf] %vm3143_vm2, %v3643_v19  ;;  %v2671_v43 = vmax.f32 %v2607_v18, %v5261_v42  ;;  %v2605_v21 = vmax.f32 %v5262_v1, %v1972_v41  ;;  %v3927_v6 = vpop.f32.mrf.mxu0  ;;  %v4055_v7 = vpop.f32.mrf.mxu1 }
 0x1c8   : > { %3187 = vst.msk [vmem:[%s4819_s8 + $0xac] sm:$0xf] %vm3143_vm2, %v3646_v40  ;;  %v3644_v2 = vpack.c.bf16 %v2864_v56, %v2864_v56  ;;  %v2869_v27 = vmax.f32 %v2805_v58, 0.0  ;;  %v2803_v44 = vadd.f32 %v4806_v55, %v2732_v20  ;;  %v2610_v45 = vmax.f32 %v5263_v28, %v3927_v6  ;;  %v5273_v56 = vld [vmem:[#allocation60_spill] sm:$0xff]  ;;  %v5274_v20 = vld [vmem:[#allocation61_spill] sm:$0xff]  ;;  %v5276_v28 = vld [vmem:[#allocation62_spill] sm:$0xff] }
 0x1c9   : > { %v2735_v22 = vmax.f32 %v2671_v43, %v4052_v15  ;;  %v2669_v59 = vmax.f32 %v2605_v21, %v5264_v23  ;;  %v1985_v4 = vpop.f32.mrf.mxu0  ;;  %v2497_v13 = vpop.f32.mrf.mxu1 }
 0x1ca   : > { %3185 = vst.msk [vmem:[%s4819_s8 + $0xa4] sm:$0xf] %vm3143_vm2, %v3644_v2  ;;  %v3649_v46 = vpack.c.bf16 %v2869_v27, %v2869_v27  ;;  %v2867_v8 = vmax.f32 %v2803_v44, 0.0  ;;  %v2674_v53 = vmax.f32 %v2610_v45, %v5265_v37  ;;  %v2608_v24 = vmax.f32 %v5266_v9, %v1985_v4  ;;  %v5275_v2 = vld [vmem:[#allocation63_spill] sm:$0xff] }
 0x1cb   : > { %v2806_v48 = vadd.f32 %v4806_v55, %v2735_v22  ;;  %v2733_v29 = vmax.f32 %v2669_v59, %v2484_v16  ;;  %v3928_v47 = vpop.f32.mrf.mxu0  ;;  %v4056_v60 = vpop.f32.mrf.mxu1 }
 0x1cc   : > { %3190 = vst.msk [vmem:[%s4819_s8 + $0xb8] sm:$0xf] %vm3143_vm2, %v3649_v46  ;;  %v3647_v61 = vpack.c.bf16 %v2867_v8, %v2867_v8  ;;  %v2738_v49 = vmax.f32 %v2674_v53, %v4055_v7  ;;  %v2672_v3 = vmax.f32 %v2608_v24, %v5267_v54  ;;  %v2611_v30 = vmax.f32 %v5268_v10, %v3928_v47  ;;  %v5278_v8 = vld [vmem:[#allocation65_spill] sm:$0xff] }
 0x1cd   : > { %v2870_v38 = vmax.f32 %v2806_v48, 0.0  ;;  %v2804_v39 = vadd.f32 %v4806_v55, %v2733_v29  ;;  %v1988_v31 = vpop.f32.mrf.mxu0  ;;  %v2500_v11 = vpop.f32.mrf.mxu1 }
 0x1ce   : > { %3188 = vst.msk [vmem:[%s4819_s8 + $0xb0] sm:$0xf] %vm3143_vm2, %v3647_v61  ;;  %v2809_v26 = vadd.f32 %v4806_v55, %v2738_v49  ;;  %v2736_v50 = vmax.f32 %v2672_v3, %v2497_v13  ;;  %v2675_v63 = vmax.f32 %v2611_v30, %v5269_v51  ;;  %v2609_v32 = vmax.f32 %v5270_v62, %v1988_v31  ;;  %v5277_v13 = vld [vmem:[#allocation64_spill] sm:$0xff]  ;;  %v5280_v49 = vld [vmem:[#allocation67_spill] sm:$0xff] }
 0x1cf   : > { %v3650_v33 = vpack.c.bf16 %v2870_v38, %v2870_v38  ;;  %v2868_v14 = vmax.f32 %v2804_v39, 0.0  ;;  %v3931_v12 = vpop.f32.mrf.mxu0  ;;  %v4059_v17 = vpop.f32.mrf.mxu1 }
 0x1d0   : > { %v2873_v52 = vmax.f32 %v2809_v26, 0.0  ;;  %v2807_v57 = vadd.f32 %v4806_v55, %v2736_v50  ;;  %v2739_v15 = vmax.f32 %v2675_v63, %v4056_v60  ;;  %v2673_v34 = vmax.f32 %v2609_v32, %v5271_v35  ;;  %v5279_v60 = vld [vmem:[#allocation66_spill] sm:$0xff]  ;;  %v5282_v50 = vld [vmem:[#allocation69_spill] sm:$0xff]  ;;  %v5284_v35 = vld [vmem:[#allocation71_spill] sm:$0xff] }
 0x1d1   : > { %3191 = vst.msk [vmem:[%s4819_s8 + $0xbc] sm:$0xf] %vm3143_vm2, %v3650_v33  ;;  %v3648_v0 = vpack.c.bf16 %v2868_v14, %v2868_v14  ;;  %v2614_v5 = vmax.f32 %v5272_v25, %v3931_v12  ;;  %v2001_v19 = vpop.f32.mrf.mxu0  ;;  %v2513_v36 = vpop.f32.mrf.mxu1 }
 0x1d2   : > { %v3653_v18 = vpack.c.bf16 %v2873_v52, %v2873_v52  ;;  %v2871_v41 = vmax.f32 %v2807_v57, 0.0  ;;  %v2810_v16 = vadd.f32 %v4806_v55, %v2739_v15  ;;  %v2737_v40 = vmax.f32 %v2673_v34, %v2500_v11  ;;  %v5281_v11 = vld [vmem:[#allocation68_spill] sm:$0xff]  ;;  %v5283_v52 = vld [vmem:[#allocation70_spill] sm:$0xff] }
 0x1d3   : > { %3189 = vst.msk [vmem:[%s4819_s8 + $0xb4] sm:$0xf] %vm3143_vm2, %v3648_v0  ;;  %v2678_v58 = vmax.f32 %v2614_v5, %v5273_v56  ;;  %v2612_v42 = vmax.f32 %v5274_v20, %v2001_v19  ;;  %v3932_v43 = vpop.f32.mrf.mxu0  ;;  %v4060_v1 = vpop.f32.mrf.mxu1 }
 0x1d4   : > { %3194 = vst.msk [vmem:[%s4819_s8 + $0xc8] sm:$0xf] %vm3143_vm2, %v3653_v18  ;;  %v3651_v21 = vpack.c.bf16 %v2871_v41, %v2871_v41  ;;  %v2874_v6 = vmax.f32 %v2810_v16, 0.0  ;;  %v2808_v7 = vadd.f32 %v4806_v55, %v2737_v40  ;;  %v2615_v27 = vmax.f32 %v5275_v2, %v3932_v43  ;;  %v5285_v41 = vld [vmem:[#allocation72_spill] sm:$0xff]  ;;  %v5286_v40 = vld [vmem:[#allocation73_spill] sm:$0xff]  ;;  %v5288_v2 = vld [vmem:[#allocation74_spill] sm:$0xff] }
 0x1d5   : > { %v2742_v44 = vmax.f32 %v2678_v58, %v4059_v17  ;;  %v2676_v45 = vmax.f32 %v2612_v42, %v5276_v28  ;;  %v2004_v22 = vpop.f32.mrf.mxu0  ;;  %v2516_v23 = vpop.f32.mrf.mxu1 }
 0x1d6   : > { %3192 = vst.msk [vmem:[%s4819_s8 + $0xc0] sm:$0xf] %vm3143_vm2, %v3651_v21  ;;  %v3654_v59 = vpack.c.bf16 %v2874_v6, %v2874_v6  ;;  %v2872_v4 = vmax.f32 %v2808_v7, 0.0  ;;  %v2679_v46 = vmax.f32 %v2615_v27, %v5277_v13  ;;  %v2613_v37 = vmax.f32 %v5278_v8, %v2004_v22  ;;  %v5287_v21 = vld [vmem:[#allocation75_spill] sm:$0xff] }
 0x1d7   : > { %v2813_v53 = vadd.f32 %v4806_v55, %v2742_v44  ;;  %v2740_v9 = vmax.f32 %v2676_v45, %v2513_v36  ;;  %v3935_v24 = vpop.f32.mrf.mxu0  ;;  %v4063_v48 = vpop.f32.mrf.mxu1 }
 0x1d8   : > { %3195 = vst.msk [vmem:[%s4819_s8 + $0xcc] sm:$0xf] %vm3143_vm2, %v3654_v59  ;;  %v3652_v29 = vpack.c.bf16 %v2872_v4, %v2872_v4  ;;  %v2743_v47 = vmax.f32 %v2679_v46, %v4060_v1  ;;  %v2677_v61 = vmax.f32 %v2613_v37, %v5279_v60  ;;  %v2618_v54 = vmax.f32 %v5280_v49, %v3935_v24  ;;  %v4224_v1 = vld [vmem:[%s5132_s2] ss:$0 sm:$0xff]  ;;  %v5290_v4 = vld [vmem:[#allocation77_spill] sm:$0xff] }
 0x1d9   : > { %v2877_v3 = vmax.f32 %v2813_v53, 0.0  ;;  %v2811_v10 = vadd.f32 %v4806_v55, %v2740_v9  ;;  %v2017_v30 = vpop.f32.mrf.mxu0  ;;  %v2529_v38 = vpop.f32.mrf.mxu1  ;;  %v5291_v24 = vld [vmem:[#allocation78_spill] sm:$0xff] }
 0x1da   : > { %3193 = vst.msk [vmem:[%s4819_s8 + $0xc4] sm:$0xf] %vm3143_vm2, %v3652_v29  ;;  %v2814_v39 = vadd.f32 %v4806_v55, %v2743_v47  ;;  %v2741_v31 = vmax.f32 %v2677_v61, %v2516_v23  ;;  %v2682_v26 = vmax.f32 %v2618_v54, %v5281_v11  ;;  %v2616_v51 = vmax.f32 %v5282_v50, %v2017_v30  ;;  %v5289_v23 = vld [vmem:[#allocation76_spill] sm:$0xff]  ;;  %v5292_v29 = vld [vmem:[#allocation79_spill] sm:$0xff] }
 0x1db   : > { %v3657_v63 = vpack.c.bf16 %v2877_v3, %v2877_v3  ;;  %v2875_v62 = vmax.f32 %v2811_v10, 0.0  ;;  %v3936_v32 = vpop.f32.mrf.mxu0  ;;  %v4064_v33 = vpop.f32.mrf.mxu1  ;;  %v5293_v30 = vld [vmem:[#allocation80_spill] sm:$0xff] }
 0x1dc   : > { %v2878_v14 = vmax.f32 %v2814_v39, 0.0  ;;  %v2812_v12 = vadd.f32 %v4806_v55, %v2741_v31  ;;  %v2746_v17 = vmax.f32 %v2682_v26, %v4063_v48  ;;  %v2680_v57 = vmax.f32 %v2616_v51, %v5283_v52  ;;  %v5294_v39 = vld [vmem:[#allocation81_spill] sm:$0xff] }
 0x1dd   : > { %3198 = vst.msk [vmem:[%s4819_s8 + $0xd8] sm:$0xf] %vm3143_vm2, %v3657_v63  ;;  %v3655_v15 = vpack.c.bf16 %v2875_v62, %v2875_v62  ;;  %v2619_v34 = vmax.f32 %v5284_v35, %v3936_v32  ;;  %v2020_v0 = vpop.f32.mrf.mxu0  ;;  %v2532_v25 = vpop.f32.mrf.mxu1  ;;  %v5295_v62 = vld [vmem:[#allocation82_spill] sm:$0xff] }
 0x1de   : > { %v3658_v5 = vpack.c.bf16 %v2878_v14, %v2878_v14  ;;  %v2876_v19 = vmax.f32 %v2812_v12, 0.0  ;;  %v2817_v36 = vadd.f32 %v4806_v55, %v2746_v17  ;;  %v2744_v18 = vmax.f32 %v2680_v57, %v2529_v38 }
 0x1df   : > { %3196 = vst.msk [vmem:[%s4819_s8 + $0xd0] sm:$0xf] %vm3143_vm2, %v3655_v15  ;;  %v2683_v16 = vmax.f32 %v2619_v34, %v5285_v41  ;;  %v2617_v56 = vmax.f32 %v5286_v40, %v2020_v0  ;;  %v3939_v58 = vpop.f32.mrf.mxu0  ;;  %v4067_v20 = vpop.f32.mrf.mxu1 }
 0x1e0   : > { %3199 = vst.msk [vmem:[%s4819_s8 + $0xdc] sm:$0xf] %vm3143_vm2, %v3658_v5  ;;  %v3656_v42 = vpack.c.bf16 %v2876_v19, %v2876_v19  ;;  %v2881_v43 = vmax.f32 %v2817_v36, 0.0  ;;  %v2815_v55 = vadd.f32 %v4224_v1, %v2744_v18  ;;  %v2622_v6 = vmax.f32 %v5287_v21, %v3939_v58 }
 0x1e1   : > { %v2747_v7 = vmax.f32 %v2683_v16, %v4064_v33  ;;  %v2681_v27 = vmax.f32 %v2617_v56, %v5288_v2  ;;  %v2033_v44 = vpop.f32.mrf.mxu0  ;;  %v2545_v28 = vpop.f32.mrf.mxu1 }
 0x1e2   : > { %3197 = vst.msk [vmem:[%s4819_s8 + $0xd4] sm:$0xf] %vm3143_vm2, %v3656_v42  ;;  %v3661_v45 = vpack.c.bf16 %v2881_v43, %v2881_v43  ;;  %v2879_v22 = vmax.f32 %v2815_v55, 0.0  ;;  %v2686_v59 = vmax.f32 %v2622_v6, %v5289_v23  ;;  %v2620_v13 = vmax.f32 %v5290_v4, %v2033_v44 }
 0x1e3   : > { %v2818_v46 = vadd.f32 %v4224_v1, %v2747_v7  ;;  %v2745_v8 = vmax.f32 %v2681_v27, %v2532_v25  ;;  %v3940_v37 = vpop.f32.mrf.mxu0  ;;  %v4068_v49 = vpop.f32.mrf.mxu1 }
 0x1e4   : > { %3202 = vst.msk [vmem:[%s4819_s8 + $0xe8] sm:$0xf] %vm3143_vm2, %v3661_v45  ;;  %v3659_v53 = vpack.c.bf16 %v2879_v22, %v2879_v22  ;;  %v2750_v9 = vmax.f32 %v2686_v59, %v4067_v20  ;;  %v2684_v48 = vmax.f32 %v2620_v13, %v5291_v24  ;;  %v2623_v47 = vmax.f32 %v5292_v29, %v3940_v37 }
 0x1e5   : > { %v2882_v60 = vmax.f32 %v2818_v46, 0.0  ;;  %v2816_v61 = vadd.f32 %v4224_v1, %v2745_v8  ;;  %v2036_v54 = vpop.f32.mrf.mxu0  ;;  %v2548_v14 = vpop.f32.mrf.mxu1 }
 0x1e6   : > { %3200 = vst.msk [vmem:[%s4819_s8 + $0xe0] sm:$0xf] %vm3143_vm2, %v3659_v53  ;;  %v2821_v3 = vadd.f32 %v4224_v1, %v2750_v9  ;;  %v2748_v10 = vmax.f32 %v2684_v48, %v2545_v28  ;;  %v2687_v38 = vmax.f32 %v2623_v47, %v5293_v30  ;;  %v2621_v31 = vmax.f32 %v5294_v39, %v2036_v54 }
 0x1e7   : > { %v3662_v11 = vpack.c.bf16 %v2882_v60, %v2882_v60  ;;  %v2880_v26 = vmax.f32 %v2816_v61, 0.0 }
 0x1e8   : > { %v2885_v50 = vmax.f32 %v2821_v3, 0.0  ;;  %v2819_v51 = vadd.f32 %v4224_v1, %v2748_v10  ;;  %v2751_v63 = vmax.f32 %v2687_v38, %v4068_v49  ;;  %v2685_v32 = vmax.f32 %v2621_v31, %v5295_v62 }
 0x1e9   : > { %3203 = vst.msk [vmem:[%s4819_s8 + $0xec] sm:$0xf] %vm3143_vm2, %v3662_v11  ;;  %v3660_v33 = vpack.c.bf16 %v2880_v26, %v2880_v26 }
 0x1ea   : > { %v3665_v12 = vpack.c.bf16 %v2885_v50, %v2885_v50  ;;  %v2883_v17 = vmax.f32 %v2819_v51, 0.0  ;;  %v2822_v52 = vadd.f32 %v4224_v1, %v2751_v63  ;;  %v2749_v57 = vmax.f32 %v2685_v32, %v2548_v14 }
 0x1eb   : > { %3201 = vst.msk [vmem:[%s4819_s8 + $0xe4] sm:$0xf] %vm3143_vm2, %v3660_v33 }
 0x1ec   : > { %3206 = vst.msk [vmem:[%s4819_s8 + $0xf8] sm:$0xf] %vm3143_vm2, %v3665_v12  ;;  %v3663_v15 = vpack.c.bf16 %v2883_v17, %v2883_v17  ;;  %v2886_v35 = vmax.f32 %v2822_v52, 0.0  ;;  %v2820_v34 = vadd.f32 %v4224_v1, %v2749_v57 }
 0x1ee   : > { %3204 = vst.msk [vmem:[%s4819_s8 + $0xf0] sm:$0xf] %vm3143_vm2, %v3663_v15  ;;  %v3666_v0 = vpack.c.bf16 %v2886_v35, %v2886_v35  ;;  %v2884_v25 = vmax.f32 %v2820_v34, 0.0 }
 0x1f0   : > { %3207 = vst.msk [vmem:[%s4819_s8 + $0xfc] sm:$0xf] %vm3143_vm2, %v3666_v0  ;;  %v3664_v5 = vpack.c.bf16 %v2884_v25, %v2884_v25 }
 0x1f2   : > { %3205 = vst.msk [vmem:[%s4819_s8 + $0xf4] sm:$0xf] %vm3143_vm2, %v3664_v5 }
 0x1f3 PF: > { %s13_s12 = sadd.s32 1, %s4231_s12  }
 0x1f4   : > { %p10_p4 = scmp.ge.s32.totalorder %s13_s12, 4  }
 0x1f6   :  { %12 = sbr.rel (!%p10_p4) target bundleno = 1 (0x1), region = 62 }

// kernel: tcn_lstm_forward.6
= control target key start
LH: loop header
LB: loop body
LE: loop exit
PB: predicated region body
PF: predicated region fallthrough
CT: control target
= control target key end

     0   :  { %s2512_s12 = smov 0   ;;  %s3054_s0 = inlined_call_operand.vmem [shape: bf16[2,512,432], index: 0, kind: input, shape index: {}]   ;;  %s3055_s1 = inlined_call_operand.vmem [shape: bf16[432,32], index: 1, kind: input, shape index: {}]   ;;  %s3056_s2 = inlined_call_operand.vmem [shape: f32[1,32], index: 2, kind: input, shape index: {}]   ;;  %s3057_s3 = inlined_call_operand.vmem [shape: bf16[2,128,32], index: 3, kind: output, shape index: {}]  }
   0x1 LB: > { %s2022_s13 = sadd.s32 4294967295, %s2489_s12   ;;  %p2026_p0 = scmp.ge.s32.totalorder %s2489_s12, 1  ;;  %s2489_s12 = sphi %s2512_s12, %s13_s12  }
   0x2   : > { %p137_p1 = scmp.lt.s32.totalorder %s2489_s12, 3 }
   0x4   : > { %p138_p2 = pnand %p2026_p0, %p137_p1 }
   0x5   : > { %p161_p3 = scmp.lt.s32.totalorder (!%p138_p2), %s2022_s13, 1 }
   0x6   : > { %141 = sbr.rel (%p138_p2) target bundleno = 532 (0x214), region = 32 }
   0xb   : > { %v2264_v0 = vld [vmem:[%s3055_s1 + $0x38] sm:$0xff]   ;;  %v2491_v1 = vmov 0   ;;  %v2265_v2 = vld [vmem:[%s3055_s1 + $0x30] sm:$0xff]   ;;  %v2266_v4 = vld [vmem:[%s3055_s1 + $0x28] sm:$0xff]   ;;  %s3061_s13 = smov (!%p161_p3, %s2022_s13), 1  ;;  %vm1124_vm0 = vcmask 392192  }
   0xc   : > { %1221 = vmatprep.subr.bf16.mxu0 %v2491_v1  ;;  %1510 = vmatprep.subr.bf16.mxu1 %v2491_v1  ;;  %v2268_v3 = vld [vmem:[%s3055_s1 + $0xb8] sm:$0xff]   ;;  %v2270_v5 = vld [vmem:[%s3055_s1 + $0xb0] sm:$0xff]   ;;  %v2267_v6 = vld [vmem:[%s3055_s1 + $0x20] sm:$0xff]   ;;  %s2237_s11 = sshll.u32 %s3061_s13, 10  ;;  %s2238_s24 = sshll.u32 %s3061_s13, 6  ;;  %vm1950_vm1 = vcmask 257024  }
   0xd   : > { %1222 = vmatpush1.bf16.msra.mxu0 %v2264_v0  ;;  %1511 = vmatpush1.bf16.msra.mxu1 %v2268_v3  ;;  %v2272_v7 = vld [vmem:[%s3055_s1 + $0xa8] sm:$0xff]   ;;  %v2269_v8 = vld [vmem:[%s3055_s1 + $0x18] sm:$0xff]   ;;  %v2274_v9 = vld [vmem:[%s3055_s1 + $0xa0] sm:$0xff]   ;;  %s2582_s18 = scalar_lea.vmem %s3054_s0, %s2237_s11  ;;  %s2988_s27 = scalar_lea.vmem %s3057_s3, %s2238_s24 }
   0xe   : > { %1223 = vmatprep.subr.bf16.mxu0 %v2491_v1  ;;  %1512 = vmatprep.subr.bf16.mxu1 %v2491_v1  ;;  %v2271_v10 = vld [vmem:[%s3055_s1 + $0x10] sm:$0xff]   ;;  %v2276_v11 = vld [vmem:[%s3055_s1 + $0x98] sm:$0xff]   ;;  %v2273_v12 = vld [vmem:[%s3055_s1 + $0x8] sm:$0xff]  }
   0xf   : > { %v2278_v13 = vld [vmem:[%s3055_s1 + $0x90] sm:$0xff]   ;;  %v2275_v14 = vld [vmem:[%s3055_s1] sm:$0xff]   ;;  %v2280_v15 = vld [vmem:[%s3055_s1 + $0x88] sm:$0xff]  }
  0x10   : > { %v2292_v16 = vld [vmem:[%s2582_s18 + $0xc] ss:$16 sps:$4 sm:$0xff]   ;;  %v2296_v17 = vld [vmem:[%s2582_s18 + $0x4] ss:$16 sps:$4 sm:$0xff]   ;;  %v2290_v26 = vld [vmem:[%s2582_s18 + $0x8] ss:$16 sps:$4 sm:$0xff]  }
  0x11   : > { %1224 = vmatpush1.bf16.msra.mxu0 %v2265_v2  ;;  %1513 = vmatpush1.bf16.msra.mxu1 %v2270_v5  ;;  %v2277_v18 = vld [vmem:[%s3055_s1 + $0x78] sm:$0xff]   ;;  %v2282_v19 = vld [vmem:[%s3055_s1 + $0x80] sm:$0xff]   ;;  %v2279_v20 = vld [vmem:[%s3055_s1 + $0x70] sm:$0xff]  }
  0x12   : > { %1225 = vmatprep.subr.bf16.mxu0 %v2491_v1  ;;  %1514 = vmatprep.subr.bf16.mxu1 %v2491_v1  ;;  %v2284_v21 = vld [vmem:[%s3055_s1 + $0xd0] sm:$0xff]   ;;  %v2281_v22 = vld [vmem:[%s3055_s1 + $0x68] sm:$0xff]   ;;  %v2283_v24 = vld [vmem:[%s3055_s1 + $0x60] sm:$0xff]  }
  0x13   : > { %2186 = vmatprep.mubr.msk.bf16.mxu1 %vm1124_vm0, %v2292_v16  ;;  %1253 = vmatprep.mubr.bf16.mxu0 %v2296_v17  ;;  %v2286_v23 = vld [vmem:[%s3055_s1 + $0xc8] sm:$0xff]   ;;  %v2288_v25 = vld [vmem:[%s3055_s1 + $0xc0] sm:$0xff]   ;;  %v2285_v27 = vld [vmem:[%s3055_s1 + $0x58] sm:$0xff]  }
  0x14   : > { %v2297_v28 = vld [vmem:[%s2582_s18 + $0x2c] ss:$16 sps:$4 sm:$0xff]   ;;  %v2287_v29 = vld [vmem:[%s3055_s1 + $0x50] sm:$0xff]   ;;  %v2299_v30 = vld [vmem:[%s2582_s18 + $0x28] ss:$16 sps:$4 sm:$0xff]  }
  0x15   : > { %1226 = vmatpush1.bf16.msra.mxu0 %v2266_v4  ;;  %1515 = vmatpush1.bf16.msra.mxu1 %v2272_v7  ;;  %v2289_v31 = vld [vmem:[%s3055_s1 + $0x48] sm:$0xff]   ;;  %v2293_v33 = vld [vmem:[%s3055_s1 + $0x40] sm:$0xff]  }
  0x16   : > { %1227 = vmatprep.subr.bf16.mxu0 %v2491_v1  ;;  %1516 = vmatprep.subr.bf16.mxu1 %v2491_v1  ;;  %v2303_v32 = vld [vmem:[%s2582_s18 + $0x4c] ss:$16 sps:$4 sm:$0xff]   ;;  %v2294_v34 = vld [vmem:[%s2582_s18] ss:$16 sps:$4 sm:$0xff]   ;;  %v2305_v35 = vld [vmem:[%s2582_s18 + $0x48] ss:$16 sps:$4 sm:$0xff]  }
  0x17   : > { %v2300_v36 = vld [vmem:[%s2582_s18 + $0x24] ss:$16 sps:$4 sm:$0xff]   ;;  %v2309_v37 = vld [vmem:[%s2582_s18 + $0x6c] ss:$16 sps:$4 sm:$0xff]   ;;  %v2302_v38 = vld [vmem:[%s2582_s18 + $0x20] ss:$16 sps:$4 sm:$0xff]  }
  0x18   : > { %v2311_v39 = vld [vmem:[%s2582_s18 + $0x68] ss:$16 sps:$4 sm:$0xff]   ;;  %v2306_v40 = vld [vmem:[%s2582_s18 + $0x44] ss:$16 sps:$4 sm:$0xff]   ;;  %v2315_v41 = vld [vmem:[%s2582_s18 + $0x8c] ss:$16 sps:$4 sm:$0xff]  }
  0x19   : > { %1228 = vmatpush1.bf16.msra.mxu0 %v2267_v6  ;;  %1517 = vmatpush1.bf16.msra.mxu1 %v2274_v9  ;;  %v2308_v42 = vld [vmem:[%s2582_s18 + $0x40] ss:$16 sps:$4 sm:$0xff]   ;;  %v2312_v43 = vld [vmem:[%s2582_s18 + $0x64] ss:$16 sps:$4 sm:$0xff]   ;;  %v2317_v44 = vld [vmem:[%s2582_s18 + $0x88] ss:$16 sps:$4 sm:$0xff]  }
  0x1a   : > { %1229 = vmatprep.subr.bf16.mxu0 %v2491_v1  ;;  %1518 = vmatprep.subr.bf16.mxu1 %v2491_v1  ;;  %v2321_v45 = vld [vmem:[%s2582_s18 + $0xac] ss:$16 sps:$4 sm:$0xff]   ;;  %v2314_v46 = vld [vmem:[%s2582_s18 + $0x60] ss:$16 sps:$4 sm:$0xff]   ;;  %v2323_v47 = vld [vmem:[%s2582_s18 + $0xa8] ss:$16 sps:$4 sm:$0xff]  }
  0x1b   : > { %v2318_v48 = vld [vmem:[%s2582_s18 + $0x84] ss:$16 sps:$4 sm:$0xff]   ;;  %v2327_v49 = vld [vmem:[%s2582_s18 + $0xcc] ss:$16 sps:$4 sm:$0xff]   ;;  %v2320_v50 = vld [vmem:[%s2582_s18 + $0x80] ss:$16 sps:$4 sm:$0xff]  }
  0x1c   : > { %v2329_v51 = vld [vmem:[%s2582_s18 + $0xc8] ss:$16 sps:$4 sm:$0xff]   ;;  %v2324_v52 = vld [vmem:[%s2582_s18 + $0xa4] ss:$16 sps:$4 sm:$0xff]   ;;  %v2333_v53 = vld [vmem:[%s2582_s18 + $0xec] ss:$16 sps:$4 sm:$0xff]  }
  0x1d   : > { %1230 = vmatpush1.bf16.msra.mxu0 %v2269_v8  ;;  %1519 = vmatpush1.bf16.msra.mxu1 %v2276_v11  ;;  %v2326_v54 = vld [vmem:[%s2582_s18 + $0xa0] ss:$16 sps:$4 sm:$0xff]   ;;  %v2335_v55 = vld [vmem:[%s2582_s18 + $0xe8] ss:$16 sps:$4 sm:$0xff]   ;;  %v2330_v56 = vld [vmem:[%s2582_s18 + $0xc4] ss:$16 sps:$4 sm:$0xff]  }
  0x1e   : > { %1231 = vmatprep.subr.bf16.mxu0 %v2491_v1  ;;  %1520 = vmatprep.subr.bf16.mxu1 %v2491_v1  ;;  %v2339_v57 = vld [vmem:[%s2582_s18 + $0x10c] ss:$16 sps:$4 sm:$0xff]   ;;  %v2332_v58 = vld [vmem:[%s2582_s18 + $0xc0] ss:$16 sps:$4 sm:$0xff]   ;;  %v2341_v59 = vld [vmem:[%s2582_s18 + $0x108] ss:$16 sps:$4 sm:$0xff]  }
  0x1f   : > { %v2336_v60 = vld [vmem:[%s2582_s18 + $0xe4] ss:$16 sps:$4 sm:$0xff]   ;;  %v2345_v61 = vld [vmem:[%s2582_s18 + $0x12c] ss:$16 sps:$4 sm:$0xff]   ;;  %v2338_v62 = vld [vmem:[%s2582_s18 + $0xe0] ss:$16 sps:$4 sm:$0xff]  }
  0x20   : > { %v2347_v63 = vld [vmem:[%s2582_s18 + $0x128] ss:$16 sps:$4 sm:$0xff]   ;;  %v2342_v0 = vld [vmem:[%s2582_s18 + $0x104] ss:$16 sps:$4 sm:$0xff]   ;;  %v2344_v2 = vld [vmem:[%s2582_s18 + $0x100] ss:$16 sps:$4 sm:$0xff]  }
  0x21   : > { %1232 = vmatpush1.bf16.msra.mxu0 %v2271_v10  ;;  %1521 = vmatpush1.bf16.msra.mxu1 %v2278_v13  ;;  %v2353_v3 = vld [vmem:[%s2582_s18 + $0x148] ss:$16 sps:$4 sm:$0xff]   ;;  %v2348_v4 = vld [vmem:[%s2582_s18 + $0x124] ss:$16 sps:$4 sm:$0xff]   ;;  %v2357_v5 = vld [vmem:[%s2582_s18 + $0x16c] ss:$16 sps:$4 sm:$0xff]  }
  0x22   : > { %1233 = vmatprep.subr.bf16.mxu0 %v2491_v1  ;;  %1522 = vmatprep.subr.bf16.mxu1 %v2491_v1  ;;  %v2350_v6 = vld [vmem:[%s2582_s18 + $0x120] ss:$16 sps:$4 sm:$0xff]   ;;  %v2359_v7 = vld [vmem:[%s2582_s18 + $0x168] ss:$16 sps:$4 sm:$0xff]   ;;  %v2354_v8 = vld [vmem:[%s2582_s18 + $0x144] ss:$16 sps:$4 sm:$0xff]  }
  0x23   : > { %v2363_v9 = vld [vmem:[%s2582_s18 + $0x18c] ss:$16 sps:$4 sm:$0xff]   ;;  %v2356_v10 = vld [vmem:[%s2582_s18 + $0x140] ss:$16 sps:$4 sm:$0xff]   ;;  %v2365_v11 = vld [vmem:[%s2582_s18 + $0x188] ss:$16 sps:$4 sm:$0xff]  }
  0x24   : > { %v2369_v13 = vld [vmem:[%s2582_s18 + $0x1ac] ss:$16 sps:$4 sm:$0xff]   ;;  %v2366_v16 = vld [vmem:[%s2582_s18 + $0x184] ss:$16 sps:$4 sm:$0xff]  }
  0x25   : > { %1234 = vmatpush1.bf16.msra.mxu0 %v2273_v12  ;;  %1523 = vmatpush1.bf16.msra.mxu1 %v2280_v15  ;;  %v2360_v12 = vld [vmem:[%s2582_s18 + $0x164] ss:$16 sps:$4 sm:$0xff]   ;;  %v2371_v15 = vld [vmem:[%s2582_s18 + $0x1a8] ss:$16 sps:$4 sm:$0xff]   ;;  %v2375_v17 = vld [vmem:[%s2582_s18 + $0x1cc] ss:$16 sps:$4 sm:$0xff]  }
  0x26   : > { %1235 = vmatprep.subr.bf16.mxu0 %v2491_v1  ;;  %1524 = vmatprep.subr.bf16.mxu1 %v2491_v1 }
  0x29   : > { %1236 = vmatpush1.bf16.msra.mxu0 %v2275_v14  ;;  %1525 = vmatpush1.bf16.msra.mxu1 %v2282_v19  ;;  %v2362_v14 = vld [vmem:[%s2582_s18 + $0x160] ss:$16 sps:$4 sm:$0xff]   ;;  %v2377_v19 = vld [vmem:[%s2582_s18 + $0x1c8] ss:$16 sps:$4 sm:$0xff]  }
  0x2a   : > { %1237 = vmatprep.subr.bf16.mxu0 %v2491_v1  ;;  %1536 = vmatprep.subr.bf16.mxu1 %v2491_v1 }
  0x2d   : > { %1238 = vmatpush2.bf16.msra.mxu0 %v2277_v18  ;;  %1537 = vmatpush2.bf16.msra.mxu1 %v2284_v21  ;;  %v2368_v18 = vld [vmem:[%s2582_s18 + $0x180] ss:$16 sps:$4 sm:$0xff]   ;;  %v2381_v21 = vld [vmem:[%s2582_s18 + $0x1ec] ss:$16 sps:$4 sm:$0xff]  }
  0x2e   : > { %1239 = vmatprep.subr.bf16.mxu0 %v2491_v1  ;;  %1538 = vmatprep.subr.bf16.mxu1 %v2491_v1 }
  0x31   : > { %1240 = vmatpush2.bf16.msra.mxu0 %v2279_v20  ;;  %1539 = vmatpush2.bf16.msra.mxu1 %v2286_v23  ;;  %v2372_v20 = vld [vmem:[%s2582_s18 + $0x1a4] ss:$16 sps:$4 sm:$0xff]   ;;  %v2383_v23 = vld [vmem:[%s2582_s18 + $0x1e8] ss:$16 sps:$4 sm:$0xff]  }
  0x32   : > { %1241 = vmatprep.subr.bf16.mxu0 %v2491_v1  ;;  %1540 = vmatprep.subr.bf16.mxu1 %v2491_v1 }
  0x35   : > { %1242 = vmatpush2.bf16.msra.mxu0 %v2281_v22  ;;  %1541 = vmatpush2.bf16.msra.mxu1 %v2288_v25  ;;  %v2374_v22 = vld [vmem:[%s2582_s18 + $0x1a0] ss:$16 sps:$4 sm:$0xff]   ;;  %v2387_v25 = vld [vmem:[%s2582_s18 + $0x20c] ss:$16 sps:$4 sm:$0xff]  }
  0x36   : > { %1243 = vmatprep.subr.bf16.mxu0 %v2491_v1 }
  0x38   : > { %1543 = vmatmul.mubr.bf16.vlgmr.msra.gmra.mxu1 %v2290_v26  ;;  %v2380_v26 = vld [vmem:[%s2582_s18 + $0x1c0] ss:$16 sps:$4 sm:$0xff]  }
  0x39   : > { %1244 = vmatpush2.bf16.msra.mxu0 %v2283_v24  ;;  %2187 = vmatprep.mubr.msk.bf16.mxu1 %vm1124_vm0, %v2297_v28  ;;  %v2378_v24 = vld [vmem:[%s2582_s18 + $0x1c4] ss:$16 sps:$4 sm:$0xff]  }
  0x3a   : > { %1245 = vmatprep.subr.bf16.mxu0 %v2491_v1  ;;  %v2384_v28 = vld [vmem:[%s2582_s18 + $0x1e4] ss:$16 sps:$4 sm:$0xff]  }
  0x3d   : > { %1246 = vmatpush2.bf16.msra.mxu0 %v2285_v27  ;;  %v2389_v27 = vld [vmem:[%s2582_s18 + $0x208] ss:$16 sps:$4 sm:$0xff]  }
  0x3e   : > { %1247 = vmatprep.subr.bf16.mxu0 %v2491_v1 }
  0x40   : > { %1551 = vmatmul.mubr.bf16.gmra.mxu1 %v2299_v30  ;;  %v2386_v30 = vld [vmem:[%s2582_s18 + $0x1e0] ss:$16 sps:$4 sm:$0xff]  }
  0x41   : > { %1248 = vmatpush2.bf16.msra.mxu0 %v2287_v29  ;;  %2188 = vmatprep.mubr.msk.bf16.mxu1 %vm1124_vm0, %v2303_v32  ;;  %v2393_v29 = vld [vmem:[%s2582_s18 + $0x22c] ss:$16 sps:$4 sm:$0xff]   ;;  %v2390_v32 = vld [vmem:[%s2582_s18 + $0x204] ss:$16 sps:$4 sm:$0xff]  }
  0x42   : > { %1249 = vmatprep.subr.bf16.mxu0 %v2491_v1 }
  0x45   : > { %1250 = vmatpush2.bf16.msra.mxu0 %v2289_v31  ;;  %v2395_v31 = vld [vmem:[%s2582_s18 + $0x228] ss:$16 sps:$4 sm:$0xff]  }
  0x46   : > { %1251 = vmatprep.subr.bf16.mxu0 %v2491_v1  ;;  %v2351_v1 = vld [vmem:[%s2582_s18 + $0x14c] ss:$16 sps:$4 sm:$0xff]  }
  0x48   : > { %1559 = vmatmul.mubr.bf16.gmra.mxu1 %v2305_v35  ;;  %v2401_v35 = vld [vmem:[%s2582_s18 + $0x248] ss:$16 sps:$4 sm:$0xff]  }
  0x49   : > { %1252 = vmatpush2.bf16.msra.mxu0 %v2293_v33  ;;  %2189 = vmatprep.mubr.msk.bf16.mxu1 %vm1124_vm0, %v2309_v37  ;;  %v2399_v33 = vld [vmem:[%s2582_s18 + $0x24c] ss:$16 sps:$4 sm:$0xff]  }
  0x4a   : > { %v2405_v37 = vld [vmem:[%s2582_s18 + $0x26c] ss:$16 sps:$4 sm:$0xff]  }
  0x4c   : > { %1254 = vmatmul.mubr.bf16.vlgmr.msra.gmra.mxu0 %v2294_v34  ;;  %v2392_v34 = vld [vmem:[%s2582_s18 + $0x200] ss:$16 sps:$4 sm:$0xff]  }
  0x4d   : > { %1261 = vmatprep.mubr.bf16.mxu0 %v2300_v36  ;;  %v2396_v36 = vld [vmem:[%s2582_s18 + $0x224] ss:$16 sps:$4 sm:$0xff]  }
  0x50   : > { %1567 = vmatmul.mubr.bf16.gmra.mxu1 %v2311_v39  ;;  %v2407_v39 = vld [vmem:[%s2582_s18 + $0x268] ss:$16 sps:$4 sm:$0xff]  }
  0x51   : > { %2190 = vmatprep.mubr.msk.bf16.mxu1 %vm1124_vm0, %v2315_v41  ;;  %v2411_v41 = vld [vmem:[%s2582_s18 + $0x28c] ss:$16 sps:$4 sm:$0xff]  }
  0x54   : > { %1262 = vmatmul.mubr.bf16.gmra.mxu0 %v2302_v38  ;;  %v2398_v38 = vld [vmem:[%s2582_s18 + $0x220] ss:$16 sps:$4 sm:$0xff]  }
  0x55   : > { %1269 = vmatprep.mubr.bf16.mxu0 %v2306_v40  ;;  %v2402_v40 = vld [vmem:[%s2582_s18 + $0x244] ss:$16 sps:$4 sm:$0xff]  }
  0x58   : > { %1575 = vmatmul.mubr.bf16.gmra.mxu1 %v2317_v44  ;;  %v2408_v44 = vld [vmem:[%s2582_s18 + $0x264] ss:$16 sps:$4 sm:$0xff]  }
  0x59   : > { %2191 = vmatprep.mubr.msk.bf16.mxu1 %vm1124_vm0, %v2321_v45  ;;  %v2417_v45 = vld [vmem:[%s2582_s18 + $0x2ac] ss:$16 sps:$4 sm:$0xff]  }
  0x5c   : > { %1270 = vmatmul.mubr.bf16.gmra.mxu0 %v2308_v42  ;;  %v2404_v42 = vld [vmem:[%s2582_s18 + $0x240] ss:$16 sps:$4 sm:$0xff]  }
  0x5d   : > { %1277 = vmatprep.mubr.bf16.mxu0 %v2312_v43  ;;  %v2413_v43 = vld [vmem:[%s2582_s18 + $0x288] ss:$16 sps:$4 sm:$0xff]  }
  0x60   : > { %1583 = vmatmul.mubr.bf16.gmra.mxu1 %v2323_v47  ;;  %v2419_v47 = vld [vmem:[%s2582_s18 + $0x2a8] ss:$16 sps:$4 sm:$0xff]  }
  0x61   : > { %2192 = vmatprep.mubr.msk.bf16.mxu1 %vm1124_vm0, %v2327_v49  ;;  %v2423_v49 = vld [vmem:[%s2582_s18 + $0x2cc] ss:$16 sps:$4 sm:$0xff]  }
  0x64   : > { %1278 = vmatmul.mubr.bf16.gmra.mxu0 %v2314_v46  ;;  %v2410_v46 = vld [vmem:[%s2582_s18 + $0x260] ss:$16 sps:$4 sm:$0xff]  }
  0x65   : > { %1285 = vmatprep.mubr.bf16.mxu0 %v2318_v48  ;;  %v2414_v48 = vld [vmem:[%s2582_s18 + $0x284] ss:$16 sps:$4 sm:$0xff]  }
  0x68   : > { %1591 = vmatmul.mubr.bf16.gmra.mxu1 %v2329_v51  ;;  %v2425_v51 = vld [vmem:[%s2582_s18 + $0x2c8] ss:$16 sps:$4 sm:$0xff]  }
  0x69   : > { %2193 = vmatprep.mubr.msk.bf16.mxu1 %vm1124_vm0, %v2333_v53  ;;  %v2429_v53 = vld [vmem:[%s2582_s18 + $0x2ec] ss:$16 sps:$4 sm:$0xff]  }
  0x6c   : > { %1286 = vmatmul.mubr.bf16.gmra.mxu0 %v2320_v50  ;;  %v2416_v50 = vld [vmem:[%s2582_s18 + $0x280] ss:$16 sps:$4 sm:$0xff]  }
  0x6d   : > { %1293 = vmatprep.mubr.bf16.mxu0 %v2324_v52  ;;  %v2420_v52 = vld [vmem:[%s2582_s18 + $0x2a4] ss:$16 sps:$4 sm:$0xff]  }
  0x70   : > { %1599 = vmatmul.mubr.bf16.gmra.mxu1 %v2335_v55  ;;  %v2431_v55 = vld [vmem:[%s2582_s18 + $0x2e8] ss:$16 sps:$4 sm:$0xff]  }
  0x71   : > { %2194 = vmatprep.mubr.msk.bf16.mxu1 %vm1124_vm0, %v2339_v57  ;;  %v2435_v57 = vld [vmem:[%s2582_s18 + $0x30c] ss:$16 sps:$4 sm:$0xff]  }
  0x74   : > { %1294 = vmatmul.mubr.bf16.gmra.mxu0 %v2326_v54  ;;  %v2422_v54 = vld [vmem:[%s2582_s18 + $0x2a0] ss:$16 sps:$4 sm:$0xff]  }
  0x75   : > { %1301 = vmatprep.mubr.bf16.mxu0 %v2330_v56  ;;  %v2426_v56 = vld [vmem:[%s2582_s18 + $0x2c4] ss:$16 sps:$4 sm:$0xff]  }
  0x78   : > { %1607 = vmatmul.mubr.bf16.gmra.mxu1 %v2341_v59  ;;  %v2437_v59 = vld [vmem:[%s2582_s18 + $0x308] ss:$16 sps:$4 sm:$0xff]  }
  0x79   : > { %2195 = vmatprep.mubr.msk.bf16.mxu1 %vm1124_vm0, %v2345_v61  ;;  %v2441_v61 = vld [vmem:[%s2582_s18 + $0x32c] ss:$16 sps:$4 sm:$0xff]  }
  0x7c   : > { %1302 = vmatmul.mubr.bf16.gmra.mxu0 %v2332_v58  ;;  %v2428_v58 = vld [vmem:[%s2582_s18 + $0x2c0] ss:$16 sps:$4 sm:$0xff]  }
  0x7d   : > { %1309 = vmatprep.mubr.bf16.mxu0 %v2336_v60  ;;  %v2432_v60 = vld [vmem:[%s2582_s18 + $0x2e4] ss:$16 sps:$4 sm:$0xff]  }
  0x80   : > { %1615 = vmatmul.mubr.bf16.gmra.mxu1 %v2347_v63 }
  0x81   : > { %2196 = vmatprep.mubr.msk.bf16.mxu1 %vm1124_vm0, %v2351_v1 }
  0x84   : > { %1310 = vmatmul.mubr.bf16.gmra.mxu0 %v2338_v62 }
  0x85   : > { %1317 = vmatprep.mubr.bf16.mxu0 %v2342_v0  ;;  %v2434_v0 = vld [vmem:[%s2582_s18 + $0x2e0] ss:$16 sps:$4 sm:$0xff]  }
  0x88   : > { %1623 = vmatmul.mubr.bf16.gmra.mxu1 %v2353_v3  ;;  %v2438_v3 = vld [vmem:[%s2582_s18 + $0x304] ss:$16 sps:$4 sm:$0xff]  }
  0x89   : > { %2197 = vmatprep.mubr.msk.bf16.mxu1 %vm1124_vm0, %v2357_v5 }
  0x8c   : > { %1318 = vmatmul.mubr.bf16.gmra.mxu0 %v2344_v2  ;;  %v2443_v2 = vld [vmem:[%s2582_s18 + $0x328] ss:$16 sps:$4 sm:$0xff]  }
  0x8d   : > { %1325 = vmatprep.mubr.bf16.mxu0 %v2348_v4  ;;  %v2447_v4 = vld [vmem:[%s2582_s18 + $0x34c] ss:$16 sps:$4 sm:$0xff]  }
  0x90   : > { %1631 = vmatmul.mubr.bf16.gmra.mxu1 %v2359_v7 }
  0x91   : > { %2198 = vmatprep.mubr.msk.bf16.mxu1 %vm1124_vm0, %v2363_v9 }
  0x94   : > { %1326 = vmatmul.mubr.bf16.gmra.mxu0 %v2350_v6 }
  0x95   : > { %1333 = vmatprep.mubr.bf16.mxu0 %v2354_v8  ;;  %v2440_v8 = vld [vmem:[%s2582_s18 + $0x300] ss:$16 sps:$4 sm:$0xff]  }
  0x98   : > { %1639 = vmatmul.mubr.bf16.gmra.mxu1 %v2365_v11  ;;  %v2444_v11 = vld [vmem:[%s2582_s18 + $0x324] ss:$16 sps:$4 sm:$0xff]  }
  0x99   : > { %2199 = vmatprep.mubr.msk.bf16.mxu1 %vm1124_vm0, %v2369_v13 }
  0x9c   : > { %1334 = vmatmul.mubr.bf16.gmra.mxu0 %v2356_v10  ;;  %v2449_v10 = vld [vmem:[%s2582_s18 + $0x348] ss:$16 sps:$4 sm:$0xff]  }
  0x9d   : > { %1341 = vmatprep.mubr.bf16.mxu0 %v2360_v12  ;;  %v2453_v12 = vld [vmem:[%s2582_s18 + $0x36c] ss:$16 sps:$4 sm:$0xff]  }
  0xa0   : > { %1647 = vmatmul.mubr.bf16.gmra.mxu1 %v2371_v15 }
  0xa1   : > { %2200 = vmatprep.mubr.msk.bf16.mxu1 %vm1124_vm0, %v2375_v17 }
  0xa4   : > { %1342 = vmatmul.mubr.bf16.gmra.mxu0 %v2362_v14 }
  0xa5   : > { %1349 = vmatprep.mubr.bf16.mxu0 %v2366_v16 }
  0xa8   : > { %1655 = vmatmul.mubr.bf16.gmra.mxu1 %v2377_v19 }
  0xa9   : > { %2201 = vmatprep.mubr.msk.bf16.mxu1 %vm1124_vm0, %v2381_v21 }
  0xac   : > { %1350 = vmatmul.mubr.bf16.gmra.mxu0 %v2368_v18 }
  0xad   : > { %1357 = vmatprep.mubr.bf16.mxu0 %v2372_v20  ;;  %v2446_v20 = vld [vmem:[%s2582_s18 + $0x320] ss:$16 sps:$4 sm:$0xff]  }
  0xb0   : > { %1663 = vmatmul.mubr.bf16.gmra.mxu1 %v2383_v23 }
  0xb1   : > { %2202 = vmatprep.mubr.msk.bf16.mxu1 %vm1124_vm0, %v2387_v25  ;;  %v2459_v25 = vld [vmem:[%s2582_s18 + $0x38c] ss:$16 sps:$4 sm:$0xff]  }
  0xb4   : > { %1358 = vmatmul.mubr.bf16.gmra.mxu0 %v2374_v22  ;;  %v2455_v22 = vld [vmem:[%s2582_s18 + $0x368] ss:$16 sps:$4 sm:$0xff]  }
  0xb5   : > { %1365 = vmatprep.mubr.bf16.mxu0 %v2378_v24  ;;  %v2450_v24 = vld [vmem:[%s2582_s18 + $0x344] ss:$16 sps:$4 sm:$0xff]  }
  0xb8   : > { %1671 = vmatmul.mubr.bf16.gmra.mxu1 %v2389_v27 }
  0xb9   : > { %2203 = vmatprep.mubr.msk.bf16.mxu1 %vm1124_vm0, %v2393_v29 }
  0xbc   : > { %1366 = vmatmul.mubr.bf16.gmra.mxu0 %v2380_v26 }
  0xbd   : > { %1373 = vmatprep.mubr.bf16.mxu0 %v2384_v28 }
  0xc0   : > { %1679 = vmatmul.mubr.bf16.gmra.mxu1 %v2395_v31 }
  0xc1   : > { %2204 = vmatprep.mubr.msk.bf16.mxu1 %vm1124_vm0, %v2399_v33 }
  0xc4   : > { %1374 = vmatmul.mubr.bf16.gmra.mxu0 %v2386_v30 }
  0xc5   : > { %1381 = vmatprep.mubr.bf16.mxu0 %v2390_v32 }
  0xc8   : > { %1687 = vmatmul.mubr.bf16.gmra.mxu1 %v2401_v35 }
  0xc9   : > { %2205 = vmatprep.mubr.msk.bf16.mxu1 %vm1124_vm0, %v2405_v37 }
  0xcc   : > { %1382 = vmatmul.mubr.bf16.gmra.mxu0 %v2392_v34  ;;  %v2452_v34 = vld [vmem:[%s2582_s18 + $0x340] ss:$16 sps:$4 sm:$0xff]  }
  0xcd   : > { %1389 = vmatprep.mubr.bf16.mxu0 %v2396_v36  ;;  %v2461_v36 = vld [vmem:[%s2582_s18 + $0x388] ss:$16 sps:$4 sm:$0xff]  }
  0xd0   : > { %1695 = vmatmul.mubr.bf16.gmra.mxu1 %v2407_v39  ;;  %v2465_v39 = vld [vmem:[%s2582_s18 + $0x3ac] ss:$16 sps:$4 sm:$0xff]  }
  0xd1   : > { %2206 = vmatprep.mubr.msk.bf16.mxu1 %vm1124_vm0, %v2411_v41 }
  0xd4   : > { %1390 = vmatmul.mubr.bf16.gmra.mxu0 %v2398_v38  ;;  %v2456_v38 = vld [vmem:[%s2582_s18 + $0x364] ss:$16 sps:$4 sm:$0xff]  }
  0xd5   : > { %1397 = vmatprep.mubr.bf16.mxu0 %v2402_v40 }
  0xd8   : > { %1703 = vmatmul.mubr.bf16.gmra.mxu1 %v2413_v43 }
  0xd9   : > { %2207 = vmatprep.mubr.msk.bf16.mxu1 %vm1124_vm0, %v2417_v45 }
  0xdc   : > { %1398 = vmatmul.mubr.bf16.gmra.mxu0 %v2404_v42 }
  0xdd   : > { %1405 = vmatprep.mubr.bf16.mxu0 %v2408_v44 }
  0xe0   : > { %1711 = vmatmul.mubr.bf16.gmra.mxu1 %v2419_v47 }
  0xe1   : > { %2208 = vmatprep.mubr.msk.bf16.mxu1 %vm1124_vm0, %v2423_v49 }
  0xe4   : > { %1406 = vmatmul.mubr.bf16.gmra.mxu0 %v2410_v46 }
  0xe5   : > { %1413 = vmatprep.mubr.bf16.mxu0 %v2414_v48  ;;  %v2458_v48 = vld [vmem:[%s2582_s18 + $0x360] ss:$16 sps:$4 sm:$0xff]  }
  0xe8   : > { %1719 = vmatmul.mubr.bf16.gmra.mxu1 %v2425_v51 }
  0xe9   : > { %2209 = vmatprep.mubr.msk.bf16.mxu1 %vm1124_vm0, %v2429_v53  ;;  %v2471_v53 = vld [vmem:[%s2582_s18 + $0x3cc] ss:$16 sps:$4 sm:$0xff]  }
  0xec   : > { %1414 = vmatmul.mubr.bf16.gmra.mxu0 %v2416_v50  ;;  %v2467_v50 = vld [vmem:[%s2582_s18 + $0x3a8] ss:$16 sps:$4 sm:$0xff]  }
  0xed   : > { %1421 = vmatprep.mubr.bf16.mxu0 %v2420_v52  ;;  %v2464_v52 = vld [vmem:[%s2582_s18 + $0x384] ss:$16 sps:$4 sm:$0xff]  }
  0xf0   : > { %1727 = vmatmul.mubr.bf16.gmra.mxu1 %v2431_v55 }
  0xf1   : > { %2210 = vmatprep.mubr.msk.bf16.mxu1 %vm1124_vm0, %v2435_v57 }
  0xf4   : > { %1422 = vmatmul.mubr.bf16.gmra.mxu0 %v2422_v54 }
  0xf5   : > { %1429 = vmatprep.mubr.bf16.mxu0 %v2426_v56 }
  0xf8   : > { %v1544_v62 = vpop.f32.mrf.mxu1  ;;  %1735 = vmatmul.mubr.bf16.gmra.mxu1 %v2437_v59 }
  0xf9   : > { %2211 = vmatprep.mubr.msk.bf16.mxu1 %vm1124_vm0, %v2441_v61 }
  0xfa   : > { %v1546_v63 = vpop.f32.mrf.mxu1 }
  0xfc   : > { %1430 = vmatmul.mubr.bf16.gmra.mxu0 %v2428_v58  ;;  %v1547_v1 = vpop.f32.mrf.mxu1 }
  0xfd   : > { %1437 = vmatprep.mubr.bf16.mxu0 %v2432_v60 }
  0xfe   : > { %v1549_v5 = vpop.f32.mrf.mxu1 }
 0x100   : > { %v1552_v6 = vpop.f32.mrf.mxu1  ;;  %1743 = vmatmul.mubr.bf16.gmra.mxu1 %v2443_v2  ;;  %v2470_v2 = vld [vmem:[%s2582_s18 + $0x3a4] ss:$16 sps:$4 sm:$0xff]  }
 0x101   : > { %2212 = vmatprep.mubr.msk.bf16.mxu1 %vm1124_vm0, %v2447_v4 }
 0x102   : > { %v1554_v7 = vpop.f32.mrf.mxu1 }
 0x104   : > { %1438 = vmatmul.mubr.bf16.gmra.mxu0 %v2434_v0  ;;  %v1555_v9 = vpop.f32.mrf.mxu1  ;;  %v2473_v0 = vld [vmem:[%s2582_s18 + $0x3c8] ss:$16 sps:$4 sm:$0xff]  }
 0x105   : > { %1445 = vmatprep.mubr.bf16.mxu0 %v2438_v3  ;;  %v2477_v3 = vld [vmem:[%s2582_s18 + $0x3ec] ss:$16 sps:$4 sm:$0xff]  }
 0x106   : > { %v1557_v13 = vpop.f32.mrf.mxu1 }
 0x108   : > { %v1560_v15 = vpop.f32.mrf.mxu1  ;;  %1751 = vmatmul.mubr.bf16.gmra.mxu1 %v2449_v10 }
 0x109   : > { %2213 = vmatprep.mubr.msk.bf16.mxu1 %vm1124_vm0, %v2453_v12  ;;  %v2468_v12 = vld [vmem:[%s2582_s18 + $0x3a0] ss:$16 sps:$4 sm:$0xff]  }
 0x10a   : > { %v1562_v18 = vpop.f32.mrf.mxu1 }
 0x10c   : > { %v1255_v14 = vpop.f32.mrf.mxu0  ;;  %1446 = vmatmul.mubr.bf16.gmra.mxu0 %v2440_v8  ;;  %v1563_v21 = vpop.f32.mrf.mxu1 }
 0x10d   : > { %v2773_v16 = vadd.f32 %v1544_v62, %v1255_v14  ;;  %1453 = vmatprep.mubr.bf16.mxu0 %v2444_v11  ;;  %v2462_v62 = vld [vmem:[%s2582_s18 + $0x380] ss:$16 sps:$4 sm:$0xff]   ;;  %v2479_v14 = vld [vmem:[%s2582_s18 + $0x3e8] ss:$16 sps:$4 sm:$0xff]  }
 0x10e   : > { %v1257_v17 = vpop.f32.mrf.mxu0  ;;  %v1565_v27 = vpop.f32.mrf.mxu1 }
 0x10f   : > { %v2476_v17 = vld [vmem:[%s2582_s18 + $0x3c4] ss:$16 sps:$4 sm:$0xff]   ;;  %v2474_v27 = vld [vmem:[%s2582_s18 + $0x3c0] ss:$16 sps:$4 sm:$0xff]  }
 0x110   : > { %v1258_v19 = vpop.f32.mrf.mxu0  ;;  %v1568_v29 = vpop.f32.mrf.mxu1  ;;  %1759 = vmatmul.mubr.bf16.gmra.mxu1 %v2455_v22 }
 0x111   : > { %v2778_v23 = vadd.f32 %v1547_v1, %v1258_v19  ;;  %2214 = vmatprep.mubr.msk.bf16.mxu1 %vm1124_vm0, %v2459_v25 }
 0x112   : > { %v1260_v26 = vpop.f32.mrf.mxu0  ;;  %v1570_v32 = vpop.f32.mrf.mxu1 }
 0x114   : > { %v1263_v28 = vpop.f32.mrf.mxu0  ;;  %1454 = vmatmul.mubr.bf16.gmra.mxu0 %v2446_v20  ;;  %v1571_v35 = vpop.f32.mrf.mxu1 }
 0x115   : > { %v2782_v30 = vadd.f32 %v1552_v6, %v1263_v28  ;;  %1461 = vmatprep.mubr.bf16.mxu0 %v2450_v24 }
 0x116   : > { %v1265_v31 = vpop.f32.mrf.mxu0  ;;  %v1573_v41 = vpop.f32.mrf.mxu1 }
 0x117   : > { %v2482_v31 = vld [vmem:[%s2582_s18 + $0x3e4] ss:$16 sps:$4 sm:$0xff]   ;;  %v2480_v41 = vld [vmem:[%s2582_s18 + $0x3e0] ss:$16 sps:$4 sm:$0xff]  }
 0x118   : > { %v1266_v33 = vpop.f32.mrf.mxu0  ;;  %v1576_v43 = vpop.f32.mrf.mxu1  ;;  %1767 = vmatmul.mubr.bf16.gmra.mxu1 %v2461_v36 }
 0x119   : > { %v2787_v37 = vadd.f32 %v1555_v9, %v1266_v33  ;;  %2215 = vmatprep.mubr.msk.bf16.mxu1 %vm1124_vm0, %v2465_v39 }
 0x11a   : > { %v1268_v40 = vpop.f32.mrf.mxu0  ;;  %v1578_v46 = vpop.f32.mrf.mxu1 }
 0x11c   : > { %v1271_v42 = vpop.f32.mrf.mxu0  ;;  %1462 = vmatmul.mubr.bf16.gmra.mxu0 %v2452_v34  ;;  %v1579_v49 = vpop.f32.mrf.mxu1 }
 0x11d   : > { %v2791_v44 = vadd.f32 %v1560_v15, %v1271_v42  ;;  %1469 = vmatprep.mubr.bf16.mxu0 %v2456_v38 }
 0x11e   : > { %v1273_v45 = vpop.f32.mrf.mxu0  ;;  %v1581_v55 = vpop.f32.mrf.mxu1 }
 0x120   : > { %v1274_v47 = vpop.f32.mrf.mxu0  ;;  %v1584_v57 = vpop.f32.mrf.mxu1  ;;  %1775 = vmatmul.mubr.bf16.gmra.mxu1 %v2467_v50 }
 0x121   : > { %v2796_v51 = vadd.f32 %v1563_v21, %v1274_v47  ;;  %2216 = vmatprep.mubr.msk.bf16.mxu1 %vm1124_vm0, %v2471_v53 }
 0x122   : > { %v1276_v54 = vpop.f32.mrf.mxu0  ;;  %v1586_v60 = vpop.f32.mrf.mxu1 }
 0x124   : > { %v1279_v56 = vpop.f32.mrf.mxu0  ;;  %1470 = vmatmul.mubr.bf16.gmra.mxu0 %v2458_v48  ;;  %v1587_v63 = vpop.f32.mrf.mxu1 }
 0x125   : > { %v2800_v58 = vadd.f32 %v1568_v29, %v1279_v56  ;;  %1477 = vmatprep.mubr.bf16.mxu0 %v2464_v52 }
 0x126   : > { %v1281_v59 = vpop.f32.mrf.mxu0  ;;  %v1589_v5 = vpop.f32.mrf.mxu1 }
 0x128   : > { %v1282_v61 = vpop.f32.mrf.mxu0  ;;  %v1592_v7 = vpop.f32.mrf.mxu1  ;;  %1783 = vmatmul.mubr.bf16.gmra.mxu1 %v2473_v0 }
 0x129   : > { %v2805_v1 = vadd.f32 %v1571_v35, %v1282_v61  ;;  %2217 = vmatprep.mubr.msk.bf16.mxu1 %vm1124_vm0, %v2477_v3 }
 0x12a   : > { %v1284_v4 = vpop.f32.mrf.mxu0  ;;  %v1594_v10 = vpop.f32.mrf.mxu1 }
 0x12c   : > { %v1287_v6 = vpop.f32.mrf.mxu0  ;;  %1478 = vmatmul.mubr.bf16.gmra.mxu0 %v2462_v62  ;;  %v1595_v13 = vpop.f32.mrf.mxu1 }
 0x12d   : > { %v2809_v8 = vadd.f32 %v1576_v43, %v1287_v6  ;;  %1485 = vmatprep.mubr.bf16.mxu0 %v2470_v2 }
 0x12e   : > { %v1289_v9 = vpop.f32.mrf.mxu0  ;;  %v1597_v19 = vpop.f32.mrf.mxu1 }
 0x130   : > { %v1290_v11 = vpop.f32.mrf.mxu0  ;;  %v1600_v21 = vpop.f32.mrf.mxu1  ;;  %1791 = vmatmul.mubr.bf16.gmra.mxu1 %v2479_v14 }
 0x131   : > { %v2814_v15 = vadd.f32 %v1579_v49, %v1290_v11 }
 0x132   : > { %v1292_v18 = vpop.f32.mrf.mxu0  ;;  %v1602_v25 = vpop.f32.mrf.mxu1 }
 0x134   : > { %v1295_v20 = vpop.f32.mrf.mxu0  ;;  %1486 = vmatmul.mubr.bf16.gmra.mxu0 %v2468_v12  ;;  %v1603_v28 = vpop.f32.mrf.mxu1 }
 0x135   : > { %v2817_v22 = vadd.f32 %v1584_v57, %v1295_v20  ;;  %1493 = vmatprep.mubr.bf16.mxu0 %v2476_v17 }
 0x136   : > { %v1297_v24 = vpop.f32.mrf.mxu0  ;;  %v1605_v33 = vpop.f32.mrf.mxu1 }
 0x138   : > { %v1298_v26 = vpop.f32.mrf.mxu0  ;;  %v1608_v35 = vpop.f32.mrf.mxu1 }
 0x139   : > { %v2820_v29 = vadd.f32 %v1587_v63, %v1298_v26 }
 0x13a   : > { %v1300_v32 = vpop.f32.mrf.mxu0  ;;  %v1610_v39 = vpop.f32.mrf.mxu1 }
 0x13c   : > { %v1303_v34 = vpop.f32.mrf.mxu0  ;;  %1494 = vmatmul.mubr.bf16.gmra.mxu0 %v2474_v27  ;;  %v1611_v42 = vpop.f32.mrf.mxu1 }
 0x13d   : > { %v2823_v36 = vadd.f32 %v1592_v7, %v1303_v34  ;;  %1501 = vmatprep.mubr.bf16.mxu0 %v2482_v31 }
 0x13e   : > { %v1305_v38 = vpop.f32.mrf.mxu0  ;;  %v1613_v46 = vpop.f32.mrf.mxu1 }
 0x140   : > { %v1306_v40 = vpop.f32.mrf.mxu0  ;;  %v1616_v48 = vpop.f32.mrf.mxu1 }
 0x141   : > { %v2826_v43 = vadd.f32 %v1595_v13, %v1306_v40 }
 0x142   : > { %v1308_v45 = vpop.f32.mrf.mxu0  ;;  %v1618_v52 = vpop.f32.mrf.mxu1 }
 0x144   : > { %v1311_v47 = vpop.f32.mrf.mxu0  ;;  %1502 = vmatmul.mubr.bf16.gmra.mxu0 %v2480_v41  ;;  %v1619_v54 = vpop.f32.mrf.mxu1 }
 0x145   : > { %v2828_v49 = vadd.f32 %v1600_v21, %v1311_v47 }
 0x146   : > { %v1313_v50 = vpop.f32.mrf.mxu0  ;;  %v1621_v57 = vpop.f32.mrf.mxu1 }
 0x148   : > { %v1314_v53 = vpop.f32.mrf.mxu0  ;;  %v1624_v60 = vpop.f32.mrf.mxu1 }
 0x149   : > { %v2830_v55 = vadd.f32 %v1603_v28, %v1314_v53 }
 0x14a   : > { %v1316_v56 = vpop.f32.mrf.mxu0  ;;  %v1626_v63 = vpop.f32.mrf.mxu1 }
 0x14c   : > { %v1319_v59 = vpop.f32.mrf.mxu0  ;;  %v1627_v3 = vpop.f32.mrf.mxu1 }
 0x14d   : > { %v2832_v61 = vadd.f32 %v1608_v35, %v1319_v59 }
 0x14e   : > { %v1321_v62 = vpop.f32.mrf.mxu0  ;;  %v1629_v6 = vpop.f32.mrf.mxu1 }
 0x14f   : > { %v1799_v0 = vmax.f32 %v2773_v16, %v2832_v61 }
 0x150   : > { %v1322_v2 = vpop.f32.mrf.mxu0  ;;  %v1632_v10 = vpop.f32.mrf.mxu1 }
 0x151   : > { %v2836_v4 = vadd.f32 %v1611_v42, %v1322_v2 }
 0x152   : > { %v1324_v5 = vpop.f32.mrf.mxu0  ;;  %v1634_v13 = vpop.f32.mrf.mxu1 }
 0x153   : > { %v1800_v7 = vmax.f32 %v2778_v23, %v2836_v4 }
 0x154   : > { %v1327_v9 = vpop.f32.mrf.mxu0  ;;  %v1635_v18 = vpop.f32.mrf.mxu1 }
 0x155   : > { %v2840_v11 = vadd.f32 %v1616_v48, %v1327_v9 }
 0x156   : > { %v1329_v12 = vpop.f32.mrf.mxu0  ;;  %v1637_v21 = vpop.f32.mrf.mxu1 }
 0x157   : > { %v1801_v14 = vmax.f32 %v2782_v30, %v2840_v11 }
 0x158   : > { %v1330_v17 = vpop.f32.mrf.mxu0  ;;  %v1640_v26 = vpop.f32.mrf.mxu1 }
 0x159   : > { %v2844_v19 = vadd.f32 %v1619_v54, %v1330_v17 }
 0x15a   : > { %v1332_v20 = vpop.f32.mrf.mxu0  ;;  %v1642_v31 = vpop.f32.mrf.mxu1 }
 0x15b   : > { %v1802_v24 = vmax.f32 %v2787_v37, %v2844_v19 }
 0x15c   : > { %v1335_v25 = vpop.f32.mrf.mxu0  ;;  %v1643_v34 = vpop.f32.mrf.mxu1 }
 0x15d   : > { %v2848_v27 = vadd.f32 %v1624_v60, %v1335_v25 }
 0x15e   : > { %v1337_v28 = vpop.f32.mrf.mxu0  ;;  %v1645_v39 = vpop.f32.mrf.mxu1 }
 0x15f   : > { %v1803_v32 = vmax.f32 %v2791_v44, %v2848_v27 }
 0x160   : > { %v1338_v33 = vpop.f32.mrf.mxu0  ;;  %v1648_v42 = vpop.f32.mrf.mxu1 }
 0x161   : > { %v2852_v35 = vadd.f32 %v1627_v3, %v1338_v33 }
 0x162   : > { %v1340_v38 = vpop.f32.mrf.mxu0  ;;  %v1650_v47 = vpop.f32.mrf.mxu1 }
 0x163   : > { %v1804_v40 = vmax.f32 %v2796_v51, %v2852_v35 }
 0x164   : > { %v1343_v41 = vpop.f32.mrf.mxu0  ;;  %v1651_v52 = vpop.f32.mrf.mxu1 }
 0x165   : > { %v2856_v45 = vadd.f32 %v1632_v10, %v1343_v41 }
 0x166   : > { %v1345_v46 = vpop.f32.mrf.mxu0  ;;  %v1653_v56 = vpop.f32.mrf.mxu1 }
 0x167   : > { %v1805_v48 = vmax.f32 %v2800_v58, %v2856_v45 }
 0x168   : > { %v1346_v50 = vpop.f32.mrf.mxu0  ;;  %v1656_v60 = vpop.f32.mrf.mxu1 }
 0x169   : > { %v2860_v53 = vadd.f32 %v1635_v18, %v1346_v50 }
 0x16a   : > { %v1348_v54 = vpop.f32.mrf.mxu0  ;;  %v1658_v2 = vpop.f32.mrf.mxu1 }
 0x16b   : > { %v1806_v57 = vmax.f32 %v2805_v1, %v2860_v53 }
 0x16c   : > { %v1351_v59 = vpop.f32.mrf.mxu0  ;;  %v1659_v6 = vpop.f32.mrf.mxu1 }
 0x16d   : > { %v2864_v62 = vadd.f32 %v1640_v26, %v1351_v59 }
 0x16e   : > { %v1353_v63 = vpop.f32.mrf.mxu0  ;;  %v1661_v12 = vpop.f32.mrf.mxu1 }
 0x16f   : > { %v1807_v3 = vmax.f32 %v2809_v8, %v2864_v62 }
 0x170   : > { %v1354_v5 = vpop.f32.mrf.mxu0  ;;  %v1664_v18 = vpop.f32.mrf.mxu1 }
 0x171   : > { %v2868_v9 = vadd.f32 %v1643_v34, %v1354_v5 }
 0x172   : > { %v1356_v10 = vpop.f32.mrf.mxu0  ;;  %v1666_v25 = vpop.f32.mrf.mxu1 }
 0x173   : > { %v1808_v13 = vmax.f32 %v2814_v15, %v2868_v9 }
 0x174   : > { %v1359_v17 = vpop.f32.mrf.mxu0  ;;  %v1667_v31 = vpop.f32.mrf.mxu1 }
 0x175   : > { %v2872_v20 = vadd.f32 %v1648_v42, %v1359_v17 }
 0x176   : > { %v1361_v21 = vpop.f32.mrf.mxu0  ;;  %v1669_v38 = vpop.f32.mrf.mxu1 }
 0x177   : > { %v1809_v26 = vmax.f32 %v2817_v22, %v2872_v20 }
 0x178   : > { %v1362_v28 = vpop.f32.mrf.mxu0  ;;  %v1672_v46 = vpop.f32.mrf.mxu1 }
 0x179   : > { %v2876_v33 = vadd.f32 %v1651_v52, %v1362_v28 }
 0x17a   : > { %v1364_v34 = vpop.f32.mrf.mxu0  ;;  %v1674_v50 = vpop.f32.mrf.mxu1 }
 0x17b   : > { %v1810_v39 = vmax.f32 %v2820_v29, %v2876_v33 }
 0x17c   : > { %v1367_v41 = vpop.f32.mrf.mxu0  ;;  %v1675_v59 = vpop.f32.mrf.mxu1 }
 0x17d   : > { %v2880_v47 = vadd.f32 %v1656_v60, %v1367_v41 }
 0x17e   : > { %v1369_v42 = vpop.f32.mrf.mxu0  ;;  %v1677_v2 = vpop.f32.mrf.mxu1 }
 0x17f   : > { %v1811_v54 = vmax.f32 %v2823_v36, %v2880_v47 }
 0x180   : > { %v1370_v56 = vpop.f32.mrf.mxu0  ;;  %v1680_v12 = vpop.f32.mrf.mxu1 }
 0x181   : > { %v2884_v63 = vadd.f32 %v1659_v6, %v1370_v56 }
 0x182   : > { %v1372_v52 = vpop.f32.mrf.mxu0  ;;  %v1682_v21 = vpop.f32.mrf.mxu1 }
 0x183   : > { %v1812_v5 = vmax.f32 %v2826_v43, %v2884_v63 }
 0x184   : > { %v1375_v10 = vpop.f32.mrf.mxu0  ;;  %v1683_v34 = vpop.f32.mrf.mxu1 }
 0x185   : > { %v2888_v17 = vadd.f32 %v1664_v18, %v1375_v10 }
 0x186   : > { %v1377_v60 = vpop.f32.mrf.mxu0  ;;  %v1685_v41 = vpop.f32.mrf.mxu1 }
 0x187   : > { %v3058_v36 = vmax.f32 %v2828_v49, %v2888_v17  ;;  %v2979_v49 = vld [vmem:[%s3056_s2] ss:$0 sm:$0xff] }
 0x188   : > { %v1378_v28 = vpop.f32.mrf.mxu0  ;;  %v1688_v56 = vpop.f32.mrf.mxu1 }
 0x189   : > { %v2892_v38 = vadd.f32 %v1667_v31, %v1378_v28 }
 0x18a   : > { %v1380_v6 = vpop.f32.mrf.mxu0  ;;  %v1690_v18 = vpop.f32.mrf.mxu1 }
 0x18b   : > { %v3059_v43 = vmax.f32 %v2830_v55, %v2892_v38 }
 0x18c   : > { %v1383_v50 = vpop.f32.mrf.mxu0  ;;  %v1691_v21 = vpop.f32.mrf.mxu1 }
 0x18d   : > { %v1673_v52 = vadd.f32 %v1672_v46, %v1383_v50 }
 0x18e   : > { %v1385_v2 = vpop.f32.mrf.mxu0  ;;  %v1693_v28 = vpop.f32.mrf.mxu1 }
 0x18f   : > { %v2899_v10 = vmax.f32 %v1799_v0, %v1673_v52 }
 0x190   : > { %v1386_v60 = vpop.f32.mrf.mxu0  ;;  %v1696_v42 = vpop.f32.mrf.mxu1 }
 0x191   : > { %v1676_v25 = vadd.f32 %v1675_v59, %v1386_v60 }
 0x192   : > { %v1388_v31 = vpop.f32.mrf.mxu0  ;;  %v1698_v2 = vpop.f32.mrf.mxu1 }
 0x193   : > { %v2904_v6 = vmax.f32 %v1800_v7, %v1676_v25 }
 0x194   : > { %v1391_v41 = vpop.f32.mrf.mxu0  ;;  %v1699_v0 = vpop.f32.mrf.mxu1 }
 0x195   : > { %v1681_v46 = vadd.f32 %v1680_v12, %v1391_v41 }
 0x196   : > { %v1393_v50 = vpop.f32.mrf.mxu0  ;;  %v1701_v18 = vpop.f32.mrf.mxu1 }
 0x197   : > { %v2909_v16 = vmax.f32 %v1801_v14, %v1681_v46 }
 0x198   : > { %v1394_v61 = vpop.f32.mrf.mxu0  ;;  %v1704_v7 = vpop.f32.mrf.mxu1 }
 0x199   : > { %v1684_v59 = vadd.f32 %v1683_v34, %v1394_v61 }
 0x19a   : > { %v1396_v52 = vpop.f32.mrf.mxu0  ;;  %v1706_v60 = vpop.f32.mrf.mxu1 }
 0x19b   : > { %v2914_v23 = vmax.f32 %v1802_v24, %v1684_v59 }
 0x19c   : > { %v1399_v4 = vpop.f32.mrf.mxu0  ;;  %v1707_v14 = vpop.f32.mrf.mxu1 }
 0x19d   : > { %v1689_v12 = vadd.f32 %v1688_v56, %v1399_v4 }
 0x19e   : > { %v1401_v25 = vpop.f32.mrf.mxu0  ;;  %v1709_v28 = vpop.f32.mrf.mxu1 }
 0x19f   : > { %v2919_v30 = vmax.f32 %v1803_v32, %v1689_v12 }
 0x1a0   : > { %v1402_v11 = vpop.f32.mrf.mxu0  ;;  %v1712_v24 = vpop.f32.mrf.mxu1 }
 0x1a1   : > { %v1692_v34 = vadd.f32 %v1691_v21, %v1402_v11 }
 0x1a2   : > { %v1404_v31 = vpop.f32.mrf.mxu0  ;;  %v1714_v46 = vpop.f32.mrf.mxu1 }
 0x1a3   : > { %v2924_v37 = vmax.f32 %v1804_v40, %v1692_v34 }
 0x1a4   : > { %v1407_v19 = vpop.f32.mrf.mxu0  ;;  %v1715_v32 = vpop.f32.mrf.mxu1 }
 0x1a5   : > { %v1697_v56 = vadd.f32 %v1696_v42, %v1407_v19 }
 0x1a6   : > { %v1409_v41 = vpop.f32.mrf.mxu0  ;;  %v1717_v2 = vpop.f32.mrf.mxu1 }
 0x1a7   : > { %v2929_v44 = vmax.f32 %v1805_v48, %v1697_v56 }
 0x1a8   : > { %v1410_v27 = vpop.f32.mrf.mxu0  ;;  %v1720_v40 = vpop.f32.mrf.mxu1 }
 0x1a9   : > { %v1700_v21 = vadd.f32 %v1699_v0, %v1410_v27 }
 0x1aa   : > { %v1412_v50 = vpop.f32.mrf.mxu0  ;;  %v1722_v59 = vpop.f32.mrf.mxu1 }
 0x1ab   : > { %v2934_v51 = vmax.f32 %v1806_v57, %v1700_v21 }
 0x1ac   : > { %v1415_v35 = vpop.f32.mrf.mxu0  ;;  %v1723_v48 = vpop.f32.mrf.mxu1 }
 0x1ad   : > { %v1705_v42 = vadd.f32 %v1704_v7, %v1415_v35 }
 0x1ae   : > { %v1417_v61 = vpop.f32.mrf.mxu0  ;;  %v1725_v18 = vpop.f32.mrf.mxu1 }
 0x1af   : > { %v2939_v58 = vmax.f32 %v1807_v3, %v1705_v42 }
 0x1b0   : > { %v1418_v45 = vpop.f32.mrf.mxu0  ;;  %v1728_v57 = vpop.f32.mrf.mxu1 }
 0x1b1   : > { %v1708_v0 = vadd.f32 %v1707_v14, %v1418_v45 }
 0x1b2   : > { %v1420_v52 = vpop.f32.mrf.mxu0  ;;  %v1730_v12 = vpop.f32.mrf.mxu1 }
 0x1b3   : > { %v2944_v1 = vmax.f32 %v1808_v13, %v1708_v0 }
 0x1b4   : > { %v1423_v53 = vpop.f32.mrf.mxu0  ;;  %v1731_v3 = vpop.f32.mrf.mxu1 }
 0x1b5   : > { %v1713_v4 = vadd.f32 %v1712_v24, %v1423_v53 }
 0x1b6   : > { %v1425_v7 = vpop.f32.mrf.mxu0  ;;  %v1733_v11 = vpop.f32.mrf.mxu1 }
 0x1b7   : > { %v2949_v8 = vmax.f32 %v1809_v26, %v1713_v4 }
 0x1b8   : > { %v1426_v62 = vpop.f32.mrf.mxu0  ;;  %v1736_v13 = vpop.f32.mrf.mxu1 }
 0x1b9   : > { %v1716_v25 = vadd.f32 %v1715_v32, %v1426_v62 }
 0x1ba   : > { %v1428_v60 = vpop.f32.mrf.mxu0  ;;  %v1738_v31 = vpop.f32.mrf.mxu1 }
 0x1bb   : > { %v2954_v15 = vmax.f32 %v1810_v39, %v1716_v25 }
 0x1bc   : > { %v1431_v9 = vpop.f32.mrf.mxu0  ;;  %v1739_v26 = vpop.f32.mrf.mxu1 }
 0x1bd   : > { %v1721_v14 = vadd.f32 %v1720_v40, %v1431_v9 }
 0x1be   : > { %v1433_v34 = vpop.f32.mrf.mxu0  ;;  %v1741_v24 = vpop.f32.mrf.mxu1 }
 0x1bf   : > { %v2959_v22 = vmax.f32 %v1811_v54, %v1721_v14 }
 0x1c0   : > { %v1434_v20 = vpop.f32.mrf.mxu0  ;;  %v1744_v39 = vpop.f32.mrf.mxu1 }
 0x1c1   : > { %v1724_v28 = vadd.f32 %v1723_v48, %v1434_v20 }
 0x1c2   : > { %v1436_v19 = vpop.f32.mrf.mxu0  ;;  %v1746_v46 = vpop.f32.mrf.mxu1 }
 0x1c3   : > { %v2964_v29 = vmax.f32 %v1812_v5, %v1724_v28 }
 0x1c4   : > { %v1439_v33 = vpop.f32.mrf.mxu0  ;;  %v1747_v27 = vpop.f32.mrf.mxu1 }
 0x1c5   : > { %v1729_v56 = vadd.f32 %v1728_v57, %v1439_v33 }
 0x1c6   : > { %v1441_v41 = vpop.f32.mrf.mxu0  ;;  %v1749_v50 = vpop.f32.mrf.mxu1 }
 0x1c7   : > { %v2969_v47 = vmax.f32 %v3058_v36, %v1729_v56 }
 0x1c8   : > { %v1442_v54 = vpop.f32.mrf.mxu0  ;;  %v1752_v2 = vpop.f32.mrf.mxu1 }
 0x1c9   : > { %v1732_v32 = vadd.f32 %v1731_v3, %v1442_v54 }
 0x1ca   : > { %v1444_v21 = vpop.f32.mrf.mxu0  ;;  %v1754_v40 = vpop.f32.mrf.mxu1 }
 0x1cb   : > { %v2974_v63 = vmax.f32 %v3059_v43, %v1732_v32 }
 0x1cc   : > { %v1447_v5 = vpop.f32.mrf.mxu0  ;;  %v1755_v59 = vpop.f32.mrf.mxu1 }
 0x1cd   : > { %v1737_v35 = vadd.f32 %v1736_v13, %v1447_v5 }
 0x1ce   : > { %v1449_v17 = vpop.f32.mrf.mxu0  ;;  %v1757_v48 = vpop.f32.mrf.mxu1 }
 0x1cf   : > { %v1831_v42 = vmax.f32 %v2899_v10, %v1737_v35 }
 0x1d0   : > { %v1450_v61 = vpop.f32.mrf.mxu0  ;;  %v1760_v10 = vpop.f32.mrf.mxu1 }
 0x1d1   : > { %v1854_v45 = vadd.f32 %v2979_v49, %v1831_v42  ;;  %v1740_v55 = vadd.f32 %v1739_v26, %v1450_v61 }
 0x1d2   : > { %v1452_v38 = vpop.f32.mrf.mxu0  ;;  %v1762_v12 = vpop.f32.mrf.mxu1 }
 0x1d3   : > { %v1870_v0 = vmax.f32 %v1854_v45, 0.0  ;;  %v1832_v52 = vmax.f32 %v2904_v6, %v1740_v55 }
 0x1d4   : > { %v1455_v18 = vpop.f32.mrf.mxu0  ;;  %v1763_v25 = vpop.f32.mrf.mxu1 }
 0x1d5   : > { %v2239_v53 = vpack.c.bf16 %v1870_v0, %v1870_v0  ;;  %v1855_v57 = vadd.f32 %v2979_v49, %v1832_v52  ;;  %v1745_v4 = vadd.f32 %v1744_v39, %v1455_v18 }
 0x1d6   : > { %v1457_v7 = vpop.f32.mrf.mxu0  ;;  %v1765_v14 = vpop.f32.mrf.mxu1 }
 0x1d7   : > { %1951 = vst.msk [vmem:[%s2988_s27] sm:$0xf] %vm1950_vm1, %v2239_v53  ;;  %v1871_v62 = vmax.f32 %v1855_v57, 0.0  ;;  %v1833_v6 = vmax.f32 %v2909_v16, %v1745_v4 }
 0x1d8   : > { %v1458_v3 = vpop.f32.mrf.mxu0  ;;  %v1768_v26 = vpop.f32.mrf.mxu1 }
 0x1d9   : > { %v2240_v60 = vpack.c.bf16 %v1871_v62, %v1871_v62  ;;  %v1856_v11 = vadd.f32 %v2979_v49, %v1833_v6  ;;  %v1748_v9 = vadd.f32 %v1747_v27, %v1458_v3 }
 0x1da   : > { %v1460_v13 = vpop.f32.mrf.mxu0  ;;  %v1770_v33 = vpop.f32.mrf.mxu1 }
 0x1db   : > { %1952 = vst.msk [vmem:[%s2988_s27 + $0x4] sm:$0xf] %vm1950_vm1, %v2240_v60  ;;  %v1872_v34 = vmax.f32 %v1856_v11, 0.0  ;;  %v1834_v31 = vmax.f32 %v2914_v23, %v1748_v9 }
 0x1dc   : > { %v1463_v20 = vpop.f32.mrf.mxu0  ;;  %v1771_v46 = vpop.f32.mrf.mxu1 }
 0x1dd   : > { %v2241_v28 = vpack.c.bf16 %v1872_v34, %v1872_v34  ;;  %v1857_v16 = vadd.f32 %v2979_v49, %v1834_v31  ;;  %v1753_v19 = vadd.f32 %v1752_v2, %v1463_v20 }
 0x1de   : > { %v1465_v24 = vpop.f32.mrf.mxu0  ;;  %v1773_v32 = vpop.f32.mrf.mxu1 }
 0x1df   : > { %1953 = vst.msk [vmem:[%s2988_s27 + $0x8] sm:$0xf] %vm1950_vm1, %v2241_v28  ;;  %v1873_v39 = vmax.f32 %v1857_v16, 0.0  ;;  %v1835_v56 = vmax.f32 %v2919_v30, %v1753_v19 }
 0x1e0   : > { %v1466_v41 = vpop.f32.mrf.mxu0  ;;  %v1776_v5 = vpop.f32.mrf.mxu1 }
 0x1e1   : > { %v2242_v36 = vpack.c.bf16 %v1873_v39, %v1873_v39  ;;  %v1858_v23 = vadd.f32 %v2979_v49, %v1835_v56  ;;  %v1756_v54 = vadd.f32 %v1755_v59, %v1466_v41 }
 0x1e2   : > { %v1468_v27 = vpop.f32.mrf.mxu0  ;;  %v1778_v40 = vpop.f32.mrf.mxu1 }
 0x1e3   : > { %1954 = vst.msk [vmem:[%s2988_s27 + $0xc] sm:$0xf] %vm1950_vm1, %v2242_v36  ;;  %v1874_v21 = vmax.f32 %v1858_v23, 0.0  ;;  %v1836_v50 = vmax.f32 %v2924_v37, %v1756_v54 }
 0x1e4   : > { %v1471_v43 = vpop.f32.mrf.mxu0  ;;  %v1779_v45 = vpop.f32.mrf.mxu1 }
 0x1e5   : > { %v2243_v2 = vpack.c.bf16 %v1874_v21, %v1874_v21  ;;  %v1859_v30 = vadd.f32 %v2979_v49, %v1836_v50  ;;  %v1761_v35 = vadd.f32 %v1760_v10, %v1471_v43 }
 0x1e6   : > { %v1473_v17 = vpop.f32.mrf.mxu0  ;;  %v1781_v0 = vpop.f32.mrf.mxu1 }
 0x1e7   : > { %1955 = vst.msk [vmem:[%s2988_s27 + $0x10] sm:$0xf] %vm1950_vm1, %v2243_v2  ;;  %v1875_v42 = vmax.f32 %v1859_v30, 0.0  ;;  %v1837_v61 = vmax.f32 %v2929_v44, %v1761_v35 }
 0x1e8   : > { %v1474_v59 = vpop.f32.mrf.mxu0  ;;  %v1784_v53 = vpop.f32.mrf.mxu1 }
 0x1e9   : > { %v2244_v55 = vpack.c.bf16 %v1875_v42, %v1875_v42  ;;  %v1860_v37 = vadd.f32 %v2979_v49, %v1837_v61  ;;  %v1764_v38 = vadd.f32 %v1763_v25, %v1474_v59 }
 0x1ea   : > { %v1476_v48 = vpop.f32.mrf.mxu0  ;;  %v1786_v12 = vpop.f32.mrf.mxu1 }
 0x1eb   : > { %1956 = vst.msk [vmem:[%s2988_s27 + $0x14] sm:$0xf] %vm1950_vm1, %v2244_v55  ;;  %v1876_v52 = vmax.f32 %v1860_v37, 0.0  ;;  %v1838_v18 = vmax.f32 %v2934_v51, %v1764_v38 }
 0x1ec   : > { %v1479_v10 = vpop.f32.mrf.mxu0  ;;  %v1787_v25 = vpop.f32.mrf.mxu1 }
 0x1ed   : > { %v2245_v57 = vpack.c.bf16 %v1876_v52, %v1876_v52  ;;  %v1861_v44 = vadd.f32 %v2979_v49, %v1838_v18  ;;  %v1769_v4 = vadd.f32 %v1768_v26, %v1479_v10 }
 0x1ee   : > { %v1481_v7 = vpop.f32.mrf.mxu0  ;;  %v1789_v13 = vpop.f32.mrf.mxu1 }
 0x1ef   : > { %1957 = vst.msk [vmem:[%s2988_s27 + $0x18] sm:$0xf] %vm1950_vm1, %v2245_v57  ;;  %v1877_v62 = vmax.f32 %v1861_v44, 0.0  ;;  %v1839_v6 = vmax.f32 %v2939_v58, %v1769_v4 }
 0x1f0   : > { %v1482_v3 = vpop.f32.mrf.mxu0  ;;  %v1792_v20 = vpop.f32.mrf.mxu1 }
 0x1f1   : > { %v2246_v60 = vpack.c.bf16 %v1877_v62, %v1877_v62  ;;  %v1862_v51 = vadd.f32 %v2979_v49, %v1839_v6  ;;  %v1772_v11 = vadd.f32 %v1771_v46, %v1482_v3 }
 0x1f2   : > { %v1484_v9 = vpop.f32.mrf.mxu0  ;;  %v1794_v19 = vpop.f32.mrf.mxu1 }
 0x1f3   : > { %1958 = vst.msk [vmem:[%s2988_s27 + $0x1c] sm:$0xf] %vm1950_vm1, %v2246_v60  ;;  %v1878_v14 = vmax.f32 %v1862_v51, 0.0  ;;  %v1840_v34 = vmax.f32 %v2944_v1, %v1772_v11 }
 0x1f4   : > { %v1487_v31 = vpop.f32.mrf.mxu0  ;;  %v1795_v56 = vpop.f32.mrf.mxu1 }
 0x1f5   : > { %v2247_v26 = vpack.c.bf16 %v1878_v14, %v1878_v14  ;;  %v1863_v58 = vadd.f32 %v2979_v49, %v1840_v34  ;;  %v1777_v28 = vadd.f32 %v1776_v5, %v1487_v31 }
 0x1f6   : > { %v1489_v16 = vpop.f32.mrf.mxu0  ;;  %v1797_v23 = vpop.f32.mrf.mxu1 }
 0x1f7   : > { %1959 = vst.msk [vmem:[%s2988_s27 + $0x20] sm:$0xf] %vm1950_vm1, %v2247_v26  ;;  %v1879_v24 = vmax.f32 %v1863_v58, 0.0  ;;  %v1841_v33 = vmax.f32 %v2949_v8, %v1777_v28 }
 0x1f8   : > { %v1490_v39 = vpop.f32.mrf.mxu0 }
 0x1f9   : > { %v2248_v41 = vpack.c.bf16 %v1879_v24, %v1879_v24  ;;  %v1864_v1 = vadd.f32 %v2979_v49, %v1841_v33  ;;  %v1780_v46 = vadd.f32 %v1779_v45, %v1490_v39 }
 0x1fa   : > { %v1492_v36 = vpop.f32.mrf.mxu0 }
 0x1fb   : > { %1960 = vst.msk [vmem:[%s2988_s27 + $0x24] sm:$0xf] %vm1950_vm1, %v2248_v41  ;;  %v1880_v54 = vmax.f32 %v1864_v1, 0.0  ;;  %v1842_v27 = vmax.f32 %v2954_v15, %v1780_v46 }
 0x1fc   : > { %v1495_v32 = vpop.f32.mrf.mxu0 }
 0x1fd   : > { %v2249_v21 = vpack.c.bf16 %v1880_v54, %v1880_v54  ;;  %v1865_v50 = vadd.f32 %v2979_v49, %v1842_v27  ;;  %v1785_v8 = vadd.f32 %v1784_v53, %v1495_v32 }
 0x1fe   : > { %v1497_v43 = vpop.f32.mrf.mxu0 }
 0x1ff   : > { %1961 = vst.msk [vmem:[%s2988_s27 + $0x28] sm:$0xf] %vm1950_vm1, %v2249_v21  ;;  %v1881_v5 = vmax.f32 %v1865_v50, 0.0  ;;  %v1843_v2 = vmax.f32 %v2959_v22, %v1785_v8 }
 0x200   : > { %v1498_v30 = vpop.f32.mrf.mxu0 }
 0x201   : > { %v2250_v35 = vpack.c.bf16 %v1881_v5, %v1881_v5  ;;  %v1866_v17 = vadd.f32 %v2979_v49, %v1843_v2  ;;  %v1788_v40 = vadd.f32 %v1787_v25, %v1498_v30 }
 0x202   : > { %v1500_v42 = vpop.f32.mrf.mxu0 }
 0x203   : > { %1962 = vst.msk [vmem:[%s2988_s27 + $0x2c] sm:$0xf] %vm1950_vm1, %v2250_v35  ;;  %v1882_v15 = vmax.f32 %v1866_v17, 0.0  ;;  %v1844_v61 = vmax.f32 %v2964_v29, %v1788_v40 }
 0x204   : > { %v1503_v59 = vpop.f32.mrf.mxu0 }
 0x205   : > { %v2251_v45 = vpack.c.bf16 %v1882_v15, %v1882_v15  ;;  %v1867_v55 = vadd.f32 %v2979_v49, %v1844_v61  ;;  %v1793_v37 = vadd.f32 %v1792_v20, %v1503_v59 }
 0x206   : > { %v1505_v38 = vpop.f32.mrf.mxu0 }
 0x207   : > { %1963 = vst.msk [vmem:[%s2988_s27 + $0x30] sm:$0xf] %vm1950_vm1, %v2251_v45  ;;  %v1883_v22 = vmax.f32 %v1867_v55, 0.0  ;;  %v1845_v48 = vmax.f32 %v2969_v47, %v1793_v37 }
 0x208   : > { %v1506_v0 = vpop.f32.mrf.mxu0 }
 0x209   : > { %v2252_v52 = vpack.c.bf16 %v1883_v22, %v1883_v22  ;;  %v1868_v18 = vadd.f32 %v2979_v49, %v1845_v48  ;;  %v1796_v10 = vadd.f32 %v1795_v56, %v1506_v0 }
 0x20a   : > { %v1508_v53 = vpop.f32.mrf.mxu0 }
 0x20b   : > { %1964 = vst.msk [vmem:[%s2988_s27 + $0x34] sm:$0xf] %vm1950_vm1, %v2252_v52  ;;  %v1884_v29 = vmax.f32 %v1868_v18, 0.0  ;;  %v1846_v57 = vmax.f32 %v2974_v63, %v1796_v10 }
 0x20d   : > { %v2253_v44 = vpack.c.bf16 %v1884_v29, %v1884_v29  ;;  %v1869_v4 = vadd.f32 %v2979_v49, %v1846_v57 }
 0x20f   : > { %1965 = vst.msk [vmem:[%s2988_s27 + $0x38] sm:$0xf] %vm1950_vm1, %v2253_v44  ;;  %v1885_v7 = vmax.f32 %v1869_v4, 0.0 }
 0x211   : > { %v2254_v12 = vpack.c.bf16 %v1885_v7, %v1885_v7 }
 0x213   : > { %1966 = vst.msk [vmem:[%s2988_s27 + $0x3c] sm:$0xf] %vm1950_vm1, %v2254_v12 }
 0x214 PF: > { %s13_s12 = sadd.s32 1, %s2489_s12  }
 0x215   : > { %p10_p4 = scmp.ge.s32.totalorder %s13_s12, 4  }
 0x217   :  { %12 = sbr.rel (!%p10_p4) target bundleno = 1 (0x1), region = 62 }

// kernel: tcn_lstm_forward.7
= control target key start
LH: loop header
LB: loop body
LE: loop exit
PB: predicated region body
PF: predicated region fallthrough
CT: control target
= control target key end

     0   :  { %s2007_s12 = smov 0   ;;  %s2375_s0 = inlined_call_operand.vmem [shape: bf16[2,128,864], index: 0, kind: input, shape index: {}]   ;;  %s2376_s1 = inlined_call_operand.vmem [shape: bf16[864,64], index: 1, kind: input, shape index: {}]   ;;  %s2377_s2 = inlined_call_operand.vmem [shape: f32[1,64], index: 2, kind: input, shape index: {}]   ;;  %s2378_s3 = inlined_call_operand.vmem [shape: bf16[2,32,64], index: 3, kind: output, shape index: {}]  }
   0x1 LB: > { %s1464_s13 = sadd.s32 4294967295, %s1985_s12   ;;  %p1468_p0 = scmp.ge.s32.totalorder %s1985_s12, 1  ;;  %s1985_s12 = sphi %s2007_s12, %s13_s12  }
   0x2   : > { %p137_p1 = scmp.lt.s32.totalorder %s1985_s12, 3 }
   0x4   : > { %p138_p2 = pnand %p1468_p0, %p137_p1 }
   0x6   : > { %141 = sbr.rel (%p138_p2) target bundleno = 379 (0x17b), region = 32 }
   0xb   : > { %v1845_v0 = vld [vmem:[%s2376_s1 + $0x78] sm:$0xff]   ;;  %v1849_v4 = vld [vmem:[%s2376_s1 + $0x70] sm:$0xff]   ;;  %v1853_v8 = vld [vmem:[%s2376_s1 + $0x68] sm:$0xff]   ;;  %p161_p3 = scmp.lt.s32.totalorder %s1464_s13, 1  ;;  %vm948_vm0 = vcmask 785408   ;;  %vm1404_vm1 = vcmask 519168  }
   0xc   : > { %v1846_v1 = vld [vmem:[%s2376_s1 + $0xf8] sm:$0xff]   ;;  %1602 = vmatprep.subr.bf16.mxu0 %v1845_v0  ;;  %v1850_v5 = vld [vmem:[%s2376_s1 + $0xf0] sm:$0xff]   ;;  %v1854_v9 = vld [vmem:[%s2376_s1 + $0xe8] sm:$0xff]  }
   0xd   : > { %v1847_v2 = vld [vmem:[%s2376_s1 + $0x38] sm:$0xff]   ;;  %1666 = vmatprep.subr.bf16.mxu1 %v1846_v1  ;;  %v1851_v6 = vld [vmem:[%s2376_s1 + $0x30] sm:$0xff]   ;;  %v1855_v10 = vld [vmem:[%s2376_s1 + $0x28] sm:$0xff]   ;;  %s2386_s13 = smov (!%p161_p3, %s1464_s13), 1 }
   0xe   : > { %v1848_v3 = vld [vmem:[%s2376_s1 + $0xb8] sm:$0xff]   ;;  %1603 = vmatpush3.bf16.msra.mxu0 %v1847_v2  ;;  %v1852_v7 = vld [vmem:[%s2376_s1 + $0xb0] sm:$0xff]   ;;  %v1856_v11 = vld [vmem:[%s2376_s1 + $0xa8] sm:$0xff]   ;;  %s1836_s16 = smul.u32 448, %s2386_s13  ;;  %s1597_s29 = sshll.u32 %s2386_s13, 4 }
   0xf   : > { %1667 = vmatpush3.bf16.msra.mxu1 %v1848_v3  ;;  %1604 = vmatprep.subr.bf16.mxu0 %v1849_v4  ;;  %v1857_v12 = vld [vmem:[%s2376_s1 + $0x60] sm:$0xff]   ;;  %v1861_v16 = vld [vmem:[%s2376_s1 + $0x58] sm:$0xff]   ;;  %v1865_v20 = vld [vmem:[%s2376_s1 + $0x50] sm:$0xff]   ;;  %s170_s5 = scalar_lea.vmem %s2378_s3, %s1597_s29 }
  0x10   : > { %1668 = vmatprep.subr.bf16.mxu1 %v1850_v5  ;;  %v1858_v13 = vld [vmem:[%s2376_s1 + $0xe0] sm:$0xff]   ;;  %v1862_v17 = vld [vmem:[%s2376_s1 + $0xd8] sm:$0xff]   ;;  %v1866_v21 = vld [vmem:[%s2376_s1 + $0xd0] sm:$0xff]   ;;  %s2115_s27 = scalar_lea.vmem %s2375_s0, %s1836_s16 }
  0x11   : > { %v1859_v14 = vld [vmem:[%s2376_s1 + $0x20] sm:$0xff]   ;;  %v1863_v18 = vld [vmem:[%s2376_s1 + $0x18] sm:$0xff]   ;;  %v1867_v22 = vld [vmem:[%s2376_s1 + $0x10] sm:$0xff]  }
  0x12   : > { %1605 = vmatpush3.bf16.msra.mxu0 %v1851_v6  ;;  %v1860_v15 = vld [vmem:[%s2376_s1 + $0xa0] sm:$0xff]   ;;  %v1864_v19 = vld [vmem:[%s2376_s1 + $0x98] sm:$0xff]   ;;  %v1868_v23 = vld [vmem:[%s2376_s1 + $0x90] sm:$0xff]  }
  0x13   : > { %1669 = vmatpush3.bf16.msra.mxu1 %v1852_v7  ;;  %1606 = vmatprep.subr.bf16.mxu0 %v1853_v8  ;;  %v1869_v24 = vld [vmem:[%s2376_s1 + $0x48] sm:$0xff]   ;;  %v1873_v28 = vld [vmem:[%s2376_s1 + $0x40] sm:$0xff]   ;;  %v1883_v36 = vld [vmem:[%s2376_s1 + $0x178] sm:$0xff]  }
  0x14   : > { %1670 = vmatprep.subr.bf16.mxu1 %v1854_v9  ;;  %v1870_v25 = vld [vmem:[%s2376_s1 + $0xc8] sm:$0xff]   ;;  %v1874_v29 = vld [vmem:[%s2376_s1 + $0xc0] sm:$0xff]   ;;  %v1884_v37 = vld [vmem:[%s2376_s1 + $0x138] sm:$0xff]  }
  0x15   : > { %v1871_v26 = vld [vmem:[%s2376_s1 + $0x8] sm:$0xff]   ;;  %v1875_v30 = vld [vmem:[%s2376_s1] sm:$0xff]   ;;  %v1885_v38 = vld [vmem:[%s2115_s27 + $0x3c] ss:$28 sps:$4 sm:$0xff]  }
  0x16   : > { %1607 = vmatpush3.bf16.msra.mxu0 %v1855_v10  ;;  %v1872_v27 = vld [vmem:[%s2376_s1 + $0x88] sm:$0xff]   ;;  %v1876_v31 = vld [vmem:[%s2376_s1 + $0x80] sm:$0xff]   ;;  %v1889_v40 = vld [vmem:[%s2115_s27 + $0x38] ss:$28 sps:$4 sm:$0xff]  }
  0x17   : > { %1671 = vmatpush3.bf16.msra.mxu1 %v1856_v11  ;;  %1608 = vmatprep.subr.bf16.mxu0 %v1857_v12  ;;  %v1877_v32 = vld [vmem:[%s2115_s27] ss:$28 sps:$4 sm:$0xff]   ;;  %v1880_v34 = vld [vmem:[%s2115_s27 + $0x8] ss:$28 sps:$4 sm:$0xff]   ;;  %v1891_v42 = vld [vmem:[%s2376_s1 + $0x170] sm:$0xff]  }
  0x18   : > { %1672 = vmatprep.subr.bf16.mxu1 %v1858_v13  ;;  %v1879_v33 = vld [vmem:[%s2115_s27 + $0x4] ss:$28 sps:$4 sm:$0xff]   ;;  %v1882_v35 = vld [vmem:[%s2115_s27 + $0xc] ss:$28 sps:$4 sm:$0xff]   ;;  %v1892_v43 = vld [vmem:[%s2376_s1 + $0x130] sm:$0xff]  }
  0x19   : > { %1005 = vmatprep.mubr.bf16.mxu0 %v1879_v33  ;;  %1102 = vmatprep.mubr.bf16.mxu1 %v1882_v35  ;;  %v1887_v39 = vld [vmem:[%s2115_s27 + $0x44] ss:$28 sps:$4 sm:$0xff]   ;;  %v1893_v44 = vld [vmem:[%s2115_s27 + $0x74] ss:$28 sps:$4 sm:$0xff]   ;;  %v1895_v45 = vld [vmem:[%s2115_s27 + $0x7c] ss:$28 sps:$4 sm:$0xff]  }
  0x1a   : > { %1609 = vmatpush3.bf16.msra.mxu0 %v1859_v14  ;;  %v1890_v41 = vld [vmem:[%s2115_s27 + $0x40] ss:$28 sps:$4 sm:$0xff]   ;;  %v1899_v46 = vld [vmem:[%s2376_s1 + $0x168] sm:$0xff]   ;;  %v1898_v49 = vld [vmem:[%s2115_s27 + $0x78] ss:$28 sps:$4 sm:$0xff]  }
  0x1b   : > { %1673 = vmatpush3.bf16.msra.mxu1 %v1860_v15  ;;  %1610 = vmatprep.subr.bf16.mxu0 %v1861_v16  ;;  %v1900_v47 = vld [vmem:[%s2376_s1 + $0x128] sm:$0xff]   ;;  %v1903_v51 = vld [vmem:[%s2115_s27 + $0xb4] ss:$28 sps:$4 sm:$0xff]   ;;  %v1907_v52 = vld [vmem:[%s2376_s1 + $0x160] sm:$0xff]  }
  0x1c   : > { %1674 = vmatprep.subr.bf16.mxu1 %v1862_v17  ;;  %v1897_v48 = vld [vmem:[%s2115_s27 + $0x70] ss:$28 sps:$4 sm:$0xff]   ;;  %v1908_v53 = vld [vmem:[%s2376_s1 + $0x120] sm:$0xff]   ;;  %v1915_v55 = vld [vmem:[%s2376_s1 + $0x158] sm:$0xff]  }
  0x1d   : > { %v1901_v50 = vld [vmem:[%s2115_s27 + $0xac] ss:$28 sps:$4 sm:$0xff]   ;;  %v1916_v57 = vld [vmem:[%s2376_s1 + $0x118] sm:$0xff]   ;;  %v1909_v59 = vld [vmem:[%s2115_s27 + $0xe4] ss:$28 sps:$4 sm:$0xff]  }
  0x1e   : > { %1611 = vmatpush3.bf16.msra.mxu0 %v1863_v18  ;;  %v1905_v54 = vld [vmem:[%s2115_s27 + $0xa8] ss:$28 sps:$4 sm:$0xff]   ;;  %v1906_v56 = vld [vmem:[%s2115_s27 + $0xb0] ss:$28 sps:$4 sm:$0xff]   ;;  %v1913_v63 = vld [vmem:[%s2115_s27 + $0xe0] ss:$28 sps:$4 sm:$0xff]  }
  0x1f   : > { %1675 = vmatpush3.bf16.msra.mxu1 %v1864_v19  ;;  %1612 = vmatprep.subr.bf16.mxu0 %v1865_v20  ;;  %v1917_v58 = vld [vmem:[%s2376_s1 + $0x1a8] sm:$0xff]   ;;  %v1924_v61 = vld [vmem:[%s2376_s1 + $0x150] sm:$0xff]   ;;  %v1930_v1 = vld [vmem:[%s2376_s1 + $0x1a0] sm:$0xff]  }
  0x20   : > { %1676 = vmatprep.subr.bf16.mxu1 %v1866_v21  ;;  %v1911_v60 = vld [vmem:[%s2115_s27 + $0xec] ss:$28 sps:$4 sm:$0xff]   ;;  %v1925_v62 = vld [vmem:[%s2376_s1 + $0x110] sm:$0xff]   ;;  %v1918_v2 = vld [vmem:[%s2115_s27 + $0x11c] ss:$28 sps:$4 sm:$0xff]  }
  0x21   : > { %v1914_v0 = vld [vmem:[%s2115_s27 + $0xe8] ss:$28 sps:$4 sm:$0xff]   ;;  %v1935_v6 = vld [vmem:[%s2376_s1 + $0x198] sm:$0xff]   ;;  %v1926_v9 = vld [vmem:[%s2115_s27 + $0x154] ss:$28 sps:$4 sm:$0xff]  }
  0x22   : > { %1613 = vmatpush3.bf16.msra.mxu0 %v1867_v22  ;;  %v1920_v3 = vld [vmem:[%s2115_s27 + $0x124] ss:$28 sps:$4 sm:$0xff]   ;;  %v1933_v4 = vld [vmem:[%s2376_s1 + $0x148] sm:$0xff]   ;;  %v1922_v7 = vld [vmem:[%s2115_s27 + $0x118] ss:$28 sps:$4 sm:$0xff]  }
  0x23   : > { %1677 = vmatpush3.bf16.msra.mxu1 %v1868_v23  ;;  %1614 = vmatprep.subr.bf16.mxu0 %v1869_v24  ;;  %v1934_v5 = vld [vmem:[%s2376_s1 + $0x108] sm:$0xff]   ;;  %v1923_v8 = vld [vmem:[%s2115_s27 + $0x120] ss:$28 sps:$4 sm:$0xff]   ;;  %v1943_v12 = vld [vmem:[%s2376_s1 + $0x190] sm:$0xff]  }
  0x24   : > { %1678 = vmatprep.subr.bf16.mxu1 %v1870_v25  ;;  %v1942_v10 = vld [vmem:[%s2376_s1 + $0x140] sm:$0xff]   ;;  %v1928_v11 = vld [vmem:[%s2115_s27 + $0x15c] ss:$28 sps:$4 sm:$0xff]   ;;  %v1945_v14 = vld [vmem:[%s2376_s1 + $0x188] sm:$0xff]  }
  0x25   : > { %v1944_v13 = vld [vmem:[%s2376_s1 + $0x100] sm:$0xff]   ;;  %v1931_v16 = vld [vmem:[%s2115_s27 + $0x150] ss:$28 sps:$4 sm:$0xff]   ;;  %v1932_v17 = vld [vmem:[%s2115_s27 + $0x158] ss:$28 sps:$4 sm:$0xff]  }
  0x26   : > { %1615 = vmatpush3.bf16.msra.mxu0 %v1871_v26  ;;  %v1949_v15 = vld [vmem:[%s2376_s1 + $0x180] sm:$0xff]   ;;  %v1936_v18 = vld [vmem:[%s2115_s27 + $0x18c] ss:$28 sps:$4 sm:$0xff]   ;;  %v1938_v19 = vld [vmem:[%s2115_s27 + $0x194] ss:$28 sps:$4 sm:$0xff]  }
  0x27   : > { %1679 = vmatpush3.bf16.msra.mxu1 %v1872_v27  ;;  %1616 = vmatprep.subr.bf16.mxu0 %v1873_v28  ;;  %v1940_v20 = vld [vmem:[%s2115_s27 + $0x188] ss:$28 sps:$4 sm:$0xff]   ;;  %v1941_v21 = vld [vmem:[%s2115_s27 + $0x190] ss:$28 sps:$4 sm:$0xff]   ;;  %v1950_v23 = vld [vmem:[%s2115_s27 + $0x18] ss:$28 sps:$4 sm:$0xff]  }
  0x28   : > { %1680 = vmatprep.subr.bf16.mxu1 %v1874_v29  ;;  %v1948_v22 = vld [vmem:[%s2115_s27 + $0x14] ss:$28 sps:$4 sm:$0xff]   ;;  %v1952_v26 = vld [vmem:[%s2115_s27 + $0x4c] ss:$28 sps:$4 sm:$0xff]   ;;  %v1955_v29 = vld [vmem:[%s2115_s27 + $0x84] ss:$28 sps:$4 sm:$0xff]  }
  0x29   : > { %v1946_v24 = vld [vmem:[%s2115_s27 + $0x10] ss:$28 sps:$4 sm:$0xff]   ;;  %v1958_v27 = vld [vmem:[%s2115_s27 + $0x88] ss:$28 sps:$4 sm:$0xff]   ;;  %v1960_v33 = vld [vmem:[%s2115_s27 + $0xbc] ss:$28 sps:$4 sm:$0xff]  }
  0x2a   : > { %1617 = vmatpush3.bf16.msra.mxu0 %v1875_v30  ;;  %v1951_v25 = vld [vmem:[%s2115_s27 + $0x50] ss:$28 sps:$4 sm:$0xff]   ;;  %v1954_v28 = vld [vmem:[%s2115_s27 + $0x48] ss:$28 sps:$4 sm:$0xff]   ;;  %v1959_v30 = vld [vmem:[%s2115_s27 + $0xc0] ss:$28 sps:$4 sm:$0xff]  }
  0x2b   : > { %1681 = vmatpush3.bf16.msra.mxu1 %v1876_v31  ;;  %1730 = vmatprep.subr.bf16.mxu0 %v1883_v36  ;;  %v1966_v31 = vld [vmem:[%s2115_s27 + $0xf8] ss:$28 sps:$4 sm:$0xff]   ;;  %v1974_v35 = vld [vmem:[%s2115_s27 + $0x168] ss:$28 sps:$4 sm:$0xff]  }
  0x2c   : > { %1808 = vmatprep.subr.bf16.mxu1 %v1917_v58  ;;  %v1962_v36 = vld [vmem:[%s2115_s27 + $0xb8] ss:$28 sps:$4 sm:$0xff]  }
  0x2d   : > { %1006 = vmatmul.mubr.bf16.vlgmr.msra.gmra.mxu0 %v1877_v32  ;;  %v1957_v32 = vld [vmem:[%s2115_s27 + $0x80] ss:$28 sps:$4 sm:$0xff]  }
  0x2e   : > { %1103 = vmatmul.mubr.bf16.vlgmr.msra.gmra.mxu1 %v1880_v34  ;;  %1731 = vmatpush3.bf16.msra.mxu0 %v1884_v37  ;;  %v1967_v34 = vld [vmem:[%s2115_s27 + $0x130] ss:$28 sps:$4 sm:$0xff]  }
  0x2f   : > { %1013 = vmatprep.mubr.bf16.mxu0 %v1885_v38  ;;  %1110 = vmatprep.mubr.bf16.mxu1 %v1887_v39  ;;  %v1963_v37 = vld [vmem:[%s2115_s27 + $0xf4] ss:$28 sps:$4 sm:$0xff]   ;;  %v1975_v38 = vld [vmem:[%s2115_s27 + $0x1a0] ss:$28 sps:$4 sm:$0xff]  }
  0x30   : > { %1732 = vmatprep.subr.bf16.mxu0 %v1891_v42  ;;  %1809 = vmatpush3.bf16.msra.mxu1 %v1917_v58  ;;  %v1965_v39 = vld [vmem:[%s2115_s27 + $0xf0] ss:$28 sps:$4 sm:$0xff]   ;;  %v1971_v42 = vld [vmem:[%s2115_s27 + $0x164] ss:$28 sps:$4 sm:$0xff]  }
  0x31   : > { %1810 = vmatprep.subr.bf16.mxu1 %v1930_v1 }
  0x32   : > { %1733 = vmatpush3.bf16.msra.mxu0 %v1892_v43  ;;  %v1973_v43 = vld [vmem:[%s2115_s27 + $0x160] ss:$28 sps:$4 sm:$0xff]  }
  0x33   : > { %1734 = vmatprep.subr.bf16.mxu0 %v1899_v46 }
  0x34   : > { %1811 = vmatpush3.bf16.msra.mxu1 %v1930_v1 }
  0x35   : > { %1014 = vmatmul.mubr.bf16.gmra.mxu0 %v1889_v40  ;;  %1812 = vmatprep.subr.bf16.mxu1 %v1935_v6  ;;  %v1968_v40 = vld [vmem:[%s2115_s27 + $0x12c] ss:$28 sps:$4 sm:$0xff]  }
  0x36   : > { %1111 = vmatmul.mubr.bf16.gmra.mxu1 %v1890_v41  ;;  %1021 = vmatprep.mubr.bf16.mxu0 %v1893_v44  ;;  %v1970_v41 = vld [vmem:[%s2115_s27 + $0x128] ss:$28 sps:$4 sm:$0xff]   ;;  %v1976_v44 = vld [vmem:[%s2115_s27 + $0x19c] ss:$28 sps:$4 sm:$0xff]  }
  0x37   : > { %1118 = vmatprep.mubr.bf16.mxu1 %v1895_v45  ;;  %1735 = vmatpush3.bf16.msra.mxu0 %v1900_v47  ;;  %v1978_v45 = vld [vmem:[%s2115_s27 + $0x198] ss:$28 sps:$4 sm:$0xff]  }
  0x38   : > { %1736 = vmatprep.subr.bf16.mxu0 %v1907_v52  ;;  %1813 = vmatpush3.bf16.msra.mxu1 %v1935_v6 }
  0x39   : > { %1814 = vmatprep.subr.bf16.mxu1 %v1943_v12 }
  0x3b   : > { %1737 = vmatpush3.bf16.msra.mxu0 %v1908_v53 }
  0x3c   : > { %1738 = vmatprep.subr.bf16.mxu0 %v1915_v55  ;;  %1815 = vmatpush3.bf16.msra.mxu1 %v1943_v12 }
  0x3d   : > { %1022 = vmatmul.mubr.bf16.gmra.mxu0 %v1897_v48  ;;  %1816 = vmatprep.subr.bf16.mxu1 %v1945_v14 }
  0x3e   : > { %1119 = vmatmul.mubr.bf16.gmra.mxu1 %v1898_v49  ;;  %1029 = vmatprep.mubr.bf16.mxu0 %v1901_v50 }
  0x3f   : > { %1126 = vmatprep.mubr.bf16.mxu1 %v1903_v51  ;;  %1739 = vmatpush3.bf16.msra.mxu0 %v1916_v57 }
  0x40   : > { %1740 = vmatprep.subr.bf16.mxu0 %v1924_v61  ;;  %1817 = vmatpush3.bf16.msra.mxu1 %v1945_v14 }
  0x41   : > { %1818 = vmatprep.subr.bf16.mxu1 %v1949_v15 }
  0x43   : > { %1741 = vmatpush3.bf16.msra.mxu0 %v1925_v62 }
  0x44   : > { %1742 = vmatprep.subr.bf16.mxu0 %v1933_v4  ;;  %1819 = vmatpush3.bf16.msra.mxu1 %v1949_v15 }
  0x45   : > { %1030 = vmatmul.mubr.bf16.gmra.mxu0 %v1905_v54 }
  0x46   : > { %1127 = vmatmul.mubr.bf16.gmra.mxu1 %v1906_v56  ;;  %1037 = vmatprep.mubr.bf16.mxu0 %v1909_v59 }
  0x47   : > { %1134 = vmatprep.mubr.bf16.mxu1 %v1911_v60  ;;  %1743 = vmatpush3.bf16.msra.mxu0 %v1934_v5 }
  0x48   : > { %1744 = vmatprep.subr.bf16.mxu0 %v1942_v10 }
  0x4b   : > { %1745 = vmatpush3.bf16.msra.mxu0 %v1944_v13 }
  0x4d   : > { %1038 = vmatmul.mubr.bf16.gmra.mxu0 %v1913_v63 }
  0x4e   : > { %1135 = vmatmul.mubr.bf16.gmra.mxu1 %v1914_v0  ;;  %1045 = vmatprep.mubr.bf16.mxu0 %v1918_v2 }
  0x4f   : > { %1142 = vmatprep.mubr.bf16.mxu1 %v1920_v3 }
  0x55   : > { %1046 = vmatmul.mubr.bf16.gmra.mxu0 %v1922_v7 }
  0x56   : > { %1143 = vmatmul.mubr.bf16.gmra.mxu1 %v1923_v8  ;;  %1053 = vmatprep.mubr.bf16.mxu0 %v1926_v9 }
  0x57   : > { %1150 = vmatprep.mubr.bf16.mxu1 %v1928_v11 }
  0x5d   : > { %1054 = vmatmul.mubr.bf16.gmra.mxu0 %v1931_v16 }
  0x5e   : > { %1151 = vmatmul.mubr.bf16.gmra.mxu1 %v1932_v17  ;;  %1061 = vmatprep.mubr.bf16.mxu0 %v1936_v18 }
  0x5f   : > { %1158 = vmatprep.mubr.bf16.mxu1 %v1938_v19 }
  0x65   : > { %1062 = vmatmul.mubr.bf16.gmra.mxu0 %v1940_v20 }
  0x66   : > { %1159 = vmatmul.mubr.bf16.gmra.mxu1 %v1941_v21  ;;  %1199 = vmatprep.mubr.bf16.mxu0 %v1948_v22 }
  0x67   : > { %1820 = vmatprep.mubr.msk.bf16.mxu1 %vm948_vm0, %v1950_v23 }
  0x6d   : > { %1200 = vmatmul.mubr.bf16.vlgmr.msra.gmra.mxu0 %v1946_v24 }
  0x6e   : > { %1821 = vmatmul.mubr.msk.bf16.vlgmr.msra.gmra.mxu1 %vm948_vm0, %v1951_v25  ;;  %1207 = vmatprep.mubr.bf16.mxu0 %v1952_v26 }
  0x6f   : > { %1824 = vmatprep.mubr.msk.bf16.mxu1 %vm948_vm0, %v1958_v27 }
  0x75   : > { %1208 = vmatmul.mubr.bf16.gmra.mxu0 %v1954_v28 }
  0x76   : > { %1215 = vmatprep.mubr.bf16.mxu0 %v1955_v29  ;;  %1825 = vmatmul.mubr.msk.bf16.gmra.mxu1 %vm948_vm0, %v1959_v30 }
  0x77   : > { %1828 = vmatprep.mubr.msk.bf16.mxu1 %vm948_vm0, %v1966_v31 }
  0x7d   : > { %1216 = vmatmul.mubr.bf16.gmra.mxu0 %v1957_v32 }
  0x7e   : > { %1223 = vmatprep.mubr.bf16.mxu0 %v1960_v33  ;;  %1829 = vmatmul.mubr.msk.bf16.gmra.mxu1 %vm948_vm0, %v1967_v34 }
  0x7f   : > { %1832 = vmatprep.mubr.msk.bf16.mxu1 %vm948_vm0, %v1974_v35 }
  0x85   : > { %1224 = vmatmul.mubr.bf16.gmra.mxu0 %v1962_v36 }
  0x86   : > { %1231 = vmatprep.mubr.bf16.mxu0 %v1963_v37  ;;  %1833 = vmatmul.mubr.msk.bf16.gmra.mxu1 %vm948_vm0, %v1975_v38 }
  0x8d   : > { %1232 = vmatmul.mubr.bf16.gmra.mxu0 %v1965_v39 }
  0x8e   : > { %1239 = vmatprep.mubr.bf16.mxu0 %v1968_v40 }
  0x95   : > { %1240 = vmatmul.mubr.bf16.gmra.mxu0 %v1970_v41 }
  0x96   : > { %1247 = vmatprep.mubr.bf16.mxu0 %v1971_v42 }
  0x9d   : > { %1248 = vmatmul.mubr.bf16.gmra.mxu0 %v1973_v43 }
  0x9e   : > { %1255 = vmatprep.mubr.bf16.mxu0 %v1976_v44 }
  0xa5   : > { %1256 = vmatmul.mubr.bf16.gmra.mxu0 %v1978_v45 }
  0xed   : > { %v1618_v46 = vpop.f32.mrf.mxu0 }
  0xee   : > { %v1682_v47 = vpop.f32.mrf.mxu1 }
  0xef   : > { %v1619_v48 = vpop.f32.mrf.mxu0 }
  0xf0   : > { %v1620_v49 = vadd.f32 %v1619_v48, %v1618_v46  ;;  %v1683_v50 = vpop.f32.mrf.mxu1 }
  0xf1   : > { %v1684_v51 = vadd.f32 %v1683_v50, %v1682_v47  ;;  %v1621_v52 = vpop.f32.mrf.mxu0 }
  0xf2   : > { %v1685_v53 = vpop.f32.mrf.mxu1 }
  0xf3   : > { %v2253_v54 = vadd.f32 %v1684_v51, %v1620_v49  ;;  %v1622_v55 = vpop.f32.mrf.mxu0 }
  0xf4   : > { %v1623_v56 = vadd.f32 %v1622_v55, %v1621_v52  ;;  %v1686_v57 = vpop.f32.mrf.mxu1 }
  0xf5   : > { %v1687_v58 = vadd.f32 %v1686_v57, %v1685_v53  ;;  %v1624_v59 = vpop.f32.mrf.mxu0 }
  0xf6   : > { %v1688_v60 = vpop.f32.mrf.mxu1 }
  0xf7   : > { %v2255_v61 = vadd.f32 %v1687_v58, %v1623_v56  ;;  %v1625_v62 = vpop.f32.mrf.mxu0 }
  0xf8   : > { %v1626_v63 = vadd.f32 %v1625_v62, %v1624_v59  ;;  %v1689_v0 = vpop.f32.mrf.mxu1 }
  0xf9   : > { %v1690_v1 = vadd.f32 %v1689_v0, %v1688_v60  ;;  %v1627_v2 = vpop.f32.mrf.mxu0 }
  0xfa   : > { %v1691_v3 = vpop.f32.mrf.mxu1 }
  0xfb   : > { %v2257_v4 = vadd.f32 %v1690_v1, %v1626_v63  ;;  %v1628_v5 = vpop.f32.mrf.mxu0 }
  0xfc   : > { %v1629_v6 = vadd.f32 %v1628_v5, %v1627_v2  ;;  %v1692_v7 = vpop.f32.mrf.mxu1 }
  0xfd   : > { %v1693_v8 = vadd.f32 %v1692_v7, %v1691_v3  ;;  %v1630_v9 = vpop.f32.mrf.mxu0 }
  0xfe   : > { %v1694_v10 = vpop.f32.mrf.mxu1 }
  0xff   : > { %v2259_v11 = vadd.f32 %v1693_v8, %v1629_v6  ;;  %v1631_v12 = vpop.f32.mrf.mxu0 }
 0x100   : > { %v1632_v13 = vadd.f32 %v1631_v12, %v1630_v9  ;;  %v1695_v14 = vpop.f32.mrf.mxu1 }
 0x101   : > { %v1696_v15 = vadd.f32 %v1695_v14, %v1694_v10  ;;  %v1633_v16 = vpop.f32.mrf.mxu0 }
 0x102   : > { %v1697_v17 = vpop.f32.mrf.mxu1 }
 0x103   : > { %v2261_v18 = vadd.f32 %v1696_v15, %v1632_v13  ;;  %v1634_v19 = vpop.f32.mrf.mxu0 }
 0x104   : > { %v1635_v20 = vadd.f32 %v1634_v19, %v1633_v16  ;;  %v1698_v21 = vpop.f32.mrf.mxu1 }
 0x105   : > { %v1699_v22 = vadd.f32 %v1698_v21, %v1697_v17  ;;  %v1636_v23 = vpop.f32.mrf.mxu0 }
 0x106   : > { %v1700_v24 = vpop.f32.mrf.mxu1 }
 0x107   : > { %v2263_v25 = vadd.f32 %v1699_v22, %v1635_v20  ;;  %v1637_v26 = vpop.f32.mrf.mxu0 }
 0x108   : > { %v1638_v27 = vadd.f32 %v1637_v26, %v1636_v23  ;;  %v1701_v28 = vpop.f32.mrf.mxu1 }
 0x109   : > { %v1702_v29 = vadd.f32 %v1701_v28, %v1700_v24  ;;  %v1639_v30 = vpop.f32.mrf.mxu0 }
 0x10a   : > { %v1703_v31 = vpop.f32.mrf.mxu1 }
 0x10b   : > { %v2265_v32 = vadd.f32 %v1702_v29, %v1638_v27  ;;  %v1640_v33 = vpop.f32.mrf.mxu0 }
 0x10c   : > { %v1641_v34 = vadd.f32 %v1640_v33, %v1639_v30  ;;  %v1704_v35 = vpop.f32.mrf.mxu1 }
 0x10d   : > { %v1705_v36 = vadd.f32 %v1704_v35, %v1703_v31  ;;  %v1642_v37 = vpop.f32.mrf.mxu0 }
 0x10e   : > { %v2267_v38 = vpop.f32.mrf.mxu1 }
 0x10f   : > { %v2269_v39 = vadd.f32 %v1705_v36, %v1641_v34  ;;  %v1643_v40 = vpop.f32.mrf.mxu0 }
 0x110   : > { %v2271_v41 = vadd.f32 %v1643_v40, %v1642_v37  ;;  %v2273_v42 = vpop.f32.mrf.mxu1 }
 0x111   : > { %v1645_v43 = vpop.f32.mrf.mxu0 }
 0x112   : > { %v2275_v44 = vpop.f32.mrf.mxu1 }
 0x113   : > { %v1646_v45 = vpop.f32.mrf.mxu0 }
 0x114   : > { %v2277_v46 = vadd.f32 %v1646_v45, %v1645_v43  ;;  %v2279_v47 = vpop.f32.mrf.mxu1 }
 0x115   : > { %v1648_v48 = vpop.f32.mrf.mxu0 }
 0x116   : > { %v2281_v49 = vpop.f32.mrf.mxu1 }
 0x117   : > { %v1649_v50 = vpop.f32.mrf.mxu0 }
 0x118   : > { %v2283_v51 = vadd.f32 %v1649_v50, %v1648_v48  ;;  %v2285_v52 = vpop.f32.mrf.mxu1 }
 0x119   : > { %v1651_v53 = vpop.f32.mrf.mxu0 }
 0x11a   : > { %v2287_v55 = vpop.f32.mrf.mxu1 }
 0x11b   : > { %v1652_v56 = vpop.f32.mrf.mxu0 }
 0x11c   : > { %v2289_v57 = vadd.f32 %v1652_v56, %v1651_v53  ;;  %v2291_v58 = vpop.f32.mrf.mxu1 }
 0x11d   : > { %v2293_v59 = vpop.f32.mrf.mxu0 }
 0x11e   : > { %v2295_v60 = vpop.f32.mrf.mxu1 }
 0x11f   : > { %v2297_v62 = vpop.f32.mrf.mxu0 }
 0x120   : > { %v2299_v63 = vpop.f32.mrf.mxu1 }
 0x121   : > { %v2301_v0 = vpop.f32.mrf.mxu0 }
 0x122   : > { %v2303_v1 = vpop.f32.mrf.mxu1 }
 0x123   : > { %v2305_v2 = vpop.f32.mrf.mxu0 }
 0x124   : > { %v2307_v3 = vpop.f32.mrf.mxu1 }
 0x125   : > { %v2309_v5 = vpop.f32.mrf.mxu0 }
 0x126   : > { %v2311_v6 = vpop.f32.mrf.mxu1 }
 0x127   : > { %v2313_v7 = vpop.f32.mrf.mxu0 }
 0x128   : > { %v2315_v8 = vpop.f32.mrf.mxu1 }
 0x129   : > { %v2317_v9 = vpop.f32.mrf.mxu0 }
 0x12a   : > { %v2319_v10 = vpop.f32.mrf.mxu1 }
 0x12b   : > { %2379 = vst [vmem:[#allocation2_spill] sm:$0xff] %v2319_v10  ;;  %v2321_v12 = vpop.f32.mrf.mxu0 }
 0x12c   : > { %2380 = vst [vmem:[#allocation3_spill] sm:$0xff] %v2321_v12  ;;  %v2323_v13 = vpop.f32.mrf.mxu1 }
 0x12d   : > { %2381 = vst [vmem:[#allocation4_spill] sm:$0xff] %v2323_v13  ;;  %v1746_v14 = vpop.f32.mrf.mxu0 }
 0x12e   : > { %v1822_v15 = vpop.f32.mrf.mxu1 }
 0x12f   : > { %v1747_v16 = vpop.f32.mrf.mxu0 }
 0x130   : > { %v1298_v17 = vpop.f32.mrf.mxu1  ;;  %v1748_v29 = vadd.f32 %v1747_v16, %v1746_v14 }
 0x131   : > { %v1749_v19 = vpop.f32.mrf.mxu0 }
 0x132   : > { %v1823_v21 = vpop.f32.mrf.mxu1  ;;  %v1202_v35 = vadd.f32 %v1748_v29, %v2253_v54 }
 0x133   : > { %v1750_v20 = vpop.f32.mrf.mxu0 }
 0x134   : > { %v1301_v24 = vpop.f32.mrf.mxu1  ;;  %v1751_v33 = vadd.f32 %v1750_v20, %v1749_v19  ;;  %v1299_v50 = vadd.f32 %v1298_v17, %v1202_v35 }
 0x135   : > { %v1752_v22 = vpop.f32.mrf.mxu0 }
 0x136   : > { %v1826_v27 = vpop.f32.mrf.mxu1  ;;  %v1205_v45 = vadd.f32 %v1751_v33, %v2255_v61 }
 0x137   : > { %v1753_v23 = vpop.f32.mrf.mxu0 }
 0x138   : > { %v1314_v31 = vpop.f32.mrf.mxu1  ;;  %v1754_v53 = vadd.f32 %v1753_v23, %v1752_v22  ;;  %v1302_v20 = vadd.f32 %v1301_v24, %v1205_v45  ;;  %v1708_v22 = vadd.f32 %v2273_v42, %v2267_v38 }
 0x139   : > { %v1755_v26 = vpop.f32.mrf.mxu0 }
 0x13a   : > { %v1827_v40 = vpop.f32.mrf.mxu1  ;;  %v1210_v54 = vadd.f32 %v1754_v53, %v2257_v4 }
 0x13b   : > { %v1756_v28 = vpop.f32.mrf.mxu0 }
 0x13c   : > { %v1317_v14 = vpop.f32.mrf.mxu1  ;;  %v1757_v29 = vadd.f32 %v1756_v28, %v1755_v26 }
 0x13d   : > { %v1758_v30 = vpop.f32.mrf.mxu0 }
 0x13f   : > { %v1759_v34 = vpop.f32.mrf.mxu0 }
 0x140   : > { %v1760_v36 = vadd.f32 %v1759_v34, %v1758_v30 }
 0x141   : > { %v1761_v37 = vpop.f32.mrf.mxu0 }
 0x142   : > { %v1218_v43 = vadd.f32 %v1760_v36, %v2261_v18  ;;  %v1830_v36 = vpop.f32.mrf.mxu1 }
 0x143   : > { %v1762_v48 = vpop.f32.mrf.mxu0 }
 0x144   : > { %v1763_v56 = vadd.f32 %v1762_v48, %v1761_v37  ;;  %v1315_v13 = vadd.f32 %v1314_v31, %v1218_v43  ;;  %v1307_v31 = vadd.f32 %v1822_v15, %v1210_v54  ;;  %v1330_v35 = vpop.f32.mrf.mxu1  ;;  %v1714_v48 = vadd.f32 %v2285_v52, %v2281_v49 }
 0x145   : > { %v1764_v10 = vpop.f32.mrf.mxu0 }
 0x146   : > { %v1361_v16 = vmax.f32 %v1299_v50, %v1315_v13  ;;  %v1221_v19 = vadd.f32 %v1763_v56, %v2263_v25  ;;  %v1213_v13 = vadd.f32 %v1757_v29, %v2259_v11  ;;  %v1831_v15 = vpop.f32.mrf.mxu1 }
 0x147   : > { %v1765_v12 = vpop.f32.mrf.mxu0 }
 0x148   : > { %v1766_v30 = vadd.f32 %v1765_v12, %v1764_v10  ;;  %v1318_v34 = vadd.f32 %v1317_v14, %v1221_v19  ;;  %v1137_v12 = vadd.f32 %v1708_v22, %v2271_v41  ;;  %v1310_v28 = vadd.f32 %v1823_v21, %v1213_v13  ;;  %v1333_v53 = vpop.f32.mrf.mxu1 }
 0x149   : > { %v1767_v18 = vpop.f32.mrf.mxu0  ;;  %v1145_v21 = vadd.f32 %v1714_v48, %v2283_v51  ;;  %v1659_v22 = vadd.f32 %v2305_v2, %v2301_v0  ;;  %v1726_v0 = vadd.f32 %v2315_v8, %v2311_v6 }
 0x14a   : > { %v1226_v61 = vadd.f32 %v1766_v30, %v2265_v32  ;;  %v1362_v17 = vmax.f32 %v1302_v20, %v1318_v34  ;;  %v1711_v32 = vadd.f32 %v2279_v47, %v2275_v44  ;;  %v1717_v44 = vadd.f32 %v2291_v58, %v2287_v55  ;;  %v1834_v54 = vpop.f32.mrf.mxu1 }
 0x14b   : > { %v1768_v23 = vpop.f32.mrf.mxu0  ;;  %v1656_v30 = vadd.f32 %v2297_v62, %v2293_v59 }
 0x14c   : > { %v1323_v25 = vadd.f32 %v1826_v27, %v1226_v61  ;;  %v1769_v24 = vadd.f32 %v1768_v23, %v1767_v18  ;;  %v1140_v45 = vadd.f32 %v1711_v32, %v2277_v46  ;;  %v1148_v49 = vadd.f32 %v1717_v44, %v2289_v57  ;;  %v1346_v18 = vpop.f32.mrf.mxu1  ;;  %v2383_v32 = vld [vmem:[#allocation2_spill] sm:$0xff] }
 0x14d   : > { %v1770_v33 = vpop.f32.mrf.mxu0 }
 0x14e   : > { %v1363_v4 = vmax.f32 %v1307_v31, %v1323_v25  ;;  %v1229_v10 = vadd.f32 %v1769_v24, %v2269_v39  ;;  %v1835_v62 = vpop.f32.mrf.mxu1  ;;  %v1662_v24 = vadd.f32 %v2313_v7, %v2309_v5 }
 0x14f   : > { %v1771_v26 = vpop.f32.mrf.mxu0 }
 0x150   : > { %v1326_v37 = vadd.f32 %v1827_v40, %v1229_v10  ;;  %v1772_v38 = vadd.f32 %v1771_v26, %v1770_v33  ;;  %v1161_v7 = vadd.f32 %v1726_v0, %v1662_v24 }
 0x151   : > { %v1773_v42 = vpop.f32.mrf.mxu0 }
 0x152   : > { %v1364_v43 = vmax.f32 %v1310_v28, %v1326_v37  ;;  %v1234_v11 = vadd.f32 %v1772_v38, %v1137_v12  ;;  %v2382_v12 = vld [vmem:[#allocation3_spill] sm:$0xff]  ;;  %v2384_v28 = vld [vmem:[#allocation4_spill] sm:$0xff] }
 0x153   : > { %v1774_v27 = vpop.f32.mrf.mxu0  ;;  %v1665_v26 = vadd.f32 %v2382_v12, %v2317_v9  ;;  %v1729_v37 = vadd.f32 %v2384_v28, %v2383_v32 }
 0x154   : > { %v1775_v39 = vadd.f32 %v1774_v27, %v1773_v42  ;;  %v1331_v50 = vadd.f32 %v1330_v35, %v1234_v11  ;;  %v1349_v35 = vpop.f32.mrf.mxu1 }
 0x155   : > { %v1776_v41 = vpop.f32.mrf.mxu0  ;;  %v1164_v27 = vadd.f32 %v1729_v37, %v1665_v26 }
 0x156   : > { %v1365_v56 = vmax.f32 %v1361_v16, %v1331_v50  ;;  %v1237_v14 = vadd.f32 %v1775_v39, %v1140_v45  ;;  %v1720_v16 = vadd.f32 %v2299_v63, %v2295_v60 }
 0x157   : > { %v1777_v47 = vpop.f32.mrf.mxu0 }
 0x158   : > { %v1778_v40 = vadd.f32 %v1777_v47, %v1776_v41  ;;  %v1334_v19 = vadd.f32 %v1333_v53, %v1237_v14  ;;  %v1153_v23 = vadd.f32 %v1720_v16, %v1656_v30 }
 0x159   : > { %v1779_v20 = vpop.f32.mrf.mxu0 }
 0x15a   : > { %v1242_v46 = vadd.f32 %v1778_v40, %v1145_v21  ;;  %v1366_v29 = vmax.f32 %v1362_v17, %v1334_v19  ;;  %v1723_v17 = vadd.f32 %v2307_v3, %v2303_v1  ;;  %v1590_v1 = vld [vmem:[%s2377_s2] ss:$0 sm:$0xff] }
 0x15b   : > { %v1780_v52 = vpop.f32.mrf.mxu0 }
 0x15c   : > { %v1339_v34 = vadd.f32 %v1830_v36, %v1242_v46  ;;  %v1781_v55 = vadd.f32 %v1780_v52, %v1779_v20  ;;  %v1156_v63 = vadd.f32 %v1723_v17, %v1659_v22 }
 0x15d   : > { %v1782_v58 = vpop.f32.mrf.mxu0 }
 0x15e   : > { %v1367_v51 = vmax.f32 %v1363_v4, %v1339_v34  ;;  %v1245_v61 = vadd.f32 %v1781_v55, %v1148_v49 }
 0x15f   : > { %v1783_v57 = vpop.f32.mrf.mxu0 }
 0x160   : > { %v1342_v31 = vadd.f32 %v1831_v15, %v1245_v61  ;;  %v1784_v13 = vadd.f32 %v1783_v57, %v1782_v58 }
 0x161   : > { %v1785_v59 = vpop.f32.mrf.mxu0 }
 0x162   : > { %v1368_v25 = vmax.f32 %v1364_v43, %v1342_v31  ;;  %v1250_v60 = vadd.f32 %v1784_v13, %v1153_v23 }
 0x163   : > { %v1786_v36 = vpop.f32.mrf.mxu0 }
 0x164   : > { %v1787_v2 = vadd.f32 %v1786_v36, %v1785_v59  ;;  %v1347_v33 = vadd.f32 %v1346_v18, %v1250_v60 }
 0x165   : > { %v1788_v3 = vpop.f32.mrf.mxu0 }
 0x166   : > { %v1369_v4 = vmax.f32 %v1365_v56, %v1347_v33  ;;  %v1253_v10 = vadd.f32 %v1787_v2, %v1156_v63 }
 0x167   : > { %v1789_v5 = vpop.f32.mrf.mxu0 }
 0x168   : > { %v1380_v6 = vadd.f32 %v1590_v1, %v1369_v4  ;;  %v1790_v8 = vadd.f32 %v1789_v5, %v1788_v3  ;;  %v1350_v38 = vadd.f32 %v1349_v35, %v1253_v10 }
 0x169   : > { %v1791_v42 = vpop.f32.mrf.mxu0 }
 0x16a   : > { %v1384_v15 = vmax.f32 %v1380_v6, 0.0  ;;  %v1258_v43 = vadd.f32 %v1790_v8, %v1161_v7  ;;  %v1370_v11 = vmax.f32 %v1366_v29, %v1350_v38 }
 0x16b   : > { %v1792_v9 = vpop.f32.mrf.mxu0 }
 0x16c   : > { %v1598_v45 = vpack.c.bf16 %v1384_v15, %v1384_v15  ;;  %v1355_v48 = vadd.f32 %v1834_v54, %v1258_v43  ;;  %v1381_v39 = vadd.f32 %v1590_v1, %v1370_v11  ;;  %v1793_v50 = vadd.f32 %v1792_v9, %v1791_v42 }
 0x16e   : > { %1405 = vst.msk [vmem:[%s170_s5] sm:$0xf] %vm1404_vm1, %v1598_v45  ;;  %v1371_v41 = vmax.f32 %v1367_v51, %v1355_v48  ;;  %v1385_v53 = vmax.f32 %v1381_v39, 0.0  ;;  %v1261_v56 = vadd.f32 %v1793_v50, %v1164_v27 }
 0x170   : > { %v1382_v14 = vadd.f32 %v1590_v1, %v1371_v41  ;;  %v1599_v44 = vpack.c.bf16 %v1385_v53, %v1385_v53  ;;  %v1358_v47 = vadd.f32 %v1835_v62, %v1261_v56 }
 0x172   : > { %v1386_v21 = vmax.f32 %v1382_v14, 0.0  ;;  %1406 = vst.msk [vmem:[%s170_s5 + $0x4] sm:$0xf] %vm1404_vm1, %v1599_v44  ;;  %v1372_v40 = vmax.f32 %v1368_v25, %v1358_v47 }
 0x174   : > { %v1600_v19 = vpack.c.bf16 %v1386_v21, %v1386_v21  ;;  %v1383_v20 = vadd.f32 %v1590_v1, %v1372_v40 }
 0x176   : > { %1407 = vst.msk [vmem:[%s170_s5 + $0x8] sm:$0xf] %vm1404_vm1, %v1600_v19  ;;  %v1387_v46 = vmax.f32 %v1383_v20, 0.0 }
 0x178   : > { %v1601_v54 = vpack.c.bf16 %v1387_v46, %v1387_v46 }
 0x17a   : > { %1408 = vst.msk [vmem:[%s170_s5 + $0xc] sm:$0xf] %vm1404_vm1, %v1601_v54 }
 0x17b PF: > { %s13_s12 = sadd.s32 1, %s1985_s12  }
 0x17c   : > { %p10_p4 = scmp.ge.s32.totalorder %s13_s12, 4  }
 0x17e   :  { %12 = sbr.rel (!%p10_p4) target bundleno = 1 (0x1), region = 62 }

// kernel: tcn_lstm_forward.8
= control target key start
LH: loop header
LB: loop body
LE: loop exit
PB: predicated region body
PF: predicated region fallthrough
CT: control target
= control target key end

     0   :  { %s2122_s12 = smov 0   ;;  %s2514_s0 = inlined_call_operand.vmem [shape: bf16[2,32,1728], index: 0, kind: input, shape index: {}]   ;;  %s2515_s1 = inlined_call_operand.vmem [shape: bf16[1728,128], index: 1, kind: input, shape index: {}]   ;;  %s2516_s2 = inlined_call_operand.vmem [shape: f32[1,128], index: 2, kind: input, shape index: {}]   ;;  %s2517_s3 = inlined_call_operand.vmem [shape: bf16[2,8,128], index: 3, kind: output, shape index: {}]  }
   0x1 LB: > { %s1617_s13 = sadd.s32 4294967295, %s2099_s12   ;;  %p1621_p0 = scmp.ge.s32.totalorder %s2099_s12, 1  ;;  %s2099_s12 = sphi %s2122_s12, %s13_s12  }
   0x2   : > { %p137_p1 = scmp.lt.s32.totalorder %s2099_s12, 3 }
   0x4   : > { %p138_p2 = pnand %p1621_p0, %p137_p1 }
   0x5   : > { %p160_p3 = scmp.lt.s32.totalorder (!%p138_p2), %s1617_s13, 1 }
   0x6   : > { %141 = sbr.rel (%p138_p2) target bundleno = 362 (0x16a), region = 32 }
   0xb   : > { %v1943_v0 = vld [vmem:[%s2515_s1 + $0x78] sm:$0xff]   ;;  %v1945_v2 = vld [vmem:[%s2515_s1 + $0x70] sm:$0xff]   ;;  %v1947_v4 = vld [vmem:[%s2515_s1 + $0x68] sm:$0xff]   ;;  %s2519_s13 = smov (!%p160_p3, %s1617_s13), 1  ;;  %vm1200_vm0 = vcmask 523264  }
   0xc   : > { %v1944_v1 = vld [vmem:[%s2515_s1 + $0x38] sm:$0xff]   ;;  %1765 = vmatprep.subr.bf16.mxu1 %v1943_v0  ;;  %v1946_v3 = vld [vmem:[%s2515_s1 + $0x30] sm:$0xff]   ;;  %v1948_v5 = vld [vmem:[%s2515_s1 + $0x28] sm:$0xff]   ;;  %s1933_s23 = smul.u32 224, %s2519_s13  ;;  %s1623_s17 = sshll.u32 %s2519_s13, 2 }
   0xd   : > { %1766 = vmatpush3.bf16.msra.mxu1 %v1944_v1  ;;  %v1949_v6 = vld [vmem:[%s2515_s1 + $0x60] sm:$0xff]   ;;  %v1952_v7 = vld [vmem:[%s2515_s1 + $0x178] sm:$0xff]   ;;  %v1956_v11 = vld [vmem:[%s2515_s1 + $0x170] sm:$0xff]   ;;  %s168_s20 = scalar_lea.vmem %s2517_s3, %s1623_s17 }
   0xe   : > { %1767 = vmatprep.subr.bf16.mxu1 %v1945_v2  ;;  %v1950_v8 = vld [vmem:[%s2515_s1 + $0x20] sm:$0xff]   ;;  %1821 = vmatprep.subr.bf16.mxu0 %v1952_v7  ;;  %v1954_v9 = vld [vmem:[%s2515_s1 + $0x138] sm:$0xff]   ;;  %v1958_v13 = vld [vmem:[%s2515_s1 + $0x130] sm:$0xff]   ;;  %s2199_s7 = scalar_lea.vmem %s2514_s0, %s1933_s23 }
   0xf   : > { %v1951_v10 = vld [vmem:[%s2515_s1 + $0x58] sm:$0xff]   ;;  %1822 = vmatpush3.bf16.msra.mxu0 %v1954_v9  ;;  %v1955_v14 = vld [vmem:[%s2515_s1 + $0x50] sm:$0xff]   ;;  %v1960_v15 = vld [vmem:[%s2515_s1 + $0x168] sm:$0xff]  }
  0x10   : > { %v1953_v12 = vld [vmem:[%s2515_s1 + $0x18] sm:$0xff]   ;;  %1823 = vmatprep.subr.bf16.mxu0 %v1956_v11  ;;  %v1957_v16 = vld [vmem:[%s2515_s1 + $0x10] sm:$0xff]   ;;  %v1962_v17 = vld [vmem:[%s2515_s1 + $0x128] sm:$0xff]  }
  0x11   : > { %1768 = vmatpush3.bf16.msra.mxu1 %v1946_v3  ;;  %v1959_v18 = vld [vmem:[%s2515_s1 + $0x48] sm:$0xff]   ;;  %v1964_v19 = vld [vmem:[%s2515_s1 + $0x160] sm:$0xff]   ;;  %v1971_v25 = vld [vmem:[%s2515_s1 + $0x158] sm:$0xff]  }
  0x12   : > { %1769 = vmatprep.subr.bf16.mxu1 %v1947_v4  ;;  %v1961_v20 = vld [vmem:[%s2515_s1 + $0x8] sm:$0xff]   ;;  %v1966_v21 = vld [vmem:[%s2515_s1 + $0x120] sm:$0xff]   ;;  %v1970_v27 = vld [vmem:[%s2515_s1 + $0xf8] sm:$0xff]  }
  0x13   : > { %1824 = vmatpush3.bf16.msra.mxu0 %v1958_v13  ;;  %v1963_v22 = vld [vmem:[%s2515_s1 + $0x40] sm:$0xff]   ;;  %v1973_v28 = vld [vmem:[%s2515_s1 + $0x118] sm:$0xff]   ;;  %v1975_v30 = vld [vmem:[%s2515_s1 + $0x150] sm:$0xff]  }
  0x14   : > { %1825 = vmatprep.subr.bf16.mxu0 %v1960_v15  ;;  %v1969_v23 = vld [vmem:[%s2199_s7 + $0x4] ss:$56 sps:$4 sm:$0xff]   ;;  %v1967_v26 = vld [vmem:[%s2199_s7] ss:$56 sps:$4 sm:$0xff]   ;;  %v1974_v31 = vld [vmem:[%s2515_s1 + $0xf0] sm:$0xff]  }
  0x15   : > { %1770 = vmatpush3.bf16.msra.mxu1 %v1948_v5  ;;  %v1965_v24 = vld [vmem:[%s2515_s1] sm:$0xff]   ;;  %1239 = vmatprep.mubr.bf16.mxu1 %v1969_v23  ;;  %v1972_v29 = vld [vmem:[%s2515_s1 + $0xb8] sm:$0xff]   ;;  %v1977_v32 = vld [vmem:[%s2515_s1 + $0x110] sm:$0xff]   ;;  %v2101_v23 = vmov 0  }
  0x16   : > { %1771 = vmatprep.subr.bf16.mxu1 %v1949_v6  ;;  %v1976_v33 = vld [vmem:[%s2515_s1 + $0xb0] sm:$0xff]   ;;  %v1979_v34 = vld [vmem:[%s2515_s1 + $0x148] sm:$0xff]   ;;  %v1983_v38 = vld [vmem:[%s2515_s1 + $0x140] sm:$0xff]  }
  0x17   : > { %1826 = vmatpush3.bf16.msra.mxu0 %v1962_v17  ;;  %v1978_v35 = vld [vmem:[%s2515_s1 + $0xe8] sm:$0xff]   ;;  %v1982_v39 = vld [vmem:[%s2515_s1 + $0xe0] sm:$0xff]   ;;  %v1986_v42 = vld [vmem:[%s2515_s1 + $0xd8] sm:$0xff]  }
  0x18   : > { %1827 = vmatprep.subr.bf16.mxu0 %v1964_v19  ;;  %v1981_v36 = vld [vmem:[%s2515_s1 + $0x108] sm:$0xff]   ;;  %v1984_v40 = vld [vmem:[%s2515_s1 + $0xa0] sm:$0xff]   ;;  %v1990_v45 = vld [vmem:[%s2515_s1 + $0x278] sm:$0xff]  }
  0x19   : > { %1772 = vmatpush3.bf16.msra.mxu1 %v1950_v8  ;;  %v1980_v37 = vld [vmem:[%s2515_s1 + $0xa8] sm:$0xff]   ;;  %v1985_v41 = vld [vmem:[%s2515_s1 + $0x100] sm:$0xff]   ;;  %v1991_v46 = vld [vmem:[%s2515_s1 + $0x98] sm:$0xff]  }
  0x1a   : > { %1773 = vmatprep.subr.bf16.mxu1 %v1951_v10  ;;  %v1987_v43 = vld [vmem:[%s2199_s7 + $0x10] ss:$56 sps:$4 sm:$0xff]   ;;  %v1989_v44 = vld [vmem:[%s2199_s7 + $0x14] ss:$56 sps:$4 sm:$0xff]   ;;  %v1992_v47 = vld [vmem:[%s2515_s1 + $0x238] sm:$0xff]  }
  0x1b   : > { %1828 = vmatpush3.bf16.msra.mxu0 %v1966_v21  ;;  %1337 = vmatprep.mubr.bf16.mxu0 %v1989_v44  ;;  %v1993_v48 = vld [vmem:[%s2199_s7 + $0x74] ss:$56 sps:$4 sm:$0xff]   ;;  %v1995_v49 = vld [vmem:[%s2199_s7 + $0x70] ss:$56 sps:$4 sm:$0xff]   ;;  %v2004_v58 = vld [vmem:[%s2515_s1 + $0xc0] sm:$0xff]  }
  0x1c   : > { %1829 = vmatprep.subr.bf16.mxu0 %v1971_v25  ;;  %v1996_v50 = vld [vmem:[%s2515_s1 + $0xd0] sm:$0xff]   ;;  %v2000_v54 = vld [vmem:[%s2515_s1 + $0xc8] sm:$0xff]   ;;  %v2005_v59 = vld [vmem:[%s2515_s1 + $0x260] sm:$0xff]  }
  0x1d   : > { %1774 = vmatpush3.bf16.msra.mxu1 %v1953_v12  ;;  %v1997_v51 = vld [vmem:[%s2515_s1 + $0x270] sm:$0xff]   ;;  %v2001_v55 = vld [vmem:[%s2515_s1 + $0x268] sm:$0xff]   ;;  %v2006_v60 = vld [vmem:[%s2515_s1 + $0x80] sm:$0xff]  }
  0x1e   : > { %1775 = vmatprep.subr.bf16.mxu1 %v1955_v14  ;;  %v1998_v52 = vld [vmem:[%s2515_s1 + $0x90] sm:$0xff]   ;;  %v2002_v56 = vld [vmem:[%s2515_s1 + $0x88] sm:$0xff]   ;;  %v2007_v61 = vld [vmem:[%s2515_s1 + $0x220] sm:$0xff]  }
  0x1f   : > { %1830 = vmatpush3.bf16.msra.mxu0 %v1973_v28  ;;  %v1999_v53 = vld [vmem:[%s2515_s1 + $0x230] sm:$0xff]   ;;  %v2003_v57 = vld [vmem:[%s2515_s1 + $0x228] sm:$0xff]   ;;  %v2011_v0 = vld [vmem:[%s2515_s1 + $0x1f8] sm:$0xff]  }
  0x20   : > { %1831 = vmatprep.subr.bf16.mxu0 %v1975_v30  ;;  %v2008_v62 = vld [vmem:[%s2199_s7 + $0x8] ss:$56 sps:$4 sm:$0xff]   ;;  %v2010_v63 = vld [vmem:[%s2199_s7 + $0xc] ss:$56 sps:$4 sm:$0xff]   ;;  %v2012_v1 = vld [vmem:[%s2515_s1 + $0x258] sm:$0xff]  }
  0x21   : > { %1776 = vmatpush3.bf16.msra.mxu1 %v1957_v16  ;;  %v2013_v2 = vld [vmem:[%s2515_s1 + $0x1b8] sm:$0xff]   ;;  %v2015_v4 = vld [vmem:[%s2515_s1 + $0x1f0] sm:$0xff]   ;;  %v2024_v11 = vld [vmem:[%s2515_s1 + $0x1e8] sm:$0xff]  }
  0x22   : > { %1777 = vmatprep.subr.bf16.mxu1 %v1959_v18  ;;  %v2014_v3 = vld [vmem:[%s2515_s1 + $0x218] sm:$0xff]   ;;  %v2016_v5 = vld [vmem:[%s2515_s1 + $0x250] sm:$0xff]   ;;  %v2025_v12 = vld [vmem:[%s2515_s1 + $0x248] sm:$0xff]  }
  0x23   : > { %1832 = vmatpush3.bf16.msra.mxu0 %v1977_v32  ;;  %v2017_v6 = vld [vmem:[%s2515_s1 + $0x1b0] sm:$0xff]   ;;  %v2022_v10 = vld [vmem:[%s2199_s7 + $0x84] ss:$56 sps:$4 sm:$0xff]   ;;  %v2026_v13 = vld [vmem:[%s2199_s7 + $0x80] ss:$56 sps:$4 sm:$0xff]  }
  0x24   : > { %1833 = vmatprep.subr.bf16.mxu0 %v1979_v34  ;;  %v2018_v7 = vld [vmem:[%s2515_s1 + $0x210] sm:$0xff]   ;;  %v2027_v14 = vld [vmem:[%s2515_s1 + $0x1a8] sm:$0xff]   ;;  %v2029_v16 = vld [vmem:[%s2515_s1 + $0x1e0] sm:$0xff]  }
  0x25   : > { %1778 = vmatpush3.bf16.msra.mxu1 %v1961_v20  ;;  %v2019_v8 = vld [vmem:[%s2199_s7 + $0x7c] ss:$56 sps:$4 sm:$0xff]   ;;  %v2021_v9 = vld [vmem:[%s2199_s7 + $0x78] ss:$56 sps:$4 sm:$0xff]   ;;  %v2028_v15 = vld [vmem:[%s2515_s1 + $0x208] sm:$0xff]  }
  0x26   : > { %1779 = vmatprep.subr.bf16.mxu1 %v1963_v22  ;;  %v2030_v17 = vld [vmem:[%s2515_s1 + $0x240] sm:$0xff]   ;;  %v2033_v20 = vld [vmem:[%s2515_s1 + $0x1d8] sm:$0xff]   ;;  %v2041_v28 = vld [vmem:[%s2515_s1 + $0x330] sm:$0xff]  }
  0x27   : > { %1834 = vmatpush3.bf16.msra.mxu0 %v1981_v36  ;;  %v2031_v18 = vld [vmem:[%s2515_s1 + $0x1a0] sm:$0xff]   ;;  %v2038_v25 = vld [vmem:[%s2515_s1 + $0x338] sm:$0xff]   ;;  %v2043_v30 = vld [vmem:[%s2515_s1 + $0x188] sm:$0xff]  }
  0x28   : > { %1835 = vmatprep.subr.bf16.mxu0 %v1983_v38  ;;  %v2032_v19 = vld [vmem:[%s2515_s1 + $0x200] sm:$0xff]   ;;  %v2050_v36 = vld [vmem:[%s2199_s7 + $0x1c] ss:$56 sps:$4 sm:$0xff]  }
  0x29   : > { %1780 = vmatpush3.bf16.msra.mxu1 %v1965_v24  ;;  %v2034_v21 = vld [vmem:[%s2199_s7 + $0x20] ss:$56 sps:$4 sm:$0xff]   ;;  %v2036_v22 = vld [vmem:[%s2199_s7 + $0x24] ss:$56 sps:$4 sm:$0xff]  }
  0x2a   : > { %1793 = vmatprep.subr.bf16.mxu1 %v1970_v27  ;;  %v2037_v24 = vld [vmem:[%s2515_s1 + $0x198] sm:$0xff]   ;;  %v2040_v27 = vld [vmem:[%s2515_s1 + $0x190] sm:$0xff]   ;;  %v2045_v32 = vld [vmem:[%s2515_s1 + $0x1c0] sm:$0xff]  }
  0x2b   : > { %1836 = vmatpush3.bf16.msra.mxu0 %v1985_v41  ;;  %v2047_v34 = vld [vmem:[%s2515_s1 + $0x320] sm:$0xff]   ;;  %v2052_v38 = vld [vmem:[%s2515_s1 + $0x2b8] sm:$0xff]   ;;  %v2055_v41 = vld [vmem:[%s2515_s1 + $0x2b0] sm:$0xff]  }
  0x2c   : > { %1240 = vmatmul.mubr.bf16.vlgmr.msra.gmra.mxu1 %v1967_v26  ;;  %1877 = vmatprep.subr.bf16.mxu0 %v1990_v45  ;;  %v2039_v26 = vld [vmem:[%s2515_s1 + $0x1d0] sm:$0xff]   ;;  %v2059_v44 = vld [vmem:[%s2199_s7 + $0x88] ss:$56 sps:$4 sm:$0xff]  }
  0x2d   : > { %1794 = vmatpush3.bf16.msra.mxu1 %v1972_v29  ;;  %1247 = vmatprep.mubr.bf16.mxu1 %v1993_v48  ;;  %v2042_v29 = vld [vmem:[%s2515_s1 + $0x1c8] sm:$0xff]  }
  0x2e   : > { %1795 = vmatprep.subr.bf16.mxu1 %v1974_v31  ;;  %1338 = vmatmul.mubr.bf16.vlgmr.msra.gmra.mxu0 %v1987_v43  ;;  %v2044_v31 = vld [vmem:[%s2515_s1 + $0x328] sm:$0xff]  }
  0x2f   : > { %1878 = vmatpush3.bf16.msra.mxu0 %v1992_v47  ;;  %1345 = vmatprep.mubr.bf16.mxu0 %v2022_v10  ;;  %v2057_v43 = vld [vmem:[%s2199_s7 + $0x8c] ss:$56 sps:$4 sm:$0xff]  }
  0x30   : > { %1879 = vmatprep.subr.bf16.mxu0 %v1997_v51  ;;  %v2060_v45 = vld [vmem:[%s2515_s1 + $0x2e8] sm:$0xff]   ;;  %v2067_v51 = vld [vmem:[%s2515_s1 + $0x2a0] sm:$0xff]  }
  0x31   : > { %1796 = vmatpush3.bf16.msra.mxu1 %v1976_v33  ;;  %v2046_v33 = vld [vmem:[%s2515_s1 + $0x180] sm:$0xff]   ;;  %v2063_v47 = vld [vmem:[%s2515_s1 + $0x2a8] sm:$0xff]  }
  0x32   : > { %1797 = vmatprep.subr.bf16.mxu1 %v1978_v35  ;;  %v2048_v35 = vld [vmem:[%s2199_s7 + $0x18] ss:$56 sps:$4 sm:$0xff]   ;;  %v2064_v48 = vld [vmem:[%s2515_s1 + $0x308] sm:$0xff]  }
  0x33   : > { %1880 = vmatpush3.bf16.msra.mxu0 %v1999_v53  ;;  %v2069_v53 = vld [vmem:[%s2515_s1 + $0x2d8] sm:$0xff]  }
  0x34   : > { %1248 = vmatmul.mubr.bf16.gmra.mxu1 %v1995_v49  ;;  %1881 = vmatprep.subr.bf16.mxu0 %v2001_v55  ;;  %v2065_v49 = vld [vmem:[%s2199_s7 + $0x90] ss:$56 sps:$4 sm:$0xff]   ;;  %v2071_v55 = vld [vmem:[%s2515_s1 + $0x358] sm:$0xff]  }
  0x35   : > { %1798 = vmatpush3.bf16.msra.mxu1 %v1980_v37  ;;  %1288 = vmatprep.mubr.bf16.mxu1 %v2010_v63  ;;  %v2051_v37 = vld [vmem:[%s2515_s1 + $0x2f8] sm:$0xff]   ;;  %v2083_v63 = vld [vmem:[%s2199_s7 + $0x2c] ss:$56 sps:$4 sm:$0xff]  }
  0x36   : > { %1799 = vmatprep.subr.bf16.mxu1 %v1982_v39  ;;  %1346 = vmatmul.mubr.bf16.gmra.mxu0 %v2026_v13  ;;  %v2053_v39 = vld [vmem:[%s2515_s1 + $0x318] sm:$0xff]  }
  0x37   : > { %1882 = vmatpush3.bf16.msra.mxu0 %v2003_v57  ;;  %1435 = vmatprep.mubr.bf16.mxu0 %v2036_v22  ;;  %v2073_v57 = vld [vmem:[%s2515_s1 + $0x290] sm:$0xff]  }
  0x38   : > { %1883 = vmatprep.subr.bf16.mxu0 %v2005_v59  ;;  %v2075_v59 = vld [vmem:[%s2515_s1 + $0x2c8] sm:$0xff]  }
  0x39   : > { %1800 = vmatpush3.bf16.msra.mxu1 %v1984_v40  ;;  %v2054_v40 = vld [vmem:[%s2515_s1 + $0x2f0] sm:$0xff]  }
  0x3a   : > { %1801 = vmatprep.subr.bf16.mxu1 %v1986_v42  ;;  %v2056_v42 = vld [vmem:[%s2515_s1 + $0x310] sm:$0xff]  }
  0x3b   : > { %1884 = vmatpush3.bf16.msra.mxu0 %v2007_v61  ;;  %v2077_v61 = vld [vmem:[%s2515_s1 + $0x348] sm:$0xff]  }
  0x3c   : > { %1885 = vmatprep.subr.bf16.mxu0 %v2012_v1  ;;  %v2079_v1 = vld [vmem:[%s2515_s1 + $0x280] sm:$0xff]  }
  0x3d   : > { %1802 = vmatpush3.bf16.msra.mxu1 %v1991_v46  ;;  %v2061_v46 = vld [vmem:[%s2199_s7 + $0x94] ss:$56 sps:$4 sm:$0xff]  }
  0x3e   : > { %1803 = vmatprep.subr.bf16.mxu1 %v1996_v50  ;;  %v2066_v50 = vld [vmem:[%s2515_s1 + $0x2e0] sm:$0xff]  }
  0x3f   : > { %1886 = vmatpush3.bf16.msra.mxu0 %v2014_v3  ;;  %v2081_v3 = vld [vmem:[%s2199_s7 + $0x28] ss:$56 sps:$4 sm:$0xff]  }
  0x40   : > { %1887 = vmatprep.subr.bf16.mxu0 %v2016_v5  ;;  %v2087_v5 = vld [vmem:[%s2199_s7 + $0x9c] ss:$56 sps:$4 sm:$0xff]  }
  0x41   : > { %1804 = vmatpush3.bf16.msra.mxu1 %v1998_v52  ;;  %v2068_v52 = vld [vmem:[%s2515_s1 + $0x300] sm:$0xff]  }
  0x42   : > { %1805 = vmatprep.subr.bf16.mxu1 %v2000_v54  ;;  %v2070_v54 = vld [vmem:[%s2515_s1 + $0x298] sm:$0xff]  }
  0x43   : > { %1888 = vmatpush3.bf16.msra.mxu0 %v2018_v7  ;;  %v2091_v7 = vld [vmem:[%s2199_s7 + $0x98] ss:$56 sps:$4 sm:$0xff]  }
  0x44   : > { %1889 = vmatprep.subr.bf16.mxu0 %v2025_v12 }
  0x45   : > { %1806 = vmatpush3.bf16.msra.mxu1 %v2002_v56  ;;  %v2072_v56 = vld [vmem:[%s2515_s1 + $0x2d0] sm:$0xff]  }
  0x46   : > { %1807 = vmatprep.subr.bf16.mxu1 %v2004_v58  ;;  %v2074_v58 = vld [vmem:[%s2515_s1 + $0x350] sm:$0xff]  }
  0x47   : > { %1890 = vmatpush3.bf16.msra.mxu0 %v2028_v15 }
  0x48   : > { %1891 = vmatprep.subr.bf16.mxu0 %v2030_v17 }
  0x49   : > { %1808 = vmatpush3.bf16.msra.mxu1 %v2006_v60  ;;  %v2076_v60 = vld [vmem:[%s2515_s1 + $0x288] sm:$0xff]  }
  0x4a   : > { %1849 = vmatprep.subr.bf16.mxu1 %v2011_v0  ;;  %v2086_v0 = vld [vmem:[%s2199_s7 + $0x34] ss:$56 sps:$4 sm:$0xff]  }
  0x4b   : > { %1892 = vmatpush3.bf16.msra.mxu0 %v2032_v19 }
  0x4c   : > { %1289 = vmatmul.mubr.bf16.vlgmr.msra.gmra.mxu1 %v2008_v62  ;;  %1501 = vmatprep.subr.bf16.mxu0 %v2101_v23  ;;  %v2078_v62 = vld [vmem:[%s2515_s1 + $0x2c0] sm:$0xff]  }
  0x4d   : > { %1850 = vmatpush3.bf16.msra.mxu1 %v2013_v2  ;;  %1296 = vmatprep.mubr.bf16.mxu1 %v2019_v8  ;;  %v2080_v2 = vld [vmem:[%s2515_s1 + $0x340] sm:$0xff]  }
  0x4e   : > { %1851 = vmatprep.subr.bf16.mxu1 %v2015_v4  ;;  %1436 = vmatmul.mubr.bf16.vlgmr.msra.gmra.mxu0 %v2034_v21  ;;  %v2084_v4 = vld [vmem:[%s2199_s7 + $0x30] ss:$56 sps:$4 sm:$0xff]   ;;  %v2092_v8 = vld [vmem:[%s2199_s7 + $0xa0] ss:$56 sps:$4 sm:$0xff]  }
  0x4f   : > { %1502 = vmatpush1.bf16.msra.mxu0 %v2038_v25  ;;  %1443 = vmatprep.mubr.bf16.mxu0 %v2061_v46 }
  0x50   : > { %1503 = vmatprep.subr.bf16.mxu0 %v2101_v23 }
  0x51   : > { %1852 = vmatpush3.bf16.msra.mxu1 %v2017_v6  ;;  %v2089_v6 = vld [vmem:[%s2199_s7 + $0xa4] ss:$56 sps:$4 sm:$0xff]  }
  0x52   : > { %1853 = vmatprep.subr.bf16.mxu1 %v2024_v11 }
  0x53   : > { %1504 = vmatpush1.bf16.msra.mxu0 %v2041_v28 }
  0x54   : > { %1297 = vmatmul.mubr.bf16.gmra.mxu1 %v2021_v9  ;;  %1505 = vmatprep.subr.bf16.mxu0 %v2101_v23 }
  0x55   : > { %1854 = vmatpush3.bf16.msra.mxu1 %v2027_v14  ;;  %1386 = vmatprep.mubr.bf16.mxu1 %v2050_v36 }
  0x56   : > { %1855 = vmatprep.subr.bf16.mxu1 %v2029_v16  ;;  %1444 = vmatmul.mubr.bf16.gmra.mxu0 %v2065_v49 }
  0x57   : > { %1506 = vmatpush1.bf16.msra.mxu0 %v2044_v31  ;;  %1760 = vmatprep.mubr.msk.bf16.mxu0 %vm1200_vm0, %v2086_v0 }
  0x58   : > { %1507 = vmatprep.subr.bf16.mxu0 %v2101_v23 }
  0x59   : > { %1856 = vmatpush3.bf16.msra.mxu1 %v2031_v18 }
  0x5a   : > { %1857 = vmatprep.subr.bf16.mxu1 %v2033_v20 }
  0x5b   : > { %1508 = vmatpush1.bf16.msra.mxu0 %v2047_v34 }
  0x5c   : > { %1509 = vmatprep.subr.bf16.mxu0 %v2101_v23 }
  0x5d   : > { %1858 = vmatpush3.bf16.msra.mxu1 %v2037_v24 }
  0x5e   : > { %1859 = vmatprep.subr.bf16.mxu1 %v2039_v26 }
  0x5f   : > { %1510 = vmatpush1.bf16.msra.mxu0 %v2053_v39 }
  0x60   : > { %1511 = vmatprep.subr.bf16.mxu0 %v2101_v23 }
  0x61   : > { %1860 = vmatpush3.bf16.msra.mxu1 %v2040_v27 }
  0x62   : > { %1861 = vmatprep.subr.bf16.mxu1 %v2042_v29 }
  0x63   : > { %1512 = vmatpush1.bf16.msra.mxu0 %v2056_v42 }
  0x64   : > { %1513 = vmatprep.subr.bf16.mxu0 %v2101_v23 }
  0x65   : > { %1862 = vmatpush3.bf16.msra.mxu1 %v2043_v30 }
  0x66   : > { %1863 = vmatprep.subr.bf16.mxu1 %v2045_v32 }
  0x67   : > { %1514 = vmatpush1.bf16.msra.mxu0 %v2064_v48 }
  0x68   : > { %1515 = vmatprep.subr.bf16.mxu0 %v2101_v23 }
  0x69   : > { %1864 = vmatpush3.bf16.msra.mxu1 %v2046_v33 }
  0x6a   : > { %1905 = vmatprep.subr.bf16.mxu1 %v2051_v37 }
  0x6b   : > { %1516 = vmatpush1.bf16.msra.mxu0 %v2068_v52 }
  0x6c   : > { %1387 = vmatmul.mubr.bf16.vlgmr.msra.gmra.mxu1 %v2048_v35  ;;  %1525 = vmatprep.subr.bf16.mxu0 %v2101_v23 }
  0x6d   : > { %1906 = vmatpush3.bf16.msra.mxu1 %v2052_v38  ;;  %1394 = vmatprep.mubr.bf16.mxu1 %v2057_v43 }
  0x6e   : > { %1907 = vmatprep.subr.bf16.mxu1 %v2054_v40 }
  0x6f   : > { %1526 = vmatpush2.bf16.msra.mxu0 %v2071_v55 }
  0x70   : > { %1527 = vmatprep.subr.bf16.mxu0 %v2101_v23 }
  0x71   : > { %1908 = vmatpush3.bf16.msra.mxu1 %v2055_v41 }
  0x72   : > { %1909 = vmatprep.subr.bf16.mxu1 %v2060_v45 }
  0x73   : > { %1528 = vmatpush2.bf16.msra.mxu0 %v2074_v58 }
  0x74   : > { %1395 = vmatmul.mubr.bf16.gmra.mxu1 %v2059_v44  ;;  %1529 = vmatprep.subr.bf16.mxu0 %v2101_v23 }
  0x75   : > { %1910 = vmatpush3.bf16.msra.mxu1 %v2063_v47  ;;  %1484 = vmatprep.mubr.bf16.mxu1 %v2083_v63 }
  0x76   : > { %1911 = vmatprep.subr.bf16.mxu1 %v2066_v50 }
  0x77   : > { %1530 = vmatpush2.bf16.msra.mxu0 %v2077_v61 }
  0x78   : > { %1531 = vmatprep.subr.bf16.mxu0 %v2101_v23 }
  0x79   : > { %1912 = vmatpush3.bf16.msra.mxu1 %v2067_v51 }
  0x7a   : > { %1913 = vmatprep.subr.bf16.mxu1 %v2069_v53 }
  0x7b   : > { %1532 = vmatpush2.bf16.msra.mxu0 %v2080_v2 }
  0x7d   : > { %1914 = vmatpush3.bf16.msra.mxu1 %v2070_v54 }
  0x7e   : > { %1915 = vmatprep.subr.bf16.mxu1 %v2072_v56  ;;  %1534 = vmatmul.mubr.bf16.vlgmr.msra.gmra.mxu0 %v2084_v4 }
  0x7f   : > { %1761 = vmatprep.mubr.msk.bf16.mxu0 %vm1200_vm0, %v2089_v6 }
  0x81   : > { %1916 = vmatpush3.bf16.msra.mxu1 %v2073_v57 }
  0x82   : > { %1917 = vmatprep.subr.bf16.mxu1 %v2075_v59 }
  0x85   : > { %1918 = vmatpush3.bf16.msra.mxu1 %v2076_v60 }
  0x86   : > { %1919 = vmatprep.subr.bf16.mxu1 %v2078_v62  ;;  %1542 = vmatmul.mubr.bf16.gmra.mxu0 %v2092_v8 }
  0x89   : > { %1920 = vmatpush3.bf16.msra.mxu1 %v2079_v1 }
  0x8c   : > { %1485 = vmatmul.mubr.bf16.vlgmr.msra.gmra.mxu1 %v2081_v3 }
  0x8d   : > { %1492 = vmatprep.mubr.bf16.mxu1 %v2087_v5 }
  0x94   : > { %1493 = vmatmul.mubr.bf16.gmra.mxu1 %v2091_v7 }
  0xec   : > { %v1781_v9 = vpop.f32.mrf.mxu1 }
  0xee   : > { %v1782_v10 = vpop.f32.mrf.mxu1  ;;  %v1837_v18 = vpop.f32.mrf.mxu0 }
  0xef   : > { %v1783_v51 = vadd.f32 %v1782_v10, %v1781_v9 }
  0xf0   : > { %v1784_v11 = vpop.f32.mrf.mxu1  ;;  %v1838_v20 = vpop.f32.mrf.mxu0 }
  0xf1   : > { %v1839_v62 = vadd.f32 %v1838_v20, %v1837_v18 }
  0xf2   : > { %v1785_v12 = vpop.f32.mrf.mxu1  ;;  %v1840_v22 = vpop.f32.mrf.mxu0 }
  0xf3   : > { %v1786_v47 = vadd.f32 %v1785_v12, %v1784_v11 }
  0xf4   : > { %v1787_v13 = vpop.f32.mrf.mxu1  ;;  %v1841_v24 = vpop.f32.mrf.mxu0 }
  0xf5   : > { %v1842_v55 = vadd.f32 %v1841_v24, %v1840_v22 }
  0xf6   : > { %v1788_v14 = vpop.f32.mrf.mxu1  ;;  %v1843_v26 = vpop.f32.mrf.mxu0 }
  0xf7   : > { %v1789_v53 = vadd.f32 %v1788_v14, %v1787_v13 }
  0xf8   : > { %v1790_v15 = vpop.f32.mrf.mxu1  ;;  %v1844_v28 = vpop.f32.mrf.mxu0 }
  0xf9   : > { %v1845_v60 = vadd.f32 %v1844_v28, %v1843_v26 }
  0xfa   : > { %v1791_v16 = vpop.f32.mrf.mxu1  ;;  %v1846_v30 = vpop.f32.mrf.mxu0 }
  0xfb   : > { %v1792_v5 = vadd.f32 %v1791_v16, %v1790_v15 }
  0xfc   : > { %v1847_v32 = vpop.f32.mrf.mxu0 }
  0xfd   : > { %v1848_v12 = vadd.f32 %v1847_v32, %v1846_v30 }
 0x10c   : > { %v1809_v17 = vpop.f32.mrf.mxu1 }
 0x10e   : > { %v1810_v19 = vpop.f32.mrf.mxu1  ;;  %v1893_v34 = vpop.f32.mrf.mxu0 }
 0x10f   : > { %v1811_v48 = vadd.f32 %v1810_v19, %v1809_v17 }
 0x110   : > { %v1812_v21 = vpop.f32.mrf.mxu1  ;;  %v1894_v36 = vpop.f32.mrf.mxu0 }
 0x111   : > { %v1291_v56 = vadd.f32 %v1811_v48, %v1783_v51  ;;  %v1895_v19 = vadd.f32 %v1894_v36, %v1893_v34 }
 0x112   : > { %v1813_v23 = vpop.f32.mrf.mxu1  ;;  %v1896_v38 = vpop.f32.mrf.mxu0 }
 0x113   : > { %v1814_v45 = vadd.f32 %v1813_v23, %v1812_v21  ;;  %v1340_v6 = vadd.f32 %v1839_v62, %v1291_v56 }
 0x114   : > { %v1815_v25 = vpop.f32.mrf.mxu1  ;;  %v1897_v40 = vpop.f32.mrf.mxu0 }
 0x115   : > { %v1294_v52 = vadd.f32 %v1814_v45, %v1786_v47  ;;  %v1898_v13 = vadd.f32 %v1897_v40, %v1896_v38 }
 0x116   : > { %v1816_v27 = vpop.f32.mrf.mxu1  ;;  %v1899_v42 = vpop.f32.mrf.mxu0 }
 0x117   : > { %v1817_v50 = vadd.f32 %v1816_v27, %v1815_v25  ;;  %v1343_v1 = vadd.f32 %v1842_v55, %v1294_v52 }
 0x118   : > { %v1818_v29 = vpop.f32.mrf.mxu1  ;;  %v1900_v44 = vpop.f32.mrf.mxu0 }
 0x119   : > { %v1299_v59 = vadd.f32 %v1817_v50, %v1789_v53  ;;  %v1901_v18 = vadd.f32 %v1900_v44, %v1899_v42 }
 0x11a   : > { %v1819_v31 = vpop.f32.mrf.mxu1  ;;  %v1902_v49 = vpop.f32.mrf.mxu0 }
 0x11b   : > { %v1820_v63 = vadd.f32 %v1819_v31, %v1818_v29  ;;  %v1348_v9 = vadd.f32 %v1845_v60, %v1299_v59 }
 0x11c   : > { %v1903_v58 = vpop.f32.mrf.mxu0 }
 0x11d   : > { %v1302_v11 = vadd.f32 %v1820_v63, %v1792_v5  ;;  %v1904_v32 = vadd.f32 %v1903_v58, %v1902_v49  ;;  %v1762_v49 = vld [vmem:[%s2516_s2] ss:$0 sm:$0xff] }
 0x11f   : > { %v1351_v16 = vadd.f32 %v1848_v12, %v1302_v11 }
 0x12c   : > { %v1865_v33 = vpop.f32.mrf.mxu1 }
 0x12e   : > { %v1866_v35 = vpop.f32.mrf.mxu1 }
 0x12f   : > { %v1867_v0 = vadd.f32 %v1866_v35, %v1865_v33 }
 0x130   : > { %v1868_v37 = vpop.f32.mrf.mxu1 }
 0x131   : > { %v1389_v14 = vadd.f32 %v1867_v0, %v1340_v6 }
 0x132   : > { %v1869_v39 = vpop.f32.mrf.mxu1 }
 0x133   : > { %v1870_v57 = vadd.f32 %v1869_v39, %v1868_v37  ;;  %v1438_v27 = vadd.f32 %v1895_v19, %v1389_v14 }
 0x134   : > { %v1871_v41 = vpop.f32.mrf.mxu1 }
 0x135   : > { %v1392_v7 = vadd.f32 %v1870_v57, %v1343_v1 }
 0x136   : > { %v1872_v43 = vpop.f32.mrf.mxu1 }
 0x137   : > { %v1873_v3 = vadd.f32 %v1872_v43, %v1871_v41  ;;  %v1441_v24 = vadd.f32 %v1898_v13, %v1392_v7 }
 0x138   : > { %v1874_v46 = vpop.f32.mrf.mxu1 }
 0x139   : > { %v1397_v21 = vadd.f32 %v1873_v3, %v1348_v9 }
 0x13a   : > { %v1875_v54 = vpop.f32.mrf.mxu1 }
 0x13b   : > { %v1876_v22 = vadd.f32 %v1875_v54, %v1874_v46  ;;  %v1446_v31 = vadd.f32 %v1901_v18, %v1397_v21 }
 0x13d   : > { %v1400_v30 = vadd.f32 %v1876_v22, %v1351_v16 }
 0x13e   : > { %v1535_v2 = vpop.f32.mrf.mxu0 }
 0x13f   : > { %v1449_v42 = vadd.f32 %v1904_v32, %v1400_v30 }
 0x140   : > { %v1537_v8 = vpop.f32.mrf.mxu0 }
 0x142   : > { %v1538_v17 = vpop.f32.mrf.mxu0 }
 0x144   : > { %v1540_v26 = vpop.f32.mrf.mxu0 }
 0x146   : > { %v1543_v29 = vpop.f32.mrf.mxu0 }
 0x148   : > { %v1545_v34 = vpop.f32.mrf.mxu0 }
 0x14a   : > { %v1546_v40 = vpop.f32.mrf.mxu0 }
 0x14c   : > { %v1921_v61 = vpop.f32.mrf.mxu1  ;;  %v1548_v46 = vpop.f32.mrf.mxu0 }
 0x14e   : > { %v1922_v4 = vpop.f32.mrf.mxu1 }
 0x14f   : > { %v1923_v23 = vadd.f32 %v1922_v4, %v1921_v61 }
 0x150   : > { %v1924_v10 = vpop.f32.mrf.mxu1 }
 0x151   : > { %v1487_v35 = vadd.f32 %v1923_v23, %v1438_v27 }
 0x152   : > { %v1925_v20 = vpop.f32.mrf.mxu1 }
 0x153   : > { %v1926_v25 = vadd.f32 %v1925_v20, %v1924_v10  ;;  %v1536_v43 = vadd.f32 %v1535_v2, %v1487_v35 }
 0x154   : > { %v1927_v15 = vpop.f32.mrf.mxu1 }
 0x155   : > { %v1490_v28 = vadd.f32 %v1926_v25, %v1441_v24 }
 0x156   : > { %v1928_v33 = vpop.f32.mrf.mxu1 }
 0x157   : > { %v1929_v37 = vadd.f32 %v1928_v33, %v1927_v15  ;;  %v1539_v38 = vadd.f32 %v1538_v17, %v1490_v28 }
 0x158   : > { %v1930_v36 = vpop.f32.mrf.mxu1 }
 0x159   : > { %v1495_v39 = vadd.f32 %v1929_v37, %v1446_v31  ;;  %v1550_v47 = vmax.f32 %v1536_v43, %v1539_v38 }
 0x15a   : > { %v1931_v41 = vpop.f32.mrf.mxu1 }
 0x15b   : > { %v1544_v44 = vadd.f32 %v1543_v29, %v1495_v39  ;;  %v1932_v45 = vadd.f32 %v1931_v41, %v1930_v36 }
 0x15d   : > { %v1498_v48 = vadd.f32 %v1932_v45, %v1449_v42  ;;  %v1551_v50 = vmax.f32 %v1550_v47, %v1544_v44 }
 0x15f   : > { %v1547_v51 = vadd.f32 %v1546_v40, %v1498_v48 }
 0x161   : > { %v1552_v52 = vmax.f32 %v1551_v50, %v1547_v51 }
 0x163   : > { %v1560_v53 = vadd.f32 %v1762_v49, %v1552_v52 }
 0x165   : > { %v1561_v54 = vmax.f32 %v1560_v53, 0.0 }
 0x167   : > { %v1562_v55 = vpack.c.bf16 %v1561_v54, %v1561_v54 }
 0x169   : > { %1563 = vst [vmem:[%s168_s20] sm:$0xf] %v1562_v55 }
 0x16a PF: > { %s13_s12 = sadd.s32 1, %s2099_s12  }
 0x16b   : > { %p10_p4 = scmp.ge.s32.totalorder %s13_s12, 4  }
 0x16d   :  { %12 = sbr.rel (!%p10_p4) target bundleno = 1 (0x1), region = 62 }

// kernel: tcn_lstm_forward.9
= control target key start
LH: loop header
LB: loop body
LE: loop exit
PB: predicated region body
PF: predicated region fallthrough
CT: control target
= control target key end

     0   :  { %vm239_vm0 = vcmask 130048   ;;  %v3423_v59 = vmov 0   ;;  %vm543_vm1 = vcmask 261120   ;;  %vm2442_vm2 = vmmov 0   ;;  %s3410_s1 = inlined_call_operand.vmem [shape: bf16[128,16], index: 1, kind: input, shape index: {}]   ;;  %s3411_s0 = inlined_call_operand.vmem [shape: bf16[64,128], index: 0, kind: input, shape index: {}]   ;;  %s3412_s3 = inlined_call_operand.vmem [shape: bf16[16,32], index: 3, kind: input, shape index: {}]   ;;  %s3413_s5 = inlined_call_operand.vmem [shape: bf16[128,32], index: 5, kind: input, shape index: {}]   ;;  %s3414_s2 = inlined_call_operand.vmem [shape: f32[1,16], index: 2, kind: input, shape index: {}]   ;;  %s3415_s7 = inlined_call_operand.vmem [shape: bf16[32,512], index: 7, kind: input, shape index: {}]   ;;  %s3416_s9 = inlined_call_operand.vmem [shape: bf16[128,512], index: 9, kind: input, shape index: {}]   ;;  %s3417_s4 = inlined_call_operand.vmem [shape: f32[1,32], index: 4, kind: input, shape index: {}]   ;;  %s3418_s6 = inlined_call_operand.vmem [shape: f32[1,32], index: 6, kind: input, shape index: {}]   ;;  %s3419_s8 = inlined_call_operand.vmem [shape: f32[1,512], index: 8, kind: input, shape index: {}]   ;;  %s3420_s10 = inlined_call_operand.vmem [shape: bf16[128,1], index: 10, kind: input, shape index: {}]   ;;  %s3421_s11 = inlined_call_operand.<no memory space> [shape: f32[1,1], index: 11, kind: input, shape index: {}]   ;;  %s3422_s12 = inlined_call_operand.vmem [shape: f32[8,1], index: 12, kind: output, shape index: {}]  }
   0x1   :  { %v2191_v0 = vld [vmem:[%s3410_s1 + $0x38] sm:$0xff]   ;;  %v2192_v1 = vld [vmem:[%s3410_s1 + $0x30] sm:$0xff]   ;;  %v2193_v2 = vld [vmem:[%s3410_s1 + $0x28] sm:$0xff]   ;;  %vm1957_vm3 = vcmask 7168  }
   0x2   :  { %2110 = vmatprep.subr.bf16.mxu0 %v2191_v0  ;;  %v2194_v3 = vld [vmem:[%s3410_s1 + $0x20] sm:$0xff]   ;;  %v2195_v5 = vld [vmem:[%s3410_s1 + $0x18] sm:$0xff]   ;;  %v2196_v6 = vld [vmem:[%s3410_s1 + $0x10] sm:$0xff]  }
   0x3   :  { %2111 = vmatpush3.bf16.msra.mxu0 %v2191_v0  ;;  %v2523_v4 = vld [vmem:[%s3411_s0] sm:$0xff]   ;;  %v2197_v7 = vld [vmem:[%s3410_s1 + $0x8] sm:$0xff]   ;;  %v2546_v10 = vld [vmem:[%s3411_s0 + $0x10] sm:$0xff]  }
   0x4   :  { %2112 = vmatprep.subr.bf16.mxu0 %v2192_v1  ;;  %2126 = vmatprep.mubr.bf16.mxu0 %v2523_v4  ;;  %v2198_v8 = vld [vmem:[%s3410_s1] sm:$0xff]   ;;  %v2541_v9 = vld [vmem:[%s3411_s0 + $0x8] sm:$0xff]   ;;  %v2553_v11 = vld [vmem:[%s3411_s0 + $0x18] sm:$0xff]  }
   0x5   :  { %v2203_v12 = vld [vmem:[%s3412_s3] sm:$0xff]   ;;  %v2204_v13 = vld [vmem:[%s3413_s5 + $0x38] sm:$0xff]   ;;  %v2205_v34 = vld [vmem:[%s3413_s5 + $0x30] sm:$0xff]  }
   0x6   :  { %2134 = vmatprep.subr.bf16.mxu1 %v2203_v12  ;;  %v1963_v16 = vld [vmem:[%s3414_s2] ss:$0 sm:$0xff]  ;;  %v2206_v41 = vld [vmem:[%s3413_s5 + $0x28] sm:$0xff]   ;;  %v2208_v46 = vld [vmem:[%s3413_s5 + $0x18] sm:$0xff]  }
   0x7   :  { %2113 = vmatpush3.bf16.msra.mxu0 %v2192_v1  ;;  %2135 = vmatpush3.bf16.msra.mxu1 %v2203_v12  ;;  %v2207_v45 = vld [vmem:[%s3413_s5 + $0x20] sm:$0xff]   ;;  %v2209_v47 = vld [vmem:[%s3413_s5 + $0x10] sm:$0xff]   ;;  %v2210_v48 = vld [vmem:[%s3413_s5 + $0x8] sm:$0xff]  }
   0x8   :  { %2114 = vmatprep.subr.bf16.mxu0 %v2193_v2  ;;  %2144 = vmatprep.subr.bf16.mxu1 %v2204_v13  ;;  %v2211_v49 = vld [vmem:[%s3413_s5] sm:$0xff]   ;;  %v2220_v52 = vld [vmem:[%s3415_s7 + $0x2c] ss:$16 sps:$4 sm:$0xff]   ;;  %v2218_v53 = vld [vmem:[%s3415_s7 + $0x28] ss:$16 sps:$4 sm:$0xff]  }
   0x9   :  { %v2212_v50 = vld [vmem:[%s3415_s7 + $0x20] ss:$16 sps:$4 sm:$0xff]   ;;  %v2214_v51 = vld [vmem:[%s3415_s7 + $0x24] ss:$16 sps:$4 sm:$0xff]   ;;  %v2223_v55 = vld [vmem:[%s3415_s7 + $0xc] ss:$16 sps:$4 sm:$0xff]  }
   0xa   :  { %v2217_v54 = vld [vmem:[%s3415_s7 + $0x4] ss:$16 sps:$4 sm:$0xff]   ;;  %v2215_v56 = vld [vmem:[%s3415_s7] ss:$16 sps:$4 sm:$0xff]   ;;  %v2221_v57 = vld [vmem:[%s3415_s7 + $0x8] ss:$16 sps:$4 sm:$0xff]  }
   0xb   :  { %2115 = vmatpush3.bf16.msra.mxu0 %v2193_v2  ;;  %v2621_v58 = vld [vmem:[%s3416_s9 + $0xe4] ss:$16 sps:$4 sm:$0xff]   ;;  %v2629_v60 = vld [vmem:[%s3416_s9 + $0xec] ss:$16 sps:$4 sm:$0xff]  }
   0xc   :  { %2116 = vmatprep.subr.bf16.mxu0 %v2194_v3 }
   0xf   :  { %2117 = vmatpush3.bf16.msra.mxu0 %v2194_v3 }
  0x10   :  { %2118 = vmatprep.subr.bf16.mxu0 %v2195_v5 }
  0x13   :  { %2119 = vmatpush3.bf16.msra.mxu0 %v2195_v5 }
  0x14   :  { %2120 = vmatprep.subr.bf16.mxu0 %v2196_v6 }
  0x17   :  { %2121 = vmatpush3.bf16.msra.mxu0 %v2196_v6  ;;  %v2639_v6 = vld [vmem:[%s3417_s4] ss:$0 sm:$0xff] }
  0x18   :  { %2122 = vmatprep.subr.bf16.mxu0 %v2197_v7 }
  0x1b   :  { %2123 = vmatpush3.bf16.msra.mxu0 %v2197_v7 }
  0x1c   :  { %2124 = vmatprep.subr.bf16.mxu0 %v2198_v8 }
  0x1f   :  { %2125 = vmatpush3.bf16.msra.mxu0 %v2198_v8 }
  0x20   :  { %568 = vmatprep.subr.bf16.mxu0 %v2214_v51  ;;  %v2744_v51 = vld [vmem:[%s3416_s9 + $0x88] ss:$16 sps:$4 sm:$0xff]  }
  0x22   :  { %2127 = vmatmul.mubr.bf16.vlgmr.msra.gmra.mxu0 %v2541_v9 }
  0x23   :  { %2130 = vmatprep.mubr.bf16.mxu0 %v2546_v10  ;;  %569 = vmatpush1.bf16.msra.mxu0 %v2212_v50  ;;  %v2739_v50 = vld [vmem:[%s3416_s9 + $0x80] ss:$16 sps:$4 sm:$0xff]  }
  0x24   :  { %570 = vmatprep.subr.bf16.mxu0 %v2217_v54  ;;  %v2751_v54 = vld [vmem:[%s3416_s9 + $0x64] ss:$16 sps:$4 sm:$0xff]  }
  0x27   :  { %571 = vmatpush1.bf16.msra.mxu0 %v2215_v56 }
  0x28   :  { %930 = vmatprep.subr.bf16.mxu0 %v2621_v58 }
  0x2a   :  { %2131 = vmatmul.mubr.bf16.gmra.mxu0 %v2553_v11 }
  0x2b   :  { %588 = vmatprep.mubr.bf16.mxu0 %v3423_v59 }
  0xe2   :  { %v2128_v14 = vpop.f32.mrf.mxu0 }
  0xe3   :  { %v190_v20 = vadd.f32 %v2128_v14, %v1963_v16 }
  0xe4   :  { %v181_v15 = vpop.f32.mrf.mxu0 }
  0xe5   :  { %v182_v18 = vadd.f32 %v1963_v16, %v181_v15  ;;  %v214_v27 = vmax.f32 %v190_v20, 0.0 }
  0xe6   :  { %v2129_v17 = vpop.f32.mrf.mxu0 }
  0xe7   :  { %v193_v19 = vadd.f32 %v2129_v17, %v1963_v16  ;;  %v212_v25 = vmax.f32 %v182_v18, 0.0 }
  0xe8   :  { %v184_v21 = vpop.f32.mrf.mxu0 }
  0xe9   :  { %v185_v22 = vadd.f32 %v1963_v16, %v184_v21  ;;  %v215_v23 = vmax.f32 %v193_v19, 0.0 }
  0xea   :  { %v2132_v24 = vpop.f32.mrf.mxu0 }
  0xeb   :  { %v213_v26 = vmax.f32 %v185_v22, 0.0  ;;  %v206_v28 = vadd.f32 %v2132_v24, %v1963_v16  ;;  %v221_v32 = vpack.c.bf16 %v215_v23, %v214_v27  ;;  %v2656_v22 = vld [vmem:[%s3416_s9 + $0xe0] ss:$16 sps:$4 sm:$0xff]   ;;  %v2661_v23 = vld [vmem:[%s3416_s9 + $0xe8] ss:$16 sps:$4 sm:$0xff]  }
  0xec   :  { %v197_v29 = vpop.f32.mrf.mxu0  ;;  %v2668_v27 = vld [vmem:[%s3416_s9 + $0xc4] ss:$16 sps:$4 sm:$0xff]  }
  0xed   :  { %v198_v30 = vadd.f32 %v1963_v16, %v197_v29  ;;  %v220_v31 = vpack.c.bf16 %v213_v26, %v212_v25  ;;  %v218_v36 = vmax.f32 %v206_v28, 0.0  ;;  %v2673_v28 = vld [vmem:[%s3416_s9 + $0xcc] ss:$16 sps:$4 sm:$0xff]  }
  0xee   :  { %v2133_v33 = vpop.f32.mrf.mxu0 }
  0xef   :  { %2136 = vmatprep.mubr.msk.bf16.mxu1 %vm239_vm0, %v220_v31  ;;  %v209_v35 = vadd.f32 %v2133_v33, %v1963_v16  ;;  %v216_v38 = vmax.f32 %v198_v30, 0.0  ;;  %v2688_v33 = vld [vmem:[%s3416_s9 + $0xc8] ss:$16 sps:$4 sm:$0xff]  }
  0xf0   :  { %2137 = vmatmul.mubr.msk.bf16.vlgmr.msra.gmra.mxu1 %vm239_vm0, %v221_v32  ;;  %v200_v37 = vpop.f32.mrf.mxu0  ;;  %v2683_v32 = vld [vmem:[%s3416_s9 + $0xc0] ss:$16 sps:$4 sm:$0xff]  }
  0xf1   :  { %v219_v39 = vmax.f32 %v209_v35, 0.0  ;;  %2145 = vmatpush3.bf16.msra.mxu1 %v2204_v13  ;;  %v201_v40 = vadd.f32 %v1963_v16, %v200_v37  ;;  %v2700_v37 = vld [vmem:[%s3416_s9 + $0xac] ss:$16 sps:$4 sm:$0xff]  }
  0xf2   :  { %2146 = vmatprep.subr.bf16.mxu1 %v2205_v34 }
  0xf3   :  { %v217_v42 = vmax.f32 %v201_v40, 0.0  ;;  %v223_v43 = vpack.c.bf16 %v219_v39, %v218_v36  ;;  %v2695_v36 = vld [vmem:[%s3416_s9 + $0xa4] ss:$16 sps:$4 sm:$0xff]  }
  0xf5   :  { %v222_v44 = vpack.c.bf16 %v217_v42, %v216_v38  ;;  %2147 = vmatpush3.bf16.msra.mxu1 %v2205_v34  ;;  %v2715_v42 = vld [vmem:[%s3416_s9 + $0xa8] ss:$16 sps:$4 sm:$0xff]  }
  0xf6   :  { %2148 = vmatprep.subr.bf16.mxu1 %v2206_v41 }
  0xf7   :  { %2140 = vmatprep.mubr.msk.bf16.mxu1 %vm239_vm0, %v222_v44 }
  0xf8   :  { %2141 = vmatmul.mubr.msk.bf16.gmra.mxu1 %vm239_vm0, %v223_v43 }
  0xf9   :  { %2149 = vmatpush3.bf16.msra.mxu1 %v2206_v41  ;;  %2160 = vmatprep.mubr.bf16.mxu1 %v2523_v4  ;;  %v2710_v41 = vld [vmem:[%s3416_s9 + $0xa0] ss:$16 sps:$4 sm:$0xff]  }
  0xfa   :  { %2150 = vmatprep.subr.bf16.mxu1 %v2207_v45 }
  0xfd   :  { %2151 = vmatpush3.bf16.msra.mxu1 %v2207_v45 }
  0xfe   :  { %2152 = vmatprep.subr.bf16.mxu1 %v2208_v46 }
 0x101   :  { %2153 = vmatpush3.bf16.msra.mxu1 %v2208_v46  ;;  %v2724_v46 = vld [vmem:[%s3416_s9 + $0x84] ss:$16 sps:$4 sm:$0xff]  }
 0x102   :  { %2154 = vmatprep.subr.bf16.mxu1 %v2209_v47 }
 0x105   :  { %2155 = vmatpush3.bf16.msra.mxu1 %v2209_v47  ;;  %v2729_v47 = vld [vmem:[%s3416_s9 + $0x8c] ss:$16 sps:$4 sm:$0xff]  }
 0x106   :  { %2156 = vmatprep.subr.bf16.mxu1 %v2210_v48 }
 0x109   :  { %2157 = vmatpush3.bf16.msra.mxu1 %v2210_v48 }
 0x10a   :  { %2158 = vmatprep.subr.bf16.mxu1 %v2211_v49 }
 0x10d   :  { %2159 = vmatpush3.bf16.msra.mxu1 %v2211_v49 }
 0x10e   :  { %641 = vmatprep.subr.bf16.mxu1 %v2220_v52 }
 0x110   :  { %2161 = vmatmul.mubr.bf16.vlgmr.msra.gmra.mxu1 %v2541_v9 }
 0x111   :  { %2164 = vmatprep.mubr.bf16.mxu1 %v2546_v10  ;;  %642 = vmatpush1.bf16.msra.mxu1 %v2218_v53  ;;  %v2646_v10 = vld [vmem:[%s3418_s6] ss:$0 sm:$0xff] }
 0x112   :  { %643 = vmatprep.subr.bf16.mxu1 %v2223_v55  ;;  %v2756_v55 = vld [vmem:[%s3416_s9 + $0x6c] ss:$16 sps:$4 sm:$0xff]  }
 0x115   :  { %644 = vmatpush1.bf16.msra.mxu1 %v2221_v57 }
 0x116   :  { %971 = vmatprep.subr.bf16.mxu1 %v2629_v60 }
 0x118   :  { %2165 = vmatmul.mubr.bf16.gmra.mxu1 %v2553_v11 }
 0x119   :  { %661 = vmatprep.mubr.bf16.mxu1 %v3423_v59 }
 0x1b0   :  { %v2138_v61 = vpop.f32.mrf.mxu1 }
 0x1b1   :  { %v295_v24 = vadd.f32 %v2138_v61, %v2639_v6  ;;  %v2767_v61 = vld [vmem:[%s3416_s9 + $0x60] ss:$16 sps:$4 sm:$0xff]  }
 0x1b2   :  { %v286_v62 = vpop.f32.mrf.mxu1 }
 0x1b3   :  { %v287_v8 = vadd.f32 %v2639_v6, %v286_v62  ;;  %v319_v34 = vmax.f32 %v295_v24, 0.0  ;;  %v2772_v62 = vld [vmem:[%s3416_s9 + $0x68] ss:$16 sps:$4 sm:$0xff]  }
 0x1b4   :  { %v2139_v63 = vpop.f32.mrf.mxu1 }
 0x1b5   :  { %v317_v14 = vmax.f32 %v287_v8, 0.0  ;;  %v298_v18 = vadd.f32 %v2139_v63, %v2639_v6 }
 0x1b6   :  { %v289_v0 = vpop.f32.mrf.mxu1 }
 0x1b7   :  { %v290_v9 = vadd.f32 %v2639_v6, %v289_v0  ;;  %v320_v30 = vmax.f32 %v298_v18, 0.0  ;;  %v2850_v18 = vld [vmem:[%s3416_s9] ss:$16 sps:$4 sm:$0xff]  }
 0x1b8   :  { %v2632_v1 = vpop.f32.mrf.mxu1 }
 0x1b9   :  { %v318_v15 = vmax.f32 %v290_v9, 0.0  ;;  %v311_v63 = vadd.f32 %v2632_v1, %v2639_v6 }
 0x1ba   :  { %v302_v2 = vpop.f32.mrf.mxu1 }
 0x1bb   :  { %v303_v43 = vadd.f32 %v2639_v6, %v302_v2  ;;  %v323_v8 = vmax.f32 %v311_v63, 0.0 }
 0x1bc   :  { %v2634_v3 = vpop.f32.mrf.mxu1 }
 0x1bd   :  { %v321_v52 = vmax.f32 %v303_v43, 0.0  ;;  %v314_v56 = vadd.f32 %v2634_v3, %v2639_v6  ;;  %v2782_v3 = vld [vmem:[%s3416_s9 + $0x44] ss:$16 sps:$4 sm:$0xff]  }
 0x1be   :  { %v305_v4 = vpop.f32.mrf.mxu1 }
 0x1bf   :  { %v306_v39 = vadd.f32 %v2639_v6, %v305_v4  ;;  %v2787_v4 = vld [vmem:[%s3416_s9 + $0x4c] ss:$16 sps:$4 sm:$0xff]   ;;  %v2798_v6 = vld [vmem:[%s3416_s9 + $0x40] ss:$16 sps:$4 sm:$0xff]  }
 0x1c1   :  { %v322_v48 = vmax.f32 %v306_v39, 0.0 }
 0x1d0   :  { %v2162_v5 = vpop.f32.mrf.mxu1 }
 0x1d1   :  { %v439_v31 = vadd.f32 %v2162_v5, %v2646_v10  ;;  %v324_v5 = vmax.f32 %v314_v56, 0.0 }
 0x1d2   :  { %v430_v7 = vpop.f32.mrf.mxu1 }
 0x1d3   :  { %v431_v12 = vadd.f32 %v2646_v10, %v430_v7  ;;  %v463_v40 = vadd.f32 %v439_v31, %v319_v34  ;;  %v2803_v7 = vld [vmem:[%s3416_s9 + $0x48] ss:$16 sps:$4 sm:$0xff]  }
 0x1d4   :  { %v2163_v11 = vpop.f32.mrf.mxu1 }
 0x1d5   :  { %v461_v19 = vadd.f32 %v431_v12, %v317_v14  ;;  %v442_v25 = vadd.f32 %v2163_v11, %v2646_v10  ;;  %v2815_v11 = vld [vmem:[%s3416_s9 + $0x2c] ss:$16 sps:$4 sm:$0xff]   ;;  %v2829_v14 = vld [vmem:[%s3416_s9 + $0x28] ss:$16 sps:$4 sm:$0xff]  }
 0x1d6   :  { %v433_v13 = vpop.f32.mrf.mxu1 }
 0x1d7   :  { %v434_v16 = vadd.f32 %v2646_v10, %v433_v13  ;;  %v464_v35 = vadd.f32 %v442_v25, %v320_v30  ;;  %v2824_v13 = vld [vmem:[%s3416_s9 + $0x20] ss:$16 sps:$4 sm:$0xff]  }
 0x1d8   :  { %v2650_v17 = vpop.f32.mrf.mxu1 }
 0x1d9   :  { %v462_v20 = vadd.f32 %v434_v16, %v318_v15  ;;  %v470_v44 = vpack.c.bf16 %v464_v35, %v463_v40  ;;  %v455_v1 = vadd.f32 %v2650_v17, %v2646_v10  ;;  %v2836_v16 = vld [vmem:[%s3416_s9 + $0x4] ss:$16 sps:$4 sm:$0xff]   ;;  %v2841_v17 = vld [vmem:[%s3416_s9 + $0xc] ss:$16 sps:$4 sm:$0xff]  }
 0x1da   :  { %v446_v21 = vpop.f32.mrf.mxu1 }
 0x1db   :  { %v469_v26 = vpack.c.bf16 %v462_v20, %v461_v19  ;;  %v447_v49 = vadd.f32 %v2646_v10, %v446_v21  ;;  %v467_v12 = vadd.f32 %v455_v1, %v323_v8  ;;  %v2855_v19 = vld [vmem:[%s3416_s9 + $0x8] ss:$16 sps:$4 sm:$0xff]   ;;  %v483_v20 = vlaneseq }
 0x1dc   :  { %v2167_v29 = vpop.f32.mrf.mxu1 }
 0x1dd   :  { %1999 = vmatmul.mubr.msk.bf16.vlgmr.msra.gmra.mxu0 %vm543_vm1, %v469_v26  ;;  %2003 = vmatmul.mubr.msk.bf16.vlgmr.msra.gmra.mxu1 %vm543_vm1, %v469_v26  ;;  %v465_v57 = vadd.f32 %v447_v49, %v321_v52  ;;  %v458_v0 = vadd.f32 %v2167_v29, %v2646_v10  ;;  %v484_v21 = vshrl.u32 %v483_v20, 7  ;;  %v481_v26 = vld [vmem:[%s3419_s8] sm:$0xf] }
 0x1de   :  { %931 = vmatpush1.bf16.msra.mxu0 %v2656_v22  ;;  %972 = vmatpush1.bf16.msra.mxu1 %v2661_v23  ;;  %v449_v38 = vpop.f32.mrf.mxu1 }
 0x1df   :  { %932 = vmatprep.subr.bf16.mxu0 %v2668_v27  ;;  %973 = vmatprep.subr.bf16.mxu1 %v2673_v28  ;;  %v450_v45 = vadd.f32 %v2646_v10, %v449_v38  ;;  %v468_v9 = vadd.f32 %v458_v0, %v324_v5  ;;  %v2810_v10 = vld [vmem:[%s3416_s9 + $0x24] ss:$16 sps:$4 sm:$0xff]   ;;  %v485_v24 = vsub.s32 0, %v484_v21  ;;  %v493_v25 = vsub.s32 2, %v484_v21 }
 0x1e0   :  { %598 = vmatprep.mubr.bf16.mxu0 %v3423_v59  ;;  %671 = vmatprep.mubr.bf16.mxu1 %v3423_v59  ;;  %v489_v31 = vsub.s32 1, %v484_v21  ;;  %v497_v34 = vsub.s32 3, %v484_v21 }
 0x1e1   :  { %v466_v53 = vadd.f32 %v450_v45, %v322_v48  ;;  %v472_v15 = vpack.c.bf16 %v468_v9, %v467_v12  ;;  %v486_v39 = vrot.slane %v481_v26, %v485_v24  ;;  %v2912_v40 = vrot.slane %v481_v26, %v493_v25 }
 0x1e2   :  { %933 = vmatpush1.bf16.msra.mxu0 %v2683_v32  ;;  %974 = vmatpush1.bf16.msra.mxu1 %v2688_v33  ;;  %v490_v45 = vrot.slane %v481_v26, %v489_v31  ;;  %v2914_v48 = vrot.slane %v481_v26, %v497_v34 }
 0x1e3   :  { %934 = vmatprep.subr.bf16.mxu0 %v2695_v36  ;;  %975 = vmatprep.subr.bf16.mxu1 %v2700_v37  ;;  %v471_v2 = vpack.c.bf16 %v466_v53, %v465_v57 }
 0x1e5   :  { %2000 = vmatmul.mubr.msk.bf16.gmra.mxu0 %vm543_vm1, %v470_v44  ;;  %2004 = vmatmul.mubr.msk.bf16.gmra.mxu1 %vm543_vm1, %v470_v44 }
 0x1e6   :  { %935 = vmatpush1.bf16.msra.mxu0 %v2710_v41  ;;  %976 = vmatpush1.bf16.msra.mxu1 %v2715_v42 }
 0x1e7   :  { %936 = vmatprep.subr.bf16.mxu0 %v2724_v46  ;;  %977 = vmatprep.subr.bf16.mxu1 %v2729_v47 }
 0x1e8   :  { %608 = vmatprep.mubr.bf16.mxu0 %v3423_v59  ;;  %681 = vmatprep.mubr.bf16.mxu1 %v3423_v59 }
 0x1ea   :  { %937 = vmatpush1.bf16.msra.mxu0 %v2739_v50  ;;  %978 = vmatpush1.bf16.msra.mxu1 %v2744_v51 }
 0x1eb   :  { %938 = vmatprep.subr.bf16.mxu0 %v2751_v54  ;;  %979 = vmatprep.subr.bf16.mxu1 %v2756_v55 }
 0x1ed   :  { %2001 = vmatmul.mubr.msk.bf16.gmra.mxu0 %vm543_vm1, %v471_v2  ;;  %2005 = vmatmul.mubr.msk.bf16.gmra.mxu1 %vm543_vm1, %v471_v2 }
 0x1ee   :  { %939 = vmatpush1.bf16.msra.mxu0 %v2767_v61  ;;  %980 = vmatpush1.bf16.msra.mxu1 %v2772_v62 }
 0x1ef   :  { %940 = vmatprep.subr.bf16.mxu0 %v2782_v3  ;;  %981 = vmatprep.subr.bf16.mxu1 %v2787_v4 }
 0x1f0   :  { %618 = vmatprep.mubr.bf16.mxu0 %v3423_v59  ;;  %691 = vmatprep.mubr.bf16.mxu1 %v3423_v59 }
 0x1f2   :  { %941 = vmatpush1.bf16.msra.mxu0 %v2798_v6  ;;  %982 = vmatpush1.bf16.msra.mxu1 %v2803_v7 }
 0x1f3   :  { %942 = vmatprep.subr.bf16.mxu0 %v2810_v10  ;;  %983 = vmatprep.subr.bf16.mxu1 %v2815_v11 }
 0x1f5   :  { %2002 = vmatmul.mubr.msk.bf16.gmra.mxu0 %vm543_vm1, %v472_v15  ;;  %2006 = vmatmul.mubr.msk.bf16.gmra.mxu1 %vm543_vm1, %v472_v15 }
 0x1f6   :  { %943 = vmatpush1.bf16.msra.mxu0 %v2824_v13  ;;  %984 = vmatpush1.bf16.msra.mxu1 %v2829_v14 }
 0x1f7   :  { %944 = vmatprep.subr.bf16.mxu0 %v2836_v16  ;;  %985 = vmatprep.subr.bf16.mxu1 %v2841_v17 }
 0x1f8   :  { %962 = vmatprep.mubr.bf16.mxu0 %v3423_v59  ;;  %1003 = vmatprep.mubr.bf16.mxu1 %v3423_v59 }
 0x1fa   :  { %945 = vmatpush1.bf16.msra.mxu0 %v2850_v18  ;;  %986 = vmatpush1.bf16.msra.mxu1 %v2855_v19 }
 0x1fb   :  { %1045 = vmatprep.subr.bf16.mxu0 %v2621_v58  ;;  %1086 = vmatprep.subr.bf16.mxu1 %v2629_v60 }
 0x1fd   :  { %963 = vmatmul.mubr.bf16.vlgmr.msra.gmra.mxu0 %v3423_v59  ;;  %1004 = vmatmul.mubr.bf16.vlgmr.msra.gmra.mxu1 %v3423_v59 }
 0x1fe   :  { %1046 = vmatpush1.bf16.msra.mxu0 %v2656_v22  ;;  %1087 = vmatpush1.bf16.msra.mxu1 %v2661_v23 }
 0x1ff   :  { %1047 = vmatprep.subr.bf16.mxu0 %v2668_v27  ;;  %1088 = vmatprep.subr.bf16.mxu1 %v2673_v28 }
 0x200   :  { %1077 = vmatprep.mubr.bf16.mxu0 %v3423_v59  ;;  %1118 = vmatprep.mubr.bf16.mxu1 %v3423_v59 }
 0x202   :  { %1048 = vmatpush1.bf16.msra.mxu0 %v2683_v32  ;;  %1089 = vmatpush1.bf16.msra.mxu1 %v2688_v33 }
 0x203   :  { %1049 = vmatprep.subr.bf16.mxu0 %v2695_v36  ;;  %1090 = vmatprep.subr.bf16.mxu1 %v2700_v37 }
 0x206   :  { %1050 = vmatpush1.bf16.msra.mxu0 %v2710_v41  ;;  %1091 = vmatpush1.bf16.msra.mxu1 %v2715_v42 }
 0x207   :  { %1051 = vmatprep.subr.bf16.mxu0 %v2724_v46  ;;  %1092 = vmatprep.subr.bf16.mxu1 %v2729_v47 }
 0x20a   :  { %1052 = vmatpush1.bf16.msra.mxu0 %v2739_v50  ;;  %1093 = vmatpush1.bf16.msra.mxu1 %v2744_v51 }
 0x20b   :  { %1053 = vmatprep.subr.bf16.mxu0 %v2751_v54  ;;  %1094 = vmatprep.subr.bf16.mxu1 %v2756_v55 }
 0x20e   :  { %1054 = vmatpush1.bf16.msra.mxu0 %v2767_v61  ;;  %1095 = vmatpush1.bf16.msra.mxu1 %v2772_v62 }
 0x20f   :  { %1055 = vmatprep.subr.bf16.mxu0 %v2782_v3  ;;  %1096 = vmatprep.subr.bf16.mxu1 %v2787_v4 }
 0x212   :  { %1056 = vmatpush1.bf16.msra.mxu0 %v2798_v6  ;;  %1097 = vmatpush1.bf16.msra.mxu1 %v2803_v7 }
 0x213   :  { %1057 = vmatprep.subr.bf16.mxu0 %v2810_v10  ;;  %1098 = vmatprep.subr.bf16.mxu1 %v2815_v11 }
 0x216   :  { %1058 = vmatpush1.bf16.msra.mxu0 %v2824_v13  ;;  %1099 = vmatpush1.bf16.msra.mxu1 %v2829_v14 }
 0x217   :  { %1059 = vmatprep.subr.bf16.mxu0 %v2836_v16  ;;  %1100 = vmatprep.subr.bf16.mxu1 %v2841_v17 }
 0x21a   :  { %1060 = vmatpush1.bf16.msra.mxu0 %v2850_v18  ;;  %1101 = vmatpush1.bf16.msra.mxu1 %v2855_v19 }
 0x21b   :  { %1160 = vmatprep.subr.bf16.mxu0 %v2621_v58  ;;  %1201 = vmatprep.subr.bf16.mxu1 %v2629_v60 }
 0x29d   :  { %v2904_v29 = vpop.f32.mrf.mxu0  ;;  %v2906_v30 = vpop.f32.mrf.mxu1 }
 0x29f   :  { %v2908_v35 = vpop.f32.mrf.mxu0  ;;  %v2910_v38 = vpop.f32.mrf.mxu1 }
 0x2a1   :  { %v594_v43 = vpop.f32.mrf.mxu0  ;;  %v667_v44 = vpop.f32.mrf.mxu1 }
 0x2a2   :  { %v2916_v49 = vadd.f32 %v594_v43, %v486_v39  ;;  %v2919_v52 = vadd.f32 %v667_v44, %v2912_v40 }
 0x2a3   :  { %v596_v53 = vpop.f32.mrf.mxu0  ;;  %v669_v56 = vpop.f32.mrf.mxu1 }
 0x2a4   :  { %v2921_v57 = vadd.f32 %v596_v53, %v490_v45  ;;  %v2924_v63 = vadd.f32 %v669_v56, %v2914_v48 }
 0x2a5   :  { %v600_v0 = vpop.f32.mrf.mxu0  ;;  %v673_v2 = vpop.f32.mrf.mxu1 }
 0x2a6   :  { %v2926_v5 = vadd.f32 %v600_v0, %v486_v39  ;;  %v2929_v1 = vadd.f32 %v673_v2, %v2912_v40 }
 0x2a7   :  { %v602_v8 = vpop.f32.mrf.mxu0  ;;  %v675_v9 = vpop.f32.mrf.mxu1 }
 0x2a8   :  { %3425 = vst [vmem:[#allocation4_spill] sm:$0xff] %v2929_v1  ;;  %v2931_v12 = vadd.f32 %v602_v8, %v490_v45  ;;  %v2934_v15 = vadd.f32 %v675_v9, %v2914_v48 }
 0x2a9   :  { %v604_v20 = vpop.f32.mrf.mxu0  ;;  %v677_v21 = vpop.f32.mrf.mxu1 }
 0x2aa   :  { %v2936_v24 = vadd.f32 %v604_v20, %v486_v39  ;;  %v2939_v25 = vadd.f32 %v677_v21, %v2912_v40 }
 0x2ab   :  { %v606_v26 = vpop.f32.mrf.mxu0  ;;  %v679_v31 = vpop.f32.mrf.mxu1 }
 0x2ac   :  { %3426 = vst [vmem:[#allocation5_spill] sm:$0xff] %v2936_v24  ;;  %3427 = vst [vmem:[#allocation6_spill] sm:$0xff] %v2939_v25  ;;  %v2941_v34 = vadd.f32 %v606_v26, %v490_v45  ;;  %v2944_v43 = vadd.f32 %v679_v31, %v2914_v48 }
 0x2ad   :  { %v610_v44 = vpop.f32.mrf.mxu0  ;;  %v683_v53 = vpop.f32.mrf.mxu1 }
 0x2ae   :  { %3428 = vst [vmem:[#allocation7_spill] sm:$0xff] %v2941_v34  ;;  %3429 = vst [vmem:[#allocation8_spill] sm:$0xff] %v2944_v43  ;;  %v2946_v56 = vadd.f32 %v610_v44, %v486_v39  ;;  %v2949_v0 = vadd.f32 %v683_v53, %v2912_v40 }
 0x2af   :  { %v612_v2 = vpop.f32.mrf.mxu0  ;;  %v685_v8 = vpop.f32.mrf.mxu1 }
 0x2b0   :  { %3430 = vst [vmem:[#allocation9_spill] sm:$0xff] %v2946_v56  ;;  %3431 = vst [vmem:[#allocation10_spill] sm:$0xff] %v2949_v0  ;;  %v2951_v9 = vadd.f32 %v612_v2, %v490_v45  ;;  %v2954_v20 = vadd.f32 %v685_v8, %v2914_v48 }
 0x2b1   :  { %v614_v21 = vpop.f32.mrf.mxu0  ;;  %v687_v26 = vpop.f32.mrf.mxu1 }
 0x2b2   :  { %3432 = vst [vmem:[#allocation11_spill] sm:$0xff] %v2951_v9  ;;  %3433 = vst [vmem:[#allocation12_spill] sm:$0xff] %v2954_v20  ;;  %v2956_v59 = vadd.f32 %v614_v21, %v486_v39  ;;  %v2959_v31 = vadd.f32 %v687_v26, %v2912_v40 }
 0x2b3   :  { %v616_v25 = vpop.f32.mrf.mxu0  ;;  %v689_v44 = vpop.f32.mrf.mxu1 }
 0x2b4   :  { %3434 = vst [vmem:[#allocation13_spill] sm:$0xff] %v2956_v59  ;;  %3435 = vst [vmem:[#allocation14_spill] sm:$0xff] %v2959_v31  ;;  %v2961_v56 = vadd.f32 %v616_v25, %v490_v45  ;;  %v2964_v53 = vadd.f32 %v689_v44, %v2914_v48 }
 0x2b5   :  { %v620_v0 = vpop.f32.mrf.mxu0  ;;  %v693_v2 = vpop.f32.mrf.mxu1 }
 0x2b6   :  { %3436 = vst [vmem:[#allocation15_spill] sm:$0xff] %v2961_v56  ;;  %3437 = vst [vmem:[#allocation16_spill] sm:$0xff] %v2964_v53  ;;  %v2966_v9 = vadd.f32 %v620_v0, %v486_v39  ;;  %v2969_v8 = vadd.f32 %v693_v2, %v2912_v40 }
 0x2b7   :  { %v622_v20 = vpop.f32.mrf.mxu0  ;;  %v695_v21 = vpop.f32.mrf.mxu1 }
 0x2b8   :  { %3438 = vst [vmem:[#allocation17_spill] sm:$0xff] %v2966_v9  ;;  %3439 = vst [vmem:[#allocation18_spill] sm:$0xff] %v2969_v8  ;;  %v2971_v59 = vadd.f32 %v622_v20, %v490_v45  ;;  %v2974_v26 = vadd.f32 %v695_v21, %v2914_v48  ;;  %v591_v9 = vadd.f32 %v2904_v29, %v486_v39 }
 0x2b9   :  { %v624_v31 = vpop.f32.mrf.mxu0  ;;  %v697_v25 = vpop.f32.mrf.mxu1  ;;  %v593_v21 = vadd.f32 %v2908_v35, %v490_v45 }
 0x2ba   :  { %3440 = vst [vmem:[#allocation19_spill] sm:$0xff] %v2971_v59  ;;  %3441 = vst [vmem:[#allocation20_spill] sm:$0xff] %v2974_v26  ;;  %v2976_v56 = vadd.f32 %v624_v31, %v486_v39  ;;  %v2979_v44 = vadd.f32 %v697_v25, %v2912_v40  ;;  %v666_v39 = vadd.f32 %v2910_v38, %v2914_v48 }
 0x2bb   :  { %v626_v53 = vpop.f32.mrf.mxu0  ;;  %v699_v0 = vpop.f32.mrf.mxu1 }
 0x2bc   :  { %3442 = vst [vmem:[#allocation21_spill] sm:$0xff] %v2976_v56  ;;  %3443 = vst [vmem:[#allocation22_spill] sm:$0xff] %v2979_v44  ;;  %v2982_v2 = vadd.f32 %v626_v53, %v490_v45  ;;  %v2985_v8 = vadd.f32 %v699_v0, %v2914_v48  ;;  %v664_v0 = vadd.f32 %v2906_v30, %v2912_v40 }
 0x2bd   :  { %v964_v20 = vpop.f32.mrf.mxu0  ;;  %v1005_v59 = vpop.f32.mrf.mxu1 }
 0x2be   :  { %v1012_v26 = vadd.f32 %v964_v20, %v591_v9  ;;  %v1014_v9 = vadd.f32 %v1005_v59, %v664_v0 }
 0x2bf   :  { %v966_v43 = vpop.f32.mrf.mxu0  ;;  %v1007_v31 = vpop.f32.mrf.mxu1 }
 0x2c0   :  { %v2039_v56 = vmul.f32 -1.442695, %v1012_v26  ;;  %v1013_v34 = vadd.f32 %v966_v43, %v593_v21  ;;  %v1015_v53 = vadd.f32 %v1007_v31, %v666_v39 }
 0x2c1   :  { %v968_v25 = vpop.f32.mrf.mxu0  ;;  %v1009_v44 = vpop.f32.mrf.mxu1 }
 0x2c2   :  { %2280 = vpow2.f32 %v2039_v56  ;;  %v2040_v24 = vmul.f32 -1.442695, %v1013_v34  ;;  %v2041_v35 = vmul.f32 -1.442695, %v1015_v53  ;;  %v3444_v25 = vmov 0  }
 0x2c3   :  { %v969_v1 = vpop.f32.mrf.mxu0  ;;  %v1010_v29 = vpop.f32.mrf.mxu1 }
 0x2c4   :  { %2282 = vpow2.f32 %v2040_v24 }
 0x2c5   :  { %2284 = vpow2.f32 %v2041_v35 }
 0x2cf   :  { %v2281_v45 = vpop.eup %2280 }
 0x2d0   :  { %v1019_v20 = vadd.f32 1.0, %v2281_v45 }
 0x2d1   :  { %v2283_v26 = vpop.eup %2282 }
 0x2d2   :  { %2286 = vrcp.f32 %v1019_v20  ;;  %v1025_v43 = vadd.f32 1.0, %v2283_v26  ;;  %v2285_v1 = vpop.eup %2284 }
 0x2d3   :  { %2288 = vtanh.f32 %v1014_v9  ;;  %v1032_v44 = vadd.f32 1.0, %v2285_v1 }
 0x2d4   :  { %2290 = vrcp.f32 %v1025_v43 }
 0x2d5   :  { %2292 = vrcp.f32 %v1032_v44 }
 0x2df   :  { %v2287_v34 = vpop.eup %2286 }
 0x2e0   :  { %v2289_v24 = vpop.eup %2288 }
 0x2e1   :  { %v2291_v56 = vpop.eup %2290  ;;  %v1036_v48 = vmul.f32 %v2289_v24, %v2287_v34 }
 0x2e2   :  { %v1035_v38 = vmul.f32 0.0, %v2291_v56  ;;  %v2293_v59 = vpop.eup %2292 }
 0x2e4   :  { %v2992_v21 = vadd.f32 %v1036_v48, %v1035_v38 }
 0x2e6   :  { %2294 = vtanh.f32 %v2992_v21 }
 0x2f3   :  { %v2295_v30 = vpop.eup %2294 }
 0x2f4   :  { %v1039_v40 = vmul.f32 %v2295_v30, %v2293_v59 }
 0x2f6   :  { %v1044_v31 = vpack.c.bf16 %v1039_v40, %v1039_v40 }
 0x2f8   :  { %1078 = vmatmul.mubr.bf16.vlgmr.msra.gmra.mxu0 %v1044_v31  ;;  %1119 = vmatmul.mubr.bf16.vlgmr.msra.gmra.mxu1 %v1044_v31 }
 0x2f9   :  { %1161 = vmatpush1.bf16.msra.mxu0 %v2656_v22  ;;  %1202 = vmatpush1.bf16.msra.mxu1 %v2661_v23 }
 0x2fa   :  { %1162 = vmatprep.subr.bf16.mxu0 %v2668_v27  ;;  %1203 = vmatprep.subr.bf16.mxu1 %v2673_v28 }
 0x2fb   :  { %1192 = vmatprep.mubr.bf16.mxu0 %v3444_v25  ;;  %1233 = vmatprep.mubr.bf16.mxu1 %v3444_v25 }
 0x2fd   :  { %1163 = vmatpush1.bf16.msra.mxu0 %v2683_v32  ;;  %1204 = vmatpush1.bf16.msra.mxu1 %v2688_v33 }
 0x2fe   :  { %1164 = vmatprep.subr.bf16.mxu0 %v2695_v36  ;;  %1205 = vmatprep.subr.bf16.mxu1 %v2700_v37 }
 0x301   :  { %1165 = vmatpush1.bf16.msra.mxu0 %v2710_v41  ;;  %1206 = vmatpush1.bf16.msra.mxu1 %v2715_v42 }
 0x302   :  { %1166 = vmatprep.subr.bf16.mxu0 %v2724_v46  ;;  %1207 = vmatprep.subr.bf16.mxu1 %v2729_v47 }
 0x305   :  { %1167 = vmatpush1.bf16.msra.mxu0 %v2739_v50  ;;  %1208 = vmatpush1.bf16.msra.mxu1 %v2744_v51 }
 0x306   :  { %1168 = vmatprep.subr.bf16.mxu0 %v2751_v54  ;;  %1209 = vmatprep.subr.bf16.mxu1 %v2756_v55 }
 0x309   :  { %1169 = vmatpush1.bf16.msra.mxu0 %v2767_v61  ;;  %1210 = vmatpush1.bf16.msra.mxu1 %v2772_v62 }
 0x30a   :  { %1170 = vmatprep.subr.bf16.mxu0 %v2782_v3  ;;  %1211 = vmatprep.subr.bf16.mxu1 %v2787_v4 }
 0x30d   :  { %1171 = vmatpush1.bf16.msra.mxu0 %v2798_v6  ;;  %1212 = vmatpush1.bf16.msra.mxu1 %v2803_v7 }
 0x30e   :  { %1172 = vmatprep.subr.bf16.mxu0 %v2810_v10  ;;  %1213 = vmatprep.subr.bf16.mxu1 %v2815_v11 }
 0x311   :  { %1173 = vmatpush1.bf16.msra.mxu0 %v2824_v13  ;;  %1214 = vmatpush1.bf16.msra.mxu1 %v2829_v14 }
 0x312   :  { %1174 = vmatprep.subr.bf16.mxu0 %v2836_v16  ;;  %1215 = vmatprep.subr.bf16.mxu1 %v2841_v17 }
 0x315   :  { %1175 = vmatpush1.bf16.msra.mxu0 %v2850_v18  ;;  %1216 = vmatpush1.bf16.msra.mxu1 %v2855_v19 }
 0x316   :  { %1275 = vmatprep.subr.bf16.mxu0 %v2621_v58  ;;  %1316 = vmatprep.subr.bf16.mxu1 %v2629_v60 }
 0x3b8   :  { %v1079_v29 = vpop.f32.mrf.mxu0  ;;  %v1120_v39 = vpop.f32.mrf.mxu1 }
 0x3b9   :  { %v1127_v53 = vadd.f32 %v1079_v29, %v2916_v49  ;;  %v1129_v56 = vadd.f32 %v1120_v39, %v2919_v52 }
 0x3ba   :  { %v1081_v0 = vpop.f32.mrf.mxu0  ;;  %v1122_v35 = vpop.f32.mrf.mxu1 }
 0x3bb   :  { %v2042_v45 = vmul.f32 -1.442695, %v1127_v53  ;;  %v1128_v9 = vadd.f32 %v1081_v0, %v2921_v57  ;;  %v1130_v24 = vadd.f32 %v1122_v35, %v2924_v63 }
 0x3bc   :  { %v1083_v20 = vpop.f32.mrf.mxu0  ;;  %v1124_v26 = vpop.f32.mrf.mxu1 }
 0x3bd   :  { %2296 = vpow2.f32 %v2042_v45  ;;  %v2043_v43 = vmul.f32 -1.442695, %v1128_v9  ;;  %v2044_v44 = vmul.f32 -1.442695, %v1130_v24 }
 0x3be   :  { %v1084_v1 = vpop.f32.mrf.mxu0  ;;  %v1125_v34 = vpop.f32.mrf.mxu1 }
 0x3bf   :  { %2298 = vpow2.f32 %v2043_v43 }
 0x3c0   :  { %2300 = vtanh.f32 %v1129_v56 }
 0x3c1   :  { %2302 = vpow2.f32 %v2044_v44 }
 0x3ca   :  { %v2297_v38 = vpop.eup %2296 }
 0x3cb   :  { %v1134_v48 = vadd.f32 1.0, %v2297_v38 }
 0x3cc   :  { %v2299_v49 = vpop.eup %2298 }
 0x3cd   :  { %2304 = vrcp.f32 %v1134_v48  ;;  %v1140_v59 = vadd.f32 1.0, %v2299_v49  ;;  %v2301_v57 = vpop.eup %2300 }
 0x3ce   :  { %v2303_v30 = vpop.eup %2302 }
 0x3cf   :  { %2306 = vrcp.f32 %v1140_v59  ;;  %v1147_v53 = vadd.f32 1.0, %v2303_v30  ;;  %v3445_v59 = vld [vmem:[#allocation4_spill] sm:$0xff] }
 0x3d1   :  { %2308 = vrcp.f32 %v1147_v53 }
 0x3da   :  { %v2305_v40 = vpop.eup %2304 }
 0x3db   :  { %v1151_v31 = vmul.f32 %v2305_v40, %v2301_v57 }
 0x3dc   :  { %v2307_v29 = vpop.eup %2306 }
 0x3dd   :  { %v1150_v0 = vmul.f32 %v2307_v29, %v2992_v21 }
 0x3de   :  { %v2309_v52 = vpop.eup %2308 }
 0x3df   :  { %v3034_v63 = vadd.f32 %v1151_v31, %v1150_v0 }
 0x3e1   :  { %2310 = vtanh.f32 %v3034_v63 }
 0x3ee   :  { %v2311_v39 = vpop.eup %2310 }
 0x3ef   :  { %v1154_v35 = vmul.f32 %v2311_v39, %v2309_v52 }
 0x3f1   :  { %v1159_v45 = vpack.c.bf16 %v1154_v35, %v1154_v35 }
 0x3f3   :  { %1193 = vmatmul.mubr.bf16.vlgmr.msra.gmra.mxu0 %v1159_v45  ;;  %1234 = vmatmul.mubr.bf16.vlgmr.msra.gmra.mxu1 %v1159_v45 }
 0x3f4   :  { %1276 = vmatpush1.bf16.msra.mxu0 %v2656_v22  ;;  %1317 = vmatpush1.bf16.msra.mxu1 %v2661_v23 }
 0x3f5   :  { %1277 = vmatprep.subr.bf16.mxu0 %v2668_v27  ;;  %1318 = vmatprep.subr.bf16.mxu1 %v2673_v28 }
 0x3f6   :  { %1307 = vmatprep.mubr.bf16.mxu0 %v3444_v25  ;;  %1348 = vmatprep.mubr.bf16.mxu1 %v3444_v25 }
 0x3f8   :  { %1278 = vmatpush1.bf16.msra.mxu0 %v2683_v32  ;;  %1319 = vmatpush1.bf16.msra.mxu1 %v2688_v33 }
 0x3f9   :  { %1279 = vmatprep.subr.bf16.mxu0 %v2695_v36  ;;  %1320 = vmatprep.subr.bf16.mxu1 %v2700_v37 }
 0x3fc   :  { %1280 = vmatpush1.bf16.msra.mxu0 %v2710_v41  ;;  %1321 = vmatpush1.bf16.msra.mxu1 %v2715_v42 }
 0x3fd   :  { %1281 = vmatprep.subr.bf16.mxu0 %v2724_v46  ;;  %1322 = vmatprep.subr.bf16.mxu1 %v2729_v47 }
 0x400   :  { %1282 = vmatpush1.bf16.msra.mxu0 %v2739_v50  ;;  %1323 = vmatpush1.bf16.msra.mxu1 %v2744_v51 }
 0x401   :  { %1283 = vmatprep.subr.bf16.mxu0 %v2751_v54  ;;  %1324 = vmatprep.subr.bf16.mxu1 %v2756_v55 }
 0x404   :  { %1284 = vmatpush1.bf16.msra.mxu0 %v2767_v61  ;;  %1325 = vmatpush1.bf16.msra.mxu1 %v2772_v62 }
 0x405   :  { %1285 = vmatprep.subr.bf16.mxu0 %v2782_v3  ;;  %1326 = vmatprep.subr.bf16.mxu1 %v2787_v4 }
 0x408   :  { %1286 = vmatpush1.bf16.msra.mxu0 %v2798_v6  ;;  %1327 = vmatpush1.bf16.msra.mxu1 %v2803_v7 }
 0x409   :  { %1287 = vmatprep.subr.bf16.mxu0 %v2810_v10  ;;  %1328 = vmatprep.subr.bf16.mxu1 %v2815_v11 }
 0x40c   :  { %1288 = vmatpush1.bf16.msra.mxu0 %v2824_v13  ;;  %1329 = vmatpush1.bf16.msra.mxu1 %v2829_v14 }
 0x40d   :  { %1289 = vmatprep.subr.bf16.mxu0 %v2836_v16  ;;  %1330 = vmatprep.subr.bf16.mxu1 %v2841_v17 }
 0x410   :  { %1290 = vmatpush1.bf16.msra.mxu0 %v2850_v18  ;;  %1331 = vmatpush1.bf16.msra.mxu1 %v2855_v19 }
 0x411   :  { %1390 = vmatprep.subr.bf16.mxu0 %v2621_v58  ;;  %1431 = vmatprep.subr.bf16.mxu1 %v2629_v60 }
 0x4b3   :  { %v1194_v21 = vpop.f32.mrf.mxu0  ;;  %v1235_v9 = vpop.f32.mrf.mxu1 }
 0x4b4   :  { %v1242_v20 = vadd.f32 %v1194_v21, %v2926_v5  ;;  %v1244_v57 = vadd.f32 %v1235_v9, %v3445_v59 }
 0x4b5   :  { %v1196_v26 = vpop.f32.mrf.mxu0  ;;  %v1237_v43 = vpop.f32.mrf.mxu1 }
 0x4b6   :  { %v2045_v1 = vmul.f32 -1.442695, %v1242_v20  ;;  %v1243_v34 = vadd.f32 %v1196_v26, %v2931_v12  ;;  %v1245_v49 = vadd.f32 %v1237_v43, %v2934_v15 }
 0x4b7   :  { %v1198_v24 = vpop.f32.mrf.mxu0  ;;  %v1239_v56 = vpop.f32.mrf.mxu1 }
 0x4b8   :  { %2312 = vpow2.f32 %v2045_v1  ;;  %v2046_v44 = vmul.f32 -1.442695, %v1243_v34  ;;  %v2047_v30 = vmul.f32 -1.442695, %v1245_v49  ;;  %v3446_v1 = vld [vmem:[#allocation5_spill] sm:$0xff] }
 0x4b9   :  { %v1199_v38 = vpop.f32.mrf.mxu0  ;;  %v1240_v48 = vpop.f32.mrf.mxu1 }
 0x4ba   :  { %2314 = vpow2.f32 %v2046_v44  ;;  %v3447_v38 = vld [vmem:[#allocation7_spill] sm:$0xff] }
 0x4bb   :  { %2316 = vtanh.f32 %v1244_v57 }
 0x4bc   :  { %2318 = vpow2.f32 %v2047_v30 }
 0x4c5   :  { %v2313_v40 = vpop.eup %2312 }
 0x4c6   :  { %v1249_v31 = vadd.f32 1.0, %v2313_v40 }
 0x4c7   :  { %v2315_v5 = vpop.eup %2314 }
 0x4c8   :  { %2320 = vrcp.f32 %v1249_v31  ;;  %v1255_v29 = vadd.f32 1.0, %v2315_v5  ;;  %v2317_v12 = vpop.eup %2316  ;;  %v3448_v31 = vld [vmem:[#allocation8_spill] sm:$0xff]  ;;  %v3449_v5 = vld [vmem:[#allocation6_spill] sm:$0xff] }
 0x4c9   :  { %v2319_v53 = vpop.eup %2318 }
 0x4ca   :  { %2322 = vrcp.f32 %v1255_v29  ;;  %v1262_v35 = vadd.f32 1.0, %v2319_v53 }
 0x4cc   :  { %2324 = vrcp.f32 %v1262_v35 }
 0x4d5   :  { %v2321_v0 = vpop.eup %2320 }
 0x4d6   :  { %v1266_v52 = vmul.f32 %v2321_v0, %v2317_v12 }
 0x4d7   :  { %v2323_v39 = vpop.eup %2322 }
 0x4d8   :  { %v1265_v45 = vmul.f32 %v2323_v39, %v3034_v63 }
 0x4d9   :  { %v2325_v21 = vpop.eup %2324 }
 0x4da   :  { %v3076_v15 = vadd.f32 %v1266_v52, %v1265_v45 }
 0x4dc   :  { %2326 = vtanh.f32 %v3076_v15 }
 0x4e9   :  { %v2327_v9 = vpop.eup %2326 }
 0x4ea   :  { %v1269_v20 = vmul.f32 %v2327_v9, %v2325_v21 }
 0x4ec   :  { %v1274_v26 = vpack.c.bf16 %v1269_v20, %v1269_v20 }
 0x4ee   :  { %1308 = vmatmul.mubr.bf16.vlgmr.msra.gmra.mxu0 %v1274_v26  ;;  %1349 = vmatmul.mubr.bf16.vlgmr.msra.gmra.mxu1 %v1274_v26 }
 0x4ef   :  { %1391 = vmatpush1.bf16.msra.mxu0 %v2656_v22  ;;  %1432 = vmatpush1.bf16.msra.mxu1 %v2661_v23 }
 0x4f0   :  { %1392 = vmatprep.subr.bf16.mxu0 %v2668_v27  ;;  %1433 = vmatprep.subr.bf16.mxu1 %v2673_v28 }
 0x4f1   :  { %1422 = vmatprep.mubr.bf16.mxu0 %v3444_v25  ;;  %1463 = vmatprep.mubr.bf16.mxu1 %v3444_v25 }
 0x4f3   :  { %1393 = vmatpush1.bf16.msra.mxu0 %v2683_v32  ;;  %1434 = vmatpush1.bf16.msra.mxu1 %v2688_v33 }
 0x4f4   :  { %1394 = vmatprep.subr.bf16.mxu0 %v2695_v36  ;;  %1435 = vmatprep.subr.bf16.mxu1 %v2700_v37 }
 0x4f7   :  { %1395 = vmatpush1.bf16.msra.mxu0 %v2710_v41  ;;  %1436 = vmatpush1.bf16.msra.mxu1 %v2715_v42 }
 0x4f8   :  { %1396 = vmatprep.subr.bf16.mxu0 %v2724_v46  ;;  %1437 = vmatprep.subr.bf16.mxu1 %v2729_v47 }
 0x4fb   :  { %1397 = vmatpush1.bf16.msra.mxu0 %v2739_v50  ;;  %1438 = vmatpush1.bf16.msra.mxu1 %v2744_v51 }
 0x4fc   :  { %1398 = vmatprep.subr.bf16.mxu0 %v2751_v54  ;;  %1439 = vmatprep.subr.bf16.mxu1 %v2756_v55 }
 0x4ff   :  { %1399 = vmatpush1.bf16.msra.mxu0 %v2767_v61  ;;  %1440 = vmatpush1.bf16.msra.mxu1 %v2772_v62 }
 0x500   :  { %1400 = vmatprep.subr.bf16.mxu0 %v2782_v3  ;;  %1441 = vmatprep.subr.bf16.mxu1 %v2787_v4 }
 0x503   :  { %1401 = vmatpush1.bf16.msra.mxu0 %v2798_v6  ;;  %1442 = vmatpush1.bf16.msra.mxu1 %v2803_v7 }
 0x504   :  { %1402 = vmatprep.subr.bf16.mxu0 %v2810_v10  ;;  %1443 = vmatprep.subr.bf16.mxu1 %v2815_v11 }
 0x507   :  { %1403 = vmatpush1.bf16.msra.mxu0 %v2824_v13  ;;  %1444 = vmatpush1.bf16.msra.mxu1 %v2829_v14 }
 0x508   :  { %1404 = vmatprep.subr.bf16.mxu0 %v2836_v16  ;;  %1445 = vmatprep.subr.bf16.mxu1 %v2841_v17 }
 0x50b   :  { %1405 = vmatpush1.bf16.msra.mxu0 %v2850_v18  ;;  %1446 = vmatpush1.bf16.msra.mxu1 %v2855_v19 }
 0x50c   :  { %1505 = vmatprep.subr.bf16.mxu0 %v2621_v58  ;;  %1546 = vmatprep.subr.bf16.mxu1 %v2629_v60 }
 0x5ae   :  { %v1309_v63 = vpop.f32.mrf.mxu0  ;;  %v1350_v43 = vpop.f32.mrf.mxu1 }
 0x5af   :  { %v1357_v34 = vadd.f32 %v1309_v63, %v3446_v1  ;;  %v1359_v60 = vadd.f32 %v1350_v43, %v3449_v5 }
 0x5b0   :  { %v1311_v24 = vpop.f32.mrf.mxu0  ;;  %v1352_v56 = vpop.f32.mrf.mxu1 }
 0x5b1   :  { %v2048_v44 = vmul.f32 -1.442695, %v1357_v34  ;;  %v1358_v48 = vadd.f32 %v1311_v24, %v3447_v38  ;;  %v1360_v58 = vadd.f32 %v1352_v56, %v3448_v31 }
 0x5b2   :  { %v1313_v49 = vpop.f32.mrf.mxu0  ;;  %v1354_v59 = vpop.f32.mrf.mxu1 }
 0x5b3   :  { %2328 = vpow2.f32 %v2048_v44  ;;  %v2049_v57 = vmul.f32 -1.442695, %v1358_v48  ;;  %v2050_v29 = vmul.f32 -1.442695, %v1360_v58 }
 0x5b4   :  { %v1314_v30 = vpop.f32.mrf.mxu0  ;;  %v1355_v40 = vpop.f32.mrf.mxu1 }
 0x5b5   :  { %2330 = vpow2.f32 %v2049_v57 }
 0x5b6   :  { %2332 = vtanh.f32 %v1359_v60 }
 0x5b7   :  { %2334 = vpow2.f32 %v2050_v29 }
 0x5c0   :  { %v2329_v12 = vpop.eup %2328 }
 0x5c1   :  { %v1364_v53 = vadd.f32 1.0, %v2329_v12 }
 0x5c2   :  { %v2331_v0 = vpop.eup %2330 }
 0x5c3   :  { %2336 = vrcp.f32 %v1364_v53  ;;  %v1370_v52 = vadd.f32 1.0, %v2331_v0  ;;  %v2333_v39 = vpop.eup %2332  ;;  %v3176_v0 = vld [vmem:[%s3416_s9 + $0xe0] ss:$16 sps:$4 sm:$0xff]  }
 0x5c4   :  { %v2335_v35 = vpop.eup %2334 }
 0x5c5   :  { %2338 = vrcp.f32 %v1370_v52  ;;  %v1377_v20 = vadd.f32 1.0, %v2335_v35  ;;  %v3182_v52 = vld [vmem:[%s3416_s9 + $0xe8] ss:$16 sps:$4 sm:$0xff]   ;;  %v3194_v35 = vld [vmem:[%s3416_s9 + $0xcc] ss:$16 sps:$4 sm:$0xff]  }
 0x5c7   :  { %2340 = vrcp.f32 %v1377_v20  ;;  %v3220_v20 = vld [vmem:[%s3416_s9 + $0xac] ss:$16 sps:$4 sm:$0xff]  }
 0x5d0   :  { %v2337_v45 = vpop.eup %2336 }
 0x5d1   :  { %v1381_v21 = vmul.f32 %v2337_v45, %v2333_v39  ;;  %v3188_v39 = vld [vmem:[%s3416_s9 + $0xc4] ss:$16 sps:$4 sm:$0xff]   ;;  %v3202_v45 = vld [vmem:[%s3416_s9 + $0xc0] ss:$16 sps:$4 sm:$0xff]  }
 0x5d2   :  { %v2339_v9 = vpop.eup %2338 }
 0x5d3   :  { %v1380_v26 = vmul.f32 %v2339_v9, %v3076_v15  ;;  %v3214_v9 = vld [vmem:[%s3416_s9 + $0xa4] ss:$16 sps:$4 sm:$0xff]  }
 0x5d4   :  { %v2341_v43 = vpop.eup %2340 }
 0x5d5   :  { %v3118_v63 = vadd.f32 %v1381_v21, %v1380_v26  ;;  %v3208_v21 = vld [vmem:[%s3416_s9 + $0xc8] ss:$16 sps:$4 sm:$0xff]   ;;  %v3226_v26 = vld [vmem:[%s3416_s9 + $0xa0] ss:$16 sps:$4 sm:$0xff]  }
 0x5d7   :  { %2342 = vtanh.f32 %v3118_v63 }
 0x5e4   :  { %v2343_v1 = vpop.eup %2342 }
 0x5e5   :  { %v1384_v34 = vmul.f32 %v2343_v1, %v2341_v43  ;;  %v3238_v43 = vld [vmem:[%s3416_s9 + $0x84] ss:$16 sps:$4 sm:$0xff]   ;;  %v3244_v1 = vld [vmem:[%s3416_s9 + $0x8c] ss:$16 sps:$4 sm:$0xff]  }
 0x5e7   :  { %v1389_v24 = vpack.c.bf16 %v1384_v34, %v1384_v34  ;;  %v3250_v34 = vld [vmem:[%s3416_s9 + $0x80] ss:$16 sps:$4 sm:$0xff]  }
 0x5e9   :  { %1423 = vmatmul.mubr.bf16.vlgmr.msra.gmra.mxu0 %v1389_v24  ;;  %1464 = vmatmul.mubr.bf16.vlgmr.msra.gmra.mxu1 %v1389_v24  ;;  %v3256_v24 = vld [vmem:[%s3416_s9 + $0x88] ss:$16 sps:$4 sm:$0xff]  }
 0x5ea   :  { %1506 = vmatpush1.bf16.msra.mxu0 %v2656_v22  ;;  %1547 = vmatpush1.bf16.msra.mxu1 %v2661_v23  ;;  %v3156_v22 = vld [vmem:[%s3416_s9 + $0xe4] ss:$16 sps:$4 sm:$0xff]   ;;  %v3162_v23 = vld [vmem:[%s3416_s9 + $0xec] ss:$16 sps:$4 sm:$0xff]  }
 0x5eb   :  { %1507 = vmatprep.subr.bf16.mxu0 %v2668_v27  ;;  %1548 = vmatprep.subr.bf16.mxu1 %v2673_v28 }
 0x5ec   :  { %1537 = vmatprep.mubr.bf16.mxu0 %v3444_v25  ;;  %1578 = vmatprep.mubr.bf16.mxu1 %v3444_v25 }
 0x5ee   :  { %1508 = vmatpush1.bf16.msra.mxu0 %v2683_v32  ;;  %1549 = vmatpush1.bf16.msra.mxu1 %v2688_v33  ;;  %v3450_v32 = vld [vmem:[#allocation9_spill] sm:$0xff] }
 0x5ef   :  { %1509 = vmatprep.subr.bf16.mxu0 %v2695_v36  ;;  %1550 = vmatprep.subr.bf16.mxu1 %v2700_v37 }
 0x5f2   :  { %1510 = vmatpush1.bf16.msra.mxu0 %v2710_v41  ;;  %1551 = vmatpush1.bf16.msra.mxu1 %v2715_v42  ;;  %v3451_v42 = vld [vmem:[#allocation11_spill] sm:$0xff] }
 0x5f3   :  { %1511 = vmatprep.subr.bf16.mxu0 %v2724_v46  ;;  %1552 = vmatprep.subr.bf16.mxu1 %v2729_v47 }
 0x5f6   :  { %1512 = vmatpush1.bf16.msra.mxu0 %v2739_v50  ;;  %1553 = vmatpush1.bf16.msra.mxu1 %v2744_v51 }
 0x5f7   :  { %1513 = vmatprep.subr.bf16.mxu0 %v2751_v54  ;;  %1554 = vmatprep.subr.bf16.mxu1 %v2756_v55 }
 0x5fa   :  { %1514 = vmatpush1.bf16.msra.mxu0 %v2767_v61  ;;  %1555 = vmatpush1.bf16.msra.mxu1 %v2772_v62  ;;  %v3452_v61 = vld [vmem:[#allocation12_spill] sm:$0xff] }
 0x5fb   :  { %1515 = vmatprep.subr.bf16.mxu0 %v2782_v3  ;;  %1556 = vmatprep.subr.bf16.mxu1 %v2787_v4  ;;  %v3453_v3 = vld [vmem:[#allocation10_spill] sm:$0xff] }
 0x5fe   :  { %1516 = vmatpush1.bf16.msra.mxu0 %v2798_v6  ;;  %1557 = vmatpush1.bf16.msra.mxu1 %v2803_v7 }
 0x5ff   :  { %1517 = vmatprep.subr.bf16.mxu0 %v2810_v10  ;;  %1558 = vmatprep.subr.bf16.mxu1 %v2815_v11 }
 0x602   :  { %1518 = vmatpush1.bf16.msra.mxu0 %v2824_v13  ;;  %1559 = vmatpush1.bf16.msra.mxu1 %v2829_v14 }
 0x603   :  { %1519 = vmatprep.subr.bf16.mxu0 %v2836_v16  ;;  %1560 = vmatprep.subr.bf16.mxu1 %v2841_v17 }
 0x606   :  { %1520 = vmatpush1.bf16.msra.mxu0 %v2850_v18  ;;  %1561 = vmatpush1.bf16.msra.mxu1 %v2855_v19 }
 0x607   :  { %1620 = vmatprep.subr.bf16.mxu0 %v3156_v22  ;;  %1661 = vmatprep.subr.bf16.mxu1 %v3162_v23 }
 0x6a9   :  { %v1424_v27 = vpop.f32.mrf.mxu0  ;;  %v1465_v28 = vpop.f32.mrf.mxu1 }
 0x6aa   :  { %v1472_v33 = vadd.f32 %v1424_v27, %v3450_v32  ;;  %v1474_v4 = vadd.f32 %v1465_v28, %v3453_v3  ;;  %v3262_v27 = vld [vmem:[%s3416_s9 + $0x64] ss:$16 sps:$4 sm:$0xff]   ;;  %v3268_v28 = vld [vmem:[%s3416_s9 + $0x6c] ss:$16 sps:$4 sm:$0xff]   ;;  %v3274_v32 = vld [vmem:[%s3416_s9 + $0x60] ss:$16 sps:$4 sm:$0xff]  }
 0x6ab   :  { %v1426_v36 = vpop.f32.mrf.mxu0  ;;  %v1467_v37 = vpop.f32.mrf.mxu1 }
 0x6ac   :  { %v2051_v41 = vmul.f32 -1.442695, %v1472_v33  ;;  %v1473_v46 = vadd.f32 %v1426_v36, %v3451_v42  ;;  %v1475_v62 = vadd.f32 %v1467_v37, %v3452_v61  ;;  %v3280_v33 = vld [vmem:[%s3416_s9 + $0x68] ss:$16 sps:$4 sm:$0xff]   ;;  %v3286_v36 = vld [vmem:[%s3416_s9 + $0x44] ss:$16 sps:$4 sm:$0xff]  }
 0x6ad   :  { %v1428_v47 = vpop.f32.mrf.mxu0  ;;  %v1469_v50 = vpop.f32.mrf.mxu1  ;;  %v3292_v37 = vld [vmem:[%s3416_s9 + $0x4c] ss:$16 sps:$4 sm:$0xff]  }
 0x6ae   :  { %2344 = vpow2.f32 %v2051_v41  ;;  %v2052_v51 = vmul.f32 -1.442695, %v1473_v46  ;;  %v2053_v15 = vmul.f32 -1.442695, %v1475_v62 }
 0x6af   :  { %v1429_v54 = vpop.f32.mrf.mxu0  ;;  %v1470_v55 = vpop.f32.mrf.mxu1 }
 0x6b0   :  { %2346 = vpow2.f32 %v2052_v51  ;;  %v3457_v51 = vld [vmem:[#allocation14_spill] sm:$0xff] }
 0x6b1   :  { %2348 = vtanh.f32 %v1474_v4 }
 0x6b2   :  { %2350 = vpow2.f32 %v2053_v15 }
 0x6bb   :  { %v2345_v56 = vpop.eup %2344 }
 0x6bc   :  { %v1479_v44 = vadd.f32 1.0, %v2345_v56 }
 0x6bd   :  { %v2347_v38 = vpop.eup %2346 }
 0x6be   :  { %2352 = vrcp.f32 %v1479_v44  ;;  %v1485_v48 = vadd.f32 1.0, %v2347_v38  ;;  %v2349_v49 = vpop.eup %2348 }
 0x6bf   :  { %v2351_v59 = vpop.eup %2350 }
 0x6c0   :  { %2354 = vrcp.f32 %v1485_v48  ;;  %v1492_v31 = vadd.f32 1.0, %v2351_v59 }
 0x6c2   :  { %2356 = vrcp.f32 %v1492_v31 }
 0x6cb   :  { %v2353_v57 = vpop.eup %2352 }
 0x6cc   :  { %v1496_v30 = vmul.f32 %v2353_v57, %v2349_v49 }
 0x6cd   :  { %v2355_v40 = vpop.eup %2354 }
 0x6ce   :  { %v1495_v58 = vmul.f32 %v2355_v40, %v3118_v63  ;;  %v3232_v63 = vld [vmem:[%s3416_s9 + $0xa8] ss:$16 sps:$4 sm:$0xff]  }
 0x6cf   :  { %v2357_v60 = vpop.eup %2356 }
 0x6d0   :  { %v3170_v5 = vadd.f32 %v1496_v30, %v1495_v58  ;;  %v2431_v58 = vld [vmem:[%s3416_s9 + $0x48] ss:$16 sps:$4 sm:$0xff]  }
 0x6d2   :  { %2358 = vtanh.f32 %v3170_v5 }
 0x6df   :  { %v2359_v29 = vpop.eup %2358 }
 0x6e0   :  { %v1499_v12 = vmul.f32 %v2359_v29, %v2357_v60  ;;  %v2433_v60 = vld [vmem:[%s3416_s9 + $0x2c] ss:$16 sps:$4 sm:$0xff]   ;;  %v2434_v29 = vld [vmem:[%s3416_s9 + $0x20] ss:$16 sps:$4 sm:$0xff]  }
 0x6e2   :  { %v1504_v53 = vpack.c.bf16 %v1499_v12, %v1499_v12  ;;  %v2435_v12 = vld [vmem:[%s3416_s9 + $0x28] ss:$16 sps:$4 sm:$0xff]  }
 0x6e4   :  { %1538 = vmatmul.mubr.bf16.vlgmr.msra.gmra.mxu0 %v1504_v53  ;;  %1579 = vmatmul.mubr.bf16.vlgmr.msra.gmra.mxu1 %v1504_v53  ;;  %v2436_v53 = vld [vmem:[%s3416_s9 + $0x4] ss:$16 sps:$4 sm:$0xff]  }
 0x6e5   :  { %1621 = vmatpush1.bf16.msra.mxu0 %v3176_v0  ;;  %1662 = vmatpush1.bf16.msra.mxu1 %v3182_v52 }
 0x6e6   :  { %1622 = vmatprep.subr.bf16.mxu0 %v3188_v39  ;;  %1663 = vmatprep.subr.bf16.mxu1 %v3194_v35 }
 0x6e7   :  { %1652 = vmatprep.mubr.bf16.mxu0 %v3444_v25  ;;  %1693 = vmatprep.mubr.bf16.mxu1 %v3444_v25 }
 0x6e9   :  { %1623 = vmatpush1.bf16.msra.mxu0 %v3202_v45  ;;  %1664 = vmatpush1.bf16.msra.mxu1 %v3208_v21 }
 0x6ea   :  { %1624 = vmatprep.subr.bf16.mxu0 %v3214_v9  ;;  %1665 = vmatprep.subr.bf16.mxu1 %v3220_v20 }
 0x6ed   :  { %1625 = vmatpush1.bf16.msra.mxu0 %v3226_v26  ;;  %1666 = vmatpush1.bf16.msra.mxu1 %v3232_v63 }
 0x6ee   :  { %1626 = vmatprep.subr.bf16.mxu0 %v3238_v43  ;;  %1667 = vmatprep.subr.bf16.mxu1 %v3244_v1 }
 0x6f1   :  { %1627 = vmatpush1.bf16.msra.mxu0 %v3250_v34  ;;  %1668 = vmatpush1.bf16.msra.mxu1 %v3256_v24 }
 0x6f2   :  { %1628 = vmatprep.subr.bf16.mxu0 %v3262_v27  ;;  %1669 = vmatprep.subr.bf16.mxu1 %v3268_v28 }
 0x6f5   :  { %1629 = vmatpush1.bf16.msra.mxu0 %v3274_v32  ;;  %1670 = vmatpush1.bf16.msra.mxu1 %v3280_v33 }
 0x6f6   :  { %1630 = vmatprep.subr.bf16.mxu0 %v3286_v36  ;;  %1671 = vmatprep.subr.bf16.mxu1 %v3292_v37 }
 0x6f9   :  { %1631 = vmatpush1.bf16.msra.mxu0 %v2798_v6  ;;  %1672 = vmatpush1.bf16.msra.mxu1 %v2803_v7 }
 0x6fa   :  { %1632 = vmatprep.subr.bf16.mxu0 %v2810_v10  ;;  %1673 = vmatprep.subr.bf16.mxu1 %v2815_v11  ;;  %v3454_v10 = vld [vmem:[#allocation13_spill] sm:$0xff] }
 0x6fd   :  { %1633 = vmatpush1.bf16.msra.mxu0 %v2824_v13  ;;  %1674 = vmatpush1.bf16.msra.mxu1 %v2829_v14  ;;  %v3455_v14 = vld [vmem:[#allocation15_spill] sm:$0xff] }
 0x6fe   :  { %1634 = vmatprep.subr.bf16.mxu0 %v2836_v16  ;;  %1675 = vmatprep.subr.bf16.mxu1 %v2841_v17 }
 0x701   :  { %1635 = vmatpush1.bf16.msra.mxu0 %v2850_v18  ;;  %1676 = vmatpush1.bf16.msra.mxu1 %v2855_v19  ;;  %v3456_v19 = vld [vmem:[#allocation16_spill] sm:$0xff] }
 0x702   :  { %1735 = vmatprep.subr.bf16.mxu0 %v3156_v22  ;;  %1776 = vmatprep.subr.bf16.mxu1 %v3162_v23 }
 0x7a4   :  { %v1539_v6 = vpop.f32.mrf.mxu0  ;;  %v1580_v7 = vpop.f32.mrf.mxu1 }
 0x7a5   :  { %v1587_v11 = vadd.f32 %v1539_v6, %v3454_v10  ;;  %v1589_v23 = vadd.f32 %v1580_v7, %v3457_v51 }
 0x7a6   :  { %v1541_v41 = vpop.f32.mrf.mxu0  ;;  %v1582_v13 = vpop.f32.mrf.mxu1 }
 0x7a7   :  { %v2054_v42 = vmul.f32 -1.442695, %v1587_v11  ;;  %v1588_v46 = vadd.f32 %v1541_v41, %v3455_v14  ;;  %v1590_v22 = vadd.f32 %v1582_v13, %v3456_v19 }
 0x7a8   :  { %v1543_v16 = vpop.f32.mrf.mxu0  ;;  %v1584_v47 = vpop.f32.mrf.mxu1 }
 0x7a9   :  { %2360 = vpow2.f32 %v2054_v42  ;;  %v2055_v17 = vmul.f32 -1.442695, %v1588_v46  ;;  %v2056_v54 = vmul.f32 -1.442695, %v1590_v22 }
 0x7aa   :  { %v1544_v18 = vpop.f32.mrf.mxu0  ;;  %v1585_v50 = vpop.f32.mrf.mxu1 }
 0x7ab   :  { %2362 = vpow2.f32 %v2055_v17 }
 0x7ac   :  { %2364 = vtanh.f32 %v1589_v23 }
 0x7ad   :  { %2366 = vpow2.f32 %v2056_v54  ;;  %v2272_v54 = vld [vmem:[%s3420_s10 + $0x38] sm:$0xff]  }
 0x7b6   :  { %v2361_v55 = vpop.eup %2360 }
 0x7b7   :  { %v1594_v61 = vadd.f32 1.0, %v2361_v55  ;;  %v2441_v55 = vmov 0.0  }
 0x7b8   :  { %v2363_v62 = vpop.eup %2362 }
 0x7b9   :  { %2368 = vrcp.f32 %v1594_v61  ;;  %v1600_v3 = vadd.f32 1.0, %v2363_v62  ;;  %v2365_v4 = vpop.eup %2364  ;;  %v2273_v61 = vld [vmem:[%s3420_s10 + $0x30] sm:$0xff]   ;;  %v2274_v62 = vld [vmem:[%s3420_s10 + $0x28] sm:$0xff]  }
 0x7ba   :  { %v2367_v15 = vpop.eup %2366 }
 0x7bb   :  { %2370 = vrcp.f32 %v1600_v3  ;;  %v1607_v48 = vadd.f32 1.0, %v2367_v15  ;;  %v2275_v3 = vld [vmem:[%s3420_s10 + $0x20] sm:$0xff]   ;;  %v2277_v15 = vld [vmem:[%s3420_s10 + $0x10] sm:$0xff]  }
 0x7bd   :  { %2372 = vrcp.f32 %v1607_v48 }
 0x7c6   :  { %v2369_v56 = vpop.eup %2368 }
 0x7c7   :  { %v1611_v44 = vmul.f32 %v2369_v56, %v2365_v4  ;;  %v2276_v4 = vld [vmem:[%s3420_s10 + $0x18] sm:$0xff]   ;;  %v2278_v56 = vld [vmem:[%s3420_s10 + $0x8] sm:$0xff]  }
 0x7c8   :  { %v2371_v38 = vpop.eup %2370 }
 0x7c9   :  { %v1610_v49 = vmul.f32 %v2371_v38, %v3170_v5  ;;  %v2432_v5 = vld [vmem:[%s3416_s9 + $0x24] ss:$16 sps:$4 sm:$0xff]   ;;  %v17_v38 = vstv %s3421_s11 }
 0x7ca   :  { %v2373_v57 = vpop.eup %2372  ;;  %18 = vst [vmem:[#allocation3] sm:$0x1] %v17_v38 }
 0x7cb   :  { %v3312_v59 = vadd.f32 %v1611_v44, %v1610_v49  ;;  %v2279_v44 = vld [vmem:[%s3420_s10] sm:$0xff]  }
 0x7cd   :  { %2374 = vtanh.f32 %v3312_v59 }
 0x7da   :  { %v2375_v30 = vpop.eup %2374 }
 0x7db   :  { %v1614_v40 = vmul.f32 %v2375_v30, %v2373_v57 }
 0x7dd   :  { %v1619_v31 = vpack.c.bf16 %v1614_v40, %v1614_v40 }
 0x7df   :  { %1653 = vmatmul.mubr.bf16.vlgmr.msra.gmra.mxu0 %v1619_v31  ;;  %1694 = vmatmul.mubr.bf16.vlgmr.msra.gmra.mxu1 %v1619_v31 }
 0x7e0   :  { %1736 = vmatpush1.bf16.msra.mxu0 %v3176_v0  ;;  %1777 = vmatpush1.bf16.msra.mxu1 %v3182_v52  ;;  %v2437_v0 = vld [vmem:[%s3416_s9 + $0xc] ss:$16 sps:$4 sm:$0xff]   ;;  %v2438_v52 = vld [vmem:[%s3416_s9] ss:$16 sps:$4 sm:$0xff]  }
 0x7e1   :  { %1737 = vmatprep.subr.bf16.mxu0 %v3188_v39  ;;  %1778 = vmatprep.subr.bf16.mxu1 %v3194_v35  ;;  %v2439_v39 = vld [vmem:[%s3416_s9 + $0x8] ss:$16 sps:$4 sm:$0xff]  }
 0x7e2   :  { %1767 = vmatprep.mubr.bf16.mxu0 %v3444_v25  ;;  %1808 = vmatprep.mubr.bf16.mxu1 %v3444_v25  ;;  %v2430_v25 = vld [vmem:[%s3416_s9 + $0x40] ss:$16 sps:$4 sm:$0xff]  }
 0x7e4   :  { %1738 = vmatpush1.bf16.msra.mxu0 %v3202_v45  ;;  %1779 = vmatpush1.bf16.msra.mxu1 %v3208_v21  ;;  %v3458_v21 = vld [vmem:[#allocation17_spill] sm:$0xff] }
 0x7e5   :  { %1739 = vmatprep.subr.bf16.mxu0 %v3214_v9  ;;  %1780 = vmatprep.subr.bf16.mxu1 %v3220_v20 }
 0x7e8   :  { %1740 = vmatpush1.bf16.msra.mxu0 %v3226_v26  ;;  %1781 = vmatpush1.bf16.msra.mxu1 %v3232_v63 }
 0x7e9   :  { %1741 = vmatprep.subr.bf16.mxu0 %v3238_v43  ;;  %1782 = vmatprep.subr.bf16.mxu1 %v3244_v1  ;;  %v3459_v43 = vld [vmem:[#allocation19_spill] sm:$0xff] }
 0x7ec   :  { %1742 = vmatpush1.bf16.msra.mxu0 %v3250_v34  ;;  %1783 = vmatpush1.bf16.msra.mxu1 %v3256_v24 }
 0x7ed   :  { %1743 = vmatprep.subr.bf16.mxu0 %v3262_v27  ;;  %1784 = vmatprep.subr.bf16.mxu1 %v3268_v28 }
 0x7f0   :  { %1744 = vmatpush1.bf16.msra.mxu0 %v3274_v32  ;;  %1785 = vmatpush1.bf16.msra.mxu1 %v3280_v33  ;;  %v3460_v33 = vld [vmem:[#allocation20_spill] sm:$0xff] }
 0x7f1   :  { %1745 = vmatprep.subr.bf16.mxu0 %v3286_v36  ;;  %1786 = vmatprep.subr.bf16.mxu1 %v3292_v37  ;;  %v3461_v37 = vld [vmem:[#allocation18_spill] sm:$0xff] }
 0x7f4   :  { %1746 = vmatpush1.bf16.msra.mxu0 %v2430_v25  ;;  %1787 = vmatpush1.bf16.msra.mxu1 %v2431_v58 }
 0x7f5   :  { %1747 = vmatprep.subr.bf16.mxu0 %v2432_v5  ;;  %1788 = vmatprep.subr.bf16.mxu1 %v2433_v60 }
 0x7f8   :  { %1748 = vmatpush1.bf16.msra.mxu0 %v2434_v29  ;;  %1789 = vmatpush1.bf16.msra.mxu1 %v2435_v12 }
 0x7f9   :  { %1749 = vmatprep.subr.bf16.mxu0 %v2436_v53  ;;  %1790 = vmatprep.subr.bf16.mxu1 %v2437_v0  ;;  %v3463_v0 = vld [vmem:[#allocation22_spill] sm:$0xff] }
 0x7fc   :  { %1750 = vmatpush1.bf16.msra.mxu0 %v2438_v52  ;;  %1791 = vmatpush1.bf16.msra.mxu1 %v2439_v39 }
 0x7fd   :  { %2168 = vmatprep.subr.bf16.mxu0 %v2441_v55 }
 0x89f   :  { %v1654_v35 = vpop.f32.mrf.mxu0  ;;  %v1695_v45 = vpop.f32.mrf.mxu1 }
 0x8a0   :  { %v1702_v9 = vadd.f32 %v1654_v35, %v3458_v21  ;;  %v1704_v6 = vadd.f32 %v1695_v45, %v3461_v37 }
 0x8a1   :  { %v1656_v20 = vpop.f32.mrf.mxu0  ;;  %v1697_v26 = vpop.f32.mrf.mxu1 }
 0x8a2   :  { %v2057_v63 = vmul.f32 -1.442695, %v1702_v9  ;;  %v1703_v1 = vadd.f32 %v1656_v20, %v3459_v43  ;;  %v1705_v36 = vadd.f32 %v1697_v26, %v3460_v33  ;;  %v2063_v33 = vld [vmem:[#allocation3] ss:$0 sm:$0xff] }
 0x8a3   :  { %v1658_v34 = vpop.f32.mrf.mxu0  ;;  %v1699_v24 = vpop.f32.mrf.mxu1 }
 0x8a4   :  { %2376 = vpow2.f32 %v2057_v63  ;;  %v2058_v27 = vmul.f32 -1.442695, %v1703_v1  ;;  %v2059_v7 = vmul.f32 -1.442695, %v1705_v36 }
 0x8a5   :  { %v1659_v28 = vpop.f32.mrf.mxu0  ;;  %v1700_v32 = vpop.f32.mrf.mxu1 }
 0x8a6   :  { %2378 = vpow2.f32 %v2058_v27 }
 0x8a7   :  { %2380 = vtanh.f32 %v1704_v6 }
 0x8a8   :  { %2382 = vpow2.f32 %v2059_v7 }
 0x8b1   :  { %v2377_v10 = vpop.eup %2376 }
 0x8b2   :  { %v1709_v11 = vadd.f32 1.0, %v2377_v10 }
 0x8b3   :  { %v2379_v41 = vpop.eup %2378 }
 0x8b4   :  { %2384 = vrcp.f32 %v1709_v11  ;;  %v1715_v13 = vadd.f32 1.0, %v2379_v41  ;;  %v2381_v42 = vpop.eup %2380 }
 0x8b5   :  { %v2383_v14 = vpop.eup %2382 }
 0x8b6   :  { %2386 = vrcp.f32 %v1715_v13  ;;  %v1722_v17 = vadd.f32 1.0, %v2383_v14 }
 0x8b8   :  { %2388 = vrcp.f32 %v1722_v17 }
 0x8c1   :  { %v2385_v46 = vpop.eup %2384 }
 0x8c2   :  { %v1726_v16 = vmul.f32 %v2385_v46, %v2381_v42 }
 0x8c3   :  { %v2387_v47 = vpop.eup %2386 }
 0x8c4   :  { %v1725_v18 = vmul.f32 %v2387_v47, %v3312_v59  ;;  %v3462_v59 = vld [vmem:[#allocation21_spill] sm:$0xff] }
 0x8c5   :  { %v2389_v19 = vpop.eup %2388 }
 0x8c6   :  { %v3372_v50 = vadd.f32 %v1726_v16, %v1725_v18 }
 0x8c8   :  { %2390 = vtanh.f32 %v3372_v50 }
 0x8d5   :  { %v2391_v22 = vpop.eup %2390 }
 0x8d6   :  { %v1729_v51 = vmul.f32 %v2391_v22, %v2389_v19 }
 0x8d8   :  { %v1734_v23 = vpack.c.bf16 %v1729_v51, %v1729_v51 }
 0x8da   :  { %1768 = vmatmul.mubr.bf16.vlgmr.msra.gmra.mxu0 %v1734_v23  ;;  %1809 = vmatmul.mubr.bf16.vlgmr.msra.gmra.mxu1 %v1734_v23 }
 0x8db   :  { %2169 = vmatpush3.bf16.msra.mxu0 %v2272_v54  ;;  %2184 = vmatprep.mubr.msk.bf16.mxu0 %vm2442_vm2, %v2441_v55 }
 0x8dc   :  { %2170 = vmatprep.subr.bf16.mxu0 %v2441_v55 }
 0x8df   :  { %2171 = vmatpush3.bf16.msra.mxu0 %v2273_v61 }
 0x8e0   :  { %2172 = vmatprep.subr.bf16.mxu0 %v2441_v55 }
 0x8e3   :  { %2173 = vmatpush3.bf16.msra.mxu0 %v2274_v62 }
 0x8e4   :  { %2174 = vmatprep.subr.bf16.mxu0 %v2441_v55 }
 0x8e7   :  { %2175 = vmatpush3.bf16.msra.mxu0 %v2275_v3 }
 0x8e8   :  { %2176 = vmatprep.subr.bf16.mxu0 %v2441_v55 }
 0x8eb   :  { %2177 = vmatpush3.bf16.msra.mxu0 %v2276_v4 }
 0x8ec   :  { %2178 = vmatprep.subr.bf16.mxu0 %v2441_v55 }
 0x8ef   :  { %2179 = vmatpush3.bf16.msra.mxu0 %v2277_v15 }
 0x8f0   :  { %2180 = vmatprep.subr.bf16.mxu0 %v2441_v55 }
 0x8f3   :  { %2181 = vmatpush3.bf16.msra.mxu0 %v2278_v56 }
 0x8f4   :  { %2182 = vmatprep.subr.bf16.mxu0 %v2441_v55 }
 0x8f7   :  { %2183 = vmatpush3.bf16.msra.mxu0 %v2279_v44 }
 0x99a   :  { %v1769_v48 = vpop.f32.mrf.mxu0  ;;  %v1810_v49 = vpop.f32.mrf.mxu1 }
 0x99b   :  { %v1817_v57 = vadd.f32 %v1769_v48, %v3462_v59  ;;  %v1819_v52 = vadd.f32 %v1810_v49, %v3463_v0 }
 0x99c   :  { %v1771_v30 = vpop.f32.mrf.mxu0  ;;  %v1812_v40 = vpop.f32.mrf.mxu1 }
 0x99d   :  { %v2060_v31 = vmul.f32 -1.442695, %v1817_v57  ;;  %v1818_v25 = vadd.f32 %v1771_v30, %v2982_v2  ;;  %v1820_v53 = vadd.f32 %v1812_v40, %v2985_v8 }
 0x99e   :  { %v1773_v58 = vpop.f32.mrf.mxu0  ;;  %v1814_v5 = vpop.f32.mrf.mxu1 }
 0x99f   :  { %2392 = vpow2.f32 %v2060_v31  ;;  %v2061_v60 = vmul.f32 -1.442695, %v1818_v25  ;;  %v2062_v39 = vmul.f32 -1.442695, %v1820_v53 }
 0x9a0   :  { %v1774_v29 = vpop.f32.mrf.mxu0  ;;  %v1815_v12 = vpop.f32.mrf.mxu1 }
 0x9a1   :  { %2394 = vpow2.f32 %v2061_v60 }
 0x9a2   :  { %2396 = vtanh.f32 %v1819_v52 }
 0x9a3   :  { %2398 = vpow2.f32 %v2062_v39 }
 0x9ac   :  { %v2393_v35 = vpop.eup %2392 }
 0x9ad   :  { %v1824_v45 = vadd.f32 1.0, %v2393_v35 }
 0x9ae   :  { %v2395_v21 = vpop.eup %2394 }
 0x9af   :  { %2400 = vrcp.f32 %v1824_v45  ;;  %v1830_v9 = vadd.f32 1.0, %v2395_v21  ;;  %v2397_v2 = vpop.eup %2396 }
 0x9b0   :  { %v2399_v20 = vpop.eup %2398 }
 0x9b1   :  { %2402 = vrcp.f32 %v1830_v9  ;;  %v1837_v1 = vadd.f32 1.0, %v2399_v20 }
 0x9b3   :  { %2404 = vrcp.f32 %v1837_v1 }
 0x9bc   :  { %v2401_v26 = vpop.eup %2400 }
 0x9bd   :  { %v1841_v63 = vmul.f32 %v2401_v26, %v2397_v2 }
 0x9be   :  { %v2403_v43 = vpop.eup %2402 }
 0x9bf   :  { %v1840_v34 = vmul.f32 %v2403_v43, %v3372_v50 }
 0x9c0   :  { %v2405_v24 = vpop.eup %2404 }
 0x9c1   :  { %v1842_v8 = vadd.f32 %v1841_v63, %v1840_v34 }
 0x9c3   :  { %2406 = vtanh.f32 %v1842_v8 }
 0x9d0   :  { %v2407_v27 = vpop.eup %2406 }
 0x9d1   :  { %v1844_v28 = vmul.f32 %v2407_v27, %v2405_v24 }
 0x9d3   :  { %v1845_v32 = vpack.c.bf16 %v1844_v28, %v1844_v28 }
 0x9d5   :  { %2185 = vmatmul.mubr.bf16.vlgmr.msra.gmra.mxu0 %v1845_v32 }
 0xa95   :  { %v1951_v36 = vpop.f32.mrf.mxu0 }
 0xa96   :  { %v1952_v37 = vadd.f32 %v2063_v33, %v1951_v36 }
 0xa97   :  { %v2186_v6 = vpop.f32.mrf.mxu0 }
 0xa98   :  { %1958 = vst.msk [vmem:[%s3422_s12] sm:$0xff] %vm1957_vm3, %v1952_v37 }
 0xa99   :  { %v1954_v7 = vpop.f32.mrf.mxu0 }
 0xa9b   :  { %v2187_v10 = vpop.f32.mrf.mxu0 }

</bundles_post_ra>
